<compile_context>
chip_gen: v7x
topology: tpu7x:2x2x1
jax: 0.10.0
libtpu: 0.0.40
codegen_flags: <defaults>
</compile_context>

<pallas_src>
import jax
import jax.numpy as jnp
from jax.experimental import pallas as pl
from jax.experimental.pallas import tpu as pltpu

EPS = 1e-5  # PyTorch InstanceNorm2d default eps


def _dense_block_kernel(x_ref, w1_ref, w2_ref, o_ref, xp_ref, hp_ref):
    """Fused (conv3x3 + IN + ReLU) -> (conv3x3 + IN) -> concat, one sample.

      x_ref  : (1, H, W, Cin)       input tile (bf16, VMEM)
      w1_ref : (9*Cin, G)           conv1 weights, im2col layout (bf16)
      w2_ref : (9, G, G)            conv2 weights, per-tap layout (bf16)
      o_ref  : (1, H, W, Cin+G)     output tile (f32) = [x, block(x)]
      xp_ref : (H+2, W+2, Cin)      VMEM scratch: zero-haloed input (bf16)
      hp_ref : (H+2, W+2, G)        VMEM scratch: zero-haloed stage-1 act (bf16)
    """
    _, H, W, Cin = x_ref.shape
    G = w2_ref.shape[-1]
    bf16 = jnp.bfloat16

    def zero_border(ref, C):
        # Zero the 1-element halo (4 thin stores); the interior is overwritten
        # below.  Done every step so it is correct under any core sharding.
        ref[0:1, :, :] = jnp.zeros((1, W + 2, C), bf16)
        ref[H + 1:H + 2, :, :] = jnp.zeros((1, W + 2, C), bf16)
        ref[:, 0:1, :] = jnp.zeros((H + 2, 1, C), bf16)
        ref[:, W + 1:W + 2, :] = jnp.zeros((H + 2, 1, C), bf16)

    def inorm(a):
        # InstanceNorm2d (affine=False): per-channel stats over spatial rows,
        # biased variance, eps inside rsqrt (matches PyTorch).  f32 throughout.
        mean = jnp.mean(a, axis=0, keepdims=True)
        var = jnp.mean((a - mean) ** 2, axis=0, keepdims=True)
        return (a - mean) * jax.lax.rsqrt(var + EPS)

    # Stage the zero-haloed input in VMEM scratch once.
    zero_border(xp_ref, Cin)
    xp_ref[1:H + 1, 1:W + 1, :] = x_ref[0]

    # ---- stage 1: conv3x3 (single im2col matmul, K = 9*Cin) -> IN -> ReLU --
    # Column order (ky, kx, cin) matches w1.reshape(9*Cin, G) of HWIO weights.
    p1 = jnp.concatenate(
        [xp_ref[ky:ky + H, kx:kx + W, :].reshape(H * W, Cin)
         for ky in range(3) for kx in range(3)], axis=-1)         # (H*W, 9*Cin)
    a1 = jnp.dot(p1, w1_ref[...], preferred_element_type=jnp.float32)
    h = jnp.maximum(inorm(a1), 0.0)                               # (H*W, G) f32

    # Stage the zero-haloed stage-1 activation (bf16) in VMEM scratch.
    zero_border(hp_ref, G)
    hp_ref[1:H + 1, 1:W + 1, :] = h.reshape(H, W, G).astype(bf16)

    # ---- stage 2: conv3x3 as 9 accumulating per-tap matmuls (K = G) -> IN --
    # No (H*W, 9*G) patch matrix is ever materialized; the f32 partial sums
    # live in VMEM/vregs under Mosaic's control.
    acc = jnp.zeros((H * W, G), jnp.float32)
    for ky in range(3):
        for kx in range(3):
            patch = hp_ref[ky:ky + H, kx:kx + W, :].reshape(H * W, G)
            acc = acc + jnp.dot(patch, w2_ref[ky * 3 + kx],
                                preferred_element_type=jnp.float32)
    y = inorm(acc)                                                # (H*W, G) f32

    # ---- fused channel concat: out = [x, block(x)] along the lane dim ------
    out = jnp.concatenate(
        [x_ref[0].astype(jnp.float32), y.reshape(H, W, G)], axis=-1)
    o_ref[0] = out.astype(o_ref.dtype)


def dense_block_nhwc(x_nhwc, params):
    """NHWC-native fused DenseBlock: returns (N, H, W, Cin+G) = [x, block(x)]."""
    N, H, W, Cin = x_nhwc.shape
    G = params["w1"].shape[-1]

    x_bf16 = x_nhwc.astype(jnp.bfloat16)
    w1r = params["w1"].reshape(9 * Cin, G).astype(jnp.bfloat16)   # im2col layout
    w2r = params["w2"].reshape(9, G, G).astype(jnp.bfloat16)      # per-tap layout
    # Conv biases are intentionally NOT passed: InstanceNorm (affine=False)
    # cancels them exactly, so they are dead work + dead DMA.

    flops = 2 * N * H * W * 9 * (Cin * G + G * G)
    bytes_accessed = (x_bf16.size * 2 + N * H * W * (Cin + G) * 4
                      + (w1r.size + w2r.size) * 2)

    return pl.pallas_call(
        _dense_block_kernel,
        out_shape=jax.ShapeDtypeStruct((N, H, W, Cin + G), jnp.float32),
        grid=(N,),
        in_specs=[
            pl.BlockSpec((1, H, W, Cin), lambda n: (n, 0, 0, 0)),
            pl.BlockSpec((9 * Cin, G), lambda n: (0, 0)),
            pl.BlockSpec((9, G, G), lambda n: (0, 0, 0)),
        ],
        out_specs=pl.BlockSpec((1, H, W, Cin + G), lambda n: (n, 0, 0, 0)),
        scratch_shapes=[
            pltpu.VMEM((H + 2, W + 2, Cin), jnp.bfloat16),   # zero-haloed input
            pltpu.VMEM((H + 2, W + 2, G), jnp.bfloat16),     # zero-haloed h
        ],
        compiler_params=pltpu.CompilerParams(
            dimension_semantics=("parallel",),
            vmem_limit_bytes=32 * 1024 * 1024),
        cost_estimate=pl.CostEstimate(
            flops=flops,
            transcendentals=2 * N * G,
            bytes_accessed=bytes_accessed),
    )(x_bf16, w1r, w2r)


def dense_block(x_nchw, params):
    """DenseBlock.forward equivalent: cat([x, block(x)], dim=1), NCHW in/out."""
    x_nhwc = jnp.transpose(x_nchw, (0, 2, 3, 1))
    out_nhwc = dense_block_nhwc(x_nhwc, params)          # (N, H, W, Cin + G)
    return jnp.transpose(out_nhwc, (0, 3, 1, 2))


def init_params(key, channels, growth_rate):
    """Deterministic synthetic parameters. Conv weights stored as (3,3,Cin,Cout).

    Biases are kept to mirror the PyTorch module's parameters, but the kernel
    does not consume them (InstanceNorm cancels them exactly)."""
    k1, k2, k3, k4 = jax.random.split(key, 4)
    w1 = 0.1 * jax.random.normal(k1, (3, 3, channels, growth_rate), jnp.float32)
    b1 = 0.1 * jax.random.normal(k2, (growth_rate,), jnp.float32)
    w2 = 0.1 * jax.random.normal(k3, (3, 3, growth_rate, growth_rate), jnp.float32)
    b2 = 0.1 * jax.random.normal(k4, (growth_rate,), jnp.float32)
    return {"w1": w1, "b1": b1, "w2": w2, "b2": b2}


def _reference(x_nchw, params):
    """Pure-JAX reference (lax.conv), WITH conv biases. Conv operands are cast
    to bf16 with f32 accumulation to mirror the kernel's MXU precision."""
    def conv(x, w, b):  # x: NCHW, w: (3,3,Cin,Cout)
        y = jax.lax.conv_general_dilated(
            x.astype(jnp.bfloat16), w.astype(jnp.bfloat16),
            window_strides=(1, 1), padding=((1, 1), (1, 1)),
            dimension_numbers=("NCHW", "HWIO", "NCHW"),
            preferred_element_type=jnp.float32)
        return y + b[None, :, None, None]

    def inorm(x):  # per (n, c) over spatial, biased var
        mean = jnp.mean(x, axis=(2, 3), keepdims=True)
        var = jnp.mean((x - mean) ** 2, axis=(2, 3), keepdims=True)
        return (x - mean) * jax.lax.rsqrt(var + EPS)

    h = jnp.maximum(inorm(conv(x_nchw, params["w1"], params["b1"])), 0.0)
    h = inorm(conv(h, params["w2"], params["b2"]))
    return jnp.concatenate([x_nchw.astype(jnp.float32), h], axis=1)


if __name__ == "__main__":
    N, C, H, W = 2, 4, 16, 16
    growth_rate = 32  # small stand-in for the module's default 256

    key = jax.random.PRNGKey(0)
    kx, kp = jax.random.split(key)
    x = jax.random.normal(kx, (N, C, H, W), jnp.float32)
    params = init_params(kp, C, growth_rate)

    out = jax.block_until_ready(dense_block(x, params))
    assert out.shape == (N, C + growth_rate, H, W), out.shape

    ref = jax.block_until_ready(_reference(x, params))
    # bf16 matmul operands + bf16 identity path -> slightly looser tolerance.
    assert jnp.allclose(out, ref, atol=2e-2, rtol=2e-2), float(
        jnp.max(jnp.abs(out - ref)))

    print("KERNEL_OK")
</pallas_src>

<mosaic_0001>
module attributes {stable_mosaic.version = 11 : i64} {
  func.func @_dense_block_kernel(%arg0: i32, %arg1: memref<1x16x16x4xbf16, #tpu.memory_space<vmem>>, %arg2: memref<36x32xbf16, #tpu.memory_space<vmem>>, %arg3: memref<9x32x32xbf16, #tpu.memory_space<vmem>>, %arg4: memref<1x16x16x36xf32, #tpu.memory_space<vmem>>, %arg5: memref<18x18x4xbf16, #tpu.memory_space<vmem>>, %arg6: memref<18x18x32xbf16, #tpu.memory_space<vmem>>) attributes {dimension_semantics = [#tpu.dimension_semantics<parallel>], iteration_bounds = array<i64: 2>, scalar_prefetch = 0 : i64, scratch_operands = 2 : i64, tpu.core_type = #tpu.core_type<tc>, window_params = [{transform_indices = @transform_0, window_bounds = array<i64: 1, 16, 16, 4>}, {pipeline_mode = #tpu.pipeline_mode<synchronous>, transform_indices = @transform_1, window_bounds = array<i64: 36, 32>}, {pipeline_mode = #tpu.pipeline_mode<synchronous>, transform_indices = @transform_2, window_bounds = array<i64: 9, 32, 32>}, {transform_indices = @transform_3, window_bounds = array<i64: 1, 16, 16, 36>}]} {
    %cst = arith.constant 0.000000e+00 : bf16
    %0 = vector.broadcast %cst : bf16 to vector<1x18x4xbf16>
    %c0 = arith.constant 0 : index
    %c0_0 = arith.constant 0 : index
    %c0_1 = arith.constant 0 : index
    %1 = vector.load %arg5[%c0, %c0_0, %c0_1] : memref<18x18x4xbf16, #tpu.memory_space<vmem>>, vector<1x18x4xbf16>
    tpu.vector_store %arg5[%c0, %c0_0, %c0_1], %0 {strides = array<i32>} : memref<18x18x4xbf16, #tpu.memory_space<vmem>>, vector<1x18x4xbf16>,
    %cst_2 = arith.constant 0.000000e+00 : bf16
    %2 = vector.broadcast %cst_2 : bf16 to vector<1x18x4xbf16>
    %c17 = arith.constant 17 : index
    %c0_3 = arith.constant 0 : index
    %c0_4 = arith.constant 0 : index
    %3 = vector.load %arg5[%c17, %c0_3, %c0_4] : memref<18x18x4xbf16, #tpu.memory_space<vmem>>, vector<1x18x4xbf16>
    tpu.vector_store %arg5[%c17, %c0_3, %c0_4], %2 {strides = array<i32>} : memref<18x18x4xbf16, #tpu.memory_space<vmem>>, vector<1x18x4xbf16>,
    %cst_5 = arith.constant 0.000000e+00 : bf16
    %4 = vector.broadcast %cst_5 : bf16 to vector<18x1x4xbf16>
    %c0_6 = arith.constant 0 : index
    %c0_7 = arith.constant 0 : index
    %c0_8 = arith.constant 0 : index
    %5 = vector.load %arg5[%c0_6, %c0_7, %c0_8] : memref<18x18x4xbf16, #tpu.memory_space<vmem>>, vector<18x1x4xbf16>
    tpu.vector_store %arg5[%c0_6, %c0_7, %c0_8], %4 {strides = array<i32>} : memref<18x18x4xbf16, #tpu.memory_space<vmem>>, vector<18x1x4xbf16>,
    %cst_9 = arith.constant 0.000000e+00 : bf16
    %6 = vector.broadcast %cst_9 : bf16 to vector<18x1x4xbf16>
    %c0_10 = arith.constant 0 : index
    %c17_11 = arith.constant 17 : index
    %c0_12 = arith.constant 0 : index
    %7 = vector.load %arg5[%c0_10, %c17_11, %c0_12] : memref<18x18x4xbf16, #tpu.memory_space<vmem>>, vector<18x1x4xbf16>
    tpu.vector_store %arg5[%c0_10, %c17_11, %c0_12], %6 {strides = array<i32>} : memref<18x18x4xbf16, #tpu.memory_space<vmem>>, vector<18x1x4xbf16>,
    %c0_13 = arith.constant 0 : index
    %c0_14 = arith.constant 0 : index
    %c0_15 = arith.constant 0 : index
    %c0_16 = arith.constant 0 : index
    %8 = vector.load %arg1[%c0_13, %c0_14, %c0_15, %c0_16] : memref<1x16x16x4xbf16, #tpu.memory_space<vmem>>, vector<1x16x16x4xbf16>
    %9 = vector.shape_cast %8 : vector<1x16x16x4xbf16> to vector<16x16x4xbf16>
    %c1 = arith.constant 1 : index
    %c1_17 = arith.constant 1 : index
    %c0_18 = arith.constant 0 : index
    %10 = vector.load %arg5[%c1, %c1_17, %c0_18] : memref<18x18x4xbf16, #tpu.memory_space<vmem>>, vector<16x16x4xbf16>
    tpu.vector_store %arg5[%c1, %c1_17, %c0_18], %9 {strides = array<i32>} : memref<18x18x4xbf16, #tpu.memory_space<vmem>>, vector<16x16x4xbf16>,
    %c0_19 = arith.constant 0 : index
    %c0_20 = arith.constant 0 : index
    %c0_21 = arith.constant 0 : index
    %11 = vector.load %arg5[%c0_19, %c0_20, %c0_21] : memref<18x18x4xbf16, #tpu.memory_space<vmem>>, vector<16x16x4xbf16>
    %12 = vector.shape_cast %11 : vector<16x16x4xbf16> to vector<256x4xbf16>
    %c0_22 = arith.constant 0 : index
    %c1_23 = arith.constant 1 : index
    %c0_24 = arith.constant 0 : index
    %13 = vector.load %arg5[%c0_22, %c1_23, %c0_24] : memref<18x18x4xbf16, #tpu.memory_space<vmem>>, vector<16x16x4xbf16>
    %14 = vector.shape_cast %13 : vector<16x16x4xbf16> to vector<256x4xbf16>
    %c0_25 = arith.constant 0 : index
    %c2 = arith.constant 2 : index
    %c0_26 = arith.constant 0 : index
    %15 = vector.load %arg5[%c0_25, %c2, %c0_26] : memref<18x18x4xbf16, #tpu.memory_space<vmem>>, vector<16x16x4xbf16>
    %16 = vector.shape_cast %15 : vector<16x16x4xbf16> to vector<256x4xbf16>
    %c1_27 = arith.constant 1 : index
    %c0_28 = arith.constant 0 : index
    %c0_29 = arith.constant 0 : index
    %17 = vector.load %arg5[%c1_27, %c0_28, %c0_29] : memref<18x18x4xbf16, #tpu.memory_space<vmem>>, vector<16x16x4xbf16>
    %18 = vector.shape_cast %17 : vector<16x16x4xbf16> to vector<256x4xbf16>
    %c1_30 = arith.constant 1 : index
    %c1_31 = arith.constant 1 : index
    %c0_32 = arith.constant 0 : index
    %19 = vector.load %arg5[%c1_30, %c1_31, %c0_32] : memref<18x18x4xbf16, #tpu.memory_space<vmem>>, vector<16x16x4xbf16>
    %20 = vector.shape_cast %19 : vector<16x16x4xbf16> to vector<256x4xbf16>
    %c1_33 = arith.constant 1 : index
    %c2_34 = arith.constant 2 : index
    %c0_35 = arith.constant 0 : index
    %21 = vector.load %arg5[%c1_33, %c2_34, %c0_35] : memref<18x18x4xbf16, #tpu.memory_space<vmem>>, vector<16x16x4xbf16>
    %22 = vector.shape_cast %21 : vector<16x16x4xbf16> to vector<256x4xbf16>
    %c2_36 = arith.constant 2 : index
    %c0_37 = arith.constant 0 : index
    %c0_38 = arith.constant 0 : index
    %23 = vector.load %arg5[%c2_36, %c0_37, %c0_38] : memref<18x18x4xbf16, #tpu.memory_space<vmem>>, vector<16x16x4xbf16>
    %24 = vector.shape_cast %23 : vector<16x16x4xbf16> to vector<256x4xbf16>
    %c2_39 = arith.constant 2 : index
    %c1_40 = arith.constant 1 : index
    %c0_41 = arith.constant 0 : index
    %25 = vector.load %arg5[%c2_39, %c1_40, %c0_41] : memref<18x18x4xbf16, #tpu.memory_space<vmem>>, vector<16x16x4xbf16>
    %26 = vector.shape_cast %25 : vector<16x16x4xbf16> to vector<256x4xbf16>
    %c2_42 = arith.constant 2 : index
    %c2_43 = arith.constant 2 : index
    %c0_44 = arith.constant 0 : index
    %27 = vector.load %arg5[%c2_42, %c2_43, %c0_44] : memref<18x18x4xbf16, #tpu.memory_space<vmem>>, vector<16x16x4xbf16>
    %28 = vector.shape_cast %27 : vector<16x16x4xbf16> to vector<256x4xbf16>
    %29 = tpu.concatenate %12, %14, %16, %18, %20, %22, %24, %26, %28 in 1 : vector<256x4xbf16>, vector<256x4xbf16>, vector<256x4xbf16>, vector<256x4xbf16>, vector<256x4xbf16>, vector<256x4xbf16>, vector<256x4xbf16>, vector<256x4xbf16>, vector<256x4xbf16> -> vector<256x36xbf16>
    %c0_45 = arith.constant 0 : index
    %c0_46 = arith.constant 0 : index
    %30 = vector.load %arg2[%c0_45, %c0_46] : memref<36x32xbf16, #tpu.memory_space<vmem>>, vector<36x32xbf16>
    %cst_47 = arith.constant dense<0.000000e+00> : vector<256x32xf32>
    %31 = tpu.matmul %29, %30, %cst_47 {dimension_numbers = #tpu.dot_dimension_numbers<[1], [0], [0], [1], [0, 0, 1, 1], [], []>} : vector<256x36xbf16>, vector<36x32xbf16>, vector<256x32xf32> -> vector<256x32xf32>
    %cst_48 = arith.constant dense<0.000000e+00> : vector<32xf32>
    %32 = vector.multi_reduction <add>, %31, %cst_48 [0] : vector<256x32xf32> to vector<32xf32>
    %33 = vector.shape_cast %32 : vector<32xf32> to vector<1x32xf32>
    %cst_49 = arith.constant 2.560000e+02 : f32
    %34 = vector.broadcast %cst_49 : f32 to vector<1x32xf32>
    %35 = arith.divf %33, %34 : vector<1x32xf32>
    %36 = vector.broadcast %35 : vector<1x32xf32> to vector<256x32xf32>
    %37 = arith.subf %31, %36 : vector<256x32xf32>
    %38 = arith.mulf %37, %37 : vector<256x32xf32>
    %cst_50 = arith.constant dense<0.000000e+00> : vector<32xf32>
    %39 = vector.multi_reduction <add>, %38, %cst_50 [0] : vector<256x32xf32> to vector<32xf32>
    %40 = vector.shape_cast %39 : vector<32xf32> to vector<1x32xf32>
    %cst_51 = arith.constant 2.560000e+02 : f32
    %41 = vector.broadcast %cst_51 : f32 to vector<1x32xf32>
    %42 = arith.divf %40, %41 : vector<1x32xf32>
    %43 = vector.broadcast %35 : vector<1x32xf32> to vector<256x32xf32>
    %44 = arith.subf %31, %43 : vector<256x32xf32>
    %cst_52 = arith.constant 9.99999974E-6 : f32
    %45 = vector.broadcast %cst_52 : f32 to vector<1x32xf32>
    %46 = arith.addf %42, %45 : vector<1x32xf32>
    %47 = math.rsqrt %46 : vector<1x32xf32>
    %48 = vector.broadcast %47 : vector<1x32xf32> to vector<256x32xf32>
    %49 = arith.mulf %44, %48 : vector<256x32xf32>
    %cst_53 = arith.constant 0.000000e+00 : f32
    %50 = vector.broadcast %cst_53 : f32 to vector<256x32xf32>
    %51 = arith.maximumf %49, %50 : vector<256x32xf32>
    %cst_54 = arith.constant 0.000000e+00 : bf16
    %52 = vector.broadcast %cst_54 : bf16 to vector<1x18x32xbf16>
    %c0_55 = arith.constant 0 : index
    %c0_56 = arith.constant 0 : index
    %c0_57 = arith.constant 0 : index
    %53 = vector.load %arg6[%c0_55, %c0_56, %c0_57] : memref<18x18x32xbf16, #tpu.memory_space<vmem>>, vector<1x18x32xbf16>
    tpu.vector_store %arg6[%c0_55, %c0_56, %c0_57], %52 {strides = array<i32>} : memref<18x18x32xbf16, #tpu.memory_space<vmem>>, vector<1x18x32xbf16>,
    %cst_58 = arith.constant 0.000000e+00 : bf16
    %54 = vector.broadcast %cst_58 : bf16 to vector<1x18x32xbf16>
    %c17_59 = arith.constant 17 : index
    %c0_60 = arith.constant 0 : index
    %c0_61 = arith.constant 0 : index
    %55 = vector.load %arg6[%c17_59, %c0_60, %c0_61] : memref<18x18x32xbf16, #tpu.memory_space<vmem>>, vector<1x18x32xbf16>
    tpu.vector_store %arg6[%c17_59, %c0_60, %c0_61], %54 {strides = array<i32>} : memref<18x18x32xbf16, #tpu.memory_space<vmem>>, vector<1x18x32xbf16>,
    %cst_62 = arith.constant 0.000000e+00 : bf16
    %56 = vector.broadcast %cst_62 : bf16 to vector<18x1x32xbf16>
    %c0_63 = arith.constant 0 : index
    %c0_64 = arith.constant 0 : index
    %c0_65 = arith.constant 0 : index
    %57 = vector.load %arg6[%c0_63, %c0_64, %c0_65] : memref<18x18x32xbf16, #tpu.memory_space<vmem>>, vector<18x1x32xbf16>
    tpu.vector_store %arg6[%c0_63, %c0_64, %c0_65], %56 {strides = array<i32>} : memref<18x18x32xbf16, #tpu.memory_space<vmem>>, vector<18x1x32xbf16>,
    %cst_66 = arith.constant 0.000000e+00 : bf16
    %58 = vector.broadcast %cst_66 : bf16 to vector<18x1x32xbf16>
    %c0_67 = arith.constant 0 : index
    %c17_68 = arith.constant 17 : index
    %c0_69 = arith.constant 0 : index
    %59 = vector.load %arg6[%c0_67, %c17_68, %c0_69] : memref<18x18x32xbf16, #tpu.memory_space<vmem>>, vector<18x1x32xbf16>
    tpu.vector_store %arg6[%c0_67, %c17_68, %c0_69], %58 {strides = array<i32>} : memref<18x18x32xbf16, #tpu.memory_space<vmem>>, vector<18x1x32xbf16>,
    %60 = vector.shape_cast %51 : vector<256x32xf32> to vector<16x16x32xf32>
    %61 = arith.truncf %60 : vector<16x16x32xf32> to vector<16x16x32xbf16>
    %c1_70 = arith.constant 1 : index
    %c1_71 = arith.constant 1 : index
    %c0_72 = arith.constant 0 : index
    %62 = vector.load %arg6[%c1_70, %c1_71, %c0_72] : memref<18x18x32xbf16, #tpu.memory_space<vmem>>, vector<16x16x32xbf16>
    tpu.vector_store %arg6[%c1_70, %c1_71, %c0_72], %61 {strides = array<i32>} : memref<18x18x32xbf16, #tpu.memory_space<vmem>>, vector<16x16x32xbf16>,
    %cst_73 = arith.constant 0.000000e+00 : f32
    %63 = vector.broadcast %cst_73 : f32 to vector<256x32xf32>
    %c0_74 = arith.constant 0 : index
    %c0_75 = arith.constant 0 : index
    %c0_76 = arith.constant 0 : index
    %64 = vector.load %arg6[%c0_74, %c0_75, %c0_76] : memref<18x18x32xbf16, #tpu.memory_space<vmem>>, vector<16x16x32xbf16>
    %65 = vector.shape_cast %64 : vector<16x16x32xbf16> to vector<256x32xbf16>
    %c0_77 = arith.constant 0 : index
    %c0_78 = arith.constant 0 : index
    %c0_79 = arith.constant 0 : index
    %66 = vector.load %arg3[%c0_77, %c0_78, %c0_79] : memref<9x32x32xbf16, #tpu.memory_space<vmem>>, vector<1x32x32xbf16>
    %67 = vector.shape_cast %66 : vector<1x32x32xbf16> to vector<32x32xbf16>
    %cst_80 = arith.constant dense<0.000000e+00> : vector<256x32xf32>
    %68 = tpu.matmul %65, %67, %cst_80 {dimension_numbers = #tpu.dot_dimension_numbers<[1], [0], [0], [1], [0, 0, 1, 1], [], []>} : vector<256x32xbf16>, vector<32x32xbf16>, vector<256x32xf32> -> vector<256x32xf32>
    %69 = arith.addf %63, %68 : vector<256x32xf32>
    %c0_81 = arith.constant 0 : index
    %c1_82 = arith.constant 1 : index
    %c0_83 = arith.constant 0 : index
    %70 = vector.load %arg6[%c0_81, %c1_82, %c0_83] : memref<18x18x32xbf16, #tpu.memory_space<vmem>>, vector<16x16x32xbf16>
    %71 = vector.shape_cast %70 : vector<16x16x32xbf16> to vector<256x32xbf16>
    %c1_84 = arith.constant 1 : index
    %c0_85 = arith.constant 0 : index
    %c0_86 = arith.constant 0 : index
    %72 = vector.load %arg3[%c1_84, %c0_85, %c0_86] : memref<9x32x32xbf16, #tpu.memory_space<vmem>>, vector<1x32x32xbf16>
    %73 = vector.shape_cast %72 : vector<1x32x32xbf16> to vector<32x32xbf16>
    %cst_87 = arith.constant dense<0.000000e+00> : vector<256x32xf32>
    %74 = tpu.matmul %71, %73, %cst_87 {dimension_numbers = #tpu.dot_dimension_numbers<[1], [0], [0], [1], [0, 0, 1, 1], [], []>} : vector<256x32xbf16>, vector<32x32xbf16>, vector<256x32xf32> -> vector<256x32xf32>
    %75 = arith.addf %69, %74 : vector<256x32xf32>
    %c0_88 = arith.constant 0 : index
    %c2_89 = arith.constant 2 : index
    %c0_90 = arith.constant 0 : index
    %76 = vector.load %arg6[%c0_88, %c2_89, %c0_90] : memref<18x18x32xbf16, #tpu.memory_space<vmem>>, vector<16x16x32xbf16>
    %77 = vector.shape_cast %76 : vector<16x16x32xbf16> to vector<256x32xbf16>
    %c2_91 = arith.constant 2 : index
    %c0_92 = arith.constant 0 : index
    %c0_93 = arith.constant 0 : index
    %78 = vector.load %arg3[%c2_91, %c0_92, %c0_93] : memref<9x32x32xbf16, #tpu.memory_space<vmem>>, vector<1x32x32xbf16>
    %79 = vector.shape_cast %78 : vector<1x32x32xbf16> to vector<32x32xbf16>
    %cst_94 = arith.constant dense<0.000000e+00> : vector<256x32xf32>
    %80 = tpu.matmul %77, %79, %cst_94 {dimension_numbers = #tpu.dot_dimension_numbers<[1], [0], [0], [1], [0, 0, 1, 1], [], []>} : vector<256x32xbf16>, vector<32x32xbf16>, vector<256x32xf32> -> vector<256x32xf32>
    %81 = arith.addf %75, %80 : vector<256x32xf32>
    %c1_95 = arith.constant 1 : index
    %c0_96 = arith.constant 0 : index
    %c0_97 = arith.constant 0 : index
    %82 = vector.load %arg6[%c1_95, %c0_96, %c0_97] : memref<18x18x32xbf16, #tpu.memory_space<vmem>>, vector<16x16x32xbf16>
    %83 = vector.shape_cast %82 : vector<16x16x32xbf16> to vector<256x32xbf16>
    %c3 = arith.constant 3 : index
    %c0_98 = arith.constant 0 : index
    %c0_99 = arith.constant 0 : index
    %84 = vector.load %arg3[%c3, %c0_98, %c0_99] : memref<9x32x32xbf16, #tpu.memory_space<vmem>>, vector<1x32x32xbf16>
    %85 = vector.shape_cast %84 : vector<1x32x32xbf16> to vector<32x32xbf16>
    %cst_100 = arith.constant dense<0.000000e+00> : vector<256x32xf32>
    %86 = tpu.matmul %83, %85, %cst_100 {dimension_numbers = #tpu.dot_dimension_numbers<[1], [0], [0], [1], [0, 0, 1, 1], [], []>} : vector<256x32xbf16>, vector<32x32xbf16>, vector<256x32xf32> -> vector<256x32xf32>
    %87 = arith.addf %81, %86 : vector<256x32xf32>
    %c1_101 = arith.constant 1 : index
    %c1_102 = arith.constant 1 : index
    %c0_103 = arith.constant 0 : index
    %88 = vector.load %arg6[%c1_101, %c1_102, %c0_103] : memref<18x18x32xbf16, #tpu.memory_space<vmem>>, vector<16x16x32xbf16>
    %89 = vector.shape_cast %88 : vector<16x16x32xbf16> to vector<256x32xbf16>
    %c4 = arith.constant 4 : index
    %c0_104 = arith.constant 0 : index
    %c0_105 = arith.constant 0 : index
    %90 = vector.load %arg3[%c4, %c0_104, %c0_105] : memref<9x32x32xbf16, #tpu.memory_space<vmem>>, vector<1x32x32xbf16>
    %91 = vector.shape_cast %90 : vector<1x32x32xbf16> to vector<32x32xbf16>
    %cst_106 = arith.constant dense<0.000000e+00> : vector<256x32xf32>
    %92 = tpu.matmul %89, %91, %cst_106 {dimension_numbers = #tpu.dot_dimension_numbers<[1], [0], [0], [1], [0, 0, 1, 1], [], []>} : vector<256x32xbf16>, vector<32x32xbf16>, vector<256x32xf32> -> vector<256x32xf32>
    %93 = arith.addf %87, %92 : vector<256x32xf32>
    %c1_107 = arith.constant 1 : index
    %c2_108 = arith.constant 2 : index
    %c0_109 = arith.constant 0 : index
    %94 = vector.load %arg6[%c1_107, %c2_108, %c0_109] : memref<18x18x32xbf16, #tpu.memory_space<vmem>>, vector<16x16x32xbf16>
    %95 = vector.shape_cast %94 : vector<16x16x32xbf16> to vector<256x32xbf16>
    %c5 = arith.constant 5 : index
    %c0_110 = arith.constant 0 : index
    %c0_111 = arith.constant 0 : index
    %96 = vector.load %arg3[%c5, %c0_110, %c0_111] : memref<9x32x32xbf16, #tpu.memory_space<vmem>>, vector<1x32x32xbf16>
    %97 = vector.shape_cast %96 : vector<1x32x32xbf16> to vector<32x32xbf16>
    %cst_112 = arith.constant dense<0.000000e+00> : vector<256x32xf32>
    %98 = tpu.matmul %95, %97, %cst_112 {dimension_numbers = #tpu.dot_dimension_numbers<[1], [0], [0], [1], [0, 0, 1, 1], [], []>} : vector<256x32xbf16>, vector<32x32xbf16>, vector<256x32xf32> -> vector<256x32xf32>
    %99 = arith.addf %93, %98 : vector<256x32xf32>
    %c2_113 = arith.constant 2 : index
    %c0_114 = arith.constant 0 : index
    %c0_115 = arith.constant 0 : index
    %100 = vector.load %arg6[%c2_113, %c0_114, %c0_115] : memref<18x18x32xbf16, #tpu.memory_space<vmem>>, vector<16x16x32xbf16>
    %101 = vector.shape_cast %100 : vector<16x16x32xbf16> to vector<256x32xbf16>
    %c6 = arith.constant 6 : index
    %c0_116 = arith.constant 0 : index
    %c0_117 = arith.constant 0 : index
    %102 = vector.load %arg3[%c6, %c0_116, %c0_117] : memref<9x32x32xbf16, #tpu.memory_space<vmem>>, vector<1x32x32xbf16>
    %103 = vector.shape_cast %102 : vector<1x32x32xbf16> to vector<32x32xbf16>
    %cst_118 = arith.constant dense<0.000000e+00> : vector<256x32xf32>
    %104 = tpu.matmul %101, %103, %cst_118 {dimension_numbers = #tpu.dot_dimension_numbers<[1], [0], [0], [1], [0, 0, 1, 1], [], []>} : vector<256x32xbf16>, vector<32x32xbf16>, vector<256x32xf32> -> vector<256x32xf32>
    %105 = arith.addf %99, %104 : vector<256x32xf32>
    %c2_119 = arith.constant 2 : index
    %c1_120 = arith.constant 1 : index
    %c0_121 = arith.constant 0 : index
    %106 = vector.load %arg6[%c2_119, %c1_120, %c0_121] : memref<18x18x32xbf16, #tpu.memory_space<vmem>>, vector<16x16x32xbf16>
    %107 = vector.shape_cast %106 : vector<16x16x32xbf16> to vector<256x32xbf16>
    %c7 = arith.constant 7 : index
    %c0_122 = arith.constant 0 : index
    %c0_123 = arith.constant 0 : index
    %108 = vector.load %arg3[%c7, %c0_122, %c0_123] : memref<9x32x32xbf16, #tpu.memory_space<vmem>>, vector<1x32x32xbf16>
    %109 = vector.shape_cast %108 : vector<1x32x32xbf16> to vector<32x32xbf16>
    %cst_124 = arith.constant dense<0.000000e+00> : vector<256x32xf32>
    %110 = tpu.matmul %107, %109, %cst_124 {dimension_numbers = #tpu.dot_dimension_numbers<[1], [0], [0], [1], [0, 0, 1, 1], [], []>} : vector<256x32xbf16>, vector<32x32xbf16>, vector<256x32xf32> -> vector<256x32xf32>
    %111 = arith.addf %105, %110 : vector<256x32xf32>
    %c2_125 = arith.constant 2 : index
    %c2_126 = arith.constant 2 : index
    %c0_127 = arith.constant 0 : index
    %112 = vector.load %arg6[%c2_125, %c2_126, %c0_127] : memref<18x18x32xbf16, #tpu.memory_space<vmem>>, vector<16x16x32xbf16>
    %113 = vector.shape_cast %112 : vector<16x16x32xbf16> to vector<256x32xbf16>
    %c8 = arith.constant 8 : index
    %c0_128 = arith.constant 0 : index
    %c0_129 = arith.constant 0 : index
    %114 = vector.load %arg3[%c8, %c0_128, %c0_129] : memref<9x32x32xbf16, #tpu.memory_space<vmem>>, vector<1x32x32xbf16>
    %115 = vector.shape_cast %114 : vector<1x32x32xbf16> to vector<32x32xbf16>
    %cst_130 = arith.constant dense<0.000000e+00> : vector<256x32xf32>
    %116 = tpu.matmul %113, %115, %cst_130 {dimension_numbers = #tpu.dot_dimension_numbers<[1], [0], [0], [1], [0, 0, 1, 1], [], []>} : vector<256x32xbf16>, vector<32x32xbf16>, vector<256x32xf32> -> vector<256x32xf32>
    %117 = arith.addf %111, %116 : vector<256x32xf32>
    %cst_131 = arith.constant dense<0.000000e+00> : vector<32xf32>
    %118 = vector.multi_reduction <add>, %117, %cst_131 [0] : vector<256x32xf32> to vector<32xf32>
    %119 = vector.shape_cast %118 : vector<32xf32> to vector<1x32xf32>
    %cst_132 = arith.constant 2.560000e+02 : f32
    %120 = vector.broadcast %cst_132 : f32 to vector<1x32xf32>
    %121 = arith.divf %119, %120 : vector<1x32xf32>
    %122 = vector.broadcast %121 : vector<1x32xf32> to vector<256x32xf32>
    %123 = arith.subf %117, %122 : vector<256x32xf32>
    %124 = arith.mulf %123, %123 : vector<256x32xf32>
    %cst_133 = arith.constant dense<0.000000e+00> : vector<32xf32>
    %125 = vector.multi_reduction <add>, %124, %cst_133 [0] : vector<256x32xf32> to vector<32xf32>
    %126 = vector.shape_cast %125 : vector<32xf32> to vector<1x32xf32>
    %cst_134 = arith.constant 2.560000e+02 : f32
    %127 = vector.broadcast %cst_134 : f32 to vector<1x32xf32>
    %128 = arith.divf %126, %127 : vector<1x32xf32>
    %129 = vector.broadcast %121 : vector<1x32xf32> to vector<256x32xf32>
    %130 = arith.subf %117, %129 : vector<256x32xf32>
    %cst_135 = arith.constant 9.99999974E-6 : f32
    %131 = vector.broadcast %cst_135 : f32 to vector<1x32xf32>
    %132 = arith.addf %128, %131 : vector<1x32xf32>
    %133 = math.rsqrt %132 : vector<1x32xf32>
    %134 = vector.broadcast %133 : vector<1x32xf32> to vector<256x32xf32>
    %135 = arith.mulf %130, %134 : vector<256x32xf32>
    %c0_136 = arith.constant 0 : index
    %c0_137 = arith.constant 0 : index
    %c0_138 = arith.constant 0 : index
    %c0_139 = arith.constant 0 : index
    %136 = vector.load %arg1[%c0_136, %c0_137, %c0_138, %c0_139] : memref<1x16x16x4xbf16, #tpu.memory_space<vmem>>, vector<1x16x16x4xbf16>
    %137 = vector.shape_cast %136 : vector<1x16x16x4xbf16> to vector<16x16x4xbf16>
    %138 = arith.extf %137 : vector<16x16x4xbf16> to vector<16x16x4xf32>
    %139 = vector.shape_cast %135 : vector<256x32xf32> to vector<16x16x32xf32>
    %140 = tpu.concatenate %138, %139 in 2 : vector<16x16x4xf32>, vector<16x16x32xf32> -> vector<16x16x36xf32>
    %c0_140 = arith.constant 0 : index
    %c0_141 = arith.constant 0 : index
    %c0_142 = arith.constant 0 : index
    %c0_143 = arith.constant 0 : index
    %141 = vector.load %arg4[%c0_140, %c0_141, %c0_142, %c0_143] : memref<1x16x16x36xf32, #tpu.memory_space<vmem>>, vector<1x16x16x36xf32>
    %142 = vector.shape_cast %141 : vector<1x16x16x36xf32> to vector<16x16x36xf32>
    %143 = vector.shape_cast %140 : vector<16x16x36xf32> to vector<1x16x16x36xf32>
    tpu.vector_store %arg4[%c0_140, %c0_141, %c0_142, %c0_143], %143 {strides = array<i32>} : memref<1x16x16x36xf32, #tpu.memory_space<vmem>>, vector<1x16x16x36xf32>,
    return
  }
  func.func @transform_0(%arg0: i32) -> (i32, i32, i32, i32) {
    %c0_i32 = arith.constant 0 : i32
    %c0_i32_0 = arith.constant 0 : i32
    %c0_i32_1 = arith.constant 0 : i32
    %c0_i32_2 = arith.constant 0 : i32
    return %arg0, %c0_i32, %c0_i32_0, %c0_i32_1 : i32, i32, i32, i32
  }
  func.func @transform_1(%arg0: i32) -> (i32, i32) {
    %c0_i32 = arith.constant 0 : i32
    %c0_i32_0 = arith.constant 0 : i32
    %c0_i32_1 = arith.constant 0 : i32
    return %c0_i32, %c0_i32_0 : i32, i32
  }
  func.func @transform_2(%arg0: i32) -> (i32, i32, i32) {
    %c0_i32 = arith.constant 0 : i32
    %c0_i32_0 = arith.constant 0 : i32
    %c0_i32_1 = arith.constant 0 : i32
    %c0_i32_2 = arith.constant 0 : i32
    return %c0_i32, %c0_i32_0, %c0_i32_1 : i32, i32, i32
  }
  func.func @transform_3(%arg0: i32) -> (i32, i32, i32, i32) {
    %c0_i32 = arith.constant 0 : i32
    %c0_i32_0 = arith.constant 0 : i32
    %c0_i32_1 = arith.constant 0 : i32
    %c0_i32_2 = arith.constant 0 : i32
    return %arg0, %c0_i32, %c0_i32_0, %c0_i32_1 : i32, i32, i32, i32
  }
}

</mosaic_0001>

<bundles_post_ra>
// kernel: tpu_custom_call.1
= control target key start
LH: loop header
LB: loop body
LE: loop exit
PB: predicated region body
PF: predicated region fallthrough
CT: control target
= control target key end

     0   :  { %8 = vsyncpa [#allocation5], 0  ;;  %s16571_s0 = inlined_call_operand.vmem [shape: bf16[2,16,16,4], index: 0, kind: input, shape index: {}]   ;;  %s16572_s1 = inlined_call_operand.vmem [shape: bf16[36,32], index: 1, kind: input, shape index: {}]   ;;  %s16573_s2 = inlined_call_operand.vmem [shape: bf16[9,32,32], index: 2, kind: input, shape index: {}]   ;;  %s16574_s3 = inlined_call_operand.hbm [shape: f32[2,16,16,36], index: 3, kind: output, shape index: {}]  }
   0x1   :  { %10 = vsyncpa [#allocation5 + $0x1], 0  ;;  %s11859_s12 = smov 0   ;;  %s11861_s13 = smov 0  }
   0x2   :  { %s11863_s14 = smov 0   ;;  %s11865_s15 = smov 0  }
   0x3 LB: > { %s11880_s16 = sadd.s32 4294967295, %s11826_s15   ;;  %s9976_s17 = sadd.s32 4294967294, %s11826_s15   ;;  %s11826_s15 = sphi %s11865_s15, %s16795_s15   ;;  %s11822_s14 = sphi %s11863_s14, %s16794_s14   ;;  %s11818_s13 = sphi %s11861_s13, %s16793_s13   ;;  %s11814_s12 = sphi %s11859_s12, %s16792_s12  }
   0x4   : > { %s11884_s18 = sadd.s32 1, %s11826_s15   ;;  %s91_s19 = sadd.s32 1, %s11822_s14 }
   0x5   : > { %s88_s20 = ssub.s32 %s11826_s15, %s11884_s18  ;;  %p101_p0 = scmp.ne.s32.totalorder %s11822_s14, %s11818_s13 }
   0x6   : > { %p89_p1 = scmp.eq.s32.totalorder %s88_s20, 0  ;;  %p102_p2 = scmp.eq.s32.totalorder %s11880_s16, 1 }
   0x7   : > { %p107_p3 = scmp.ne.s32.totalorder %s11818_s13, %s11814_s12  ;;  %p108_p4 = scmp.eq.s32.totalorder %s9976_s17, 1 }
   0x8   : > { %s11895_s21 = scalar_select %p89_p1, %s11822_s14, %s91_s19  }
   0x9   : > { %p11897_p5 = por %p102_p2, %p101_p0  ;;  %p11901_p6 = por %p108_p4, %p107_p3 }
   0xa   : > { %p9979_p7 = scmp.ge.s32.totalorder %s11826_s15, 1  ;;  %p140_p8 = scmp.lt.s32.totalorder %s11826_s15, 3 }
   0xc   : > { %p141_p9 = pnand %p9979_p7, %p140_p8 }
   0xe   : > { %144 = sbr.rel (%p141_p9) target bundleno = 1893 (0x765), region = 32 }
  0x15   : > { %vm170_vm0 = vcmask 27648   ;;  %vm173_vm1 = vcmask 24576   ;;  %vm16579_vm2 = vsmask.f32 256  ;;  %v16575_v0 = vmov 0   ;;  %p164_p10 = scmp.lt.s32.totalorder %s11880_s16, 1 }
  0x16   : > { %171 = vst.msk [vmem:[#allocation2] sm:$0xf] %vm170_vm0, %v16575_v0  ;;  %172 = vst.msk [vmem:[#allocation2 + $0x4] sm:$0xf] %vm170_vm0, %v16575_v0  ;;  %vm16577_vm4 = vcmask 257024   ;;  %vm1260_vm7 = vcmask 1042432  }
  0x17   : > { %174 = vst.msk [vmem:[#allocation2 + $0x8] sm:$0x1] %vm173_vm1, %v16575_v0  ;;  %vm11915_vm3 = vmand %vm173_vm1, %vm16579_vm2  ;;  %vm16578_vm5 = vsmask.f32 7938  ;;  %v185_v2 = vld [vmem:[#allocation2 + $0xc] sm:$0x1] }
  0x18   : > { %176 = vst.msk [vmem:[#allocation2 + $0xcc] sm:$0xf] %vm170_vm0, %v16575_v0  ;;  %177 = vst.msk [vmem:[#allocation2 + $0xd0] sm:$0xf] %vm170_vm0, %v16575_v0  ;;  %s165_s24 = scalar_select %p164_p10, %s11880_s16, 1  ;;  %v186_v3 = vsel %vm11915_vm3, 0, %v185_v2 }
  0x19   : > { %178 = vst.msk [vmem:[#allocation2 + $0xd4] sm:$0x1] %vm173_vm1, %v16575_v0  ;;  %v188_v4 = vld [vmem:[#allocation2 + $0x18] sm:$0x1]  ;;  %v191_v5 = vld [vmem:[#allocation2 + $0x24] sm:$0x1]  ;;  %vm11943_vm6 = vmand %vm173_vm1, %vm16578_vm5 }
  0x1a   : > { %4098 = vst.msk [vmem:[#allocation3] sm:$0xf] %vm16577_vm4, %v16575_v0  ;;  %4099 = vst.msk [vmem:[#allocation3 + $0x4] sm:$0xf] %vm16577_vm4, %v16575_v0  ;;  %v189_v6 = vsel %vm11915_vm3, 0, %v188_v4  ;;  %v192_v7 = vsel %vm11915_vm3, 0, %v191_v5 }
  0x1b   : > { %4103 = vst.msk [vmem:[#allocation3 + $0xcc] sm:$0xf] %vm16577_vm4, %v16575_v0  ;;  %4104 = vst.msk [vmem:[#allocation3 + $0xd0] sm:$0xf] %vm16577_vm4, %v16575_v0  ;;  %s10617_s25 = sshll.u32 %s165_s24, 7  ;;  %vm1261_vm8 = vcmask 1046532  }
  0x1c   : > { %187 = vst [vmem:[#allocation2 + $0xc] sm:$0x1] %v186_v3  ;;  %190 = vst [vmem:[#allocation2 + $0x18] sm:$0x1] %v189_v6  ;;  %v241_v9 = vld [vmem:[#allocation2 + $0x14] sm:$0x1]  ;;  %s11950_s28 = scalar_lea.vmem %s16571_s0, %s10617_s25 }
  0x1d   : > { %193 = vst [vmem:[#allocation2 + $0x24] sm:$0x1] %v192_v7  ;;  %v244_v10 = vld [vmem:[#allocation2 + $0x20] sm:$0x1]  ;;  %vm324_vm9 = vsmask.f32 4368  ;;  %vm11969_vm10 = vmor %vm1260_vm7, %vm1261_vm8 }
  0x1e   : > { %v242_v11 = vsel %vm11943_vm6, 0, %v241_v9  ;;  %v245_v12 = vsel %vm11943_vm6, 0, %v244_v10  ;;  %v292_v13 = vld [vmem:[%s11950_s28] sm:$0xf]  ;;  %v293_v14 = vld [vmem:[%s11950_s28 + $0x4] sm:$0xf]  ;;  %vm11975_vm11 = vmand %vm170_vm0, %vm16578_vm5 }
  0x1f   : > { %v294_v15 = vld [vmem:[%s11950_s28 + $0x8] sm:$0xf]  ;;  %243 = vst [vmem:[#allocation2 + $0x14] sm:$0x1] %v242_v11  ;;  %246 = vst [vmem:[#allocation2 + $0x20] sm:$0x1] %v245_v12 }
  0x20   : > { %v238_v16 = vld [vmem:[#allocation2 + $0x8] sm:$0x1]  ;;  %v11959_v17 = vld [vmem:[#allocation2 + $0x4] sm:$0xf]  ;;  %v1196_v18 = vld [vmem:[#allocation2] sm:$0xe] }
  0x21   : > { %v239_v19 = vsel %vm11943_vm6, 0, %v238_v16  ;;  %v9983_v20 = vrot.slane %v1196_v18, 9  ;;  %v1265_v21 = vrot.slane %v11959_v17, 5  ;;  %v182_v22 = vld [vmem:[#allocation2] sm:$0x1]  ;;  %v327_v23 = vshrl.u32 %v292_v13, 16  ;;  %vm11981_vm12 = vmor %vm16579_vm2, %vm324_vm9 }
  0x22   : > { %240 = vst [vmem:[#allocation2 + $0x8] sm:$0x1] %v239_v19  ;;  %v183_v24 = vsel %vm11915_vm3, 0, %v182_v22  ;;  %v330_v25 = vshll.u32 %v292_v13, 16  ;;  %v335_v26 = vshrl.u32 %v293_v14, 16  ;;  %v338_v27 = vshll.u32 %v293_v14, 16 }
  0x23   : > { %v295_v28 = vld [vmem:[%s11950_s28 + $0xc] sm:$0xf]  ;;  %v16616_v29 = vmov 0  ;;  %184 = vst [vmem:[#allocation2] sm:$0x1] %v183_v24  ;;  %v329_v30 = vrot.slane %v327_v23, 7  ;;  %v1266_v44 = vsel %vm11969_vm10, %v9983_v20, %v1265_v21 }
  0x24   : > { %v16617_v29 = vsel %vm11969_vm10, 4294967295, %v16616_v29  ;;  %v344_v31 = vshrl.u32 %v294_v15, 16  ;;  %v337_v33 = vrot.slane %v335_v26, 7  ;;  %v649_v34 = vld [vmem:[#allocation2 + $0xc] sm:$0xf]  ;;  %v347_v35 = vshll.u32 %v294_v15, 16 }
  0x25   : > { %16618 = vst [vmem:[#allocation7_spill] sm:$0xff] %v16617_v29  ;;  %v352_v36 = vshrl.u32 %v295_v28, 16  ;;  %v355_v37 = vshll.u32 %v295_v28, 16  ;;  %v1267_v38 = vrot.slane %v1265_v21, 4  ;;  %v332_v40 = vor.u32 %v330_v25, %v329_v30  ;;  %v296_v43 = vld [vmem:[%s11950_s28 + $0x10] sm:$0xf] }
  0x26   : > { %v333_v41 = vrot.slane %v329_v30, 4  ;;  %v346_v42 = vrot.slane %v344_v31, 7  ;;  %v340_v45 = vor.u32 %v338_v27, %v337_v33  ;;  %v656_v47 = vld [vmem:[#allocation2 + $0x18] sm:$0xf]  ;;  %v297_v48 = vld [vmem:[%s11950_s28 + $0x14] sm:$0xf] }
  0x27   : > { %v354_v46 = vrot.slane %v352_v36, 7  ;;  %v361_v49 = vshrl.u32 %v296_v43, 16  ;;  %v650_v50 = vsel %vm11975_vm11, %v332_v40, %v649_v34  ;;  %v364_v53 = vshll.u32 %v296_v43, 16  ;;  %v663_v58 = vld [vmem:[#allocation2 + $0x24] sm:$0xf]  ;;  %s11829_s29 = smov 8  }
  0x28   : > { %v349_v51 = vor.u32 %v347_v35, %v346_v42  ;;  %v350_v52 = vrot.slane %v346_v42, 4  ;;  %v341_v54 = vsel %vm11981_vm12, %v333_v41, %v340_v45  ;;  %v342_v55 = vrot.slane %v337_v33, 4  ;;  %651 = vst [vmem:[#allocation2 + $0xc] sm:$0xf] %v650_v50  ;;  %v653_v12 = vld [vmem:[#allocation2 + $0x14] sm:$0x1] }
  0x29   : > { %v357_v56 = vor.u32 %v355_v37, %v354_v46  ;;  %v363_v57 = vrot.slane %v361_v49, 7  ;;  %v793_v59 = vld [vmem:[#allocation2 + $0x8] sm:$0x1]  ;;  %652 = vst.msk [vmem:[#allocation2 + $0x10] sm:$0xf] %vm170_vm0, %v341_v54  ;;  %v369_v61 = vshrl.u32 %v297_v48, 16 }
  0x2a   : > { %v657_v60 = vsel %vm11975_vm11, %v349_v51, %v656_v47  ;;  %v372_v62 = vshll.u32 %v297_v48, 16  ;;  %v822_v63 = vshll.u32 %v11959_v17, 16  ;;  %v1268_v2 = vrot.slane %v793_v59, 5  ;;  %v761_v6 = vld [vmem:[#allocation2] sm:$0xf]  ;;  %s11830_s30 = smov 12  }
  0x2b   : > { %v358_v3 = vsel %vm11981_vm12, %v350_v52, %v357_v56  ;;  %v359_v4 = vrot.slane %v354_v46, 4  ;;  %658 = vst [vmem:[#allocation2 + $0x18] sm:$0xf] %v657_v60  ;;  %v366_v5 = vor.u32 %v364_v53, %v363_v57  ;;  %v367_v7 = vrot.slane %v363_v57, 4  ;;  %v660_v18 = vld [vmem:[#allocation2 + $0x20] sm:$0x1] }
  0x2c   : > { %659 = vst.msk [vmem:[#allocation2 + $0x1c] sm:$0xf] %vm170_vm0, %v358_v3  ;;  %v12000_v9 = vrot.slane %v369_v61, 7  ;;  %v813_v10 = vshrl.u32 %v761_v6, 16  ;;  %v816_v11 = vshll.u32 %v761_v6, 16  ;;  %v832_v13 = vshll.u32 %v793_v59, 16 }
  0x2d   : > { %v1269_v14 = vsel %vm11969_vm10, %v1267_v38, %v1268_v2  ;;  %v664_v15 = vsel %vm11975_vm11, %v366_v5, %v663_v58  ;;  %v826_v16 = vshrl.u32 %v11959_v17, 16  ;;  %v12008_v22 = vrot.slane %v822_v63, 5  ;;  %s11831_s4 = smov 24   ;;  %s11832_s5 = smov 4  }
  0x2e   : > { %v10063_v19 = vcombine.low %v1266_v44, %v1269_v14  ;;  %v374_v20 = vor.u32 %v372_v62, %v12000_v9  ;;  %665 = vst [vmem:[#allocation2 + $0x24] sm:$0xf] %v664_v15  ;;  %v815_v21 = vrot.slane %v813_v10, 4  ;;  %v818_v23 = vrot.slane %v816_v11, 5  ;;  %s11833_s6 = smov 20   ;;  %s11834_s7 = smov 32  }
  0x2f   : > { %v828_v24 = vrot.slane %v826_v16, 4  ;;  %v654_v25 = vsel %vm11915_vm3, %v342_v55, %v653_v12  ;;  %v1375_v26 = vld [vmem:[#allocation2 + $0xc] sm:$0xf]  ;;  %vm809_vm13 = vsmask.f32 3328  ;;  %v661_v27 = vsel %vm11915_vm3, %v359_v4, %v660_v18  ;;  %s11835_s8 = smov 16  }
  0x30   : > { %2784 = vrot.lane.b32.xlu1 %v10063_v19, %s11829_s29  ;;  %v375_v17 = vsel %vm11981_vm12, %v367_v7, %v374_v20  ;;  %vm810_vm14 = vsmask.f32 7440  ;;  %655 = vst [vmem:[#allocation2 + $0x14] sm:$0x1] %v654_v25  ;;  %v12017_v28 = vld [vmem:[#allocation2 + $0x10] sm:$0xf]  ;;  %v819_v40 = vor.u32 %v818_v23, %v815_v21 }
  0x31   : > { %v1424_v30 = vshrl.u32 %v1375_v26, 16  ;;  %v1427_v31 = vshll.u32 %v1375_v26, 16  ;;  %v376_v33 = vrot.slane %v12000_v9, 4  ;;  %666 = vst.msk [vmem:[#allocation2 + $0x28] sm:$0xf] %vm170_vm0, %v375_v17  ;;  %v834_v34 = vrot.slane %v832_v13, 5  ;;  %vm12056_vm15 = vmor %vm809_vm13, %vm810_vm14 }
  0x32   : > { %662 = vst [vmem:[#allocation2 + $0x20] sm:$0x1] %v661_v27  ;;  %v1437_v35 = vshrl.u32 %v12017_v28, 16  ;;  %v10079_v36 = vcombine.low %v1375_v26, %v12017_v28  ;;  %v1377_v37 = vld [vmem:[#allocation2 + $0x18] sm:$0xf]  ;;  %v829_v41 = vor.u32 %v828_v24, %v12008_v22  ;;  %v1433_v49 = vshll.u32 %v12017_v28, 16 }
  0x33   : > { %v12023_v38 = vld [vmem:[#allocation2 + $0x18] sm:$0xf]  ;;  %v12026_v42 = vrot.slane %v1424_v30, 4  ;;  %v12028_v43 = vrot.slane %v1427_v31, 5  ;;  %v12030_v44 = vld [vmem:[#allocation2 + $0x1c] sm:$0xf] }
  0x34   : > { %v1448_v45 = vshrl.u32 %v1377_v37, 16  ;;  %v1451_v46 = vshll.u32 %v1377_v37, 16  ;;  %v12032_v47 = vld [vmem:[#allocation2 + $0x10] sm:$0xf]  ;;  %v1197_v48 = vld [vmem:[#allocation2 + $0xc] sm:$0xe]  ;;  %2880 = vrot.lane.b32.xlu0 %v10079_v36, %s11830_s30  ;;  %v10080_v51 = vcombine.low %v1377_v37, %v12030_v44 }
  0x35   : > { %v12035_v50 = vrot.slane %v1437_v35, 4  ;;  %v12039_v52 = vld [vmem:[#allocation2 + $0x1c] sm:$0xf]  ;;  %v2033_v53 = vshrl.u32 %v12023_v38, 16  ;;  %v1461_v54 = vshrl.u32 %v12030_v44, 16  ;;  %v2036_v57 = vshll.u32 %v12023_v38, 16 }
  0x36   : > { %v12043_v55 = vrot.slane %v1448_v45, 4  ;;  %v12045_v56 = vrot.slane %v1451_v46, 5  ;;  %v1986_v58 = vld [vmem:[#allocation2 + $0x24] sm:$0xf]  ;;  %2882 = vrot.lane.b32.xlu1 %v10080_v51, %s11830_s30  ;;  %v2046_v60 = vshrl.u32 %v12039_v52, 16  ;;  %v10127_v61 = vcombine.low %v12023_v38, %v12039_v52  ;;  %s11836_s9 = smov 28  }
  0x37   : > { %v12049_v59 = vrot.slane %v2033_v53, 4  ;;  %v2057_v62 = vshrl.u32 %v1986_v58, 16  ;;  %v16623_v63 = vmov 0  ;;  %v1807_v2 = vld [vmem:[#allocation2 + $0xc] sm:$0xe]  ;;  %v1430_v3 = vor.u32 %v12028_v43, %v12026_v42  ;;  %s161_s11 = sand.u32 1, %s11818_s13  }
  0x38   : > { %v16624_v63 = vsel %vm12056_vm15, 4294967295, %v16623_v63  ;;  %v2060_v4 = vshll.u32 %v1986_v58, 16  ;;  %v820_v5 = vrot.slane %v819_v40, 4  ;;  %v12062_v6 = vld [vmem:[#allocation2 + $0x14] sm:$0x1]  ;;  %3136 = vrot.lane.b32.xlu0 %v10127_v61, %s11831_s4  ;;  %v830_v12 = vrot.slane %v829_v41, 4 }
  0x39   : > { %16625 = vst [vmem:[#allocation8_spill] sm:$0xff] %v16624_v63  ;;  %v1808_v7 = vld [vmem:[#allocation2 + $0x18] sm:$0xe]  ;;  %v12065_v10 = vld [vmem:[#allocation2 + $0x28] sm:$0xf]  ;;  %v12067_v11 = vrot.slane %v2057_v62, 4  ;;  %v1454_v61 = vor.u32 %v12045_v56, %v12043_v55 }
  0x3a   : > { %v9984_v13 = vrot.slane %v1197_v48, 9  ;;  %v1272_v14 = vrot.slane %v12032_v47, 5  ;;  %v12070_v15 = vrot.slane %v2060_v4, 5  ;;  %v2070_v16 = vshrl.u32 %v12065_v10, 16  ;;  %v12077_v20 = vld [vmem:[#allocation2 + $0x14] sm:$0x1] }
  0x3b   : > { %v10128_v18 = vcombine.low %v1986_v58, %v12065_v10  ;;  %v825_v19 = vsel %vm12056_vm15, %v820_v5, %v12008_v22  ;;  %v1408_v21 = vld [vmem:[#allocation2 + $0x20] sm:$0x1]  ;;  %v835_v23 = vsel %vm12056_vm15, %v830_v12, %v834_v34  ;;  %v1275_v26 = vrot.slane %v12062_v6, 5  ;;  %v2416_v17 = vld [vmem:[#allocation2 + $0x18] sm:$0xe]  ;;  %s9980_s17 = sshll.u32 %s161_s11, 8 }
  0x3c   : > { %v1273_v24 = vsel %vm11969_vm10, %v9984_v13, %v1272_v14  ;;  %v1274_v25 = vrot.slane %v1272_v14, 4  ;;  %v10047_v27 = vcombine.low %v825_v19, %v835_v23  ;;  %v9999_v30 = vrot.slane %v1807_v2, 9  ;;  %v12087_v35 = vld [vmem:[#allocation2 + $0x20] sm:$0x1]  ;;  %v247_v4 = vld [vmem:[#allocation2 + $0x2c] sm:$0x1] }
  0x3d   : > { %3138 = vrot.lane.b32.xlu1 %v10128_v18, %s11831_s4  ;;  %v1873_v31 = vrot.slane %v12017_v28, 5  ;;  %v1876_v22 = vrot.slane %v12077_v20, 5  ;;  %v10000_v36 = vrot.slane %v1808_v7, 9  ;;  %v1880_v37 = vrot.slane %v12030_v44, 5  ;;  %v2417_v5 = vld [vmem:[#allocation2 + $0x24] sm:$0xe] }
  0x3e   : > { %v1276_v34 = vsel %vm11969_vm10, %v1274_v25, %v1275_v26  ;;  %v1883_v40 = vrot.slane %v1408_v21, 5  ;;  %2704 = vrot.lane.b32.xlu0 %v10047_v27, %s11832_s5  ;;  %v10015_v45 = vrot.slane %v2416_v17, 9  ;;  %v2482_v51 = vrot.slane %v12039_v52, 5  ;;  %v763_v56 = vld [vmem:[#allocation2 + $0xc] sm:$0xf]  ;;  %s16407_s19 = scalar_lea.vmem [#allocation4], %s9980_s17 }
  0x3f   : > { %v10064_v41 = vcombine.low %v1273_v24, %v1276_v34  ;;  %v1874_v42 = vsel %vm11969_vm10, %v9999_v30, %v1873_v31  ;;  %v1875_v43 = vrot.slane %v1873_v31, 4  ;;  %v1881_v46 = vsel %vm11969_vm10, %v10000_v36, %v1880_v37  ;;  %s9914_s20 = sshll.u32 %s16407_s19, 4  ;;  %s11837_s27 = smov [#allocation4]   ;;  %s16520_s20 = int_to_ptr.vmem [resolvable:$true] %s9914_s20 }
  0x40   : > { %v1882_v48 = vrot.slane %v1880_v37, 4  ;;  %v2485_v53 = vrot.slane %v12087_v35, 5  ;;  %v1457_v62 = vshll.u32 %v12030_v44, 16  ;;  %v1463_v2 = vrot.slane %v1461_v54, 4  ;;  %s11764_s26 = scalar_lea.vmem %s16520_s20, 4096 }
  0x41   : > { %2786 = vrot.lane.b32.xlu1 %v10064_v41, %s11829_s29  ;;  %v1877_v58 = vsel %vm11969_vm10, %v1875_v43, %v1876_v22  ;;  %v2483_v13 = vsel %vm11969_vm10, %v10015_v45, %v2482_v51  ;;  %v2484_v14 = vrot.slane %v2482_v51, 4  ;;  %v1455_v19 = vrot.slane %v1454_v61, 4  ;;  %v12139_v45 = vld [vmem:[#allocation2 + $0x1c] sm:$0xf]  ;;  %p11765_p11 = scmp.ne.s32.totalorder %s16520_s20, %s11764_s26 }
  0x42   : > { %v10111_v7 = vcombine.low %v1874_v42, %v1877_v58  ;;  %v1884_v12 = vsel %vm11969_vm10, %v1882_v48, %v1883_v40  ;;  %v1459_v23 = vrot.slane %v1457_v62, 5  ;;  %v1467_v24 = vshll.u32 %v1408_v21, 16  ;;  %v12146_v62 = vld [vmem:[#allocation2 + $0x20] sm:$0x1] }
  0x43   : > { %v10112_v18 = vcombine.low %v1881_v46, %v1884_v12  ;;  %v12109_v25 = vrot.slane %v1430_v3, 4  ;;  %v2486_v44 = vsel %vm11969_vm10, %v2484_v14, %v2485_v53  ;;  %v248_v54 = vsel %vm11943_vm6, 0, %v247_v4  ;;  %p11766_p12 = pnand %p11765_p11, %p11897_p5 }
  0x44   : > { %3040 = vrot.lane.b32.xlu0 %v10111_v7, %s11833_s6  ;;  %v10016_v55 = vrot.slane %v2417_v5, 9  ;;  %v12118_v26 = vrot.slane %v2036_v57, 5  ;;  %v10159_v21 = vcombine.low %v2483_v13, %v2486_v44  ;;  %v1464_v3 = vor.u32 %v1463_v2, %v1459_v23  ;;  %249 = vst [vmem:[#allocation2 + $0x2c] sm:$0x1] %v248_v54 }
  0x45   : > { %3042 = vrot.lane.b32.xlu1 %v10112_v18, %s11833_s6  ;;  %v1469_v17 = vrot.slane %v1467_v24, 5  ;;  %v1460_v27 = vsel %vm12056_vm15, %v1455_v19, %v1459_v23  ;;  %v2489_v30 = vrot.slane %v12065_v10, 5  ;;  %v2063_v31 = vor.u32 %v12070_v15, %v12067_v11  ;;  %v765_v11 = vld [vmem:[#allocation2 + $0x18] sm:$0xf]  ;;  %v767_v23 = vld [vmem:[#allocation2 + $0x24] sm:$0xf]  ;;  %p11767_p13 = pneg %p11766_p12 }
  0x46   : > { %v2066_v22 = vshll.u32 %v12065_v10, 16  ;;  %v1465_v34 = vrot.slane %v1464_v3, 4  ;;  %v2072_v38 = vrot.slane %v2070_v16, 4  ;;  %v837_v57 = vshrl.u32 %v763_v56, 16 }
  0x47   : > { %v840_v36 = vshll.u32 %v763_v56, 16  ;;  %v12130_v37 = vsel %vm11969_vm10, %v10016_v55, %v2489_v30  ;;  %v846_v41 = vshll.u32 %v12032_v47, 16  ;;  %v850_v42 = vshrl.u32 %v12032_v47, 16 }
  0x48   : > { %3296 = vrot.lane.b32.xlu0 %v10159_v21, %s11834_s7  ;;  %v12132_v40 = vrot.slane %v2066_v22, 5  ;;  %v1470_v10 = vsel %vm12056_vm15, %v1465_v34, %v1469_v17  ;;  %v839_v15 = vrot.slane %v837_v57, 4  ;;  %v856_v43 = vshll.u32 %v12062_v6, 16 }
  0x49   : > { %v842_v16 = vrot.slane %v840_v36, 5  ;;  %v10096_v46 = vcombine.low %v1460_v27, %v1470_v10  ;;  %v12141_v48 = vrot.slane %v2489_v30, 4  ;;  %v12143_v51 = vrot.slane %v2063_v31, 4  ;;  %v12165_v30 = vld [vmem:[#allocation2 + $0x28] sm:$0xf] }
  0x4a   : > { %v848_v53 = vrot.slane %v846_v41, 5  ;;  %v2073_v58 = vor.u32 %v2072_v38, %v12132_v40  ;;  %v852_v47 = vrot.slane %v850_v42, 4  ;;  %v861_v2 = vshrl.u32 %v765_v11, 16 }
  0x4b   : > { %v843_v61 = vor.u32 %v842_v16, %v839_v15  ;;  %2962 = vrot.lane.b32.xlu1 %v10096_v46, %s11835_s8  ;;  %v667_v4 = vld [vmem:[#allocation2 + $0x2c] sm:$0x1]  ;;  %v858_v6 = vrot.slane %v856_v43, 5  ;;  %v864_v5 = vshll.u32 %v765_v11, 16  ;;  %v870_v7 = vshll.u32 %v12139_v45, 16 }
  0x4c   : > { %v874_v12 = vshrl.u32 %v12139_v45, 16  ;;  %v668_v13 = vsel %vm11915_vm3, %v376_v33, %v667_v4  ;;  %v853_v18 = vor.u32 %v852_v47, %v848_v53  ;;  %v863_v19 = vrot.slane %v861_v2, 4 }
  0x4d   : > { %v844_v14 = vrot.slane %v843_v61, 4  ;;  %669 = vst [vmem:[#allocation2 + $0x2c] sm:$0x1] %v668_v13  ;;  %v866_v24 = vrot.slane %v864_v5, 5  ;;  %v872_v44 = vrot.slane %v870_v7, 5  ;;  %v880_v55 = vshll.u32 %v12146_v62, 16 }
  0x4e   : > { %v876_v54 = vrot.slane %v874_v12, 4  ;;  %v2069_v56 = vsel %vm12056_vm15, %v12143_v51, %v12132_v40  ;;  %v854_v21 = vrot.slane %v853_v18, 4  ;;  %v12162_v9 = vrot.slane %v1433_v49, 5  ;;  %v1199_v5 = vld [vmem:[#allocation2 + $0x24] sm:$0xe] }
  0x4f   : > { %v1443_v33 = vshll.u32 %v12077_v20, 16  ;;  %v867_v3 = vor.u32 %v866_v24, %v863_v19  ;;  %v882_v27 = vrot.slane %v880_v55, 5  ;;  %v885_v31 = vshrl.u32 %v767_v23, 16  ;;  %v1198_v19 = vld [vmem:[#allocation2 + $0x18] sm:$0xe] }
  0x50   : > { %v877_v17 = vor.u32 %v876_v54, %v872_v44  ;;  %v2074_v22 = vrot.slane %v2073_v58, 4  ;;  %v849_v34 = vsel %vm12056_vm15, %v844_v14, %v848_v53  ;;  %v859_v38 = vsel %vm12056_vm15, %v854_v21, %v858_v6  ;;  %v194_v55 = vld [vmem:[#allocation2 + $0x30] sm:$0x1] }
  0x51   : > { %v1440_v28 = vor.u32 %v12035_v50, %v12162_v9  ;;  %v868_v49 = vrot.slane %v867_v3, 4  ;;  %v1445_v36 = vrot.slane %v1443_v33, 5  ;;  %v887_v20 = vrot.slane %v885_v31, 4  ;;  %v298_v3 = vld [vmem:[%s11950_s28 + $0x18] sm:$0xf] }
  0x52   : > { %v878_v57 = vrot.slane %v877_v17, 4  ;;  %v888_v41 = vshll.u32 %v767_v23, 16  ;;  %v894_v42 = vshll.u32 %v12165_v30, 16  ;;  %v898_v11 = vshrl.u32 %v12165_v30, 16 }
  0x53   : > { %v1441_v40 = vrot.slane %v1440_v28, 4  ;;  %v873_v10 = vsel %vm12056_vm15, %v868_v49, %v872_v44  ;;  %v2039_v16 = vor.u32 %v12118_v26, %v12049_v59  ;;  %v2042_v50 = vshll.u32 %v12039_v52, 16 }
  0x54   : > { %v883_v15 = vsel %vm12056_vm15, %v878_v57, %v882_v27  ;;  %v2017_v43 = vld [vmem:[#allocation2 + $0x2c] sm:$0x1]  ;;  %v10048_v46 = vcombine.low %v849_v34, %v859_v38  ;;  %v1436_v51 = vsel %vm12056_vm15, %v12109_v25, %v12162_v9  ;;  %v890_v58 = vrot.slane %v888_v41, 5  ;;  %v299_v27 = vld [vmem:[%s11950_s28 + $0x1c] sm:$0xf] }
  0x55   : > { %v796_v53 = vld [vmem:[#allocation2 + $0x2c] sm:$0x1]  ;;  %v896_v61 = vrot.slane %v894_v42, 5  ;;  %v2492_v47 = vrot.slane %v2017_v43, 5  ;;  %v2076_v2 = vshll.u32 %v2017_v43, 16  ;;  %v10049_v4 = vcombine.low %v873_v10, %v883_v15 }
  0x56   : > { %v900_v6 = vrot.slane %v898_v11, 4  ;;  %v891_v7 = vor.u32 %v890_v58, %v887_v20  ;;  %v904_v12 = vshll.u32 %v796_v53, 16  ;;  %v2040_v59 = vrot.slane %v2039_v16, 4  ;;  %v12219_v15 = vld [vmem:[#allocation2 + $0x28] sm:$0xf] }
  0x57   : > { %v2044_v26 = vrot.slane %v2042_v50, 5  ;;  %v2493_v13 = vsel %vm11969_vm10, %v12141_v48, %v2492_v47  ;;  %v2078_v14 = vrot.slane %v2076_v2, 5  ;;  %v2048_v25 = vrot.slane %v2046_v60, 4  ;;  %v1809_v47 = vld [vmem:[#allocation2 + $0x24] sm:$0xe] }
  0x58   : > { %v901_v18 = vor.u32 %v900_v6, %v896_v61  ;;  %v10160_v23 = vcombine.low %v12130_v37, %v2493_v13  ;;  %v1446_v24 = vsel %vm12056_vm15, %v1441_v40, %v1445_v36  ;;  %v892_v44 = vrot.slane %v891_v7, 4  ;;  %v12212_v40 = vld [vmem:[#allocation2 + $0x24] sm:$0xf] }
  0x59   : > { %v906_v54 = vrot.slane %v904_v12, 5  ;;  %v2079_v21 = vsel %vm12056_vm15, %v2074_v22, %v2078_v14  ;;  %v2049_v48 = vor.u32 %v2048_v25, %v2044_v26  ;;  %v2052_v33 = vshll.u32 %v12087_v35, 16  ;;  %v197_v12 = vld [vmem:[#allocation2 + $0x3c] sm:$0x1]  ;;  %v300_v14 = vld [vmem:[%s11950_s28 + $0x20] sm:$0xf] }
  0x5a   : > { %v902_v9 = vrot.slane %v901_v18, 4  ;;  %3298 = vrot.lane.b32.xlu0 %v10160_v23, %s11834_s7  ;;  %v10144_v52 = vcombine.low %v2069_v56, %v2079_v21  ;;  %v897_v60 = vsel %vm12056_vm15, %v892_v44, %v896_v61  ;;  %v9986_v37 = vrot.slane %v1199_v5, 9 }
  0x5b   : > { %v1286_v17 = vrot.slane %v12165_v30, 5  ;;  %v2050_v34 = vrot.slane %v2049_v48, 4  ;;  %v2054_v22 = vrot.slane %v2052_v33, 5  ;;  %v1289_v38 = vrot.slane %v796_v53, 5 }
  0x5c   : > { %v907_v31 = vsel %vm12056_vm15, %v902_v9, %v906_v54  ;;  %3218 = vrot.lane.b32.xlu1 %v10144_v52, %s11836_s9  ;;  %v10095_v35 = vcombine.low %v1436_v51, %v1446_v24  ;;  %v2045_v56 = vsel %vm12056_vm15, %v2040_v59, %v2044_v26  ;;  %v9985_v49 = vrot.slane %v1198_v19, 9  ;;  %v301_v24 = vld [vmem:[%s11950_s28 + $0x24] sm:$0xf] }
  0x5d   : > { %v1288_v28 = vrot.slane %v1286_v17, 4  ;;  %v10050_v57 = vcombine.low %v897_v60, %v907_v31  ;;  %v1279_v36 = vrot.slane %v12139_v45, 5  ;;  %v1282_v30 = vrot.slane %v12146_v62, 5  ;;  %v250_v45 = vld [vmem:[#allocation2 + $0x38] sm:$0x1] }
  0x5e   : > { %v195_v20 = vsel %vm11915_vm3, 0, %v194_v55  ;;  %2706 = vrot.lane.b32.xlu0 %v10048_v46, %s11832_s5  ;;  %v2055_v41 = vsel %vm12056_vm15, %v2050_v34, %v2054_v22  ;;  %v1287_v42 = vsel %vm11969_vm10, %v9986_v37, %v1286_v17  ;;  %v378_v11 = vshrl.u32 %v298_v3, 16  ;;  %v1409_v46 = vld [vmem:[#allocation2 + $0x2c] sm:$0x1]  ;;  %v253_v9 = vld [vmem:[#allocation2 + $0x44] sm:$0x1] }
  0x5f   : > { %196 = vst [vmem:[#allocation2 + $0x30] sm:$0x1] %v195_v20  ;;  %v381_v10 = vshll.u32 %v298_v3, 16  ;;  %v1290_v62 = vsel %vm11969_vm10, %v1288_v28, %v1289_v38  ;;  %v1280_v16 = vsel %vm11969_vm10, %v9985_v49, %v1279_v36  ;;  %v1281_v50 = vrot.slane %v1279_v36, 4  ;;  %v200_v37 = vld [vmem:[#allocation2 + $0x48] sm:$0x1] }
  0x60   : > { %v386_v43 = vshrl.u32 %v299_v27, 16  ;;  %2708 = vrot.lane.b32.xlu1 %v10049_v4, %s11832_s5  ;;  %v380_v51 = vrot.slane %v378_v11, 7  ;;  %v389_v53 = vshll.u32 %v299_v27, 16  ;;  %v1472_v58 = vshrl.u32 %v12212_v40, 16  ;;  %v12257_v11 = vld [vmem:[%s11950_s28 + $0x28] sm:$0xf] }
  0x61   : > { %v1475_v61 = vshll.u32 %v12212_v40, 16  ;;  %v10143_v2 = vcombine.low %v2045_v56, %v2055_v41  ;;  %v1283_v6 = vsel %vm11969_vm10, %v1281_v50, %v1282_v30  ;;  %v1485_v7 = vshrl.u32 %v12219_v15, 16 }
  0x62   : > { %v388_v5 = vrot.slane %v386_v43, 7  ;;  %2960 = vrot.lane.b32.xlu0 %v10095_v35, %s11835_s8  ;;  %v10066_v4 = vcombine.low %v1287_v42, %v1290_v62  ;;  %v383_v59 = vor.u32 %v381_v10, %v380_v51  ;;  %v384_v26 = vrot.slane %v380_v51, 4 }
  0x63   : > { %v1474_v13 = vrot.slane %v1472_v58, 4  ;;  %v10065_v18 = vcombine.low %v1280_v16, %v1283_v6  ;;  %v1477_v19 = vrot.slane %v1475_v61, 5  ;;  %v251_v23 = vsel %vm11943_vm6, 0, %v250_v45 }
  0x64   : > { %v391_v25 = vor.u32 %v389_v53, %v388_v5  ;;  %2710 = vrot.lane.b32.xlu1 %v10050_v57, %s11832_s5  ;;  %v393_v44 = vrot.slane %v388_v5, 4  ;;  %252 = vst [vmem:[#allocation2 + $0x38] sm:$0x1] %v251_v23  ;;  %v1481_v54 = vshll.u32 %v12219_v15, 16  ;;  %v1487_v55 = vrot.slane %v1485_v7, 4 }
  0x65   : > { %v1491_v21 = vshll.u32 %v1409_v46, 16  ;;  %v1478_v3 = vor.u32 %v1477_v19, %v1474_v13  ;;  %v10001_v52 = vrot.slane %v1809_v47, 9  ;;  %v1887_v60 = vrot.slane %v12219_v15, 5 }
  0x66   : > { %v392_v48 = vsel %vm11981_vm12, %v384_v26, %v391_v25  ;;  %v670_v33 = vld [vmem:[#allocation2 + $0x30] sm:$0xf]  ;;  %3216 = vrot.lane.b32.xlu0 %v10143_v2, %s11836_s9  ;;  %v1483_v27 = vrot.slane %v1481_v54, 5  ;;  %v1890_v31 = vrot.slane %v1409_v46, 5  ;;  %v198_v34 = vsel %vm11915_vm3, 0, %v197_v12 }
  0x67   : > { %v671_v17 = vsel %vm11975_vm11, %v383_v59, %v670_v33  ;;  %673 = vst.msk [vmem:[#allocation2 + $0x34] sm:$0xf] %vm170_vm0, %v392_v48  ;;  %v1479_v22 = vrot.slane %v1478_v3, 4  ;;  %v1493_v38 = vrot.slane %v1491_v21, 5  ;;  %v1889_v35 = vrot.slane %v1887_v60, 4 }
  0x68   : > { %672 = vst [vmem:[#allocation2 + $0x30] sm:$0xf] %v671_v17  ;;  %199 = vst [vmem:[#allocation2 + $0x3c] sm:$0x1] %v198_v34  ;;  %v395_v56 = vshrl.u32 %v300_v14, 16  ;;  %2790 = vrot.lane.b32.xlu1 %v10066_v4, %s11829_s29  ;;  %v1488_v28 = vor.u32 %v1487_v55, %v1483_v27  ;;  %v398_v49 = vshll.u32 %v300_v14, 16  ;;  %v10081_v30 = vcombine.low %v12212_v40, %v12219_v15 }
  0x69   : > { %v403_v57 = vshrl.u32 %v301_v24, 16  ;;  %v406_v36 = vshll.u32 %v301_v24, 16  ;;  %v12252_v20 = vsel %vm11969_vm10, %v10001_v52, %v1887_v60  ;;  %v254_v42 = vsel %vm11943_vm6, 0, %v253_v9 }
  0x6a   : > { %v397_v41 = vrot.slane %v395_v56, 7  ;;  %2788 = vrot.lane.b32.xlu0 %v10065_v18, %s11829_s29  ;;  %v1489_v10 = vrot.slane %v1488_v28, 4  ;;  %v12262_v45 = vsel %vm11969_vm10, %v1889_v35, %v1890_v31  ;;  %255 = vst [vmem:[#allocation2 + $0x44] sm:$0x1] %v254_v42  ;;  %v201_v40 = vsel %vm11915_vm3, 0, %v200_v37 }
  0x6b   : > { %v405_v62 = vrot.slane %v403_v57, 7  ;;  %v674_v15 = vld [vmem:[#allocation2 + $0x38] sm:$0x1]  ;;  %v1484_v16 = vsel %vm12056_vm15, %v1479_v22, %v1483_v27  ;;  %202 = vst [vmem:[#allocation2 + $0x48] sm:$0x1] %v201_v40  ;;  %v10113_v61 = vcombine.low %v12252_v20, %v12262_v45  ;;  %v412_v6 = vshrl.u32 %v12257_v11, 16 }
  0x6c   : > { %v401_v50 = vrot.slane %v397_v41, 4  ;;  %v675_v43 = vsel %vm11915_vm3, %v393_v44, %v674_v15  ;;  %v1494_v46 = vsel %vm12056_vm15, %v1489_v10, %v1493_v38  ;;  %v400_v51 = vor.u32 %v398_v49, %v397_v41 }
  0x6d   : > { %v408_v53 = vor.u32 %v406_v36, %v405_v62  ;;  %676 = vst [vmem:[#allocation2 + $0x38] sm:$0x1] %v675_v43  ;;  %v410_v47 = vrot.slane %v405_v62, 4  ;;  %v10097_v4 = vcombine.low %v1484_v16, %v1494_v46  ;;  %v415_v17 = vshll.u32 %v12257_v11, 16  ;;  %v203_v11 = vld [vmem:[#allocation2 + $0x54] sm:$0x1] }
  0x6e   : > { %v1382_v58 = vld [vmem:[#allocation2 + $0x34] sm:$0xf]  ;;  %2884 = vrot.lane.b32.xlu0 %v10081_v30, %s11830_s30  ;;  %vm3328_vm1 = vcmask 31744   ;;  %vm3377_vm7 = vcmask 64512   ;;  %vm3410_vm8 = vcmask 97280   ;;  %vm3443_vm9 = vcmask 130048  }
  0x6f   : > { %v12274_v2 = vld [vmem:[#allocation2 + $0x34] sm:$0xf]  ;;  %v1381_v5 = vld [vmem:[#allocation2 + $0x30] sm:$0xf]  ;;  %v1509_v7 = vshrl.u32 %v1382_v58, 16  ;;  %v1505_v12 = vshll.u32 %v1382_v58, 16  ;;  %v409_v26 = vsel %vm11981_vm12, %v401_v50, %v408_v53 }
  0x70   : > { %v1810_v59 = vld [vmem:[#allocation2 + $0x30] sm:$0xe]  ;;  %v1496_v13 = vshrl.u32 %v1381_v5, 16  ;;  %v1499_v14 = vshll.u32 %v1381_v5, 16  ;;  %v10082_v18 = vcombine.low %v1381_v5, %v1382_v58  ;;  %v677_v19 = vld [vmem:[#allocation2 + $0x3c] sm:$0xf] }
  0x71   : > { %v10002_v25 = vrot.slane %v1810_v59, 9  ;;  %680 = vst.msk [vmem:[#allocation2 + $0x40] sm:$0xf] %vm170_vm0, %v409_v26  ;;  %v1507_v23 = vrot.slane %v1505_v12, 5  ;;  %v1511_v24 = vrot.slane %v1509_v7, 4  ;;  %v1894_v44 = vrot.slane %v1382_v58, 5 }
  0x72   : > { %v678_v54 = vsel %vm11975_vm11, %v400_v51, %v677_v19  ;;  %v1988_v55 = vld [vmem:[#allocation2 + $0x30] sm:$0xf]  ;;  %v1498_v21 = vrot.slane %v1496_v13, 4  ;;  %v1501_v9 = vrot.slane %v1499_v14, 5  ;;  %2886 = vrot.lane.b32.xlu1 %v10082_v18, %s11830_s30  ;;  %v681_v3 = vld [vmem:[#allocation2 + $0x44] sm:$0x1]  ;;  %2964 = vrot.lane.b32.xlu0 %v10097_v4, %s11835_s8 }
  0x73   : > { %679 = vst [vmem:[#allocation2 + $0x3c] sm:$0xf] %v678_v54  ;;  %v2081_v48 = vshrl.u32 %v1988_v55, 16  ;;  %v2084_v33 = vshll.u32 %v1988_v55, 16  ;;  %v1512_v52 = vor.u32 %v1511_v24, %v1507_v23  ;;  %v12287_v60 = vsel %vm11969_vm10, %v10002_v25, %v1894_v44  ;;  %v769_v38 = vld [vmem:[#allocation2 + $0x30] sm:$0xf] }
  0x74   : > { %v2094_v37 = vshrl.u32 %v12274_v2, 16  ;;  %v1502_v27 = vor.u32 %v1501_v9, %v1498_v21  ;;  %v1896_v31 = vrot.slane %v1894_v44, 4  ;;  %v1410_v35 = vld [vmem:[#allocation2 + $0x38] sm:$0x1]  ;;  %v10129_v28 = vcombine.low %v1988_v55, %v12274_v2  ;;  %v12316_v59 = vld [vmem:[#allocation2 + $0x34] sm:$0xf] }
  0x75   : > { %v2083_v34 = vrot.slane %v2081_v48, 4  ;;  %v2086_v22 = vrot.slane %v2084_v33, 5  ;;  %v1513_v56 = vrot.slane %v1512_v52, 4  ;;  %v682_v49 = vsel %vm11915_vm3, %v410_v47, %v681_v3  ;;  %v12294_v57 = vld [vmem:[#allocation2 + $0x38] sm:$0x1]  ;;  %v11597_v54 = vld [vmem:[%s16572_s1] sm:$0xff]  }
  0x76   : > { %v2090_v36 = vshll.u32 %v12274_v2, 16  ;;  %v1503_v30 = vrot.slane %v1502_v27, 4  ;;  %v1515_v20 = vshll.u32 %v1410_v35, 16  ;;  %v1897_v41 = vrot.slane %v1410_v35, 5  ;;  %683 = vst [vmem:[#allocation2 + $0x44] sm:$0x1] %v682_v49  ;;  %3044 = vrot.lane.b32.xlu0 %v10113_v61, %s11833_s6  ;;  %10911 = vmatprep.subr.bf16.mxu0 %v11597_v54 }
  0x77   : > { %v2087_v42 = vor.u32 %v2086_v22, %v2083_v34  ;;  %v2096_v62 = vrot.slane %v2094_v37, 4  ;;  %v2100_v40 = vshll.u32 %v12294_v57, 16  ;;  %v909_v15 = vshrl.u32 %v769_v38, 16  ;;  %v12321_v25 = vld [vmem:[#allocation2 + $0x38] sm:$0x1]  ;;  %10912 = vmatpush3.bf16.msra.mxu0 %v11597_v54 }
  0x78   : > { %v12298_v10 = vld [vmem:[#allocation2 + $0x40] sm:$0xf]  ;;  %v2092_v45 = vrot.slane %v2090_v36, 5  ;;  %v1508_v16 = vsel %vm12056_vm15, %v1503_v30, %v1507_v23  ;;  %v1517_v50 = vrot.slane %v1515_v20, 5  ;;  %v1898_v43 = vsel %vm11969_vm10, %v1896_v31, %v1897_v41  ;;  %v2418_v27 = vld [vmem:[#allocation2 + $0x30] sm:$0xe] }
  0x79   : > { %v2118_v46 = vshrl.u32 %v12298_v10, 16  ;;  %v10114_v51 = vcombine.low %v12287_v60, %v1898_v43  ;;  %v2114_v58 = vshll.u32 %v12298_v10, 16  ;;  %v2088_v61 = vrot.slane %v2087_v42, 4  ;;  %v772_v36 = vld [vmem:[#allocation2 + $0x40] sm:$0xf] }
  0x7a   : > { %v12307_v53 = vld [vmem:[#allocation2 + $0x3c] sm:$0xf]  ;;  %v2097_v47 = vor.u32 %v2096_v62, %v2092_v45  ;;  %v1518_v5 = vsel %vm12056_vm15, %v1513_v56, %v1517_v50  ;;  %3140 = vrot.lane.b32.xlu0 %v10129_v28, %s11831_s4  ;;  %v2102_v44 = vrot.slane %v2100_v40, 5  ;;  %v911_v9 = vrot.slane %v909_v15, 4 }
  0x7b   : > { %v2105_v7 = vshrl.u32 %v12307_v53, 16  ;;  %v2108_v12 = vshll.u32 %v12307_v53, 16  ;;  %v10130_v4 = vcombine.low %v12307_v53, %v12298_v10  ;;  %v10098_v26 = vcombine.low %v1508_v16, %v1518_v5  ;;  %v1201_v5 = vld [vmem:[#allocation2 + $0x3c] sm:$0xe] }
  0x7c   : > { %v2116_v13 = vrot.slane %v2114_v58, 5  ;;  %v2120_v14 = vrot.slane %v2118_v46, 4  ;;  %v2093_v18 = vsel %vm12056_vm15, %v2088_v61, %v2092_v45  ;;  %v2098_v24 = vrot.slane %v2097_v47, 4  ;;  %v771_v45 = vld [vmem:[#allocation2 + $0x3c] sm:$0xf] }
  0x7d   : > { %v2107_v19 = vrot.slane %v2105_v7, 4  ;;  %v2110_v23 = vrot.slane %v2108_v12, 5  ;;  %2966 = vrot.lane.b32.xlu1 %v10098_v26, %s11835_s8  ;;  %v12327_v55 = vld [vmem:[#allocation2 + $0x44] sm:$0x1]  ;;  %v912_v48 = vshll.u32 %v769_v38, 16  ;;  %v918_v33 = vshll.u32 %v12316_v59, 16 }
  0x7e   : > { %v2121_v21 = vor.u32 %v2120_v14, %v2116_v13  ;;  %v2124_v52 = vshll.u32 %v12327_v55, 16  ;;  %v2103_v60 = vsel %vm12056_vm15, %v2098_v24, %v2102_v44  ;;  %v922_v37 = vshrl.u32 %v12316_v59, 16  ;;  %v798_v50 = vld [vmem:[#allocation2 + $0x44] sm:$0x1]  ;;  %v2419_v58 = vld [vmem:[#allocation2 + $0x3c] sm:$0xe] }
  0x7f   : > { %v2111_v3 = vor.u32 %v2110_v23, %v2107_v19  ;;  %v10145_v34 = vcombine.low %v2093_v18, %v2103_v60  ;;  %v914_v22 = vrot.slane %v912_v48, 5  ;;  %v920_v35 = vrot.slane %v918_v33, 5 }
  0x80   : > { %v2122_v31 = vrot.slane %v2121_v21, 4  ;;  %v2126_v28 = vrot.slane %v2124_v52, 5  ;;  %v924_v38 = vrot.slane %v922_v37, 4  ;;  %v928_v49 = vshll.u32 %v12321_v25, 16 }
  0x81   : > { %v2112_v56 = vrot.slane %v2111_v3, 4  ;;  %3046 = vrot.lane.b32.xlu1 %v10114_v51, %s11833_s6  ;;  %3220 = vrot.lane.b32.xlu0 %v10145_v34, %s11836_s9  ;;  %v915_v30 = vor.u32 %v914_v22, %v911_v9  ;;  %v10017_v20 = vrot.slane %v2418_v27, 9  ;;  %v2496_v41 = vrot.slane %v12274_v2, 5  ;;  %v1200_v9 = vld [vmem:[#allocation2 + $0x30] sm:$0xe] }
  0x82   : > { %v2499_v42 = vrot.slane %v12294_v57, 5  ;;  %v2127_v40 = vsel %vm12056_vm15, %v2122_v31, %v2126_v28  ;;  %v925_v15 = vor.u32 %v924_v38, %v920_v35  ;;  %v930_v16 = vrot.slane %v928_v49, 5 }
  0x83   : > { %v2117_v62 = vsel %vm12056_vm15, %v2112_v56, %v2116_v13  ;;  %v916_v46 = vrot.slane %v915_v30, 4  ;;  %v2497_v51 = vsel %vm11969_vm10, %v10017_v20, %v2496_v41  ;;  %v2498_v53 = vrot.slane %v2496_v41, 4  ;;  %v303_v20 = vld [vmem:[%s11950_s28 + $0x2c] sm:$0xf] }
  0x84   : > { %v10146_v43 = vcombine.low %v2117_v62, %v2127_v40  ;;  %v926_v2 = vrot.slane %v925_v15, 4  ;;  %v933_v61 = vshrl.u32 %v771_v45, 16  ;;  %v936_v57 = vshll.u32 %v771_v45, 16  ;;  %v684_v40 = vld [vmem:[#allocation2 + $0x48] sm:$0xf] }
  0x85   : > { %v942_v47 = vshll.u32 %v772_v36, 16  ;;  %3142 = vrot.lane.b32.xlu1 %v10130_v4, %s11831_s4  ;;  %v921_v7 = vsel %vm12056_vm15, %v916_v46, %v920_v35  ;;  %v2500_v12 = vsel %vm11969_vm10, %v2498_v53, %v2499_v42  ;;  %v946_v26 = vshrl.u32 %v772_v36, 16  ;;  %v11598_v4 = vld [vmem:[%s16572_s1 + $0x8] sm:$0xff]   ;;  %v1383_v42 = vld [vmem:[#allocation2 + $0x3c] sm:$0xf] }
  0x86   : > { %v952_v13 = vshll.u32 %v798_v50, 16  ;;  %v931_v14 = vsel %vm12056_vm15, %v926_v2, %v930_v16  ;;  %v10161_v18 = vcombine.low %v2497_v51, %v2500_v12  ;;  %v935_v19 = vrot.slane %v933_v61, 4  ;;  %10913 = vmatprep.subr.bf16.mxu0 %v11598_v4  ;;  %v12377_v15 = vld [vmem:[#allocation2 + $0x40] sm:$0xf] }
  0x87   : > { %v938_v23 = vrot.slane %v936_v57, 5  ;;  %v10051_v24 = vcombine.low %v921_v7, %v931_v14  ;;  %v944_v44 = vrot.slane %v942_v47, 5  ;;  %v948_v54 = vrot.slane %v946_v26, 4  ;;  %10914 = vmatpush3.bf16.msra.mxu0 %v11598_v4 }
  0x88   : > { %v954_v21 = vrot.slane %v952_v13, 5  ;;  %3300 = vrot.lane.b32.xlu0 %v10161_v18, %s11834_s7  ;;  %v10018_v33 = vrot.slane %v2419_v58, 9  ;;  %v2503_v3 = vrot.slane %v12298_v10, 5  ;;  %v2506_v52 = vrot.slane %v12327_v55, 5  ;;  %v256_v58 = vld [vmem:[#allocation2 + $0x50] sm:$0x1] }
  0x89   : > { %v939_v48 = vor.u32 %v938_v23, %v935_v19  ;;  %3222 = vrot.lane.b32.xlu1 %v10146_v43, %s11836_s9  ;;  %v949_v60 = vor.u32 %v948_v54, %v944_v44  ;;  %v9988_v37 = vrot.slane %v1201_v5, 9  ;;  %v1300_v27 = vrot.slane %v772_v36, 5  ;;  %v1411_v5 = vld [vmem:[#allocation2 + $0x44] sm:$0x1]  ;;  %v1811_v13 = vld [vmem:[#allocation2 + $0x3c] sm:$0xe] }
  0x8a   : > { %v1303_v31 = vrot.slane %v798_v50, 5  ;;  %v2504_v22 = vsel %vm11969_vm10, %v10018_v33, %v2503_v3  ;;  %v2505_v35 = vrot.slane %v2503_v3, 4  ;;  %v9987_v56 = vrot.slane %v1200_v9, 9  ;;  %v305_v3 = vld [vmem:[%s11950_s28 + $0x34] sm:$0xf] }
  0x8b   : > { %v940_v34 = vrot.slane %v939_v48, 4  ;;  %v950_v28 = vrot.slane %v949_v60, 4  ;;  %v1301_v10 = vsel %vm11969_vm10, %v9988_v37, %v1300_v27  ;;  %v1302_v55 = vrot.slane %v1300_v27, 4 }
  0x8c   : > { %v1293_v38 = vrot.slane %v12316_v59, 5  ;;  %v2507_v36 = vsel %vm11969_vm10, %v2505_v35, %v2506_v52  ;;  %v1296_v30 = vrot.slane %v12321_v25, 5  ;;  %v414_v41 = vrot.slane %v412_v6, 7 }
  0x8d   : > { %v945_v49 = vsel %vm12056_vm15, %v940_v34, %v944_v44  ;;  %2712 = vrot.lane.b32.xlu1 %v10051_v24, %s11832_s5  ;;  %v955_v45 = vsel %vm12056_vm15, %v950_v28, %v954_v21  ;;  %v10162_v62 = vcombine.low %v2504_v22, %v2507_v36  ;;  %v1304_v59 = vsel %vm11969_vm10, %v1302_v55, %v1303_v31  ;;  %v304_v24 = vld [vmem:[%s11950_s28 + $0x30] sm:$0xf]  ;;  %v259_v31 = vld [vmem:[#allocation2 + $0x5c] sm:$0x1] }
  0x8e   : > { %v10052_v16 = vcombine.low %v945_v49, %v955_v45  ;;  %v1294_v25 = vsel %vm11969_vm10, %v9987_v56, %v1293_v38  ;;  %v1295_v50 = vrot.slane %v1293_v38, 4  ;;  %v417_v6 = vor.u32 %v415_v17, %v414_v41 }
  0x8f   : > { %3302 = vrot.lane.b32.xlu0 %v10162_v62, %s11834_s7  ;;  %v10068_v43 = vcombine.low %v1301_v10, %v1304_v59  ;;  %v420_v46 = vshrl.u32 %v303_v20, 16  ;;  %v423_v51 = vshll.u32 %v303_v20, 16  ;;  %v1520_v53 = vshrl.u32 %v1383_v42, 16 }
  0x90   : > { %v1297_v2 = vsel %vm11969_vm10, %v1295_v50, %v1296_v30  ;;  %v685_v61 = vsel %vm11975_vm11, %v417_v6, %v684_v40  ;;  %v1523_v57 = vshll.u32 %v1383_v42, 16  ;;  %v1533_v47 = vshrl.u32 %v12377_v15, 16 }
  0x91   : > { %2714 = vrot.lane.b32.xlu1 %v10052_v16, %s11832_s5  ;;  %v10067_v17 = vcombine.low %v1294_v25, %v1297_v2  ;;  %v418_v7 = vrot.slane %v414_v41, 4  ;;  %v422_v12 = vrot.slane %v420_v46, 7  ;;  %686 = vst [vmem:[#allocation2 + $0x48] sm:$0xf] %v685_v61  ;;  %v1522_v26 = vrot.slane %v1520_v53, 4 }
  0x92   : > { %v1525_v14 = vrot.slane %v1523_v57, 5  ;;  %v257_v18 = vsel %vm11943_vm6, 0, %v256_v58  ;;  %v1529_v19 = vshll.u32 %v12377_v15, 16  ;;  %v1535_v23 = vrot.slane %v1533_v47, 4 }
  0x93   : > { %2792 = vrot.lane.b32.xlu0 %v10067_v17, %s11829_s29  ;;  %v425_v44 = vor.u32 %v423_v51, %v422_v12  ;;  %v10083_v54 = vcombine.low %v1383_v42, %v12377_v15  ;;  %258 = vst [vmem:[#allocation2 + $0x50] sm:$0x1] %v257_v18  ;;  %v1539_v21 = vshll.u32 %v1411_v5, 16  ;;  %v10003_v48 = vrot.slane %v1811_v13, 9 }
  0x94   : > { %v1526_v9 = vor.u32 %v1525_v14, %v1522_v26  ;;  %v1531_v4 = vrot.slane %v1529_v19, 5  ;;  %v1901_v33 = vrot.slane %v12377_v15, 5  ;;  %v1904_v60 = vrot.slane %v1411_v5, 5 }
  0x95   : > { %2794 = vrot.lane.b32.xlu1 %v10068_v43, %s11829_s29  ;;  %v426_v52 = vsel %vm11981_vm12, %v418_v7, %v425_v44  ;;  %v204_v37 = vsel %vm11915_vm3, 0, %v203_v11  ;;  %v429_v27 = vshrl.u32 %v304_v24, 16  ;;  %v1541_v35 = vrot.slane %v1539_v21, 5 }
  0x96   : > { %687 = vst.msk [vmem:[#allocation2 + $0x4c] sm:$0xf] %vm170_vm0, %v426_v52  ;;  %v1527_v34 = vrot.slane %v1526_v9, 4  ;;  %v1536_v22 = vor.u32 %v1535_v23, %v1531_v4  ;;  %v1903_v56 = vrot.slane %v1901_v33, 4  ;;  %205 = vst [vmem:[#allocation2 + $0x54] sm:$0x1] %v204_v37  ;;  %v1902_v59 = vsel %vm11969_vm10, %v10003_v48, %v1901_v33 }
  0x97   : > { %v427_v28 = vrot.slane %v422_v12, 4  ;;  %2888 = vrot.lane.b32.xlu0 %v10083_v54, %s11830_s30  ;;  %v431_v10 = vrot.slane %v429_v27, 7  ;;  %v432_v55 = vshll.u32 %v304_v24, 16  ;;  %v437_v38 = vshrl.u32 %v305_v3, 16  ;;  %v12436_v52 = vld [vmem:[#allocation2] sm:$0xf] }
  0x98   : > { %v1385_v49 = vld [vmem:[#allocation2 + $0x48] sm:$0xf]  ;;  %v1532_v36 = vsel %vm12056_vm15, %v1527_v34, %v1531_v4  ;;  %v1537_v30 = vrot.slane %v1536_v22, 4  ;;  %v440_v20 = vshll.u32 %v305_v3, 16  ;;  %v260_v41 = vsel %vm11943_vm6, 0, %v259_v31 }
  0x99   : > { %v1544_v42 = vshrl.u32 %v1385_v49, 16  ;;  %v1547_v45 = vshll.u32 %v1385_v49, 16  ;;  %v1812_v62 = vld [vmem:[#allocation2 + $0x48] sm:$0xe]  ;;  %v1905_v40 = vsel %vm11969_vm10, %v1903_v56, %v1904_v60  ;;  %261 = vst [vmem:[#allocation2 + $0x5c] sm:$0x1] %v260_v41  ;;  %v434_v50 = vor.u32 %v432_v55, %v431_v10 }
  0x9a   : > { %v12413_v15 = vld [vmem:[#allocation2 + $0x48] sm:$0xf]  ;;  %v688_v16 = vld [vmem:[#allocation2 + $0x50] sm:$0x1]  ;;  %v1542_v25 = vsel %vm12056_vm15, %v1537_v30, %v1541_v35  ;;  %v435_v6 = vrot.slane %v431_v10, 4  ;;  %v439_v43 = vrot.slane %v437_v38, 7  ;;  %v10115_v11 = vcombine.low %v1902_v59, %v1905_v40 }
  0x9b   : > { %v1546_v46 = vrot.slane %v1544_v42, 4  ;;  %v1549_v51 = vrot.slane %v1547_v45, 5  ;;  %v689_v53 = vsel %vm11915_vm3, %v427_v28, %v688_v16  ;;  %v10099_v58 = vcombine.low %v1532_v36, %v1542_v25  ;;  %v773_v21 = vld [vmem:[#allocation2 + $0x48] sm:$0xf]  ;;  %v12434_v3 = vld [vmem:[#allocation2 + $0x4] sm:$0xf] }
  0x9c   : > { %690 = vst [vmem:[#allocation2 + $0x50] sm:$0x1] %v689_v53  ;;  %v10004_v2 = vrot.slane %v1812_v62, 9  ;;  %v442_v61 = vor.u32 %v440_v20, %v439_v43  ;;  %v2129_v57 = vshrl.u32 %v12413_v15, 16  ;;  %v444_v17 = vrot.slane %v439_v43, 4 }
  0x9d   : > { %v1386_v47 = vld [vmem:[#allocation2 + $0x4c] sm:$0xf]  ;;  %v1550_v5 = vor.u32 %v1549_v51, %v1546_v46  ;;  %2968 = vrot.lane.b32.xlu0 %v10099_v58, %s11835_s8  ;;  %v691_v7 = vld [vmem:[#allocation2 + $0x54] sm:$0xf]  ;;  %v2132_v12 = vshll.u32 %v12413_v15, 16  ;;  %v10031_v60 = vcombine.low %v12436_v52, %v12434_v3  ;;  %v957_v10 = vshrl.u32 %v773_v21, 16 }
  0x9e   : > { %v1557_v26 = vshrl.u32 %v1386_v47, 16  ;;  %v10084_v13 = vcombine.low %v1385_v49, %v1386_v47  ;;  %v1553_v14 = vshll.u32 %v1386_v47, 16  ;;  %v1908_v18 = vrot.slane %v1386_v47, 5  ;;  %v12422_v19 = vld [vmem:[#allocation2 + $0x4c] sm:$0xf] }
  0x9f   : > { %v1551_v23 = vrot.slane %v1550_v5, 4  ;;  %v443_v24 = vsel %vm11981_vm12, %v435_v6, %v442_v61  ;;  %v692_v44 = vsel %vm11975_vm11, %v434_v50, %v691_v7  ;;  %v2131_v54 = vrot.slane %v2129_v57, 4  ;;  %v12447_v28 = vld [vmem:[#allocation2 + $0x4c] sm:$0xf] }
  0xa0   : > { %2890 = vrot.lane.b32.xlu1 %v10084_v13, %s11830_s30  ;;  %v1555_v9 = vrot.slane %v1553_v14, 5  ;;  %v1559_v4 = vrot.slane %v1557_v26, 4  ;;  %v12431_v48 = vsel %vm11969_vm10, %v10004_v2, %v1908_v18  ;;  %693 = vst [vmem:[#allocation2 + $0x54] sm:$0xf] %v692_v44  ;;  %694 = vst.msk [vmem:[#allocation2 + $0x58] sm:$0xf] %vm170_vm0, %v443_v24  ;;  %v10131_v31 = vcombine.low %v12413_v15, %v12422_v19 }
  0xa1   : > { %v695_v33 = vld [vmem:[#allocation2 + $0x5c] sm:$0x1]  ;;  %3048 = vrot.lane.b32.xlu0 %v10115_v11, %s11833_s6  ;;  %v2134_v37 = vrot.slane %v2132_v12, 5  ;;  %v2142_v27 = vshrl.u32 %v12422_v19, 16  ;;  %v1910_v35 = vrot.slane %v1908_v18, 4  ;;  %v2138_v56 = vshll.u32 %v12422_v19, 16 }
  0xa2   : > { %v696_v34 = vsel %vm11915_vm3, %v444_v17, %v695_v33  ;;  %v1560_v22 = vor.u32 %v1559_v4, %v1555_v9  ;;  %v1556_v38 = vsel %vm12056_vm15, %v1551_v23, %v1555_v9  ;;  %v960_v20 = vshll.u32 %v773_v21, 16  ;;  %v2420_v14 = vld [vmem:[#allocation2 + $0x48] sm:$0xe] }
  0xa3   : > { %697 = vst [vmem:[#allocation2 + $0x5c] sm:$0x1] %v696_v34  ;;  %v1412_v55 = vld [vmem:[#allocation2 + $0x50] sm:$0x1]  ;;  %v2135_v36 = vor.u32 %v2134_v37, %v2131_v54  ;;  %v2144_v30 = vrot.slane %v2142_v27, 4  ;;  %v2140_v62 = vrot.slane %v2138_v56, 5 }
  0xa4   : > { %v12451_v49 = vld [vmem:[#allocation2 + $0x50] sm:$0x1]  ;;  %v1561_v41 = vrot.slane %v1560_v22, 4  ;;  %v1563_v42 = vshll.u32 %v1412_v55, 16  ;;  %v1911_v45 = vrot.slane %v1412_v55, 5  ;;  %v959_v15 = vrot.slane %v957_v10, 4  ;;  %v12480_v55 = vpop.permute.xlu1 %2784 }
  0xa5   : > { %3144 = vrot.lane.b32.xlu0 %v10131_v31, %s11831_s4  ;;  %v2136_v59 = vrot.slane %v2135_v36, 4  ;;  %v2148_v40 = vshll.u32 %v12451_v49, 16  ;;  %v962_v16 = vrot.slane %v960_v20, 5  ;;  %v2145_v6 = vor.u32 %v2144_v30, %v2140_v62  ;;  %v12471_v54 = vld [vmem:[#allocation2 + $0x50] sm:$0x1] }
  0xa6   : > { %v1565_v25 = vrot.slane %v1563_v42, 5  ;;  %v1912_v50 = vsel %vm11969_vm10, %v1910_v35, %v1911_v45  ;;  %v966_v43 = vshll.u32 %v12447_v28, 16  ;;  %v970_v31 = vshrl.u32 %v12447_v28, 16 }
  0xa7   : > { %v10116_v46 = vcombine.low %v12431_v48, %v1912_v50  ;;  %v1994_v51 = vld [vmem:[#allocation2 + $0x54] sm:$0xf]  ;;  %v12459_v53 = vld [vmem:[#allocation2 + $0x58] sm:$0xf]  ;;  %v2141_v58 = vsel %vm12056_vm15, %v2136_v59, %v2140_v62  ;;  %v2150_v2 = vrot.slane %v2148_v40, 5  ;;  %v963_v61 = vor.u32 %v962_v16, %v959_v15  ;;  %v12486_v40 = vpop.permute.xlu0 %2880 }
  0xa8   : > { %v1566_v57 = vsel %vm12056_vm15, %v1561_v41, %v1565_v25  ;;  %v2153_v47 = vshrl.u32 %v1994_v51, 16  ;;  %v2156_v5 = vshll.u32 %v1994_v51, 16  ;;  %v2166_v11 = vshrl.u32 %v12459_v53, 16  ;;  %v775_v34 = vld [vmem:[#allocation2 + $0x54] sm:$0xf] }
  0xa9   : > { %v10100_v17 = vcombine.low %v1556_v38, %v1566_v57  ;;  %v10132_v7 = vcombine.low %v1994_v51, %v12459_v53  ;;  %v2162_v26 = vshll.u32 %v12459_v53, 16  ;;  %v2146_v13 = vrot.slane %v2145_v6, 4  ;;  %v776_v41 = vld [vmem:[#allocation2 + $0x58] sm:$0xf]  ;;  %v2421_v51 = vld [vmem:[#allocation2 + $0x54] sm:$0xe] }
  0xaa   : > { %v12467_v12 = vld [vmem:[#allocation2 + $0x5c] sm:$0x1]  ;;  %v2155_v18 = vrot.slane %v2153_v47, 4  ;;  %v2158_v23 = vrot.slane %v2156_v5, 5  ;;  %v2168_v24 = vrot.slane %v2166_v11, 4  ;;  %v964_v4 = vrot.slane %v963_v61, 4 }
  0xab   : > { %v2172_v44 = vshll.u32 %v12467_v12, 16  ;;  %2970 = vrot.lane.b32.xlu1 %v10100_v17, %s11835_s8  ;;  %v2164_v21 = vrot.slane %v2162_v26, 5  ;;  %v2151_v9 = vsel %vm12056_vm15, %v2146_v13, %v2150_v2  ;;  %v968_v48 = vrot.slane %v966_v43, 5  ;;  %v1203_v26 = vld [vmem:[#allocation2 + $0x54] sm:$0xe]  ;;  %v12497_v13 = vpop.permute.xlu1 %2882 }
  0xac   : > { %v2159_v33 = vor.u32 %v2158_v23, %v2155_v18  ;;  %v10147_v27 = vcombine.low %v2141_v58, %v2151_v9  ;;  %v976_v56 = vshll.u32 %v12471_v54, 16  ;;  %v10019_v10 = vrot.slane %v2420_v14, 9 }
  0xad   : > { %v2174_v37 = vrot.slane %v2172_v44, 5  ;;  %v2169_v22 = vor.u32 %v2168_v24, %v2164_v21  ;;  %v969_v35 = vsel %vm12056_vm15, %v964_v4, %v968_v48  ;;  %v972_v36 = vrot.slane %v970_v31, 4  ;;  %v1202_v44 = vld [vmem:[#allocation2 + $0x48] sm:$0xe] }
  0xae   : > { %v2160_v38 = vrot.slane %v2159_v33, 4  ;;  %3224 = vrot.lane.b32.xlu0 %v10147_v27, %s11836_s9  ;;  %v2510_v30 = vrot.slane %v12422_v19, 5  ;;  %v2513_v20 = vrot.slane %v12451_v49, 5  ;;  %v978_v45 = vrot.slane %v976_v56, 5  ;;  %v800_v19 = vld [vmem:[#allocation2 + $0x5c] sm:$0x1] }
  0xaf   : > { %3050 = vrot.lane.b32.xlu1 %v10116_v46, %s11833_s6  ;;  %v2170_v42 = vrot.slane %v2169_v22, 4  ;;  %v981_v62 = vshrl.u32 %v775_v34, 16  ;;  %v984_v59 = vshll.u32 %v775_v34, 16  ;;  %v973_v16 = vor.u32 %v972_v36, %v968_v48  ;;  %v12504_v48 = vpop.permute.xlu0 %3136  ;;  %v206_v34 = vld [vmem:[#allocation2 + $0x60] sm:$0x1] }
  0xb0   : > { %v2165_v15 = vsel %vm12056_vm15, %v2160_v38, %v2164_v21  ;;  %v2511_v25 = vsel %vm11969_vm10, %v10019_v10, %v2510_v30  ;;  %v2512_v50 = vrot.slane %v2510_v30, 4  ;;  %v990_v46 = vshll.u32 %v776_v41, 16  ;;  %v306_v10 = vld [vmem:[%s11950_s28 + $0x38] sm:$0xf] }
  0xb1   : > { %v2175_v49 = vsel %vm12056_vm15, %v2170_v42, %v2174_v37  ;;  %v983_v6 = vrot.slane %v981_v62, 4  ;;  %v986_v43 = vrot.slane %v984_v59, 5  ;;  %v974_v2 = vrot.slane %v973_v16, 4  ;;  %v12523_v59 = vpop.permute.xlu1 %3138 }
  0xb2   : > { %v10148_v58 = vcombine.low %v2165_v15, %v2175_v49  ;;  %v2514_v61 = vsel %vm11969_vm10, %v2512_v50, %v2513_v20  ;;  %v994_v57 = vshrl.u32 %v776_v41, 16  ;;  %v992_v11 = vrot.slane %v990_v46, 5  ;;  %v307_v20 = vld [vmem:[%s11950_s28 + $0x3c] sm:$0xf] }
  0xb3   : > { %3146 = vrot.lane.b32.xlu1 %v10132_v7, %s11831_s4  ;;  %v10163_v47 = vcombine.low %v2511_v25, %v2514_v61  ;;  %v987_v5 = vor.u32 %v986_v43, %v983_v6  ;;  %v1000_v17 = vshll.u32 %v800_v19, 16  ;;  %v979_v14 = vsel %vm12056_vm15, %v974_v2, %v978_v45  ;;  %v1387_v25 = vld [vmem:[#allocation2 + $0x54] sm:$0xf]  ;;  %v12533_v43 = vld [vmem:[#allocation2 + $0x58] sm:$0xf]  ;;  %v12535_v46 = vpop.permute.xlu0 %2704 }
  0xb4   : > { %v996_v18 = vrot.slane %v994_v57, 4  ;;  %v10020_v23 = vrot.slane %v2421_v51, 9  ;;  %v2517_v24 = vrot.slane %v12459_v53, 5  ;;  %v10053_v21 = vcombine.low %v969_v35, %v979_v14  ;;  %v262_v61 = vld [vmem:[#allocation2 + $0x68] sm:$0x1] }
  0xb5   : > { %3304 = vrot.lane.b32.xlu0 %v10163_v47, %s11834_s7  ;;  %v988_v7 = vrot.slane %v987_v5, 4  ;;  %v1002_v9 = vrot.slane %v1000_v17, 5  ;;  %v2520_v4 = vrot.slane %v12467_v12, 5  ;;  %v9990_v31 = vrot.slane %v1203_v26, 9  ;;  %v12539_v57 = vld [vmem:[#allocation2 + $0x10] sm:$0xf] }
  0xb6   : > { %v997_v33 = vor.u32 %v996_v18, %v992_v11  ;;  %v2518_v37 = vsel %vm11969_vm10, %v10020_v23, %v2517_v24  ;;  %v2519_v27 = vrot.slane %v2517_v24, 4  ;;  %v1314_v22 = vrot.slane %v776_v41, 5  ;;  %v12541_v47 = vld [vmem:[#allocation2 + $0xc] sm:$0xf]  ;;  %v12547_v18 = vld [vmem:[#allocation2 + $0x5c] sm:$0x1] }
  0xb7   : > { %3226 = vrot.lane.b32.xlu1 %v10148_v58, %s11836_s9  ;;  %v993_v53 = vsel %vm12056_vm15, %v988_v7, %v992_v11  ;;  %v1317_v35 = vrot.slane %v800_v19, 5  ;;  %v9989_v56 = vrot.slane %v1202_v44, 9  ;;  %v1307_v36 = vrot.slane %v12447_v28, 5 }
  0xb8   : > { %v998_v12 = vrot.slane %v997_v33, 4  ;;  %v2521_v38 = vsel %vm11969_vm10, %v2519_v27, %v2520_v4  ;;  %v1310_v30 = vrot.slane %v12471_v54, 5  ;;  %v12519_v45 = vsel %vm11969_vm10, %v9990_v31, %v1314_v22  ;;  %v209_v27 = vld [vmem:[#allocation2 + $0x6c] sm:$0x1]  ;;  %v12555_v31 = vpop.permute.xlu1 %2786 }
  0xb9   : > { %v10164_v42 = vcombine.low %v2518_v37, %v2521_v38  ;;  %v1316_v62 = vrot.slane %v1314_v22, 4  ;;  %v207_v41 = vsel %vm11915_vm3, 0, %v206_v34  ;;  %v1308_v28 = vsel %vm11969_vm10, %v9989_v56, %v1307_v36  ;;  %v1813_v37 = vld [vmem:[#allocation2 + $0x54] sm:$0xe]  ;;  %v308_v56 = vld [vmem:[%s11950_s28 + $0x40] sm:$0xf] }
  0xba   : > { %v1003_v15 = vsel %vm12056_vm15, %v998_v12, %v1002_v9  ;;  %v1309_v16 = vrot.slane %v1307_v36, 4  ;;  %208 = vst [vmem:[#allocation2 + $0x60] sm:$0x1] %v207_v41  ;;  %v446_v54 = vshrl.u32 %v306_v10, 16  ;;  %v449_v49 = vshll.u32 %v306_v10, 16 }
  0xbb   : > { %2716 = vrot.lane.b32.xlu1 %v10053_v21, %s11832_s5  ;;  %v10054_v50 = vcombine.low %v993_v53, %v1003_v15  ;;  %3306 = vrot.lane.b32.xlu0 %v10164_v42, %s11834_s7  ;;  %v1318_v19 = vsel %vm11969_vm10, %v1316_v62, %v1317_v35  ;;  %v454_v6 = vshrl.u32 %v307_v20, 16  ;;  %v457_v2 = vshll.u32 %v307_v20, 16  ;;  %v12566_v20 = vpop.permute.xlu0 %3040  ;;  %v12568_v42 = vld [vmem:[#allocation2 + $0x18] sm:$0xf] }
  0xbc   : > { %v1311_v51 = vsel %vm11969_vm10, %v1309_v16, %v1310_v30  ;;  %v448_v58 = vrot.slane %v446_v54, 7  ;;  %v1568_v26 = vshrl.u32 %v1387_v25, 16  ;;  %v1571_v14 = vshll.u32 %v1387_v25, 16  ;;  %v309_v30 = vld [vmem:[%s11950_s28 + $0x44] sm:$0xf] }
  0xbd   : > { %v10069_v11 = vcombine.low %v1308_v28, %v1311_v51  ;;  %v12545_v17 = vrot.slane %v454_v6, 7  ;;  %v10070_v23 = vcombine.low %v12519_v45, %v1318_v19  ;;  %v1581_v21 = vshrl.u32 %v12533_v43, 16  ;;  %v12570_v45 = vld [vmem:[#allocation2 + $0x1c] sm:$0xf]  ;;  %v265_v54 = vld [vmem:[#allocation2 + $0x74] sm:$0x1] }
  0xbe   : > { %v451_v24 = vor.u32 %v449_v49, %v448_v58  ;;  %v452_v44 = vrot.slane %v448_v58, 4  ;;  %v1570_v9 = vrot.slane %v1568_v26, 4  ;;  %v1573_v4 = vrot.slane %v1571_v14, 5  ;;  %v12585_v14 = vpop.permute.xlu1 %3042 }
  0xbf   : > { %2718 = vrot.lane.b32.xlu1 %v10054_v50, %s11832_s5  ;;  %2796 = vrot.lane.b32.xlu0 %v10069_v11, %s11829_s29  ;;  %v459_v7 = vor.u32 %v457_v2, %v12545_v17  ;;  %v10085_v33 = vcombine.low %v1387_v25, %v12533_v43  ;;  %v263_v34 = vsel %vm11943_vm6, 0, %v262_v61  ;;  %v1577_v53 = vshll.u32 %v12533_v43, 16  ;;  %v212_v2 = vld [vmem:[#allocation2 + $0x78] sm:$0x1] }
  0xc0   : > { %v1583_v22 = vrot.slane %v1581_v21, 4  ;;  %v1587_v35 = vshll.u32 %v12547_v18, 16  ;;  %264 = vst [vmem:[#allocation2 + $0x68] sm:$0x1] %v263_v34  ;;  %v1574_v38 = vor.u32 %v1573_v4, %v1570_v9  ;;  %v1915_v36 = vrot.slane %v12533_v43, 5 }
  0xc1   : > { %v460_v10 = vsel %vm11981_vm12, %v452_v44, %v459_v7  ;;  %v698_v12 = vld [vmem:[#allocation2 + $0x60] sm:$0xf]  ;;  %v1579_v15 = vrot.slane %v1577_v53, 5  ;;  %v10005_v16 = vrot.slane %v1813_v37, 9  ;;  %v1918_v19 = vrot.slane %v12547_v18, 5  ;;  %v12602_v37 = vpop.permute.xlu0 %3296 }
  0xc2   : > { %v699_v41 = vsel %vm11975_vm11, %v451_v24, %v698_v12  ;;  %701 = vst.msk [vmem:[#allocation2 + $0x64] sm:$0xf] %vm170_vm0, %v460_v10  ;;  %v1589_v28 = vrot.slane %v1587_v35, 5  ;;  %v1575_v25 = vrot.slane %v1574_v38, 4  ;;  %v1917_v50 = vrot.slane %v1915_v36, 4 }
  0xc3   : > { %2798 = vrot.lane.b32.xlu1 %v10070_v23, %s11829_s29  ;;  %700 = vst [vmem:[#allocation2 + $0x60] sm:$0xf] %v699_v41  ;;  %2892 = vrot.lane.b32.xlu0 %v10085_v33, %s11830_s30  ;;  %v210_v49 = vsel %vm11915_vm3, 0, %v209_v27  ;;  %v1584_v6 = vor.u32 %v1583_v22, %v1579_v15  ;;  %v463_v43 = vshrl.u32 %v308_v56, 16  ;;  %v466_v51 = vshll.u32 %v308_v56, 16 }
  0xc4   : > { %211 = vst [vmem:[#allocation2 + $0x6c] sm:$0x1] %v210_v49  ;;  %v471_v58 = vshrl.u32 %v309_v30, 16  ;;  %v461_v61 = vrot.slane %v12545_v17, 4  ;;  %v474_v11 = vshll.u32 %v309_v30, 16  ;;  %v266_v26 = vsel %vm11943_vm6, 0, %v265_v54 }
  0xc5   : > { %v12587_v23 = vld [vmem:[#allocation2 + $0x24] sm:$0xf]  ;;  %v12589_v18 = vld [vmem:[#allocation2 + $0x28] sm:$0xf]  ;;  %v1580_v44 = vsel %vm12056_vm15, %v1575_v25, %v1579_v15  ;;  %v1585_v21 = vrot.slane %v1584_v6, 4  ;;  %v465_v7 = vrot.slane %v463_v43, 7  ;;  %v1916_v4 = vsel %vm11969_vm10, %v10005_v16, %v1915_v36 }
  0xc6   : > { %v473_v9 = vrot.slane %v471_v58, 7  ;;  %267 = vst [vmem:[#allocation2 + $0x74] sm:$0x1] %v266_v26  ;;  %v12596_v17 = vld [vmem:[%s11950_s28 + $0x48] sm:$0xf]  ;;  %v1919_v33 = vsel %vm11969_vm10, %v1917_v50, %v1918_v19  ;;  %v213_v27 = vsel %vm11915_vm3, 0, %v212_v2  ;;  %v12617_v58 = vpop.permute.xlu1 %2962 }
  0xc7   : > { %v702_v34 = vld [vmem:[#allocation2 + $0x68] sm:$0x1]  ;;  %v1590_v53 = vsel %vm12056_vm15, %v1585_v21, %v1589_v28  ;;  %v468_v22 = vor.u32 %v466_v51, %v465_v7  ;;  %v469_v35 = vrot.slane %v465_v7, 4  ;;  %214 = vst [vmem:[#allocation2 + $0x78] sm:$0x1] %v213_v27  ;;  %v10117_v28 = vcombine.low %v1916_v4, %v1919_v33 }
  0xc8   : > { %v476_v56 = vor.u32 %v474_v11, %v473_v9  ;;  %v703_v12 = vsel %vm11915_vm3, %v461_v61, %v702_v34  ;;  %v10101_v38 = vcombine.low %v1580_v44, %v1590_v53  ;;  %v478_v36 = vrot.slane %v473_v9, 4 }
  0xc9   : > { %v1390_v10 = vld [vmem:[#allocation2 + $0x64] sm:$0xf]  ;;  %704 = vst [vmem:[#allocation2 + $0x68] sm:$0x1] %v703_v12  ;;  %vm3476_vm13 = vcmask 162816   ;;  %vm3661_vm14 = vcmask 1041408  }
  0xca   : > { %v12610_v30 = vld [vmem:[#allocation2 + $0x64] sm:$0xf]  ;;  %v1389_v15 = vld [vmem:[#allocation2 + $0x60] sm:$0xf]  ;;  %v1605_v16 = vshrl.u32 %v1390_v10, 16  ;;  %v1601_v54 = vshll.u32 %v1390_v10, 16  ;;  %v477_v50 = vsel %vm11981_vm12, %v469_v35, %v476_v56  ;;  %2972 = vrot.lane.b32.xlu0 %v10101_v38, %s11835_s8 }
  0xcb   : > { %v1814_v25 = vld [vmem:[#allocation2 + $0x60] sm:$0xe]  ;;  %v1592_v19 = vshrl.u32 %v1389_v15, 16  ;;  %v1595_v49 = vshll.u32 %v1389_v15, 16  ;;  %v10086_v6 = vcombine.low %v1389_v15, %v1390_v10  ;;  %v705_v51 = vld [vmem:[#allocation2 + $0x6c] sm:$0xf] }
  0xcc   : > { %v10006_v43 = vrot.slane %v1814_v25, 9  ;;  %708 = vst.msk [vmem:[#allocation2 + $0x70] sm:$0xf] %vm170_vm0, %v477_v50  ;;  %v1603_v2 = vrot.slane %v1601_v54, 5  ;;  %v1607_v61 = vrot.slane %v1605_v16, 4  ;;  %v1922_v11 = vrot.slane %v1390_v10, 5  ;;  %v12622_v27 = vpop.permute.xlu0 %3298 }
  0xcd   : > { %v706_v26 = vsel %vm11975_vm11, %v468_v22, %v705_v51  ;;  %v1996_v44 = vld [vmem:[#allocation2 + $0x60] sm:$0xf]  ;;  %v1594_v21 = vrot.slane %v1592_v19, 4  ;;  %v1597_v7 = vrot.slane %v1595_v49, 5  ;;  %2894 = vrot.lane.b32.xlu1 %v10086_v6, %s11830_s30  ;;  %v709_v33 = vld [vmem:[#allocation2 + $0x74] sm:$0x1]  ;;  %v12630_v22 = vsel %vm3328_vm1, %v10031_v60, %v12535_v46 }
  0xce   : > { %707 = vst [vmem:[#allocation2 + $0x6c] sm:$0xf] %v706_v26  ;;  %v2177_v9 = vshrl.u32 %v1996_v44, 16  ;;  %v2180_v4 = vshll.u32 %v1996_v44, 16  ;;  %v1608_v34 = vor.u32 %v1607_v61, %v1603_v2  ;;  %v1924_v53 = vrot.slane %v1922_v11, 4  ;;  %3052 = vrot.lane.b32.xlu0 %v10117_v28, %s11833_s6  ;;  %v12646_v49 = vpop.permute.xlu1 %3218 }
  0xcf   : > { %v2190_v35 = vshrl.u32 %v12610_v30, 16  ;;  %v12632_v56 = vld [vmem:[#allocation2 + $0x60] sm:$0xf]  ;;  %v1598_v10 = vor.u32 %v1597_v7, %v1594_v21  ;;  %v10133_v15 = vcombine.low %v1996_v44, %v12610_v30  ;;  %v710_v54 = vsel %vm11915_vm3, %v478_v36, %v709_v33 }
  0xd0   : > { %v2179_v12 = vrot.slane %v2177_v9, 4  ;;  %v2182_v38 = vrot.slane %v2180_v4, 5  ;;  %v1609_v16 = vrot.slane %v1608_v34, 4  ;;  %v2186_v25 = vshll.u32 %v12610_v30, 16  ;;  %v1414_v3 = vld [vmem:[#allocation2 + $0x68] sm:$0x1]  ;;  %v12648_v6 = vpop.permute.xlu0 %2706 }
  0xd1   : > { %v2192_v50 = vrot.slane %v2190_v35, 4  ;;  %v1599_v52 = vrot.slane %v1598_v10, 4  ;;  %v12641_v60 = vsel %vm11969_vm10, %v10006_v43, %v1922_v11  ;;  %711 = vst [vmem:[#allocation2 + $0x74] sm:$0x1] %v710_v54  ;;  %v12643_v46 = vld [vmem:[#allocation2 + $0x68] sm:$0x1] }
  0xd2   : > { %v2183_v28 = vor.u32 %v2182_v38, %v2179_v12  ;;  %v1005_v19 = vshrl.u32 %v12632_v56, 16  ;;  %v1611_v36 = vshll.u32 %v1414_v3, 16  ;;  %v1925_v51 = vrot.slane %v1414_v3, 5  ;;  %3148 = vrot.lane.b32.xlu0 %v10133_v15, %s11831_s4  ;;  %v12667_v15 = vld [vmem:[#allocation2 + $0x64] sm:$0xf] }
  0xd3   : > { %v12650_v61 = vld [vmem:[#allocation2 + $0x70] sm:$0xf]  ;;  %v2188_v26 = vrot.slane %v2186_v25, 5  ;;  %v2196_v44 = vshll.u32 %v12643_v46, 16  ;;  %v1604_v43 = vsel %vm12056_vm15, %v1599_v52, %v1603_v2  ;;  %v1008_v24 = vshll.u32 %v12632_v56, 16 }
  0xd4   : > { %v2214_v11 = vshrl.u32 %v12650_v61, 16  ;;  %v2210_v21 = vshll.u32 %v12650_v61, 16  ;;  %v2184_v7 = vrot.slane %v2183_v28, 4  ;;  %v1613_v9 = vrot.slane %v1611_v36, 5  ;;  %v12669_v54 = vpop.permute.xlu0 %2960  ;;  %v780_v5 = vld [vmem:[#allocation2 + $0x70] sm:$0xf] }
  0xd5   : > { %v1926_v4 = vsel %vm11969_vm10, %v1924_v53, %v1925_v51  ;;  %v12660_v33 = vld [vmem:[#allocation2 + $0x6c] sm:$0xf]  ;;  %v2193_v34 = vor.u32 %v2192_v50, %v2188_v26  ;;  %v2198_v35 = vrot.slane %v2196_v44, 5  ;;  %v12675_v51 = vld [vmem:[#allocation2 + $0x68] sm:$0x1]  ;;  %v12677_v44 = vpop.permute.xlu1 %2708  ;;  %v1007_v0 = vrot.slane %v1005_v19, 4 }
  0xd6   : > { %v10118_v10 = vcombine.low %v12641_v60, %v1926_v4  ;;  %v2201_v12 = vshrl.u32 %v12660_v33, 16  ;;  %v2204_v2 = vshll.u32 %v12660_v33, 16  ;;  %v10134_v38 = vcombine.low %v12660_v33, %v12650_v61  ;;  %v1204_v41 = vld [vmem:[#allocation2 + $0x60] sm:$0xe]  ;;  %v11703_v32 = vld [vmem:[#allocation2 + $0x70] sm:$0xf] }
  0xd7   : > { %v1614_v53 = vsel %vm12056_vm15, %v1609_v16, %v1613_v9  ;;  %v2212_v25 = vrot.slane %v2210_v21, 5  ;;  %v2216_v3 = vrot.slane %v2214_v11, 4  ;;  %v2189_v50 = vsel %vm12056_vm15, %v2184_v7, %v2188_v26  ;;  %v2422_v7 = vld [vmem:[#allocation2 + $0x60] sm:$0xe] }
  0xd8   : > { %v10102_v52 = vcombine.low %v1604_v43, %v1614_v53  ;;  %v2203_v60 = vrot.slane %v2201_v12, 4  ;;  %v2206_v28 = vrot.slane %v2204_v2, 5  ;;  %v2194_v36 = vrot.slane %v2193_v34, 4  ;;  %v12679_v4 = vld [vmem:[#allocation2 + $0x74] sm:$0x1]  ;;  %v12688_v9 = vpop.permute.xlu0 %3216 }
  0xd9   : > { %v2217_v33 = vor.u32 %v2216_v3, %v2212_v25  ;;  %v1014_v16 = vshll.u32 %v12667_v15, 16  ;;  %v2220_v26 = vshll.u32 %v12679_v4, 16  ;;  %v1018_v21 = vshrl.u32 %v12667_v15, 16 }
  0xda   : > { %2974 = vrot.lane.b32.xlu1 %v10102_v52, %s11835_s8  ;;  %v2207_v11 = vor.u32 %v2206_v28, %v2203_v60  ;;  %v2199_v43 = vsel %vm12056_vm15, %v2194_v36, %v2198_v35  ;;  %v1010_v19 = vrot.slane %v1008_v24, 5  ;;  %v1024_v52 = vshll.u32 %v12675_v51, 16  ;;  %v779_v60 = vld [vmem:[#allocation2 + $0x6c] sm:$0xf] }
  0xdb   : > { %v2218_v34 = vrot.slane %v2217_v33, 4  ;;  %v10149_v12 = vcombine.low %v2189_v50, %v2199_v43  ;;  %v1016_v2 = vrot.slane %v1014_v16, 5  ;;  %v2222_v53 = vrot.slane %v2220_v26, 5  ;;  %v12699_v26 = vpop.permute.xlu1 %2710 }
  0xdc   : > { %v2208_v56 = vrot.slane %v2207_v11, 4  ;;  %v1020_v3 = vrot.slane %v1018_v21, 4  ;;  %v1011_v28 = vor.u32 %v1010_v19, %v1007_v0  ;;  %v10021_v62 = vrot.slane %v2422_v7, 9  ;;  %v802_v11 = vld [vmem:[#allocation2 + $0x74] sm:$0x1]  ;;  %v12701_v0 = vpop.permute.xlu0 %2788 }
  0xdd   : > { %3228 = vrot.lane.b32.xlu0 %v10149_v12, %s11836_s9  ;;  %v2524_v35 = vrot.slane %v12610_v30, 5  ;;  %v2527_v36 = vrot.slane %v12643_v46, 5  ;;  %v2223_v50 = vsel %vm12056_vm15, %v2218_v34, %v2222_v53  ;;  %v1026_v16 = vrot.slane %v1024_v52, 5  ;;  %16626 = vst [vmem:[#allocation9_spill] sm:$0xff] %v12701_v0 }
  0xde   : > { %3054 = vrot.lane.b32.xlu1 %v10118_v10, %s11833_s6  ;;  %v2213_v24 = vsel %vm12056_vm15, %v2208_v56, %v2212_v25  ;;  %v1021_v33 = vor.u32 %v1020_v3, %v1016_v2  ;;  %v1012_v43 = vrot.slane %v1011_v28, 4  ;;  %v1029_v7 = vshrl.u32 %v779_v60, 16  ;;  %v2423_v3 = vld [vmem:[#allocation2 + $0x6c] sm:$0xe] }
  0xdf   : > { %v10150_v30 = vcombine.low %v2213_v24, %v2223_v50  ;;  %v2525_v46 = vsel %vm11969_vm10, %v10021_v62, %v2524_v35  ;;  %v2526_v10 = vrot.slane %v2524_v35, 4  ;;  %v1032_v25 = vshll.u32 %v779_v60, 16  ;;  %v1205_v24 = vld [vmem:[#allocation2 + $0x6c] sm:$0xe] }
  0xe0   : > { %v1022_v21 = vrot.slane %v1021_v33, 4  ;;  %v1038_v12 = vshll.u32 %v780_v5, 16  ;;  %v1017_v34 = vsel %vm12056_vm15, %v1012_v43, %v1016_v2  ;;  %v1042_v56 = vshrl.u32 %v780_v5, 16  ;;  %v12712_v60 = vpop.permute.xlu0 %2884 }
  0xe1   : > { %v2528_v19 = vsel %vm11969_vm10, %v2526_v10, %v2527_v36  ;;  %v1048_v53 = vshll.u32 %v802_v11, 16  ;;  %v1031_v28 = vrot.slane %v1029_v7, 4  ;;  %v1034_v35 = vrot.slane %v1032_v25, 5 }
  0xe2   : > { %3150 = vrot.lane.b32.xlu1 %v10134_v38, %s11831_s4  ;;  %v1027_v52 = vsel %vm12056_vm15, %v1022_v21, %v1026_v16  ;;  %v10165_v62 = vcombine.low %v2525_v46, %v2528_v19  ;;  %v1040_v33 = vrot.slane %v1038_v12, 5  ;;  %v1044_v2 = vrot.slane %v1042_v56, 4  ;;  %v12717_v16 = vpop.permute.xlu1 %2790 }
  0xe3   : > { %v10055_v50 = vcombine.low %v1017_v34, %v1027_v52  ;;  %v1050_v43 = vrot.slane %v1048_v53, 5  ;;  %v1035_v36 = vor.u32 %v1034_v35, %v1031_v28  ;;  %v10022_v10 = vrot.slane %v2423_v3, 9  ;;  %v1391_v35 = vld [vmem:[#allocation2 + $0x6c] sm:$0xf] }
  0xe4   : > { %3308 = vrot.lane.b32.xlu0 %v10165_v62, %s11834_s7  ;;  %v2531_v38 = vrot.slane %v12650_v61, 5  ;;  %v2534_v0 = vrot.slane %v12679_v4, 5  ;;  %v1045_v46 = vor.u32 %v1044_v2, %v1040_v33  ;;  %v9992_v21 = vrot.slane %v1205_v24, 9  ;;  %v12722_v53 = vpop.permute.xlu0 %2964  ;;  %v311_v62 = vld [vmem:[%s11950_s28 + $0x4c] sm:$0xf] }
  0xe5   : > { %v1328_v7 = vrot.slane %v780_v5, 5  ;;  %v1331_v25 = vrot.slane %v802_v11, 5  ;;  %v1036_v12 = vrot.slane %v1035_v36, 4  ;;  %v9991_v56 = vrot.slane %v1204_v41, 9  ;;  %v12742_v36 = vld [vmem:[#allocation2 + $0x70] sm:$0xf] }
  0xe6   : > { %3230 = vrot.lane.b32.xlu1 %v10150_v30, %s11836_s9  ;;  %v2532_v34 = vsel %vm11969_vm10, %v10022_v10, %v2531_v38  ;;  %v2533_v19 = vrot.slane %v2531_v38, 4  ;;  %v1046_v61 = vrot.slane %v1045_v46, 4  ;;  %v1321_v52 = vrot.slane %v12667_v15, 5  ;;  %v12748_v46 = vpop.permute.xlu1 %2886 }
  0xe7   : > { %v1329_v4 = vsel %vm11969_vm10, %v9992_v21, %v1328_v7  ;;  %v1330_v3 = vrot.slane %v1328_v7, 4  ;;  %v1041_v5 = vsel %vm12056_vm15, %v1036_v12, %v1040_v33  ;;  %v1324_v30 = vrot.slane %v12675_v51, 5  ;;  %v712_v7 = vld [vmem:[#allocation2 + $0x78] sm:$0xf] }
  0xe8   : > { %v2535_v11 = vsel %vm11969_vm10, %v2533_v19, %v2534_v0  ;;  %v16627_v41 = vshrl.u32 %v12596_v17, 16  ;;  %v3379_v24 = vsel %vm3377_vm7, %v12630_v22, %v12480_v55  ;;  %v1051_v15 = vsel %vm12056_vm15, %v1046_v61, %v1050_v43  ;;  %v12750_v55 = vpop.permute.xlu0 %3044 }
  0xe9   : > { %v10166_v2 = vcombine.low %v2532_v34, %v2535_v11  ;;  %v1332_v33 = vsel %vm11969_vm10, %v1330_v3, %v1331_v25  ;;  %v10056_v51 = vcombine.low %v1041_v5, %v1051_v15  ;;  %v1322_v0 = vsel %vm11969_vm10, %v9991_v56, %v1321_v52  ;;  %v268_v56 = vld [vmem:[#allocation2 + $0x80] sm:$0x1] }
  0xea   : > { %v482_v28 = vrot.slane %v16627_v41, 7  ;;  %2720 = vrot.lane.b32.xlu1 %v10055_v50, %s11832_s5  ;;  %v1323_v10 = vrot.slane %v1321_v52, 4  ;;  %v483_v38 = vshll.u32 %v12596_v17, 16  ;;  %v10072_v22 = vcombine.low %v1329_v4, %v1332_v33 }
  0xeb   : > { %3310 = vrot.lane.b32.xlu0 %v10166_v2, %s11834_s7  ;;  %v488_v43 = vshrl.u32 %v311_v62, 16  ;;  %v491_v21 = vshll.u32 %v311_v62, 16  ;;  %v1616_v25 = vshrl.u32 %v1391_v35, 16  ;;  %v1619_v34 = vshll.u32 %v1391_v35, 16 }
  0xec   : > { %v1325_v50 = vsel %vm11969_vm10, %v1323_v10, %v1324_v30  ;;  %v485_v12 = vor.u32 %v483_v38, %v482_v28  ;;  %v1629_v19 = vshrl.u32 %v12742_v36, 16  ;;  %v486_v61 = vrot.slane %v482_v28, 4  ;;  %v1415_v30 = vld [vmem:[#allocation2 + $0x74] sm:$0x1]  ;;  %v12776_v38 = vpop.permute.xlu0 %3140 }
  0xed   : > { %v10071_v17 = vcombine.low %v1322_v0, %v1325_v50  ;;  %v12756_v3 = vrot.slane %v488_v43, 7  ;;  %v1618_v52 = vrot.slane %v1616_v25, 4  ;;  %v1621_v5 = vrot.slane %v1619_v34, 5  ;;  %v1815_v0 = vld [vmem:[#allocation2 + $0x6c] sm:$0xe] }
  0xee   : > { %2722 = vrot.lane.b32.xlu1 %v10056_v51, %s11832_s5  ;;  %v713_v4 = vsel %vm11975_vm11, %v485_v12, %v712_v7  ;;  %v10087_v11 = vcombine.low %v1391_v35, %v12742_v36  ;;  %v16628_v41 = vcombine.low %v12541_v47, %v12539_v57  ;;  %v269_v15 = vsel %vm11943_vm6, 0, %v268_v56  ;;  %v12781_v43 = vld [vmem:[#allocation2 + $0x30] sm:$0xf] }
  0xef   : > { %2800 = vrot.lane.b32.xlu0 %v10071_v17, %s11829_s29  ;;  %v493_v62 = vor.u32 %v491_v21, %v12756_v3  ;;  %714 = vst [vmem:[#allocation2 + $0x78] sm:$0xf] %v713_v4  ;;  %270 = vst [vmem:[#allocation2 + $0x80] sm:$0x1] %v269_v15  ;;  %v1622_v2 = vor.u32 %v1621_v5, %v1618_v52  ;;  %v1625_v33 = vshll.u32 %v12742_v36, 16  ;;  %v1631_v51 = vrot.slane %v1629_v19, 4  ;;  %v12774_v10 = vpop.permute.xlu1 %2966 }
  0xf0   : > { %v3334_v28 = vsel %vm3328_vm1, %v16628_v41, %v12648_v6  ;;  %v495_v47 = vrot.slane %v12756_v3, 4  ;;  %v1635_v6 = vshll.u32 %v1415_v30, 16  ;;  %v12783_v21 = vld [vmem:[#allocation2 + $0x34] sm:$0xf]  ;;  %v3412_v12 = vsel %vm3410_vm8, %v3379_v24, %v12486_v40 }
  0xf1   : > { %v3381_v35 = vsel %vm3377_vm7, %v3334_v28, %v12555_v31  ;;  %v494_v57 = vsel %vm11981_vm12, %v486_v61, %v493_v62  ;;  %v10035_v31 = vcombine.low %v12781_v43, %v12783_v21  ;;  %v1623_v25 = vrot.slane %v1622_v2, 4  ;;  %v11599_v34 = vld [vmem:[%s16572_s1 + $0x10] ss:$0 sps:$4 sm:$0x33]   ;;  %v215_v2 = vld [vmem:[#allocation2 + $0x84] sm:$0x1] }
  0xf2   : > { %2802 = vrot.lane.b32.xlu1 %v10072_v22, %s11829_s29  ;;  %715 = vst.msk [vmem:[#allocation2 + $0x7c] sm:$0xf] %vm170_vm0, %v494_v57  ;;  %v3414_v7 = vsel %vm3410_vm8, %v3381_v35, %v12497_v13  ;;  %v1627_v50 = vrot.slane %v1625_v33, 5  ;;  %v16629_v22 = vcombine.low %v12568_v42, %v12570_v45  ;;  %v3445_v13 = vsel %vm3443_vm9, %v3412_v12, %v12669_v54  ;;  %v312_v33 = vld [vmem:[%s11950_s28 + $0x50] sm:$0xf] }
  0xf3   : > { %2896 = vrot.lane.b32.xlu0 %v10087_v11, %s11830_s30  ;;  %v10007_v56 = vrot.slane %v1815_v0, 9  ;;  %v1637_v40 = vrot.slane %v1635_v6, 5  ;;  %v3478_v24 = vsel %vm3476_vm13, %v3445_v13, %v12566_v20  ;;  %v1929_v61 = vrot.slane %v12742_v36, 5  ;;  %v12813_v45 = vpop.permute.xlu1 %3046  ;;  %11529 = vmatprep.subr.msk.bf16.mxu0 %vm3661_vm14, %v11599_v34  ;;  %v313_v12 = vld [vmem:[%s11950_s28 + $0x54] sm:$0xf] }
  0xf4   : > { %v12802_v19 = vsel %vm3328_vm1, %v16629_v22, %v12677_v44  ;;  %v1632_v17 = vor.u32 %v1631_v51, %v1627_v50  ;;  %v12811_v3 = vsel %vm3443_vm9, %v3414_v7, %v12617_v58  ;;  %v1932_v42 = vrot.slane %v1415_v30, 5  ;;  %v12820_v58 = vpop.permute.xlu0 %3220 }
  0xf5   : > { %vm3509_vm4 = vcmask 195584   ;;  %v1628_v54 = vsel %vm12056_vm15, %v1623_v25, %v1627_v50  ;;  %v1930_v20 = vsel %vm11969_vm10, %v10007_v56, %v1929_v61  ;;  %v1931_v36 = vrot.slane %v1929_v61, 4 }
  0xf6   : > { %v1393_v44 = vld [vmem:[#allocation2 + $0x78] sm:$0xf]  ;;  %v1633_v52 = vrot.slane %v1632_v17, 4  ;;  %v716_v30 = vld [vmem:[#allocation2 + $0x80] sm:$0x1]  ;;  %v3511_v41 = vsel %vm3509_vm4, %v3478_v24, %v12504_v48  ;;  %vm3542_vm5 = vcmask 228352  }
  0xf7   : > { %v1816_v4 = vld [vmem:[#allocation2 + $0x78] sm:$0xe]  ;;  %v1640_v5 = vshrl.u32 %v1393_v44, 16  ;;  %v1643_v11 = vshll.u32 %v1393_v44, 16  ;;  %v717_v28 = vsel %vm11915_vm3, %v495_v47, %v716_v30  ;;  %v1933_v35 = vsel %vm11969_vm10, %v1931_v36, %v1932_v42  ;;  %v12836_v24 = vpop.permute.xlu1 %3142 }
  0xf8   : > { %v10008_v62 = vrot.slane %v1816_v4, 9  ;;  %v1638_v15 = vsel %vm12056_vm15, %v1633_v52, %v1637_v40  ;;  %718 = vst [vmem:[#allocation2 + $0x80] sm:$0x1] %v717_v28  ;;  %v10119_v7 = vcombine.low %v1930_v20, %v1933_v35  ;;  %v3663_v13 = vsel %vm3661_vm14, %v11599_v34, 0  ;;  %v2000_v40 = vld [vmem:[#allocation2 + $0x78] sm:$0xf] }
  0xf9   : > { %v1394_v51 = vld [vmem:[#allocation2 + $0x7c] sm:$0xf]  ;;  %v1642_v0 = vrot.slane %v1640_v5, 4  ;;  %v1645_v57 = vrot.slane %v1643_v11, 5  ;;  %v10103_v6 = vcombine.low %v1628_v54, %v1638_v15  ;;  %v216_v56 = vsel %vm11915_vm3, 0, %v215_v2  ;;  %10916 = vmatpush3.bf16.msra.mxu0 %v3663_v13 }
  0xfa   : > { %v1653_v48 = vshrl.u32 %v1394_v51, 16  ;;  %v10088_v25 = vcombine.low %v1393_v44, %v1394_v51  ;;  %v1649_v50 = vshll.u32 %v1394_v51, 16  ;;  %v1936_v47 = vrot.slane %v1394_v51, 5  ;;  %217 = vst [vmem:[#allocation2 + $0x84] sm:$0x1] %v216_v56  ;;  %v12846_v52 = vpop.permute.xlu0 %3300 }
  0xfb   : > { %v1646_v22 = vor.u32 %v1645_v57, %v1642_v0  ;;  %2976 = vrot.lane.b32.xlu0 %v10103_v6, %s11835_s8  ;;  %v497_v17 = vshrl.u32 %v312_v33, 16  ;;  %v16630_v44 = vcombine.low %v12587_v23, %v12589_v18  ;;  %v3544_v34 = vsel %vm3542_vm5, %v3511_v41, %v12688_v9  ;;  %v12855_v41 = vld [vmem:[#allocation2 + $0x7c] sm:$0xf] }
  0xfc   : > { %2898 = vrot.lane.b32.xlu1 %v10088_v25, %s11830_s30  ;;  %v1651_v61 = vrot.slane %v1649_v50, 5  ;;  %v1655_v42 = vrot.slane %v1653_v48, 4  ;;  %v500_v36 = vshll.u32 %v312_v33, 16  ;;  %v505_v5 = vshrl.u32 %v313_v12, 16  ;;  %v271_v25 = vld [vmem:[#allocation2 + $0x8c] sm:$0x1]  ;;  %v12860_v50 = vpop.permute.xlu1 %3222 }
  0xfd   : > { %v3340_v54 = vsel %vm3328_vm1, %v16630_v44, %v12699_v26  ;;  %v1647_v4 = vrot.slane %v1646_v22, 4  ;;  %v499_v20 = vrot.slane %v497_v17, 7  ;;  %v508_v30 = vshll.u32 %v313_v12, 16 }
  0xfe   : > { %v1656_v11 = vor.u32 %v1655_v42, %v1651_v61  ;;  %v2225_v28 = vshrl.u32 %v2000_v40, 16  ;;  %v2228_v15 = vshll.u32 %v2000_v40, 16  ;;  %v12850_v23 = vsel %vm11969_vm10, %v10008_v62, %v1936_v47 }
  0xff   : > { %v1938_v18 = vrot.slane %v1936_v47, 4  ;;  %3056 = vrot.lane.b32.xlu0 %v10119_v7, %s11833_s6  ;;  %v503_v9 = vrot.slane %v499_v20, 4  ;;  %v12853_v26 = vrot.slane %v505_v5, 7  ;;  %v1416_v35 = vld [vmem:[#allocation2 + $0x80] sm:$0x1]  ;;  %v1652_v2 = vsel %vm12056_vm15, %v1647_v4, %v1651_v61 }
 0x100   : > { %v1657_v33 = vrot.slane %v1656_v11, 4  ;;  %v502_v51 = vor.u32 %v500_v36, %v499_v20  ;;  %v2227_v0 = vrot.slane %v2225_v28, 4  ;;  %v1659_v57 = vshll.u32 %v1416_v35, 16  ;;  %v781_v11 = vld [vmem:[#allocation2 + $0x78] sm:$0xf] }
 0x101   : > { %v1939_v6 = vrot.slane %v1416_v35, 5  ;;  %v510_v62 = vor.u32 %v508_v30, %v12853_v26  ;;  %v2230_v48 = vrot.slane %v2228_v15, 5  ;;  %v2238_v7 = vshrl.u32 %v12855_v41, 16  ;;  %v12864_v12 = vpop.permute.xlu0 %3302  ;;  %v719_v17 = vld [vmem:[#allocation2 + $0x84] sm:$0xf]  ;;  %v12903_v35 = vpop.permute.xlu1 %2712 }
 0x102   : > { %v10135_v47 = vcombine.low %v2000_v40, %v12855_v41  ;;  %vm3575_vm14 = vcmask 261120   ;;  %vm16580_vm2 = vcmask 293888   ;;  %v1661_v22 = vrot.slane %v1659_v57, 5  ;;  %v12894_v15 = vld [vmem:[#allocation2 + $0x7c] sm:$0xf] }
 0x103   : > { %v511_v13 = vsel %vm11981_vm12, %v503_v9, %v510_v62  ;;  %v512_v56 = vrot.slane %v12853_v26, 4  ;;  %v3577_v61 = vsel %vm3575_vm14, %v3544_v34, %v12602_v37  ;;  %v1940_v42 = vsel %vm11969_vm10, %v1938_v18, %v1939_v6  ;;  %v12883_v37 = vld [vmem:[#allocation2 + $0x80] sm:$0x1]  ;;  %v2424_v26 = vld [vmem:[#allocation2 + $0x78] sm:$0xe] }
 0x104   : > { %v720_v40 = vsel %vm11975_vm11, %v502_v51, %v719_v17  ;;  %722 = vst.msk [vmem:[#allocation2 + $0x88] sm:$0xf] %vm170_vm0, %v511_v13  ;;  %3152 = vrot.lane.b32.xlu0 %v10135_v47, %s11831_s4  ;;  %10917 = vmatprep.mubr.msk.bf16.mxu0 %vm16580_vm2, %v3577_v61  ;;  %v3480_v44 = vsel %vm3476_vm13, %v12811_v3, %v12585_v14  ;;  %v272_v4 = vsel %vm11943_vm6, 0, %v271_v25  ;;  %v2234_v3 = vshll.u32 %v12855_v41, 16 }
 0x105   : > { %v1662_v34 = vsel %vm12056_vm15, %v1657_v33, %v1661_v22  ;;  %721 = vst [vmem:[#allocation2 + $0x84] sm:$0xf] %v720_v40  ;;  %v3385_v20 = vsel %vm3377_vm7, %v3340_v54, %v12717_v16  ;;  %v3513_v36 = vsel %vm3509_vm4, %v3480_v44, %v12523_v59  ;;  %273 = vst [vmem:[#allocation2 + $0x8c] sm:$0x1] %v272_v4  ;;  %v2240_v28 = vrot.slane %v2238_v7, 4  ;;  %v16631_v54 = vld [vmem:[#allocation9_spill] sm:$0xff] }
 0x106   : > { %v2231_v5 = vor.u32 %v2230_v48, %v2227_v0  ;;  %v10104_v30 = vcombine.low %v1652_v2, %v1662_v34  ;;  %v3546_v14 = vsel %vm3542_vm5, %v3513_v36, %v12646_v49  ;;  %v10120_v18 = vcombine.low %v12850_v23, %v1940_v42  ;;  %v12905_v49 = vpop.permute.xlu0 %2792  ;;  %v12909_v33 = vld [vmem:[#allocation2 + $0x80] sm:$0x1] }
 0x107   : > { %v3579_v16 = vsel %vm3575_vm14, %v3546_v14, %v12622_v27  ;;  %v3383_v59 = vsel %vm3377_vm7, %v12802_v19, %v16631_v54  ;;  %v2244_v9 = vshll.u32 %v12883_v37, 16  ;;  %v2236_v23 = vrot.slane %v2234_v3, 5 }
 0x108   : > { %2978 = vrot.lane.b32.xlu1 %v10104_v30, %s11835_s8  ;;  %10918 = vmatmul.mubr.msk.bf16.vlgmr.msra.gmra.mrb[0].mxu0 %vm16580_vm2, %v3579_v16  ;;  %v2232_v2 = vrot.slane %v2231_v5, 4  ;;  %v1053_v27 = vshrl.u32 %v781_v11, 16  ;;  %v1056_v51 = vshll.u32 %v781_v11, 16  ;;  %v3418_v19 = vsel %vm3410_vm8, %v3385_v20, %v12748_v46  ;;  %v12932_v11 = vpop.permute.xlu1 %2714 }
 0x109   : > { %v12915_v0 = vsel %vm3410_vm8, %v3383_v59, %v12712_v60  ;;  %v1062_v57 = vshll.u32 %v12894_v15, 16  ;;  %v1066_v6 = vshrl.u32 %v12894_v15, 16  ;;  %v2241_v62 = vor.u32 %v2240_v28, %v2236_v23 }
 0x10a   : > { %v2246_v48 = vrot.slane %v2244_v9, 5  ;;  %v1055_v25 = vrot.slane %v1053_v27, 4  ;;  %v1058_v7 = vrot.slane %v1056_v51, 5  ;;  %v1072_v17 = vshll.u32 %v12909_v33, 16  ;;  %v12934_v30 = vpop.permute.xlu0 %2888 }
 0x10b   : > { %v12919_v47 = vld [vmem:[#allocation2 + $0x88] sm:$0xf]  ;;  %v12921_v22 = vrot.slane %v1062_v57, 5  ;;  %v1068_v13 = vrot.slane %v1066_v6, 4  ;;  %v10023_v46 = vrot.slane %v2424_v26, 9  ;;  %v2237_v44 = vsel %vm12056_vm15, %v2232_v2, %v2236_v23 }
 0x10c   : > { %3058 = vrot.lane.b32.xlu1 %v10120_v18, %s11833_s6  ;;  %v2002_v60 = vld [vmem:[#allocation2 + $0x84] sm:$0xf]  ;;  %v2262_v61 = vshrl.u32 %v12919_v47, 16  ;;  %v723_v42 = vld [vmem:[#allocation2 + $0x8c] sm:$0x1]  ;;  %v2258_v40 = vshll.u32 %v12919_v47, 16  ;;  %v1059_v4 = vor.u32 %v1058_v7, %v1055_v25  ;;  %v3451_v25 = vsel %vm3443_vm9, %v3418_v19, %v12774_v10 }
 0x10d   : > { %v2249_v34 = vshrl.u32 %v2002_v60, 16  ;;  %v2252_v20 = vshll.u32 %v2002_v60, 16  ;;  %v10136_v36 = vcombine.low %v2002_v60, %v12919_v47  ;;  %v724_v5 = vsel %vm11915_vm3, %v512_v56, %v723_v42  ;;  %v783_v26 = vld [vmem:[#allocation2 + $0x84] sm:$0xf]  ;;  %v12945_v51 = vld [vmem:[#allocation2 + $0x88] sm:$0xf] }
 0x10e   : > { %725 = vst [vmem:[#allocation2 + $0x8c] sm:$0x1] %v724_v5  ;;  %v12936_v14 = vrot.slane %v2258_v40, 5  ;;  %v2264_v3 = vrot.slane %v2262_v61, 4  ;;  %v2242_v28 = vrot.slane %v2241_v62, 4  ;;  %v1060_v18 = vrot.slane %v1059_v4, 4  ;;  %v12956_v40 = vpop.permute.xlu1 %2794 }
 0x10f   : > { %v2251_v16 = vrot.slane %v2249_v34, 4  ;;  %v2254_v54 = vrot.slane %v2252_v20, 5  ;;  %v1069_v59 = vor.u32 %v1068_v13, %v12921_v22  ;;  %v2538_v9 = vrot.slane %v12855_v41, 5  ;;  %v2425_v42 = vld [vmem:[#allocation2 + $0x84] sm:$0xe]  ;;  %v12958_v10 = vpop.permute.xlu0 %2968 }
 0x110   : > { %3154 = vrot.lane.b32.xlu1 %v10136_v36, %s11831_s4  ;;  %v2265_v56 = vor.u32 %v2264_v3, %v12936_v14  ;;  %v2247_v2 = vsel %vm12056_vm15, %v2242_v28, %v2246_v48  ;;  %v1074_v23 = vrot.slane %v1072_v17, 5  ;;  %v2541_v27 = vrot.slane %v12883_v37, 5 }
 0x111   : > { %v2255_v57 = vor.u32 %v2254_v54, %v2251_v16  ;;  %v10151_v6 = vcombine.low %v2237_v44, %v2247_v2  ;;  %v1070_v62 = vrot.slane %v1069_v59, 4  ;;  %v1065_v41 = vsel %vm12056_vm15, %v1060_v18, %v12921_v22  ;;  %v1207_v59 = vld [vmem:[#allocation2 + $0x84] sm:$0xe] }
 0x112   : > { %v2539_v7 = vsel %vm11969_vm10, %v10023_v46, %v2538_v9  ;;  %v2540_v13 = vrot.slane %v2538_v9, 4  ;;  %v1077_v48 = vshrl.u32 %v783_v26, 16  ;;  %v2266_v60 = vrot.slane %v2265_v56, 4 }
 0x113   : > { %v2256_v17 = vrot.slane %v2255_v57, 4  ;;  %3232 = vrot.lane.b32.xlu0 %v10151_v6, %s11836_s9  ;;  %v1080_v37 = vshll.u32 %v783_v26, 16  ;;  %v1086_v61 = vshll.u32 %v12945_v51, 16  ;;  %v1075_v19 = vsel %vm12056_vm15, %v1070_v62, %v1074_v23  ;;  %v1206_v57 = vld [vmem:[#allocation2 + $0x78] sm:$0xe] }
 0x114   : > { %v2542_v22 = vsel %vm11969_vm10, %v2540_v13, %v2541_v27  ;;  %v1079_v46 = vrot.slane %v1077_v48, 4  ;;  %v1090_v44 = vshrl.u32 %v12945_v51, 16  ;;  %v3449_v20 = vsel %vm3443_vm9, %v12915_v0, %v12722_v53  ;;  %v12975_v13 = vpop.permute.xlu1 %2890  ;;  %v12977_v48 = vpop.permute.xlu0 %3048 }
 0x115   : > { %v2025_v4 = vld [vmem:[#allocation2 + $0x8c] sm:$0x1]  ;;  %v10167_v34 = vcombine.low %v2539_v7, %v2542_v22  ;;  %v1082_v5 = vrot.slane %v1080_v37, 5  ;;  %v1088_v3 = vrot.slane %v1086_v61, 5  ;;  %v10024_v54 = vrot.slane %v2425_v42, 9 }
 0x116   : > { %v804_v36 = vld [vmem:[#allocation2 + $0x8c] sm:$0x1]  ;;  %v2268_v28 = vshll.u32 %v2025_v4, 16  ;;  %v1092_v18 = vrot.slane %v1090_v44, 4  ;;  %v10057_v9 = vcombine.low %v1065_v41, %v1075_v19  ;;  %v2545_v56 = vrot.slane %v12919_v47, 5 }
 0x117   : > { %v1096_v16 = vshll.u32 %v804_v36, 16  ;;  %3312 = vrot.lane.b32.xlu0 %v10167_v34, %s11834_s7  ;;  %v1083_v26 = vor.u32 %v1082_v5, %v1079_v46  ;;  %v2548_v2 = vrot.slane %v2025_v4, 5  ;;  %v2261_v23 = vsel %vm12056_vm15, %v2256_v17, %v12936_v14  ;;  %v218_v46 = vld [vmem:[#allocation2 + $0x90] sm:$0x1]  ;;  %v314_v44 = vld [vmem:[%s11950_s28 + $0x58] sm:$0xf] }
 0x118   : > { %v2270_v53 = vrot.slane %v2268_v28, 5  ;;  %v1093_v0 = vor.u32 %v1092_v18, %v1088_v3  ;;  %v2546_v62 = vsel %vm11969_vm10, %v10024_v54, %v2545_v56  ;;  %v2547_v41 = vrot.slane %v2545_v56, 4  ;;  %v315_v18 = vld [vmem:[%s11950_s28 + $0x5c] sm:$0xf] }
 0x119   : > { %v1098_v27 = vrot.slane %v1096_v16, 5  ;;  %v1084_v6 = vrot.slane %v1083_v26, 4  ;;  %v9994_v7 = vrot.slane %v1207_v59, 9  ;;  %v1342_v14 = vrot.slane %v12945_v51, 5  ;;  %v1395_v16 = vld [vmem:[#allocation2 + $0x84] sm:$0xf] }
 0x11a   : > { %v2271_v47 = vsel %vm12056_vm15, %v2266_v60, %v2270_v53  ;;  %v1094_v37 = vrot.slane %v1093_v0, 4  ;;  %v1345_v17 = vrot.slane %v804_v36, 5  ;;  %v2549_v19 = vsel %vm11969_vm10, %v2547_v41, %v2548_v2  ;;  %v13014_v2 = vpop.permute.xlu0 %3144  ;;  %v274_v41 = vld [vmem:[#allocation2 + $0x98] sm:$0x1] }
 0x11b   : > { %v10152_v61 = vcombine.low %v2261_v23, %v2271_v47  ;;  %v1089_v42 = vsel %vm12056_vm15, %v1084_v6, %v1088_v3  ;;  %v9993_v22 = vrot.slane %v1206_v57, 9  ;;  %v10168_v34 = vcombine.low %v2546_v62, %v2549_v19 }
 0x11c   : > { %v1099_v4 = vsel %vm12056_vm15, %v1094_v37, %v1098_v27  ;;  %v3484_v60 = vsel %vm3476_vm13, %v3451_v25, %v12813_v45  ;;  %v1344_v51 = vrot.slane %v1342_v14, 4  ;;  %v3482_v36 = vsel %vm3476_vm13, %v3449_v20, %v12750_v55  ;;  %v13006_v20 = vld [vmem:[#allocation2 + $0x88] sm:$0xf] }
 0x11d   : > { %3234 = vrot.lane.b32.xlu1 %v10152_v61, %s11836_s9  ;;  %v12996_v5 = vsel %vm11969_vm10, %v9994_v7, %v1342_v14  ;;  %v1335_v3 = vrot.slane %v12894_v15, 5  ;;  %v1338_v28 = vrot.slane %v12909_v33, 5  ;;  %v10058_v54 = vcombine.low %v1089_v42, %v1099_v4  ;;  %3314 = vrot.lane.b32.xlu0 %v10168_v34, %s11834_s7  ;;  %v13012_v56 = vpop.permute.xlu1 %2970 }
 0x11e   : > { %v3517_v45 = vsel %vm3509_vm4, %v3484_v60, %v12836_v24  ;;  %v219_v25 = vsel %vm11915_vm3, 0, %v218_v46  ;;  %v514_v55 = vshrl.u32 %v314_v44, 16  ;;  %v1346_v59 = vsel %vm11969_vm10, %v1344_v51, %v1345_v17  ;;  %v1417_v17 = vld [vmem:[#allocation2 + $0x8c] sm:$0x1] }
 0x11f   : > { %v1336_v15 = vsel %vm11969_vm10, %v9993_v22, %v1335_v3  ;;  %v1337_v33 = vrot.slane %v1335_v3, 4  ;;  %220 = vst [vmem:[#allocation2 + $0x90] sm:$0x1] %v219_v25  ;;  %v517_v26 = vshll.u32 %v314_v44, 16  ;;  %v522_v23 = vshrl.u32 %v315_v18, 16 }
 0x120   : > { %v516_v24 = vrot.slane %v514_v55, 7  ;;  %v525_v53 = vshll.u32 %v315_v18, 16  ;;  %v1664_v0 = vshrl.u32 %v1395_v16, 16  ;;  %v3515_v57 = vsel %vm3509_vm4, %v3482_v36, %v12776_v38  ;;  %v1817_v22 = vld [vmem:[#allocation2 + $0x84] sm:$0xe]  ;;  %v13038_v3 = vpop.permute.xlu0 %3224 }
 0x121   : > { %2724 = vrot.lane.b32.xlu1 %v10057_v9, %s11832_s5  ;;  %v1339_v27 = vsel %vm11969_vm10, %v1337_v33, %v1338_v28  ;;  %v1667_v6 = vshll.u32 %v1395_v16, 16  ;;  %v1677_v62 = vshrl.u32 %v13006_v20, 16  ;;  %v10074_v7 = vcombine.low %v12996_v5, %v1346_v59  ;;  %v13036_v5 = vpop.permute.xlu1 %3050 }
 0x122   : > { %v10073_v47 = vcombine.low %v1336_v15, %v1339_v27  ;;  %v520_v37 = vrot.slane %v516_v24, 4  ;;  %v13023_v14 = vrot.slane %v522_v23, 7  ;;  %v519_v61 = vor.u32 %v517_v26, %v516_v24  ;;  %v316_v15 = vld [vmem:[%s11950_s28 + $0x60] sm:$0xf]  ;;  %v11695_v24 = vld [vmem:[#allocation2 + $0x3c] sm:$0xf] }
 0x123   : > { %v1666_v42 = vrot.slane %v1664_v0, 4  ;;  %v1669_v9 = vrot.slane %v1667_v6, 5  ;;  %v10089_v19 = vcombine.low %v1395_v16, %v13006_v20  ;;  %v3550_v46 = vsel %vm3542_vm5, %v3517_v45, %v12860_v50  ;;  %v221_v45 = vld [vmem:[#allocation2 + $0x9c] sm:$0x1]  ;;  %v11694_v26 = vld [vmem:[#allocation2 + $0x40] sm:$0xf] }
 0x124   : > { %2804 = vrot.lane.b32.xlu0 %v10073_v47, %s11829_s29  ;;  %v527_v38 = vor.u32 %v525_v53, %v13023_v14  ;;  %v275_v44 = vsel %vm11943_vm6, 0, %v274_v41  ;;  %v1673_v4 = vshll.u32 %v13006_v20, 16  ;;  %v3548_v34 = vsel %vm3542_vm5, %v3515_v57, %v12820_v58  ;;  %v317_v0 = vld [vmem:[%s11950_s28 + $0x64] sm:$0xf] }
 0x125   : > { %2726 = vrot.lane.b32.xlu1 %v10058_v54, %s11832_s5  ;;  %276 = vst [vmem:[#allocation2 + $0x98] sm:$0x1] %v275_v44  ;;  %v1670_v60 = vor.u32 %v1669_v9, %v1666_v42  ;;  %v1679_v51 = vrot.slane %v1677_v62, 4  ;;  %v1683_v36 = vshll.u32 %v1417_v17, 16  ;;  %v3581_v16 = vsel %vm3575_vm14, %v3548_v34, %v12846_v52  ;;  %v13067_v42 = vpop.permute.xlu1 %3146 }
 0x126   : > { %v528_v50 = vsel %vm11981_vm12, %v520_v37, %v527_v38  ;;  %v726_v28 = vld [vmem:[#allocation2 + $0x90] sm:$0xf]  ;;  %v1675_v18 = vrot.slane %v1673_v4, 5  ;;  %v10009_v54 = vrot.slane %v1817_v22, 9  ;;  %v1943_v59 = vrot.slane %v13006_v20, 5  ;;  %10921 = vmatprep.mubr.msk.bf16.mxu0 %vm16580_vm2, %v3581_v16 }
 0x127   : > { %v727_v58 = vsel %vm11975_vm11, %v519_v61, %v726_v28  ;;  %729 = vst.msk [vmem:[#allocation2 + $0x94] sm:$0xf] %vm170_vm0, %v528_v50  ;;  %v1671_v25 = vrot.slane %v1670_v60, 4  ;;  %v1685_v55 = vrot.slane %v1683_v36, 5  ;;  %v1946_v52 = vrot.slane %v1417_v17, 5  ;;  %v13069_v9 = vpop.permute.xlu0 %3304 }
 0x128   : > { %728 = vst [vmem:[#allocation2 + $0x90] sm:$0xf] %v727_v58  ;;  %2900 = vrot.lane.b32.xlu0 %v10089_v19, %s11830_s30  ;;  %v1680_v33 = vor.u32 %v1679_v51, %v1675_v18  ;;  %v10036_v23 = vcombine.low %v11695_v24, %v11694_v26  ;;  %v3583_v53 = vsel %vm3575_vm14, %v3550_v46, %v12864_v12  ;;  %v529_v27 = vrot.slane %v13023_v14, 4  ;;  %v277_v37 = vld [vmem:[#allocation2 + $0xa4] sm:$0x1] }
 0x129   : > { %2806 = vrot.lane.b32.xlu1 %v10074_v7, %s11829_s29  ;;  %v1676_v20 = vsel %vm12056_vm15, %v1671_v25, %v1675_v18  ;;  %v1945_v57 = vrot.slane %v1943_v59, 4  ;;  %v222_v6 = vsel %vm11915_vm3, 0, %v221_v45  ;;  %10922 = vmatmul.mubr.msk.bf16.gmra.mrb[4].mxu0 %vm16580_vm2, %v3583_v53  ;;  %v531_v12 = vshrl.u32 %v316_v15, 16  ;;  %v13093_v24 = vpop.permute.xlu1 %3226 }
 0x12a   : > { %v1681_v62 = vrot.slane %v1680_v33, 4  ;;  %v3346_v41 = vsel %vm3328_vm1, %v10036_v23, %v12932_v11  ;;  %223 = vst [vmem:[#allocation2 + $0x9c] sm:$0x1] %v222_v6  ;;  %v534_v47 = vshll.u32 %v316_v15, 16  ;;  %v1944_v7 = vsel %vm11969_vm10, %v10009_v54, %v1943_v59 }
 0x12b   : > { %v1947_v14 = vsel %vm11969_vm10, %v1945_v57, %v1946_v52  ;;  %v539_v17 = vshrl.u32 %v317_v0, 16  ;;  %v542_v61 = vshll.u32 %v317_v0, 16  ;;  %v3343_v22 = vsel %vm3328_vm1, %v10035_v31, %v12903_v35 }
 0x12c   : > { %v730_v19 = vld [vmem:[#allocation2 + $0x98] sm:$0x1]  ;;  %v1686_v11 = vsel %vm12056_vm15, %v1681_v62, %v1685_v55  ;;  %v533_v38 = vrot.slane %v531_v12, 7  ;;  %v3389_v46 = vsel %vm3377_vm7, %v3346_v41, %v12956_v40  ;;  %v278_v60 = vsel %vm11943_vm6, 0, %v277_v37 }
 0x12d   : > { %v731_v44 = vsel %vm11915_vm3, %v529_v27, %v730_v19  ;;  %v10105_v4 = vcombine.low %v1676_v20, %v1686_v11  ;;  %v541_v34 = vrot.slane %v539_v17, 7  ;;  %v10121_v36 = vcombine.low %v1944_v7, %v1947_v14  ;;  %279 = vst [vmem:[#allocation2 + $0xa4] sm:$0x1] %v278_v60  ;;  %v13095_v23 = vpop.permute.xlu0 %3306 }
 0x12e   : > { %v1398_v51 = vld [vmem:[#allocation2 + $0x94] sm:$0xf]  ;;  %732 = vst [vmem:[#allocation2 + $0x98] sm:$0x1] %v731_v44  ;;  %v536_v50 = vor.u32 %v534_v47, %v533_v38  ;;  %v537_v28 = vrot.slane %v533_v38, 4  ;;  %v3387_v43 = vsel %vm3377_vm7, %v3343_v22, %v12905_v49  ;;  %v3422_v54 = vsel %vm3410_vm8, %v3389_v46, %v12975_v13 }
 0x12f   : > { %v1397_v21 = vld [vmem:[#allocation2 + $0x90] sm:$0xf]  ;;  %v1701_v31 = vshrl.u32 %v1398_v51, 16  ;;  %v1697_v35 = vshll.u32 %v1398_v51, 16  ;;  %2980 = vrot.lane.b32.xlu0 %v10105_v4, %s11835_s8  ;;  %v544_v18 = vor.u32 %v542_v61, %v541_v34  ;;  %v13087_v16 = vld [vmem:[#allocation2 + $0x94] sm:$0xf]  ;;  %v3420_v27 = vsel %vm3410_vm8, %v3387_v43, %v12934_v30 }
 0x130   : > { %v1818_v40 = vld [vmem:[#allocation2 + $0x90] sm:$0xe]  ;;  %v1688_v45 = vshrl.u32 %v1397_v21, 16  ;;  %v1691_v58 = vshll.u32 %v1397_v21, 16  ;;  %v10090_v25 = vcombine.low %v1397_v21, %v1398_v51  ;;  %v1950_v33 = vrot.slane %v1398_v51, 5 }
 0x131   : > { %v10010_v55 = vrot.slane %v1818_v40, 9  ;;  %v2004_v59 = vld [vmem:[#allocation2 + $0x90] sm:$0xf]  ;;  %v1699_v15 = vrot.slane %v1697_v35, 5  ;;  %v1703_v49 = vrot.slane %v1701_v31, 4  ;;  %v545_v52 = vsel %vm11981_vm12, %v537_v28, %v544_v18 }
 0x132   : > { %v733_v26 = vld [vmem:[#allocation2 + $0x9c] sm:$0xf]  ;;  %v1690_v53 = vrot.slane %v1688_v45, 4  ;;  %v1693_v0 = vrot.slane %v1691_v58, 5  ;;  %2902 = vrot.lane.b32.xlu1 %v10090_v25, %s11830_s30  ;;  %736 = vst.msk [vmem:[#allocation2 + $0xa0] sm:$0xf] %vm170_vm0, %v545_v52  ;;  %v10137_v37 = vcombine.low %v2004_v59, %v13087_v16  ;;  %v13110_v11 = vsel %vm3443_vm9, %v3422_v54, %v13012_v56  ;;  %v13121_v56 = vpop.permute.xlu0 %2796 }
 0x133   : > { %v734_v13 = vsel %vm11975_vm11, %v536_v50, %v733_v26  ;;  %v1704_v20 = vor.u32 %v1703_v49, %v1699_v15  ;;  %v1952_v57 = vrot.slane %v1950_v33, 4  ;;  %3060 = vrot.lane.b32.xlu0 %v10121_v36, %s11833_s6  ;;  %v546_v6 = vrot.slane %v541_v34, 4  ;;  %v785_v7 = vld [vmem:[#allocation2 + $0x90] sm:$0xf]  ;;  %v13119_v50 = vpop.permute.xlu1 %2716 }
 0x134   : > { %735 = vst [vmem:[#allocation2 + $0x9c] sm:$0xf] %v734_v13  ;;  %v2273_v62 = vshrl.u32 %v2004_v59, 16  ;;  %v1694_v41 = vor.u32 %v1693_v0, %v1690_v53  ;;  %v2276_v12 = vshll.u32 %v2004_v59, 16  ;;  %v2286_v47 = vshrl.u32 %v13087_v16, 16 }
 0x135   : > { %v1418_v14 = vld [vmem:[#allocation2 + $0x98] sm:$0x1]  ;;  %v1705_v17 = vrot.slane %v1704_v20, 4  ;;  %v1951_v61 = vsel %vm11969_vm10, %v10010_v55, %v1950_v33  ;;  %v737_v19 = vld [vmem:[#allocation2 + $0xa4] sm:$0x1]  ;;  %v2282_v60 = vshll.u32 %v13087_v16, 16  ;;  %v13131_v45 = vsel %vm3443_vm9, %v3420_v27, %v12958_v10 }
 0x136   : > { %v2275_v30 = vrot.slane %v2273_v62, 4  ;;  %v1695_v22 = vrot.slane %v1694_v41, 4  ;;  %v1707_v38 = vshll.u32 %v1418_v14, 16  ;;  %v1953_v46 = vrot.slane %v1418_v14, 5  ;;  %v13112_v4 = vld [vmem:[#allocation2 + $0x98] sm:$0x1] }
 0x137   : > { %v2278_v44 = vrot.slane %v2276_v12, 5  ;;  %3156 = vrot.lane.b32.xlu0 %v10137_v37, %s11831_s4  ;;  %v738_v34 = vsel %vm11915_vm3, %v546_v6, %v737_v19  ;;  %v2288_v51 = vrot.slane %v2286_v47, 4  ;;  %v2292_v36 = vshll.u32 %v13112_v4, 16  ;;  %v13137_v53 = vld [vmem:[#allocation2 + $0x94] sm:$0xf]  ;;  %v13144_v12 = vpop.permute.xlu1 %2718  ;;  %v13146_v47 = vpop.permute.xlu0 %2892 }
 0x138   : > { %v1700_v28 = vsel %vm12056_vm15, %v1695_v22, %v1699_v15  ;;  %v1709_v43 = vrot.slane %v1707_v38, 5  ;;  %v1954_v21 = vsel %vm11969_vm10, %v1952_v57, %v1953_v46  ;;  %739 = vst [vmem:[#allocation2 + $0xa4] sm:$0x1] %v738_v34  ;;  %v2284_v18 = vrot.slane %v2282_v60, 5  ;;  %v13141_v20 = vld [vmem:[#allocation2 + $0x98] sm:$0x1] }
 0x139   : > { %v2279_v31 = vor.u32 %v2278_v44, %v2275_v30  ;;  %v10122_v35 = vcombine.low %v1951_v61, %v1954_v21  ;;  %v13127_v40 = vld [vmem:[#allocation2 + $0xa0] sm:$0xf]  ;;  %v1101_v54 = vshrl.u32 %v785_v7, 16  ;;  %v2294_v26 = vrot.slane %v2292_v36, 5  ;;  %v2426_v44 = vld [vmem:[#allocation2 + $0x90] sm:$0xe] }
 0x13a   : > { %v1710_v58 = vsel %vm12056_vm15, %v1705_v17, %v1709_v43  ;;  %v2310_v55 = vshrl.u32 %v13127_v40, 16  ;;  %v2306_v59 = vshll.u32 %v13127_v40, 16  ;;  %v2289_v27 = vor.u32 %v2288_v51, %v2284_v18 }
 0x13b   : > { %v2006_v25 = vld [vmem:[#allocation2 + $0x9c] sm:$0xf]  ;;  %v2280_v15 = vrot.slane %v2279_v31, 4  ;;  %v10106_v49 = vcombine.low %v1700_v28, %v1710_v58  ;;  %v1103_v62 = vrot.slane %v1101_v54, 4  ;;  %v1104_v41 = vshll.u32 %v785_v7, 16 }
 0x13c   : > { %v2297_v33 = vshrl.u32 %v2006_v25, 16  ;;  %v2300_v52 = vshll.u32 %v2006_v25, 16  ;;  %v2308_v0 = vrot.slane %v2306_v59, 5  ;;  %v2312_v13 = vrot.slane %v2310_v55, 4  ;;  %v787_v31 = vld [vmem:[#allocation2 + $0x9c] sm:$0xf] }
 0x13d   : > { %v2285_v10 = vsel %vm12056_vm15, %v2280_v15, %v2284_v18  ;;  %2982 = vrot.lane.b32.xlu1 %v10106_v49, %s11835_s8  ;;  %v2290_v14 = vrot.slane %v2289_v27, 4  ;;  %v1110_v17 = vshll.u32 %v13137_v53, 16  ;;  %v1114_v61 = vshrl.u32 %v13137_v53, 16 }
 0x13e   : > { %v2299_v57 = vrot.slane %v2297_v33, 4  ;;  %v2302_v6 = vrot.slane %v2300_v52, 5  ;;  %v2313_v37 = vor.u32 %v2312_v13, %v2308_v0  ;;  %v10138_v30 = vcombine.low %v2006_v25, %v13127_v40  ;;  %v13163_v33 = vpop.permute.xlu1 %2798  ;;  %v13165_v52 = vpop.permute.xlu0 %2972 }
 0x13f   : > { %v13151_v19 = vld [vmem:[#allocation2 + $0xa4] sm:$0x1]  ;;  %v1106_v38 = vrot.slane %v1104_v41, 5  ;;  %v1120_v46 = vshll.u32 %v13141_v20, 16  ;;  %v2295_v60 = vsel %vm12056_vm15, %v2290_v14, %v2294_v26  ;;  %v1112_v51 = vrot.slane %v1110_v17, 5 }
 0x140   : > { %v2303_v22 = vor.u32 %v2302_v6, %v2299_v57  ;;  %v2314_v7 = vrot.slane %v2313_v37, 4  ;;  %v2316_v34 = vshll.u32 %v13151_v19, 16  ;;  %v10153_v28 = vcombine.low %v2285_v10, %v2295_v60  ;;  %v806_v10 = vld [vmem:[#allocation2 + $0xa4] sm:$0x1]  ;;  %v2427_v17 = vld [vmem:[#allocation2 + $0x9c] sm:$0xe] }
 0x141   : > { %3062 = vrot.lane.b32.xlu1 %v10122_v35, %s11833_s6  ;;  %v1107_v43 = vor.u32 %v1106_v38, %v1103_v62  ;;  %v1116_v21 = vrot.slane %v1114_v61, 4  ;;  %v1122_v54 = vrot.slane %v1120_v46, 5  ;;  %v10025_v58 = vrot.slane %v2426_v44, 9  ;;  %v788_v35 = vld [vmem:[#allocation2 + $0xa0] sm:$0xf] }
 0x142   : > { %v2304_v36 = vrot.slane %v2303_v22, 4  ;;  %v2318_v18 = vrot.slane %v2316_v34, 5  ;;  %v2552_v25 = vrot.slane %v13087_v16, 5  ;;  %3236 = vrot.lane.b32.xlu0 %v10153_v28, %s11836_s9  ;;  %v2555_v49 = vrot.slane %v13112_v4, 5 }
 0x143   : > { %v1108_v59 = vrot.slane %v1107_v43, 4  ;;  %v1117_v15 = vor.u32 %v1116_v21, %v1112_v51  ;;  %v1128_v6 = vshll.u32 %v787_v31, 16  ;;  %v1134_v37 = vshll.u32 %v788_v35, 16  ;;  %v1208_v21 = vld [vmem:[#allocation2 + $0x90] sm:$0xe] }
 0x144   : > { %v2309_v55 = vsel %vm12056_vm15, %v2304_v36, %v2308_v0  ;;  %v2319_v26 = vsel %vm12056_vm15, %v2314_v7, %v2318_v18  ;;  %v2553_v16 = vsel %vm11969_vm10, %v10025_v58, %v2552_v25  ;;  %v2554_v13 = vrot.slane %v2552_v25, 4  ;;  %v13186_v18 = vpop.permute.xlu0 %3052 }
 0x145   : > { %v1125_v0 = vshrl.u32 %v787_v31, 16  ;;  %3158 = vrot.lane.b32.xlu1 %v10138_v30, %s11831_s4  ;;  %v10154_v27 = vcombine.low %v2309_v55, %v2319_v26  ;;  %v1113_v4 = vsel %vm12056_vm15, %v1108_v59, %v1112_v51  ;;  %v1118_v57 = vrot.slane %v1117_v15, 4  ;;  %v1209_v30 = vld [vmem:[#allocation2 + $0x9c] sm:$0xe]  ;;  %v13184_v31 = vpop.permute.xlu1 %2894 }
 0x146   : > { %v2556_v62 = vsel %vm11969_vm10, %v2554_v13, %v2555_v49  ;;  %v1138_v14 = vshrl.u32 %v788_v35, 16  ;;  %v1130_v38 = vrot.slane %v1128_v6, 5  ;;  %v1144_v46 = vshll.u32 %v806_v10, 16  ;;  %v224_v13 = vld [vmem:[#allocation2 + $0xa8] sm:$0x1] }
 0x147   : > { %v1127_v41 = vrot.slane %v1125_v0, 4  ;;  %v1123_v61 = vsel %vm12056_vm15, %v1118_v57, %v1122_v54  ;;  %v10169_v22 = vcombine.low %v2553_v16, %v2556_v62  ;;  %v1136_v7 = vrot.slane %v1134_v37, 5  ;;  %v319_v6 = vld [vmem:[%s11950_s28 + $0x6c] sm:$0xf]  ;;  %v1399_v62 = vld [vmem:[#allocation2 + $0x9c] sm:$0xf] }
 0x148   : > { %v10059_v44 = vcombine.low %v1113_v4, %v1123_v61  ;;  %v1140_v34 = vrot.slane %v1138_v14, 4  ;;  %v3488_v60 = vsel %vm3476_vm13, %v13110_v11, %v13036_v5  ;;  %v1359_v36 = vrot.slane %v806_v10, 5  ;;  %v13213_v61 = vld [vmem:[#allocation2 + $0xa0] sm:$0xf] }
 0x149   : > { %3238 = vrot.lane.b32.xlu1 %v10154_v27, %s11836_s9  ;;  %3316 = vrot.lane.b32.xlu0 %v10169_v22, %s11834_s7  ;;  %v1131_v51 = vor.u32 %v1130_v38, %v1127_v41  ;;  %v10026_v28 = vrot.slane %v2427_v17, 9  ;;  %v2559_v43 = vrot.slane %v13127_v40, 5  ;;  %v1146_v58 = vrot.slane %v1144_v46, 5  ;;  %v318_v27 = vld [vmem:[%s11950_s28 + $0x68] sm:$0xf]  ;;  %v13217_v38 = vpop.permute.xlu0 %3148 }
 0x14a   : > { %v1141_v54 = vor.u32 %v1140_v34, %v1136_v7  ;;  %v2562_v25 = vrot.slane %v13151_v19, 5  ;;  %v9996_v5 = vrot.slane %v1209_v30, 9  ;;  %v1356_v15 = vrot.slane %v788_v35, 5 }
 0x14b   : > { %v1132_v11 = vrot.slane %v1131_v51, 4  ;;  %v2560_v55 = vsel %vm11969_vm10, %v10026_v28, %v2559_v43  ;;  %v2561_v59 = vrot.slane %v2559_v43, 4  ;;  %v1352_v40 = vrot.slane %v13141_v20, 5 }
 0x14c   : > { %v1142_v49 = vrot.slane %v1141_v54, 4  ;;  %v9995_v26 = vrot.slane %v1208_v21, 9  ;;  %v1349_v16 = vrot.slane %v13137_v53, 5  ;;  %v1357_v0 = vsel %vm11969_vm10, %v9996_v5, %v1356_v15  ;;  %v13215_v22 = vpop.permute.xlu1 %2974 }
 0x14d   : > { %2728 = vrot.lane.b32.xlu1 %v10059_v44, %s11832_s5  ;;  %v1137_v19 = vsel %vm12056_vm15, %v1132_v11, %v1136_v7  ;;  %v2563_v10 = vsel %vm11969_vm10, %v2561_v59, %v2562_v25  ;;  %v1358_v35 = vrot.slane %v1356_v15, 4  ;;  %v3486_v37 = vsel %vm3476_vm13, %v13131_v45, %v12977_v48 }
 0x14e   : > { %v1147_v20 = vsel %vm12056_vm15, %v1142_v49, %v1146_v58  ;;  %v10170_v4 = vcombine.low %v2560_v55, %v2563_v10  ;;  %v1350_v53 = vsel %vm11969_vm10, %v9995_v26, %v1349_v16  ;;  %v1351_v57 = vrot.slane %v1349_v16, 4  ;;  %v1419_v55 = vld [vmem:[#allocation2 + $0xa4] sm:$0x1] }
 0x14f   : > { %v10060_v41 = vcombine.low %v1137_v19, %v1147_v20  ;;  %v1360_v14 = vsel %vm11969_vm10, %v1358_v35, %v1359_v36  ;;  %v225_v17 = vsel %vm11915_vm3, 0, %v224_v13  ;;  %v548_v48 = vshrl.u32 %v318_v27, 16  ;;  %v280_v36 = vld [vmem:[#allocation2 + $0xb0] sm:$0x1]  ;;  %v13241_v19 = vpop.permute.xlu0 %3228  ;;  %v227_v20 = vld [vmem:[#allocation2 + $0xb4] sm:$0x1] }
 0x150   : > { %3318 = vrot.lane.b32.xlu0 %v10170_v4, %s11834_s7  ;;  %v10076_v46 = vcombine.low %v1357_v0, %v1360_v14  ;;  %v1353_v30 = vsel %vm11969_vm10, %v1351_v57, %v1352_v40  ;;  %226 = vst [vmem:[#allocation2 + $0xa8] sm:$0x1] %v225_v17  ;;  %v551_v45 = vshll.u32 %v318_v27, 16  ;;  %v556_v7 = vshrl.u32 %v319_v6, 16  ;;  %v13239_v13 = vpop.permute.xlu1 %3054  ;;  %v320_v17 = vld [vmem:[%s11950_s28 + $0x70] sm:$0xf] }
 0x151   : > { %2730 = vrot.lane.b32.xlu1 %v10060_v41, %s11832_s5  ;;  %v10075_v44 = vcombine.low %v1350_v53, %v1353_v30  ;;  %v559_v34 = vshll.u32 %v319_v6, 16  ;;  %v1712_v51 = vshrl.u32 %v1399_v62, 16  ;;  %v3521_v28 = vsel %vm3509_vm4, %v3488_v60, %v13067_v42  ;;  %v1819_v60 = vld [vmem:[#allocation2 + $0x9c] sm:$0xe]  ;;  %v11696_v41 = vld [vmem:[#allocation2 + $0x48] sm:$0xf] }
 0x152   : > { %v550_v43 = vrot.slane %v548_v48, 7  ;;  %v1715_v21 = vshll.u32 %v1399_v62, 16  ;;  %v1725_v54 = vshrl.u32 %v13213_v61, 16  ;;  %v3519_v58 = vsel %vm3509_vm4, %v3486_v37, %v13014_v2  ;;  %v11697_v37 = vld [vmem:[#allocation2 + $0x4c] sm:$0xf] }
 0x153   : > { %v13228_v25 = vrot.slane %v556_v7, 7  ;;  %v1714_v5 = vrot.slane %v1712_v51, 4  ;;  %v10091_v11 = vcombine.low %v1399_v62, %v13213_v61  ;;  %v281_v42 = vsel %vm11943_vm6, 0, %v280_v36  ;;  %v11698_v7 = vld [vmem:[#allocation2 + $0x54] sm:$0xf] }
 0x154   : > { %2808 = vrot.lane.b32.xlu0 %v10075_v44, %s11829_s29  ;;  %v553_v59 = vor.u32 %v551_v45, %v550_v43  ;;  %v554_v15 = vrot.slane %v550_v43, 4  ;;  %v1717_v40 = vrot.slane %v1715_v21, 5  ;;  %v3552_v2 = vsel %vm3542_vm5, %v3519_v58, %v13038_v3  ;;  %282 = vst [vmem:[#allocation2 + $0xb0] sm:$0x1] %v281_v42  ;;  %v321_v45 = vld [vmem:[%s11950_s28 + $0x74] sm:$0xf] }
 0x155   : > { %2810 = vrot.lane.b32.xlu1 %v10076_v46, %s11829_s29  ;;  %v561_v49 = vor.u32 %v559_v34, %v13228_v25  ;;  %v1721_v26 = vshll.u32 %v13213_v61, 16  ;;  %v1727_v16 = vrot.slane %v1725_v54, 4  ;;  %v3554_v10 = vsel %vm3542_vm5, %v3521_v28, %v13093_v24  ;;  %v11699_v34 = vld [vmem:[#allocation2 + $0x58] sm:$0xf] }
 0x156   : > { %v1718_v0 = vor.u32 %v1717_v40, %v1714_v5  ;;  %v1731_v35 = vshll.u32 %v1419_v55, 16  ;;  %v3585_v27 = vsel %vm3575_vm14, %v3552_v2, %v13069_v9  ;;  %v10011_v57 = vrot.slane %v1819_v60, 9  ;;  %v13269_v5 = vpop.permute.xlu1 %3150 }
 0x157   : > { %v562_v3 = vsel %vm11981_vm12, %v554_v15, %v561_v49  ;;  %v740_v4 = vld [vmem:[#allocation2 + $0xa8] sm:$0xf]  ;;  %v1723_v53 = vrot.slane %v1721_v26, 5  ;;  %v1957_v6 = vrot.slane %v13213_v61, 5  ;;  %10925 = vmatprep.mubr.msk.bf16.mxu0 %vm16580_vm2, %v3585_v27  ;;  %v563_v24 = vrot.slane %v13228_v25, 4 }
 0x158   : > { %v741_v62 = vsel %vm11975_vm11, %v553_v59, %v740_v4  ;;  %743 = vst.msk [vmem:[#allocation2 + $0xac] sm:$0xf] %vm170_vm0, %v562_v3  ;;  %2904 = vrot.lane.b32.xlu0 %v10091_v11, %s11830_s30  ;;  %v1719_v9 = vrot.slane %v1718_v0, 4  ;;  %v10037_v14 = vcombine.low %v11696_v41, %v11697_v37  ;;  %v1733_v61 = vrot.slane %v1731_v35, 5  ;;  %v283_v25 = vld [vmem:[#allocation2 + $0xbc] sm:$0x1]  ;;  %v13271_v11 = vpop.permute.xlu0 %3308 }
 0x159   : > { %742 = vst [vmem:[#allocation2 + $0xa8] sm:$0xf] %v741_v62  ;;  %v1728_v46 = vor.u32 %v1727_v16, %v1723_v53  ;;  %v1959_v30 = vrot.slane %v1957_v6, 4  ;;  %v1960_v48 = vrot.slane %v1419_v55, 5  ;;  %v13260_v44 = vsel %vm11969_vm10, %v10011_v57, %v1957_v6 }
 0x15a   : > { %v10038_v51 = vcombine.low %v11698_v7, %v11699_v34  ;;  %v3587_v36 = vsel %vm3575_vm14, %v3554_v10, %v13095_v23  ;;  %v228_v28 = vsel %vm11915_vm3, 0, %v227_v20  ;;  %v1724_v43 = vsel %vm12056_vm15, %v1719_v9, %v1723_v53 }
 0x15b   : > { %v1729_v21 = vrot.slane %v1728_v46, 4  ;;  %229 = vst [vmem:[#allocation2 + $0xb4] sm:$0x1] %v228_v28  ;;  %v565_v54 = vshrl.u32 %v320_v17, 16  ;;  %v568_v58 = vshll.u32 %v320_v17, 16  ;;  %10926 = vmatmul.mubr.msk.bf16.gmra.mrb[8].mxu0 %vm16580_vm2, %v3587_v36  ;;  %v1961_v23 = vsel %vm11969_vm10, %v1959_v30, %v1960_v48 }
 0x15c   : > { %v744_v55 = vld [vmem:[#allocation2 + $0xb0] sm:$0x1]  ;;  %v3352_v59 = vsel %vm3328_vm1, %v10038_v51, %v13144_v12  ;;  %v573_v15 = vshrl.u32 %v321_v45, 16  ;;  %v576_v40 = vshll.u32 %v321_v45, 16  ;;  %v3349_v26 = vsel %vm3328_vm1, %v10037_v14, %v13119_v50  ;;  %v13297_v14 = vpop.permute.xlu1 %3230 }
 0x15d   : > { %v745_v42 = vsel %vm11915_vm3, %v563_v24, %v744_v55  ;;  %v1734_v60 = vsel %vm12056_vm15, %v1729_v21, %v1733_v61  ;;  %v567_v49 = vrot.slane %v565_v54, 7  ;;  %v284_v10 = vsel %vm11943_vm6, 0, %v283_v25  ;;  %v13299_v17 = vpop.permute.xlu0 %3310 }
 0x15e   : > { %746 = vst [vmem:[#allocation2 + $0xb0] sm:$0x1] %v745_v42  ;;  %v10107_v2 = vcombine.low %v1724_v43, %v1734_v60  ;;  %v575_v16 = vrot.slane %v573_v15, 7  ;;  %v10123_v12 = vcombine.low %v13260_v44, %v1961_v23  ;;  %v13288_v20 = vsel %vm3377_vm7, %v3352_v59, %v13163_v33  ;;  %285 = vst [vmem:[#allocation2 + $0xbc] sm:$0x1] %v284_v10 }
 0x15f   : > { %v1402_v0 = vld [vmem:[#allocation2 + $0xac] sm:$0xf]  ;;  %v570_v35 = vor.u32 %v568_v58, %v567_v49  ;;  %v571_v27 = vrot.slane %v567_v49, 4  ;;  %v13295_v24 = vsel %vm3377_vm7, %v3349_v26, %v13121_v56 }
 0x160   : > { %v1401_v3 = vld [vmem:[#allocation2 + $0xa8] sm:$0xf]  ;;  %v1749_v4 = vshrl.u32 %v1402_v0, 16  ;;  %v1745_v53 = vshll.u32 %v1402_v0, 16  ;;  %2984 = vrot.lane.b32.xlu0 %v10107_v2, %s11835_s8  ;;  %v578_v57 = vor.u32 %v576_v40, %v575_v16  ;;  %v13291_v6 = vld [vmem:[#allocation2 + $0xac] sm:$0xf] }
 0x161   : > { %v1820_v50 = vld [vmem:[#allocation2 + $0xa8] sm:$0xe]  ;;  %v1736_v62 = vshrl.u32 %v1401_v3, 16  ;;  %v1739_v9 = vshll.u32 %v1401_v3, 16  ;;  %v10092_v41 = vcombine.low %v1401_v3, %v1402_v0  ;;  %v1964_v30 = vrot.slane %v1402_v0, 5  ;;  %v13321_v0 = vpop.permute.xlu1 %2720 }
 0x162   : > { %v10012_v37 = vrot.slane %v1820_v50, 9  ;;  %v2008_v33 = vld [vmem:[#allocation2 + $0xa8] sm:$0xf]  ;;  %v1747_v46 = vrot.slane %v1745_v53, 5  ;;  %v1751_v61 = vrot.slane %v1749_v4, 4  ;;  %v579_v48 = vsel %vm11981_vm12, %v571_v27, %v578_v57 }
 0x163   : > { %v747_v45 = vld [vmem:[#allocation2 + $0xb4] sm:$0xf]  ;;  %v1738_v44 = vrot.slane %v1736_v62, 4  ;;  %v1741_v7 = vrot.slane %v1739_v9, 5  ;;  %2906 = vrot.lane.b32.xlu1 %v10092_v41, %s11830_s30  ;;  %v580_v56 = vrot.slane %v575_v16, 4  ;;  %v1966_v28 = vrot.slane %v1964_v30, 4 }
 0x164   : > { %v748_v34 = vsel %vm11975_vm11, %v570_v35, %v747_v45  ;;  %750 = vst.msk [vmem:[#allocation2 + $0xb8] sm:$0xf] %vm170_vm0, %v579_v48  ;;  %v1752_v51 = vor.u32 %v1751_v61, %v1747_v46  ;;  %v13309_v36 = vsel %vm11969_vm10, %v10012_v37, %v1964_v30  ;;  %3064 = vrot.lane.b32.xlu0 %v10123_v12, %s11833_s6  ;;  %v2321_v43 = vshrl.u32 %v2008_v33, 16  ;;  %v13319_v10 = vld [vmem:[#allocation2 + $0xa8] sm:$0xf]  ;;  %v13323_v12 = vpop.permute.xlu0 %2800 }
 0x165   : > { %749 = vst [vmem:[#allocation2 + $0xb4] sm:$0xf] %v748_v34  ;;  %v1420_v21 = vld [vmem:[#allocation2 + $0xb0] sm:$0x1]  ;;  %v1742_v54 = vor.u32 %v1741_v7, %v1738_v44  ;;  %v2324_v58 = vshll.u32 %v2008_v33, 16  ;;  %v2334_v25 = vshrl.u32 %v13291_v6, 16  ;;  %v10139_v55 = vcombine.low %v2008_v33, %v13291_v6 }
 0x166   : > { %v13314_v23 = vld [vmem:[#allocation2 + $0xb0] sm:$0x1]  ;;  %v1753_v59 = vrot.slane %v1752_v51, 4  ;;  %v1755_v15 = vshll.u32 %v1420_v21, 16  ;;  %v1967_v40 = vrot.slane %v1420_v21, 5  ;;  %v2323_v42 = vrot.slane %v2321_v43, 4 }
 0x167   : > { %v751_v60 = vld [vmem:[#allocation2 + $0xbc] sm:$0x1]  ;;  %v1743_v49 = vrot.slane %v1742_v54, 4  ;;  %v2326_v2 = vrot.slane %v2324_v58, 5  ;;  %v2330_v16 = vshll.u32 %v13291_v6, 16  ;;  %v2336_v3 = vrot.slane %v2334_v25, 4  ;;  %v13348_v25 = vpop.permute.xlu1 %2722 }
 0x168   : > { %v752_v26 = vsel %vm11915_vm3, %v580_v56, %v751_v60  ;;  %v1757_v35 = vrot.slane %v1755_v15, 5  ;;  %v1968_v27 = vsel %vm11969_vm10, %v1966_v28, %v1967_v40  ;;  %3160 = vrot.lane.b32.xlu0 %v10139_v55, %s11831_s4  ;;  %v2340_v4 = vshll.u32 %v13314_v23, 16  ;;  %v13343_v28 = vld [vmem:[#allocation2 + $0xb0] sm:$0x1]  ;;  %v13350_v55 = vpop.permute.xlu0 %2896 }
 0x169   : > { %753 = vst [vmem:[#allocation2 + $0xbc] sm:$0x1] %v752_v26  ;;  %v1748_v53 = vsel %vm12056_vm15, %v1743_v49, %v1747_v46  ;;  %v10124_v50 = vcombine.low %v13309_v36, %v1968_v27  ;;  %v2327_v57 = vor.u32 %v2326_v2, %v2323_v42  ;;  %v2332_v62 = vrot.slane %v2330_v16, 5  ;;  %v13341_v36 = vld [vmem:[#allocation2 + $0xac] sm:$0xf] }
 0x16a   : > { %v1758_v9 = vsel %vm12056_vm15, %v1753_v59, %v1757_v35  ;;  %v2342_v37 = vrot.slane %v2340_v4, 5  ;;  %v1149_v33 = vshrl.u32 %v13319_v10, 16  ;;  %v1152_v61 = vshll.u32 %v13319_v10, 16 }
 0x16b   : > { %v13334_v41 = vld [vmem:[#allocation2 + $0xb8] sm:$0xf]  ;;  %v10108_v30 = vcombine.low %v1748_v53, %v1758_v9  ;;  %v2328_v44 = vrot.slane %v2327_v57, 4  ;;  %v2337_v51 = vor.u32 %v2336_v3, %v2332_v62  ;;  %v1158_v2 = vshll.u32 %v13341_v36, 16  ;;  %v2428_v53 = vld [vmem:[#allocation2 + $0xa8] sm:$0xe] }
 0x16c   : > { %v2010_v48 = vld [vmem:[#allocation2 + $0xb4] sm:$0xf]  ;;  %v2358_v45 = vshrl.u32 %v13334_v41, 16  ;;  %v2354_v46 = vshll.u32 %v13334_v41, 16  ;;  %v1151_v58 = vrot.slane %v1149_v33, 4  ;;  %v1154_v42 = vrot.slane %v1152_v61, 5 }
 0x16d   : > { %v2345_v7 = vshrl.u32 %v2010_v48, 16  ;;  %v2348_v56 = vshll.u32 %v2010_v48, 16  ;;  %v10140_v34 = vcombine.low %v2010_v48, %v13334_v41  ;;  %2986 = vrot.lane.b32.xlu1 %v10108_v30, %s11835_s8  ;;  %v2333_v54 = vsel %vm12056_vm15, %v2328_v44, %v2332_v62 }
 0x16e   : > { %v2356_v43 = vrot.slane %v2354_v46, 5  ;;  %v2360_v21 = vrot.slane %v2358_v45, 4  ;;  %v2338_v40 = vrot.slane %v2337_v51, 4  ;;  %v1162_v26 = vshrl.u32 %v13341_v36, 16  ;;  %v13361_v46 = vld [vmem:[#allocation2 + $0xb4] sm:$0xf] }
 0x16f   : > { %v2347_v59 = vrot.slane %v2345_v7, 4  ;;  %v2350_v15 = vrot.slane %v2348_v56, 5  ;;  %v1168_v16 = vshll.u32 %v13343_v28, 16  ;;  %v1155_v4 = vor.u32 %v1154_v42, %v1151_v58  ;;  %v13366_v51 = vld [vmem:[#allocation2 + $0xb8] sm:$0xf] }
 0x170   : > { %v13352_v60 = vld [vmem:[#allocation2 + $0xbc] sm:$0x1]  ;;  %v2361_v49 = vor.u32 %v2360_v21, %v2356_v43  ;;  %v2343_v3 = vsel %vm12056_vm15, %v2338_v40, %v2342_v37  ;;  %v1160_v9 = vrot.slane %v1158_v2, 5  ;;  %v1164_v33 = vrot.slane %v1162_v26, 4  ;;  %v13370_v21 = vpop.permute.xlu0 %2976 }
 0x171   : > { %v2351_v35 = vor.u32 %v2350_v15, %v2347_v59  ;;  %v2364_v27 = vshll.u32 %v13352_v60, 16  ;;  %3066 = vrot.lane.b32.xlu1 %v10124_v50, %s11833_s6  ;;  %v10155_v62 = vcombine.low %v2333_v54, %v2343_v3  ;;  %v1156_v48 = vrot.slane %v1155_v4, 4  ;;  %v13368_v50 = vpop.permute.xlu1 %2802  ;;  %v2429_v15 = vld [vmem:[#allocation2 + $0xb4] sm:$0xe] }
 0x172   : > { %v2362_v57 = vrot.slane %v2361_v49, 4  ;;  %v1170_v45 = vrot.slane %v1168_v16, 5  ;;  %v1165_v44 = vor.u32 %v1164_v33, %v1160_v9  ;;  %v10027_v7 = vrot.slane %v2428_v53, 9 }
 0x173   : > { %v2352_v61 = vrot.slane %v2351_v35, 4  ;;  %v2366_v30 = vrot.slane %v2364_v27, 5  ;;  %3240 = vrot.lane.b32.xlu0 %v10155_v62, %s11836_s9  ;;  %v2566_v37 = vrot.slane %v13291_v6, 5  ;;  %v2569_v56 = vrot.slane %v13314_v23, 5  ;;  %v13381_v23 = vld [vmem:[#allocation2 + $0xbc] sm:$0x1] }
 0x174   : > { %v3426_v59 = vsel %vm3410_vm8, %v13288_v20, %v13184_v31  ;;  %v1161_v6 = vsel %vm12056_vm15, %v1156_v48, %v1160_v9  ;;  %v1166_v42 = vrot.slane %v1165_v44, 4  ;;  %v1173_v2 = vshrl.u32 %v13361_v46, 16  ;;  %v1211_v62 = vld [vmem:[#allocation2 + $0xb4] sm:$0xe]  ;;  %v1210_v48 = vld [vmem:[#allocation2 + $0xa8] sm:$0xe]  ;;  %v13402_v44 = vpop.permute.xlu0 %3056 }
 0x175   : > { %v2357_v54 = vsel %vm12056_vm15, %v2352_v61, %v2356_v43  ;;  %v2367_v58 = vsel %vm12056_vm15, %v2362_v57, %v2366_v30  ;;  %3162 = vrot.lane.b32.xlu1 %v10140_v34, %s11831_s4  ;;  %v2567_v43 = vsel %vm11969_vm10, %v10027_v7, %v2566_v37  ;;  %v2568_v49 = vrot.slane %v2566_v37, 4 }
 0x176   : > { %v10156_v40 = vcombine.low %v2357_v54, %v2367_v58  ;;  %v1176_v26 = vshll.u32 %v13361_v46, 16  ;;  %v1182_v31 = vshll.u32 %v13366_v51, 16  ;;  %v1186_v20 = vshrl.u32 %v13366_v51, 16 }
 0x177   : > { %v1171_v16 = vsel %vm12056_vm15, %v1166_v42, %v1170_v45  ;;  %v2570_v34 = vsel %vm11969_vm10, %v2568_v49, %v2569_v56  ;;  %v1192_v35 = vshll.u32 %v13381_v23, 16  ;;  %v10028_v27 = vrot.slane %v2429_v15, 9  ;;  %v13400_v45 = vpop.permute.xlu1 %2898  ;;  %v230_v49 = vld [vmem:[#allocation2 + $0xc0] sm:$0x1] }
 0x178   : > { %v3424_v3 = vsel %vm3410_vm8, %v13295_v24, %v13146_v47  ;;  %v10171_v4 = vcombine.low %v2567_v43, %v2570_v34  ;;  %v1175_v53 = vrot.slane %v1173_v2, 4  ;;  %v1178_v57 = vrot.slane %v1176_v26, 5 }
 0x179   : > { %3242 = vrot.lane.b32.xlu1 %v10156_v40, %s11836_s9  ;;  %v10061_v9 = vcombine.low %v1161_v6, %v1171_v16  ;;  %v1184_v33 = vrot.slane %v1182_v31, 5  ;;  %v1188_v61 = vrot.slane %v1186_v20, 4  ;;  %v2573_v30 = vrot.slane %v13334_v41, 5  ;;  %v322_v20 = vld [vmem:[%s11950_s28 + $0x78] sm:$0xf] }
 0x17a   : > { %3320 = vrot.lane.b32.xlu0 %v10171_v4, %s11834_s7  ;;  %v3459_v47 = vsel %vm3443_vm9, %v3426_v59, %v13215_v22  ;;  %v1179_v24 = vor.u32 %v1178_v57, %v1175_v53  ;;  %v1194_v7 = vrot.slane %v1192_v35, 5  ;;  %v2576_v37 = vrot.slane %v13352_v60, 5  ;;  %v1403_v4 = vld [vmem:[#allocation2 + $0xb4] sm:$0xf]  ;;  %v13431_v57 = vpop.permute.xlu0 %3152 }
 0x17b   : > { %v1189_v56 = vor.u32 %v1188_v61, %v1184_v33  ;;  %v2574_v54 = vsel %vm11969_vm10, %v10028_v27, %v2573_v30  ;;  %v2575_v58 = vrot.slane %v2573_v30, 4  ;;  %v9998_v41 = vrot.slane %v1211_v62, 9  ;;  %v323_v27 = vld [vmem:[%s11950_s28 + $0x7c] sm:$0xf]  ;;  %v13429_v53 = vpop.permute.xlu1 %2978 }
 0x17c   : > { %v1180_v6 = vrot.slane %v1179_v24, 4  ;;  %v1370_v15 = vrot.slane %v13366_v51, 5  ;;  %v1373_v40 = vrot.slane %v13381_v23, 5  ;;  %v9997_v42 = vrot.slane %v1210_v48, 9 }
 0x17d   : > { %2732 = vrot.lane.b32.xlu1 %v10061_v9, %s11832_s5  ;;  %v1190_v22 = vrot.slane %v1189_v56, 4  ;;  %v2577_v60 = vsel %vm11969_vm10, %v2575_v58, %v2576_v37  ;;  %v1363_v59 = vrot.slane %v13341_v36, 5  ;;  %v1366_v43 = vrot.slane %v13343_v28, 5  ;;  %v286_v56 = vld [vmem:[#allocation2 + $0xc8] sm:$0x1] }
 0x17e   : > { %v1185_v2 = vsel %vm12056_vm15, %v1180_v6, %v1184_v33  ;;  %v10172_v26 = vcombine.low %v2574_v54, %v2577_v60  ;;  %v1371_v23 = vsel %vm11969_vm10, %v9998_v41, %v1370_v15  ;;  %v1372_v31 = vrot.slane %v1370_v15, 4  ;;  %v13440_v33 = vld [vmem:[#allocation2 + $0xb8] sm:$0xf]  ;;  %v1421_v60 = vld [vmem:[#allocation2 + $0xbc] sm:$0x1] }
 0x17f   : > { %v3457_v16 = vsel %vm3443_vm9, %v3424_v3, %v13165_v52  ;;  %v1195_v34 = vsel %vm12056_vm15, %v1190_v22, %v1194_v7  ;;  %v1364_v35 = vsel %vm11969_vm10, %v9997_v42, %v1363_v59  ;;  %v1365_v28 = vrot.slane %v1363_v59, 4 }
 0x180   : > { %v10062_v62 = vcombine.low %v1185_v2, %v1195_v34  ;;  %3322 = vrot.lane.b32.xlu0 %v10172_v26, %s11834_s7  ;;  %v3492_v9 = vsel %vm3476_vm13, %v3459_v47, %v13239_v13  ;;  %v1374_v52 = vsel %vm11969_vm10, %v1372_v31, %v1373_v40  ;;  %v231_v3 = vsel %vm11915_vm3, 0, %v230_v49  ;;  %v1821_v2 = vld [vmem:[#allocation2 + $0xb4] sm:$0xe]  ;;  %v13456_v26 = vpop.permute.xlu1 %3058 }
 0x181   : > { %v10078_v61 = vcombine.low %v1371_v23, %v1374_v52  ;;  %v1367_v30 = vsel %vm11969_vm10, %v1365_v28, %v1366_v43  ;;  %232 = vst [vmem:[#allocation2 + $0xc0] sm:$0x1] %v231_v3  ;;  %v582_v48 = vshrl.u32 %v322_v20, 16  ;;  %v585_v24 = vshll.u32 %v322_v20, 16 }
 0x182   : > { %2734 = vrot.lane.b32.xlu1 %v10062_v62, %s11832_s5  ;;  %v10077_v7 = vcombine.low %v1364_v35, %v1367_v30  ;;  %v590_v37 = vshrl.u32 %v323_v27, 16  ;;  %v593_v13 = vshll.u32 %v323_v27, 16  ;;  %v1760_v47 = vshrl.u32 %v1403_v4, 16 }
 0x183   : > { %v3490_v54 = vsel %vm3476_vm13, %v3457_v16, %v13186_v18  ;;  %v584_v58 = vrot.slane %v582_v48, 7  ;;  %v1763_v41 = vshll.u32 %v1403_v4, 16  ;;  %v1773_v6 = vshrl.u32 %v13440_v33, 16  ;;  %v13480_v48 = vld [vmem:[#allocation2 + $0xd0] sm:$0xf] }
 0x184   : > { %2812 = vrot.lane.b32.xlu0 %v10077_v7, %s11829_s29  ;;  %v3523_v15 = vsel %vm3509_vm4, %v3490_v54, %v13217_v38  ;;  %v13451_v40 = vrot.slane %v590_v37, 7  ;;  %v1762_v42 = vrot.slane %v1760_v47, 4  ;;  %v10093_v22 = vcombine.low %v1403_v4, %v13440_v33  ;;  %v233_v4 = vld [vmem:[#allocation2 + $0xcc] sm:$0x1]  ;;  %v11700_v47 = vld [vmem:[#allocation2 + $0x60] sm:$0xf] }
 0x185   : > { %v587_v59 = vor.u32 %v585_v24, %v584_v58  ;;  %v588_v43 = vrot.slane %v584_v58, 4  ;;  %v1765_v49 = vrot.slane %v1763_v41, 5  ;;  %v287_v18 = vsel %vm11943_vm6, 0, %v286_v56  ;;  %v13458_v23 = vpop.permute.xlu0 %3232  ;;  %v11701_v56 = vld [vmem:[#allocation2 + $0x64] sm:$0xf] }
 0x186   : > { %2814 = vrot.lane.b32.xlu1 %v10078_v61, %s11829_s29  ;;  %v595_v38 = vor.u32 %v593_v13, %v13451_v40  ;;  %v3556_v31 = vsel %vm3542_vm5, %v3523_v15, %v13241_v19  ;;  %288 = vst [vmem:[#allocation2 + $0xc8] sm:$0x1] %v287_v18  ;;  %v1769_v20 = vshll.u32 %v13440_v33, 16  ;;  %v1775_v16 = vrot.slane %v1773_v6, 4  ;;  %v289_v13 = vld [vmem:[#allocation2 + $0xd4] sm:$0x1]  ;;  %v13486_v15 = vpop.permute.xlu1 %3154 }
 0x187   : > { %v3525_v34 = vsel %vm3509_vm4, %v3492_v9, %v13269_v5  ;;  %v1766_v35 = vor.u32 %v1765_v49, %v1762_v42  ;;  %v1779_v28 = vshll.u32 %v1421_v60, 16  ;;  %v3589_v27 = vsel %vm3575_vm14, %v3556_v31, %v13271_v11  ;;  %v11702_v58 = vld [vmem:[#allocation2 + $0x6c] sm:$0xf] }
 0x188   : > { %v596_v62 = vsel %vm11981_vm12, %v588_v43, %v595_v38  ;;  %v754_v52 = vld [vmem:[#allocation2 + $0xc0] sm:$0xf]  ;;  %2908 = vrot.lane.b32.xlu0 %v10093_v22, %s11830_s30  ;;  %v1771_v19 = vrot.slane %v1769_v20, 5  ;;  %v10013_v3 = vrot.slane %v1821_v2, 9  ;;  %v1971_v61 = vrot.slane %v13440_v33, 5  ;;  %10929 = vmatprep.mubr.msk.bf16.mxu0 %vm16580_vm2, %v3589_v27 }
 0x189   : > { %v597_v5 = vrot.slane %v13451_v40, 4  ;;  %v755_v9 = vsel %vm11975_vm11, %v587_v59, %v754_v52  ;;  %757 = vst.msk [vmem:[#allocation2 + $0xc4] sm:$0xf] %vm170_vm0, %v596_v62  ;;  %v3558_v11 = vsel %vm3542_vm5, %v3525_v34, %v13297_v14  ;;  %v1767_v30 = vrot.slane %v1766_v35, 4  ;;  %v13488_v40 = vpop.permute.xlu0 %3312 }
 0x18a   : > { %756 = vst [vmem:[#allocation2 + $0xc0] sm:$0xf] %v755_v9  ;;  %v1776_v24 = vor.u32 %v1775_v16, %v1771_v19  ;;  %v1781_v7 = vrot.slane %v1779_v28, 5  ;;  %v1973_v37 = vrot.slane %v1971_v61, 4  ;;  %v1974_v33 = vrot.slane %v1421_v60, 5 }
 0x18b   : > { %v10039_v54 = vcombine.low %v11700_v47, %v11701_v56  ;;  %v10040_v41 = vcombine.low %v11702_v58, %v11703_v32  ;;  %v3591_v6 = vsel %vm3575_vm14, %v3558_v11, %v13299_v17  ;;  %v234_v14 = vsel %vm11915_vm3, 0, %v233_v4 }
 0x18c   : > { %v1772_v42 = vsel %vm12056_vm15, %v1767_v30, %v1771_v19  ;;  %v1777_v22 = vrot.slane %v1776_v24, 4  ;;  %v1972_v60 = vsel %vm11969_vm10, %v10013_v3, %v1971_v61  ;;  %235 = vst [vmem:[#allocation2 + $0xcc] sm:$0x1] %v234_v14  ;;  %v2406_v59 = vshrl.u32 %v13480_v48, 16  ;;  %10930 = vmatmul.mubr.msk.bf16.gmra.mrb[12].mxu0 %vm16580_vm2, %v3591_v6 }
 0x18d   : > { %v758_v17 = vld [vmem:[#allocation2 + $0xc8] sm:$0x1]  ;;  %v1975_v43 = vsel %vm11969_vm10, %v1973_v37, %v1974_v33  ;;  %v3358_v49 = vsel %vm3328_vm1, %v10040_v41, %v13348_v25  ;;  %v290_v18 = vsel %vm11943_vm6, 0, %v289_v13  ;;  %v2402_v2 = vshll.u32 %v13480_v48, 16 }
 0x18e   : > { %v759_v38 = vsel %vm11915_vm3, %v597_v5, %v758_v17  ;;  %v1782_v31 = vsel %vm12056_vm15, %v1777_v22, %v1781_v7  ;;  %291 = vst [vmem:[#allocation2 + $0xd4] sm:$0x1] %v290_v18  ;;  %v3355_v16 = vsel %vm3328_vm1, %v10039_v54, %v13321_v0  ;;  %v10125_v35 = vcombine.low %v1972_v60, %v1975_v43 }
 0x18f   : > { %760 = vst [vmem:[#allocation2 + $0xc8] sm:$0x1] %v759_v38  ;;  %v10109_v20 = vcombine.low %v1772_v42, %v1782_v31  ;;  %v3397_v8 = vsel %vm3377_vm7, %v3358_v49, %v13368_v50  ;;  %v3395_v25 = vsel %vm3377_vm7, %v3355_v16, %v13323_v12  ;;  %v2408_v28 = vrot.slane %v2406_v59, 4  ;;  %v13520_v0 = vpop.permute.xlu1 %3234  ;;  %v13522_v19 = vpop.permute.xlu0 %3314 }
 0x190   : > { %v1406_v34 = vld [vmem:[#allocation2 + $0xc4] sm:$0xf]  ;;  %v13514_v62 = vrot.slane %v2402_v2, 5  ;;  %v13518_v52 = vsel %vm3410_vm8, %v3397_v8, %v13400_v45  ;;  %v13526_v9 = vsel %vm3410_vm8, %v3395_v25, %v13350_v55  ;;  %vm4100_vm0 = vcmask 253952  }
 0x191   : > { %v1405_v1 = vld [vmem:[#allocation2 + $0xc0] sm:$0xf]  ;;  %v1797_v27 = vshrl.u32 %v1406_v34, 16  ;;  %v1793_v4 = vshll.u32 %v1406_v34, 16  ;;  %2988 = vrot.lane.b32.xlu0 %v10109_v20, %s11835_s8  ;;  %v1978_v24 = vrot.slane %v1406_v34, 5 }
 0x192   : > { %v1784_v50 = vshrl.u32 %v1405_v1, 16  ;;  %v1787_v3 = vshll.u32 %v1405_v1, 16  ;;  %v10094_v61 = vcombine.low %v1405_v1, %v1406_v34  ;;  %v1822_v12 = vld [vmem:[#allocation2 + $0xc0] sm:$0xe]  ;;  %v13534_v55 = vld [vmem:[#allocation2 + $0xc4] sm:$0xf]  ;;  %v2409_v32 = vor.u32 %v2408_v28, %v13514_v62 }
 0x193   : > { %v2012_v5 = vld [vmem:[#allocation2 + $0xc0] sm:$0xf]  ;;  %v1795_v11 = vrot.slane %v1793_v4, 5  ;;  %v1799_v30 = vrot.slane %v1797_v27, 4  ;;  %v13528_v7 = vld [vmem:[#allocation2 + $0xcc] sm:$0xf]  ;;  %v13539_v18 = vpop.permute.xlu1 %2724 }
 0x194   : > { %v2369_v45 = vshrl.u32 %v2012_v5, 16  ;;  %v1786_v37 = vrot.slane %v1784_v50, 4  ;;  %v1789_v33 = vrot.slane %v1787_v3, 5  ;;  %2910 = vrot.lane.b32.xlu1 %v10094_v61, %s11830_s30  ;;  %v2393_v13 = vshrl.u32 %v13528_v7, 16  ;;  %v13554_v3 = vld [vmem:[#allocation2 + $0xcc] sm:$0xe] }
 0x195   : > { %v2396_v47 = vshll.u32 %v13528_v7, 16  ;;  %v1800_v56 = vor.u32 %v1799_v30, %v1795_v11  ;;  %v10014_v54 = vrot.slane %v1822_v12, 9  ;;  %v1980_v58 = vrot.slane %v1978_v24, 4  ;;  %3068 = vrot.lane.b32.xlu0 %v10125_v35, %s11833_s6  ;;  %v13537_v49 = vld [vmem:[#allocation2 + $0xd4] sm:$0x1]  ;;  %s11768_s30 = sshll.u32 %s11837_s27, 4  ;;  %s11769_s30 = int_to_ptr.vmem [resolvable:$false] %s11768_s30 }
 0x196   : > { %v1422_v41 = vld [vmem:[#allocation2 + $0xc8] sm:$0x1]  ;;  %v1790_v6 = vor.u32 %v1789_v33, %v1786_v37  ;;  %v2395_v14 = vrot.slane %v2393_v13, 4  ;;  %v2371_v22 = vrot.slane %v2369_v45, 4  ;;  %v2372_v43 = vshll.u32 %v2012_v5, 16  ;;  %v13541_v2 = vpop.permute.xlu0 %2804  ;;  %p11771_p0 = scmp.lt.s32.totalorder %s16520_s20, %s11769_s30 }
 0x197   : > { %v2398_v42 = vrot.slane %v2396_v47, 5  ;;  %v1801_v60 = vrot.slane %v1800_v56, 4  ;;  %v1803_v59 = vshll.u32 %v1422_v41, 16  ;;  %v1981_v17 = vrot.slane %v1422_v41, 5  ;;  %v2030_v25 = vld [vmem:[#allocation2 + $0xc8] sm:$0x1] }
 0x198   : > { %v1791_v38 = vrot.slane %v1790_v6, 4  ;;  %v2382_v31 = vshrl.u32 %v13534_v55, 16  ;;  %v10141_v20 = vcombine.low %v2012_v5, %v13534_v55  ;;  %v1979_v35 = vsel %vm11969_vm10, %v10014_v54, %v1978_v24  ;;  %v2430_v24 = vld [vmem:[#allocation2 + $0xc0] sm:$0xe] }
 0x199   : > { %v2399_v16 = vor.u32 %v2398_v42, %v2395_v14  ;;  %v1805_v34 = vrot.slane %v1803_v59, 5  ;;  %v2374_v8 = vrot.slane %v2372_v43, 5  ;;  %v2587_v28 = vrot.slane %v13480_v48, 5 }
 0x19a   : > { %v1796_v1 = vsel %vm12056_vm15, %v1791_v38, %v1795_v11  ;;  %v1982_v27 = vsel %vm11969_vm10, %v1980_v58, %v1981_v17  ;;  %3164 = vrot.lane.b32.xlu0 %v10141_v20, %s11831_s4  ;;  %v2410_v4 = vrot.slane %v2409_v32, 4  ;;  %v2412_v50 = vshll.u32 %v13537_v49, 16  ;;  %v13563_v58 = vpop.permute.xlu1 %2726  ;;  %v13565_v32 = vpop.permute.xlu0 %2900 }
 0x19b   : > { %v1806_v61 = vsel %vm12056_vm15, %v1801_v60, %v1805_v34  ;;  %v2375_v12 = vor.u32 %v2374_v8, %v2371_v22  ;;  %v2378_v5 = vshll.u32 %v13534_v55, 16  ;;  %v2384_v30 = vrot.slane %v2382_v31, 4 }
 0x19c   : > { %v10110_v45 = vcombine.low %v1796_v1, %v1806_v61  ;;  %v2400_v11 = vrot.slane %v2399_v16, 4  ;;  %v2414_v37 = vrot.slane %v2412_v50, 5  ;;  %v2388_v33 = vshll.u32 %v2030_v25, 16  ;;  %v4114_v1 = vld [vmem:[#allocation3 + $0x18] sm:$0x1] }
 0x19d   : > { %v2376_v13 = vrot.slane %v2375_v12, 4  ;;  %v2380_v47 = vrot.slane %v2378_v5, 5  ;;  %v10030_v56 = vrot.slane %v13554_v3, 9  ;;  %v3463_v54 = vsel %vm3443_vm9, %v13518_v52, %v13429_v53  ;;  %v4120_v50 = vld [vmem:[#allocation3 + $0x30] sm:$0x1] }
 0x19e   : > { %2990 = vrot.lane.b32.xlu1 %v10110_v45, %s11835_s8  ;;  %v10126_v41 = vcombine.low %v1979_v35, %v1982_v27  ;;  %v10029_v6 = vrot.slane %v2430_v24, 9  ;;  %v3461_v14 = vsel %vm3443_vm9, %v13526_v9, %v13370_v21  ;;  %v3496_v42 = vsel %vm3476_vm13, %v3463_v54, %v13456_v26  ;;  %v13603_v35 = vpop.permute.xlu1 %2806  ;;  %v4111_v27 = vld [vmem:[#allocation3 + $0xc] sm:$0x1]  ;;  %v4175_v12 = vld [vmem:[#allocation3 + $0x38] sm:$0x1] }
 0x19f   : > { %v10142_v22 = vcombine.low %v13528_v7, %v13480_v48  ;;  %v2385_v60 = vor.u32 %v2384_v30, %v2380_v47  ;;  %v2390_v53 = vrot.slane %v2388_v33, 5  ;;  %v2580_v52 = vrot.slane %v13534_v55, 5  ;;  %v4172_v48 = vld [vmem:[#allocation3 + $0x2c] sm:$0x1] }
 0x1a0   : > { %v2405_v59 = vsel %vm12056_vm15, %v2400_v11, %v13514_v62  ;;  %v2415_v17 = vsel %vm12056_vm15, %v2410_v4, %v2414_v37  ;;  %v2589_v21 = vrot.slane %v2587_v28, 4  ;;  %v2583_v9 = vrot.slane %v2030_v25, 5  ;;  %v4169_v4 = vld [vmem:[#allocation3 + $0x20] sm:$0x1] }
 0x1a1   : > { %v2381_v26 = vsel %vm12056_vm15, %v2376_v13, %v2380_v47  ;;  %v2386_v43 = vrot.slane %v2385_v60, 4  ;;  %v2582_v7 = vrot.slane %v2580_v52, 4  ;;  %v3494_v38 = vsel %vm3476_vm13, %v3461_v14, %v13402_v44  ;;  %v13605_v8 = vpop.permute.xlu0 %2980 }
 0x1a2   : > { %3070 = vrot.lane.b32.xlu1 %v10126_v41, %s11833_s6  ;;  %v2590_v55 = vrot.slane %v13537_v49, 5  ;;  %v2581_v62 = vsel %vm11969_vm10, %v10029_v6, %v2580_v52  ;;  %v3529_v31 = vsel %vm3509_vm4, %v3496_v42, %v13486_v15  ;;  %v3527_v20 = vsel %vm3509_vm4, %v3494_v38, %v13431_v57  ;;  %v11704_v52 = vld [vmem:[#allocation2 + $0x78] sm:$0xf] }
 0x1a3   : > { %v2391_v16 = vsel %vm12056_vm15, %v2386_v43, %v2390_v53  ;;  %v2584_v34 = vsel %vm11969_vm10, %v2582_v7, %v2583_v9  ;;  %v3562_v44 = vsel %vm3542_vm5, %v3529_v31, %v13520_v0  ;;  %v3560_v49 = vsel %vm3542_vm5, %v3527_v20, %v13458_v23  ;;  %v4166_v0 = vld [vmem:[#allocation3 + $0x14] sm:$0x1]  ;;  %v4126_v53 = vld [vmem:[#allocation3 + $0x48] sm:$0x1]  ;;  %v4181_v43 = vld [vmem:[#allocation3 + $0x50] sm:$0x1] }
 0x1a4   : > { %v10157_v15 = vcombine.low %v2381_v26, %v2391_v16  ;;  %v3593_v57 = vsel %vm3575_vm14, %v3560_v49, %v13488_v40  ;;  %v3595_v25 = vsel %vm3575_vm14, %v3562_v44, %v13522_v19  ;;  %v10158_v23 = vcombine.low %v2405_v59, %v2415_v17  ;;  %v4117_v40 = vld [vmem:[#allocation3 + $0x24] sm:$0x1]  ;;  %v2903_v13 = vpop.permute.xlu1 %2902  ;;  %v4123_v26 = vld [vmem:[#allocation3 + $0x3c] sm:$0x1]  ;;  %v11706_v20 = vld [vmem:[#allocation2 + $0x84] sm:$0xf] }
 0x1a5   : > { %10933 = vmatprep.mubr.msk.bf16.mxu0 %vm16580_vm2, %v3593_v57  ;;  %v10173_v3 = vcombine.low %v2581_v62, %v2584_v34  ;;  %v10045_v61 = vcombine.low %v13319_v10, %v13341_v36  ;;  %v2588_v19 = vsel %vm11969_vm10, %v10030_v56, %v2587_v28  ;;  %v2591_v5 = vsel %vm11969_vm10, %v2589_v21, %v2590_v55  ;;  %v3061_v47 = vpop.permute.xlu0 %3060  ;;  %v11705_v59 = vld [vmem:[#allocation2 + $0x7c] sm:$0xf]  ;;  %v11707_v16 = vld [vmem:[#allocation2 + $0x88] sm:$0xf] }
 0x1a6   : > { %3166 = vrot.lane.b32.xlu1 %v10142_v22, %s11831_s4  ;;  %3244 = vrot.lane.b32.xlu0 %v10157_v15, %s11836_s9  ;;  %v10046_v30 = vcombine.low %v13361_v46, %v13366_v51  ;;  %vm16632_vm3 = vsmask.f32 256  ;;  %v16635_v45 = vmov 0   ;;  %vm16636_vm11 = vsmask.f32 7938  ;;  %s11770_s4 = scalar_lea.vmem %s11769_s30, 8192 }
 0x1a7   : > { %10934 = vmatmul.mubr.msk.bf16.gmra.mrb[16].mxu0 %vm16580_vm2, %v3595_v25  ;;  %vm13626_vm6 = vmand %vm4100_vm0, %vm16632_vm3  ;;  %4101 = vst.msk [vmem:[#allocation3 + $0x8] sm:$0x1] %vm4100_vm0, %v16635_v45  ;;  %v16637_v37 = vmov 0  ;;  %v10174_v14 = vcombine.low %v2588_v19, %v2591_v5  ;;  %v10041_v17 = vcombine.low %v11704_v52, %v11705_v59  ;;  %v4178_v31 = vld [vmem:[#allocation3 + $0x44] sm:$0x1]  ;;  %v10042_v34 = vcombine.low %v11706_v20, %v11707_v16  ;;  %p11772_p1 = scmp.lt.s32.totalorder %s11770_s4, %s11764_s26 }
 0x1a8   : > { %4105 = vst.msk [vmem:[#allocation3 + $0xd4] sm:$0x1] %vm4100_vm0, %v16635_v45  ;;  %v4115_v28 = vsel %vm13626_vm6, 0, %v4114_v1  ;;  %v4112_v11 = vsel %vm13626_vm6, 0, %v4111_v27  ;;  %vm13637_vm2 = vmand %vm4100_vm0, %vm16636_vm11  ;;  %v4121_v33 = vsel %vm13626_vm6, 0, %v4120_v50  ;;  %v4118_v41 = vsel %vm13626_vm6, 0, %v4117_v40 }
 0x1a9   : > { %v16638_v37 = vsel %vm13637_vm2, 4294967295, %v16637_v37  ;;  %4116 = vst [vmem:[#allocation3 + $0x18] sm:$0x1] %v4115_v28  ;;  %4113 = vst [vmem:[#allocation3 + $0xc] sm:$0x1] %v4112_v11  ;;  %v4170_v56 = vsel %vm13637_vm2, 0, %v4169_v4  ;;  %v3157_v60 = vpop.permute.xlu0 %3156  ;;  %v3361_v55 = vsel %vm3328_vm1, %v10041_v17, %v13539_v18  ;;  %v3364_v1 = vsel %vm3328_vm1, %v10042_v34, %v13563_v58  ;;  %p11773_p2 = por %p11772_p1, %p11771_p0 }
 0x1aa   : > { %16639 = vst [vmem:[#allocation9_spill] sm:$0xff] %v16638_v37  ;;  %v4167_v54 = vsel %vm13637_vm2, 0, %v4166_v0  ;;  %4122 = vst [vmem:[#allocation3 + $0x30] sm:$0x1] %v4121_v33  ;;  %v4176_v6 = vsel %vm13637_vm2, 0, %v4175_v12  ;;  %3246 = vrot.lane.b32.xlu1 %v10158_v23, %s11836_s9  ;;  %3324 = vrot.lane.b32.xlu0 %v10173_v3, %s11834_s7  ;;  %v4173_v42 = vsel %vm13637_vm2, 0, %v4172_v48  ;;  %v3399_v44 = vsel %vm3377_vm7, %v3361_v55, %v13541_v2 }
 0x1ab   : > { %4171 = vst [vmem:[#allocation3 + $0x20] sm:$0x1] %v4170_v56  ;;  %4168 = vst [vmem:[#allocation3 + $0x14] sm:$0x1] %v4167_v54  ;;  %v4127_v21 = vsel %vm13626_vm6, 0, %v4126_v53  ;;  %v4124_v7 = vsel %vm13626_vm6, 0, %v4123_v26  ;;  %v3432_v15 = vsel %vm3410_vm8, %v3399_v44, %v13565_v32  ;;  %v3401_v32 = vsel %vm3377_vm7, %v3364_v1, %v13603_v35  ;;  %p11774_p3 = pnand %p11773_p2, %p11767_p13 }
 0x1ac   : > { %4119 = vst [vmem:[#allocation3 + $0x24] sm:$0x1] %v4118_v41  ;;  %4177 = vst [vmem:[#allocation3 + $0x38] sm:$0x1] %v4176_v6  ;;  %v4182_v38 = vsel %vm13637_vm2, 0, %v4181_v43  ;;  %v4179_v49 = vsel %vm13637_vm2, 0, %v4178_v31  ;;  %v3465_v18 = vsel %vm3443_vm9, %v3432_v15, %v13605_v8  ;;  %v3434_v8 = vsel %vm3410_vm8, %v3401_v32, %v2903_v13 }
 0x1ad   : > { %4174 = vst [vmem:[#allocation3 + $0x2c] sm:$0x1] %v4173_v42  ;;  %4128 = vst [vmem:[#allocation3 + $0x48] sm:$0x1] %v4127_v21  ;;  %v3498_v57 = vsel %vm3476_vm13, %v3465_v18, %v3061_v47  ;;  %vm16640_vm0 = vcmask 293888  }
 0x1ae   : > { %3326 = vrot.lane.b32.xlu1 %v10174_v14, %s11834_s7  ;;  %4125 = vst [vmem:[#allocation3 + $0x3c] sm:$0x1] %v4124_v7  ;;  %4183 = vst [vmem:[#allocation3 + $0x50] sm:$0x1] %v4182_v38  ;;  %v3531_v27 = vsel %vm3509_vm4, %v3498_v57, %v3157_v60  ;;  %v4132_v53 = vld [vmem:[#allocation3 + $0x60] sm:$0x1] }
 0x1af   : > { %v2983_v22 = vpop.permute.xlu1 %2982  ;;  %4180 = vst [vmem:[#allocation3 + $0x44] sm:$0x1] %v4179_v49  ;;  %vm16641_vm3 = vmmov %vm16640_vm0  ;;  %v4133_v59 = vsel %vm13626_vm6, 0, %v4132_v53  ;;  %v11708_v17 = vld [vmem:[#allocation2 + $0x90] sm:$0xf] }
 0x1b0   : > { %v3467_v50 = vsel %vm3443_vm9, %v3434_v8, %v2983_v22  ;;  %v11709_v21 = vld [vmem:[#allocation2 + $0x94] sm:$0xf]  ;;  %4134 = vst [vmem:[#allocation3 + $0x60] sm:$0x1] %v4133_v59  ;;  %v4129_v43 = vld [vmem:[#allocation3 + $0x54] sm:$0x1]  ;;  %vm16642_vm11 = vmmov %vm16640_vm0 }
 0x1b1   : > { %v4187_v7 = vld [vmem:[#allocation3 + $0x68] sm:$0x1]  ;;  %v11710_v34 = vld [vmem:[#allocation2 + $0x9c] sm:$0xf]  ;;  %v4184_v18 = vld [vmem:[#allocation3 + $0x5c] sm:$0x1] }
 0x1b2   : > { %v4188_v31 = vsel %vm13637_vm2, 0, %v4187_v7  ;;  %v11711_v44 = vld [vmem:[#allocation2 + $0xa0] sm:$0xf]  ;;  %v4141_v36 = vld [vmem:[#allocation3 + $0x84] sm:$0x1] }
 0x1b3   : > { %v3063_v9 = vpop.permute.xlu1 %3062  ;;  %4189 = vst [vmem:[#allocation3 + $0x68] sm:$0x1] %v4188_v31  ;;  %v10044_v49 = vcombine.low %v11710_v34, %v11711_v44  ;;  %v4142_v51 = vsel %vm13626_vm6, 0, %v4141_v36  ;;  %v4156_v36 = vld [vmem:[#allocation3 + $0xc0] sm:$0x1] }
 0x1b4   : > { %v3237_v62 = vpop.permute.xlu0 %3236  ;;  %v3500_v3 = vsel %vm3476_vm13, %v3467_v50, %v3063_v9  ;;  %v10043_v9 = vcombine.low %v11708_v17, %v11709_v21  ;;  %4143 = vst [vmem:[#allocation3 + $0x84] sm:$0x1] %v4142_v51 }
 0x1b5   : > { %v3564_v2 = vsel %vm3542_vm5, %v3531_v27, %v3237_v62  ;;  %v4130_v62 = vsel %vm13626_vm6, 0, %v4129_v43 }
 0x1b6   : > { %4131 = vst [vmem:[#allocation3 + $0x54] sm:$0x1] %v4130_v62 }
 0x1b7   : > { %v3159_v25 = vpop.permute.xlu1 %3158 }
 0x1b8   : > { %v3533_v58 = vsel %vm3509_vm4, %v3500_v3, %v3159_v25  ;;  %v4185_v25 = vsel %vm13637_vm2, 0, %v4184_v18 }
 0x1b9   : > { %4186 = vst [vmem:[#allocation3 + $0x5c] sm:$0x1] %v4185_v25 }
 0x1bb   : > { %v3317_v4 = vpop.permute.xlu0 %3316  ;;  %v3239_v23 = vpop.permute.xlu1 %3238 }
 0x1bc   : > { %v3597_v0 = vsel %vm3575_vm14, %v3564_v2, %v3317_v4  ;;  %v3566_v40 = vsel %vm3542_vm5, %v3533_v58, %v3239_v23 }
 0x1bd   : > { %10937 = vmatprep.mubr.msk.bf16.mxu0 %vm16640_vm0, %v3597_v0 }
 0x1bf   : > { %v2729_v5 = vpop.permute.xlu1 %2728 }
 0x1c0   : > { %v3367_v16 = vsel %vm3328_vm1, %v10043_v9, %v2729_v5 }
 0x1c2   : > { %v3319_v12 = vpop.permute.xlu0 %3318 }
 0x1c3   : > { %v3599_v19 = vsel %vm3575_vm14, %v3566_v40, %v3319_v12  ;;  %v2731_v45 = vpop.permute.xlu1 %2730 }
 0x1c4   : > { %10938 = vmatmul.mubr.msk.bf16.gmra.mrb[20].mxu0 %vm16641_vm3, %v3599_v19  ;;  %v3370_v4 = vsel %vm3328_vm1, %v10044_v49, %v2731_v45 }
 0x1c6   : > { %v2809_v35 = vpop.permute.xlu0 %2808 }
 0x1c7   : > { %v2811_v28 = vpop.permute.xlu1 %2810  ;;  %v3403_v57 = vsel %vm3377_vm7, %v3367_v16, %v2809_v35 }
 0x1c8   : > { %v3405_v23 = vsel %vm3377_vm7, %v3370_v4, %v2811_v28 }
 0x1ca   : > { %v2905_v48 = vpop.permute.xlu0 %2904 }
 0x1cb   : > { %v3436_v1 = vsel %vm3410_vm8, %v3403_v57, %v2905_v48 }
 0x1d2   : > { %v2985_v11 = vpop.permute.xlu0 %2984 }
 0x1d3   : > { %v3469_v27 = vsel %vm3443_vm9, %v3436_v1, %v2985_v11 }
 0x1d5   : > { %v2907_v33 = vpop.permute.xlu1 %2906 }
 0x1d6   : > { %v3065_v13 = vpop.permute.xlu0 %3064  ;;  %v3438_v58 = vsel %vm3410_vm8, %v3405_v23, %v2907_v33 }
 0x1d7   : > { %v3502_v0 = vsel %vm3476_vm13, %v3469_v27, %v3065_v13  ;;  %v4138_v13 = vld [vmem:[#allocation3 + $0x78] sm:$0x1] }
 0x1da   : > { %v3161_v22 = vpop.permute.xlu0 %3160 }
 0x1db   : > { %v13688_v47 = vpop.f32.mrb[0].mxu0  ;;  %v3535_v32 = vsel %vm3509_vm4, %v3502_v0, %v3161_v22  ;;  %v4193_v22 = vld [vmem:[#allocation3 + $0x80] sm:$0x1] }
 0x1dc   : > { %v13690_v56 = vpop.f32.mrb[1].mxu0  ;;  %v3829_v52 = vsel %vm3575_vm14, %v13688_v47, 0.0  ;;  %v4194_v17 = vsel %vm13637_vm2, 0, %v4193_v22 }
 0x1dd   : > { %v13692_v54 = vpop.f32.mrb[2].mxu0  ;;  %v3826_v14 = vsel %vm3575_vm14, %v13690_v56, 0.0  ;;  %4195 = vst [vmem:[#allocation3 + $0x80] sm:$0x1] %v4194_v17 }
 0x1de   : > { %v13694_v41 = vpop.f32.mrb[3].mxu0  ;;  %v3831_v55 = vsel %vm3575_vm14, %v13692_v54, 0.0 }
 0x1df   : > { %v2987_v6 = vpop.permute.xlu1 %2986  ;;  %v3827_v42 = vsel %vm3575_vm14, %v13694_v41, 0.0 }
 0x1e0   : > { %v3828_v60 = vadd.f32 %v3827_v42, %v3826_v14  ;;  %v3471_v40 = vsel %vm3443_vm9, %v3438_v58, %v2987_v6  ;;  %v4139_v6 = vsel %vm13626_vm6, 0, %v4138_v13  ;;  %v4135_v42 = vld [vmem:[#allocation3 + $0x6c] sm:$0x1] }
 0x1e1   : > { %4140 = vst [vmem:[#allocation3 + $0x78] sm:$0x1] %v4139_v6  ;;  %v4136_v59 = vsel %vm13626_vm6, 0, %v4135_v42 }
 0x1e2   : > { %v3830_v26 = vadd.f32 %v3829_v52, %v3828_v60  ;;  %4137 = vst [vmem:[#allocation3 + $0x6c] sm:$0x1] %v4136_v59 }
 0x1e3   : > { %v3067_v38 = vpop.permute.xlu1 %3066 }
 0x1e4   : > { %v3832_v20 = vadd.f32 %v3831_v55, %v3830_v26  ;;  %v3504_v19 = vsel %vm3476_vm13, %v3471_v40, %v3067_v38  ;;  %v4190_v38 = vld [vmem:[#allocation3 + $0x74] sm:$0x1] }
 0x1e5   : > { %v3241_v15 = vpop.permute.xlu0 %3240  ;;  %v4191_v62 = vsel %vm13637_vm2, 0, %v4190_v38 }
 0x1e6   : > { %v3568_v8 = vsel %vm3542_vm5, %v3535_v32, %v3241_v15  ;;  %4192 = vst [vmem:[#allocation3 + $0x74] sm:$0x1] %v4191_v62 }
 0x1e7   : > { %v3163_v2 = vpop.permute.xlu1 %3162 }
 0x1e8   : > { %v3537_v5 = vsel %vm3509_vm4, %v3504_v19, %v3163_v2 }
 0x1eb   : > { %v3243_v12 = vpop.permute.xlu1 %3242 }
 0x1ec   : > { %v3321_v50 = vpop.permute.xlu0 %3320  ;;  %v3570_v35 = vsel %vm3542_vm5, %v3537_v5, %v3243_v12 }
 0x1ed   : > { %v3601_v3 = vsel %vm3575_vm14, %v3568_v8, %v3321_v50  ;;  %v4144_v8 = vld [vmem:[#allocation3 + $0x90] sm:$0x1]  ;;  %v4696_v29 = vld [vmem:[#allocation3 + $0x74] sm:$0x1] }
 0x1ee   : > { %10941 = vmatprep.mubr.msk.bf16.mxu0 %vm16642_vm11, %v3601_v3  ;;  %v4145_v23 = vsel %vm13626_vm6, 0, %v4144_v8 }
 0x1ef   : > { %v2733_v28 = vpop.permute.xlu1 %2732  ;;  %4146 = vst [vmem:[#allocation3 + $0x90] sm:$0x1] %v4145_v23 }
 0x1f0   : > { %v3373_v1 = vsel %vm3328_vm1, %v10045_v61, %v2733_v28  ;;  %v4199_v61 = vld [vmem:[#allocation3 + $0x98] sm:$0x1] }
 0x1f2   : > { %v3323_v45 = vpop.permute.xlu0 %3322 }
 0x1f3   : > { %v3603_v48 = vsel %vm3575_vm14, %v3570_v35, %v3323_v45 }
 0x1f4   : > { %10942 = vmatmul.mubr.msk.bf16.gmra.mrb[24].mxu0 %vm16640_vm0, %v3603_v48  ;;  %v2735_v60 = vpop.permute.xlu1 %2734  ;;  %v4196_v48 = vld [vmem:[#allocation3 + $0x8c] sm:$0x1] }
 0x1f5   : > { %v3376_v2 = vsel %vm3328_vm1, %v10046_v30, %v2735_v60  ;;  %v4200_v30 = vsel %vm13637_vm2, 0, %v4199_v61  ;;  %v4157_v61 = vsel %vm13626_vm6, 0, %v4156_v36 }
 0x1f6   : > { %v2813_v11 = vpop.permute.xlu0 %2812  ;;  %4201 = vst [vmem:[#allocation3 + $0x98] sm:$0x1] %v4200_v30  ;;  %4158 = vst [vmem:[#allocation3 + $0xc0] sm:$0x1] %v4157_v61 }
 0x1f7   : > { %v3407_v27 = vsel %vm3377_vm7, %v3373_v1, %v2813_v11  ;;  %v4197_v11 = vsel %vm13637_vm2, 0, %v4196_v48 }
 0x1f8   : > { %v2815_v16 = vpop.permute.xlu1 %2814  ;;  %4198 = vst [vmem:[#allocation3 + $0x8c] sm:$0x1] %v4197_v11 }
 0x1f9   : > { %v3409_v3 = vsel %vm3377_vm7, %v3376_v2, %v2815_v16  ;;  %vm16643_vm7 = vmmov %vm16640_vm0 }
 0x1fa   : > { %v2909_v26 = vpop.permute.xlu0 %2908 }
 0x1fb   : > { %v3440_v4 = vsel %vm3410_vm8, %v3407_v27, %v2909_v26 }
 0x1fc   : > { %v13730_v33 = vpop.f32.mrb[4].mxu0 }
 0x1fd   : > { %v13734_v14 = vpop.f32.mrb[5].mxu0  ;;  %v3837_v55 = vsel %vm3575_vm14, %v13730_v33, 0.0 }
 0x1fe   : > { %v3833_v53 = vsel %vm3575_vm14, %v13734_v14, 0.0  ;;  %v13738_v52 = vpop.f32.mrb[6].mxu0 }
 0x1ff   : > { %v3834_v21 = vadd.f32 %v3833_v53, %v3832_v20  ;;  %v13744_v9 = vpop.f32.mrb[7].mxu0  ;;  %v3839_v20 = vsel %vm3575_vm14, %v13738_v52, 0.0 }
 0x200   : > { %v3835_v43 = vsel %vm3575_vm14, %v13744_v9, 0.0 }
 0x201   : > { %v3836_v7 = vadd.f32 %v3835_v43, %v3834_v21 }
 0x203   : > { %v3838_v31 = vadd.f32 %v3837_v55, %v3836_v7  ;;  %v2989_v44 = vpop.permute.xlu0 %2988 }
 0x204   : > { %v3473_v50 = vsel %vm3443_vm9, %v3440_v4, %v2989_v44 }
 0x205   : > { %v3840_v34 = vadd.f32 %v3839_v20, %v3838_v31  ;;  %v4150_v31 = vld [vmem:[#allocation3 + $0xa8] sm:$0x1]  ;;  %v4147_v20 = vld [vmem:[#allocation3 + $0x9c] sm:$0x1] }
 0x206   : > { %v2911_v49 = vpop.permute.xlu1 %2910  ;;  %v4151_v16 = vsel %vm13626_vm6, 0, %v4150_v31  ;;  %v4148_v44 = vsel %vm13626_vm6, 0, %v4147_v20 }
 0x207   : > { %v3069_v15 = vpop.permute.xlu0 %3068  ;;  %v3442_v58 = vsel %vm3410_vm8, %v3409_v3, %v2911_v49  ;;  %vm16644_vm8 = vmmov %vm16640_vm0  ;;  %4152 = vst [vmem:[#allocation3 + $0xa8] sm:$0x1] %v4151_v16  ;;  %v4153_v3 = vld [vmem:[#allocation3 + $0xb4] sm:$0x1] }
 0x208   : > { %v3506_v10 = vsel %vm3476_vm13, %v3473_v50, %v3069_v15  ;;  %4149 = vst [vmem:[#allocation3 + $0x9c] sm:$0x1] %v4148_v44  ;;  %v4202_v15 = vld [vmem:[#allocation3 + $0xa4] sm:$0x1]  ;;  %v4154_v51 = vsel %vm13626_vm6, 0, %v4153_v3 }
 0x209   : > { %4155 = vst [vmem:[#allocation3 + $0xb4] sm:$0x1] %v4154_v51 }
 0x20c   : > { %v3165_v57 = vpop.permute.xlu0 %3164 }
 0x20d   : > { %v3539_v46 = vsel %vm3509_vm4, %v3506_v10, %v3165_v57 }
 0x210   : > { %v2991_v18 = vpop.permute.xlu1 %2990 }
 0x211   : > { %v3475_v5 = vsel %vm3443_vm9, %v3442_v58, %v2991_v18  ;;  %v4203_v18 = vsel %vm13637_vm2, 0, %v4202_v15 }
 0x212   : > { %4204 = vst [vmem:[#allocation3 + $0xa4] sm:$0x1] %v4203_v18 }
 0x214   : > { %v3071_v25 = vpop.permute.xlu1 %3070 }
 0x215   : > { %v3508_v45 = vsel %vm3476_vm13, %v3475_v5, %v3071_v25 }
 0x218   : > { %v3167_v0 = vpop.permute.xlu1 %3166  ;;  %v3245_v32 = vpop.permute.xlu0 %3244 }
 0x219   : > { %v3572_v12 = vsel %vm3542_vm5, %v3539_v46, %v3245_v32  ;;  %v3541_v28 = vsel %vm3509_vm4, %v3508_v45, %v3167_v0  ;;  %v4211_v46 = vld [vmem:[#allocation3 + $0xc8] sm:$0x1]  ;;  %vm16645_vm4 = vcmask 257024  }
 0x21a   : > { %v4212_v30 = vsel %vm13637_vm2, 0, %v4211_v46  ;;  %vm16647_vm9 = vmmov %vm16645_vm4 }
 0x21b   : > { %4213 = vst [vmem:[#allocation3 + $0xc8] sm:$0x1] %v4212_v30  ;;  %vm16648_vm13 = vmmov %vm16645_vm4 }
 0x21c   : > { %v3247_v40 = vpop.permute.xlu1 %3246  ;;  %v3325_v19 = vpop.permute.xlu0 %3324  ;;  %vm16649_vm3 = vmmov %vm16645_vm4 }
 0x21d   : > { %v3605_v35 = vsel %vm3575_vm14, %v3572_v12, %v3325_v19  ;;  %v3574_v13 = vsel %vm3542_vm5, %v3541_v28, %v3247_v40  ;;  %vm16646_vm5 = vmmov %vm16645_vm4 }
 0x21e   : > { %10945 = vmatprep.mubr.msk.bf16.mxu0 %vm16643_vm7, %v3605_v35  ;;  %vm16650_vm11 = vmmov %vm16649_vm3 }
 0x21f   : > { %vm16651_vm0 = vmmov %vm16649_vm3 }
 0x220   : > { %v3327_v6 = vpop.permute.xlu1 %3326  ;;  %vm16652_vm7 = vmmov %vm16651_vm0 }
 0x221   : > { %v3607_v42 = vsel %vm3575_vm14, %v3574_v13, %v3327_v6 }
 0x222   : > { %10946 = vmatmul.mubr.msk.bf16.gmra.mrb[28].mxu0 %vm16644_vm8, %v3607_v42  ;;  %vm16653_vm8 = vmmov %vm16651_vm0 }
 0x22e   : > { %v13786_v22 = vpop.f32.mrb[8].mxu0 }
 0x22f   : > { %v13788_v60 = vpop.f32.mrb[9].mxu0  ;;  %v3845_v7 = vsel %vm3575_vm14, %v13786_v22, 0.0 }
 0x230   : > { %v3841_v53 = vsel %vm3575_vm14, %v13788_v60, 0.0  ;;  %v13792_v59 = vpop.f32.mrb[10].mxu0 }
 0x231   : > { %v3842_v17 = vadd.f32 %v3841_v53, %v3840_v34  ;;  %v13794_v21 = vpop.f32.mrb[11].mxu0  ;;  %v3847_v55 = vsel %vm3575_vm14, %v13792_v59, 0.0  ;;  %v4205_v34 = vld [vmem:[#allocation3 + $0xb0] sm:$0x1] }
 0x232   : > { %v3843_v26 = vsel %vm3575_vm14, %v13794_v21, 0.0  ;;  %v4206_v49 = vsel %vm13637_vm2, 0, %v4205_v34 }
 0x233   : > { %v3844_v43 = vadd.f32 %v3843_v26, %v3842_v17  ;;  %4207 = vst [vmem:[#allocation3 + $0xb0] sm:$0x1] %v4206_v49 }
 0x235   : > { %v3846_v38 = vadd.f32 %v3845_v7, %v3844_v43 }
 0x237   : > { %v3848_v62 = vadd.f32 %v3847_v55, %v3846_v38 }
 0x25f   : > { %v13810_v57 = vpop.f32.mrb[12].mxu0 }
 0x260   : > { %v13812_v25 = vpop.f32.mrb[13].mxu0  ;;  %v3853_v8 = vsel %vm3575_vm14, %v13810_v57, 0.0 }
 0x261   : > { %v3849_v1 = vsel %vm3575_vm14, %v13812_v25, 0.0  ;;  %v13816_v27 = vpop.f32.mrb[14].mxu0 }
 0x262   : > { %v3850_v2 = vadd.f32 %v3849_v1, %v3848_v62  ;;  %v13818_v4 = vpop.f32.mrb[15].mxu0  ;;  %v3855_v23 = vsel %vm3575_vm14, %v13816_v27, 0.0 }
 0x263   : > { %v3851_v0 = vsel %vm3575_vm14, %v13818_v4, 0.0 }
 0x264   : > { %v3852_v32 = vadd.f32 %v3851_v0, %v3850_v2 }
 0x266   : > { %v3854_v50 = vadd.f32 %v3853_v8, %v3852_v32 }
 0x268   : > { %v3856_v10 = vadd.f32 %v3855_v23, %v3854_v50 }
 0x27a   : > { %v13832_v58 = vpop.f32.mrb[16].mxu0 }
 0x27b   : > { %v13834_v40 = vpop.f32.mrb[17].mxu0  ;;  %v3861_v28 = vsel %vm3575_vm14, %v13832_v58, 0.0 }
 0x27c   : > { %v3857_v12 = vsel %vm3575_vm14, %v13834_v40, 0.0  ;;  %v13838_v19 = vpop.f32.mrb[18].mxu0 }
 0x27d   : > { %v3858_v5 = vadd.f32 %v3857_v12, %v3856_v10  ;;  %v13840_v35 = vpop.f32.mrb[19].mxu0  ;;  %v3863_v13 = vsel %vm3575_vm14, %v13838_v19, 0.0 }
 0x27e   : > { %v3859_v45 = vsel %vm3575_vm14, %v13840_v35, 0.0 }
 0x27f   : > { %v3860_v48 = vadd.f32 %v3859_v45, %v3858_v5  ;;  %v4208_v5 = vld [vmem:[#allocation3 + $0xbc] sm:$0x1] }
 0x281   : > { %v3862_v11 = vadd.f32 %v3861_v28, %v3860_v48  ;;  %v4209_v48 = vsel %vm13637_vm2, 0, %v4208_v5 }
 0x282   : > { %4210 = vst [vmem:[#allocation3 + $0xbc] sm:$0x1] %v4209_v48 }
 0x283   : > { %v3864_v6 = vadd.f32 %v3863_v13, %v3862_v11 }
 0x297   : > { %v13848_v42 = vpop.f32.mrb[20].mxu0 }
 0x298   : > { %v13850_v53 = vpop.f32.mrb[21].mxu0  ;;  %v3869_v62 = vsel %vm3575_vm14, %v13848_v42, 0.0 }
 0x299   : > { %v3865_v17 = vsel %vm3575_vm14, %v13850_v53, 0.0  ;;  %v13854_v26 = vpop.f32.mrb[22].mxu0 }
 0x29a   : > { %v3866_v43 = vadd.f32 %v3865_v17, %v3864_v6  ;;  %v3782_v7 = vpop.f32.mrb[23].mxu0  ;;  %v3871_v16 = vsel %vm3575_vm14, %v13854_v26, 0.0 }
 0x29b   : > { %v3867_v38 = vsel %vm3575_vm14, %v3782_v7, 0.0 }
 0x29c   : > { %v3868_v55 = vadd.f32 %v3867_v38, %v3866_v43 }
 0x29e   : > { %v3870_v31 = vadd.f32 %v3869_v62, %v3868_v55 }
 0x2a0   : > { %v3872_v20 = vadd.f32 %v3871_v16, %v3870_v31 }
 0x2c7   : > { %v10943_v34 = vpop.f32.mrb[24].mxu0 }
 0x2c8   : > { %v3795_v44 = vpop.f32.mrb[25].mxu0  ;;  %v3877_v32 = vsel %vm3575_vm14, %v10943_v34, 0.0 }
 0x2c9   : > { %v3873_v49 = vsel %vm3575_vm14, %v3795_v44, 0.0  ;;  %v10944_v15 = vpop.f32.mrb[26].mxu0 }
 0x2ca   : > { %v3874_v18 = vadd.f32 %v3873_v49, %v3872_v20  ;;  %v3798_v1 = vpop.f32.mrb[27].mxu0  ;;  %v3879_v50 = vsel %vm3575_vm14, %v10944_v15, 0.0 }
 0x2cb   : > { %v3875_v2 = vsel %vm3575_vm14, %v3798_v1, 0.0 }
 0x2cc   : > { %v3876_v0 = vadd.f32 %v3875_v2, %v3874_v18 }
 0x2ce   : > { %v3878_v8 = vadd.f32 %v3877_v32, %v3876_v0 }
 0x2d0   : > { %v3880_v23 = vadd.f32 %v3879_v50, %v3878_v8 }
 0x2f5   : > { %v10947_v10 = vpop.f32.mrb[28].mxu0 }
 0x2f6   : > { %v3811_v36 = vpop.f32.mrb[29].mxu0  ;;  %v3885_v45 = vsel %vm3575_vm14, %v10947_v10, 0.0 }
 0x2f7   : > { %v3881_v61 = vsel %vm3575_vm14, %v3811_v36, 0.0  ;;  %v10948_v3 = vpop.f32.mrb[30].mxu0 }
 0x2f8   : > { %v3882_v46 = vadd.f32 %v3881_v61, %v3880_v23  ;;  %v3814_v51 = vpop.f32.mrb[31].mxu0  ;;  %v3887_v11 = vsel %vm3575_vm14, %v10948_v3, 0.0 }
 0x2f9   : > { %v3883_v30 = vsel %vm3575_vm14, %v3814_v51, 0.0 }
 0x2fa   : > { %v3884_v12 = vadd.f32 %v3883_v30, %v3882_v46 }
 0x2fc   : > { %v3886_v28 = vadd.f32 %v3885_v45, %v3884_v12 }
 0x2fe   : > { %v3888_v13 = vadd.f32 %v3887_v11, %v3886_v28 }
 0x300   : > { %v3889_v6 = vrot.slane %v3888_v13, 4 }
 0x302   : > { %v3890_v17 = vadd.f32 %v3889_v6, %v3888_v13 }
 0x304   : > { %v3891_v43 = vrot.slane %v3890_v17, 2 }
 0x306   : > { %v3892_v38 = vadd.f32 %v3891_v43, %v3890_v17 }
 0x308   : > { %v3893_v55 = vrot.slane %v3892_v38, 1 }
 0x30a   : > { %v3894_v62 = vadd.f32 %v3893_v55, %v3892_v38 }
 0x30c   : > { %v3896_v31 = vmul.f32 0.00390625, %v3894_v62 }
 0x30e   : > { %v13872_v16 = vsub.f32 %v13690_v56, %v3896_v31  ;;  %v13875_v20 = vsub.f32 %v13694_v41, %v3896_v31  ;;  %v13878_v49 = vsub.f32 %v13688_v47, %v3896_v31  ;;  %v13881_v18 = vsub.f32 %v13692_v54, %v3896_v31 }
 0x30f   : > { %v13884_v2 = vsub.f32 %v13734_v14, %v3896_v31  ;;  %v13887_v0 = vsub.f32 %v13744_v9, %v3896_v31  ;;  %v13890_v32 = vsub.f32 %v13730_v33, %v3896_v31  ;;  %v13893_v56 = vsub.f32 %v13738_v52, %v3896_v31 }
 0x310   : > { %v13896_v41 = vsub.f32 %v13788_v60, %v3896_v31  ;;  %v13899_v47 = vsub.f32 %v13794_v21, %v3896_v31  ;;  %v13902_v54 = vsub.f32 %v13786_v22, %v3896_v31  ;;  %v13905_v14 = vsub.f32 %v13792_v59, %v3896_v31 }
 0x311   : > { %v13908_v9 = vsub.f32 %v13812_v25, %v3896_v31  ;;  %v13911_v33 = vsub.f32 %v13818_v4, %v3896_v31  ;;  %v13914_v52 = vsub.f32 %v13810_v57, %v3896_v31  ;;  %v13917_v60 = vsub.f32 %v13816_v27, %v3896_v31 }
 0x312   : > { %v13920_v21 = vsub.f32 %v13834_v40, %v3896_v31  ;;  %v13923_v22 = vsub.f32 %v13840_v35, %v3896_v31  ;;  %v13926_v59 = vsub.f32 %v13832_v58, %v3896_v31  ;;  %v13929_v25 = vsub.f32 %v13838_v19, %v3896_v31 }
 0x313   : > { %v13932_v4 = vsub.f32 %v13850_v53, %v3896_v31  ;;  %v13934_v57 = vsub.f32 %v3782_v7, %v3896_v31  ;;  %v13937_v27 = vsub.f32 %v13848_v42, %v3896_v31  ;;  %v13940_v40 = vsub.f32 %v13854_v26, %v3896_v31 }
 0x314   : > { %v13942_v8 = vsub.f32 %v3795_v44, %v3896_v31  ;;  %v13944_v35 = vsub.f32 %v3798_v1, %v3896_v31  ;;  %v13946_v58 = vsub.f32 %v10943_v34, %v3896_v31  ;;  %v13948_v50 = vsub.f32 %v10944_v15, %v3896_v31 }
 0x315   : > { %v13950_v19 = vsub.f32 %v3811_v36, %v3896_v31  ;;  %v13952_v53 = vsub.f32 %v3814_v51, %v3896_v31  ;;  %v13954_v7 = vsub.f32 %v10947_v10, %v3896_v31  ;;  %v13956_v23 = vsub.f32 %v10948_v3, %v3896_v31 }
 0x316   : > { %v3929_v42 = vmul.f32 %v13872_v16, %v13872_v16  ;;  %v3930_v26 = vmul.f32 %v13875_v20, %v13875_v20  ;;  %v3931_v34 = vmul.f32 %v13878_v49, %v13878_v49  ;;  %v3932_v44 = vmul.f32 %v13881_v18, %v13881_v18 }
 0x317   : > { %v3933_v36 = vmul.f32 %v13884_v2, %v13884_v2  ;;  %v3934_v46 = vmul.f32 %v13887_v0, %v13887_v0  ;;  %v3935_v12 = vmul.f32 %v13890_v32, %v13890_v32  ;;  %v3936_v48 = vmul.f32 %v13893_v56, %v13893_v56 }
 0x318   : > { %v3961_v15 = vsel %vm3575_vm14, %v3929_v42, 0.0  ;;  %v3962_v1 = vsel %vm3575_vm14, %v3930_v26, 0.0  ;;  %v3964_v61 = vsel %vm3575_vm14, %v3931_v34, 0.0  ;;  %v3966_v51 = vsel %vm3575_vm14, %v3932_v44, 0.0 }
 0x319   : > { %v3963_v10 = vadd.f32 %v3962_v1, %v3961_v15  ;;  %v3968_v5 = vsel %vm3575_vm14, %v3933_v36, 0.0  ;;  %v3970_v28 = vsel %vm3575_vm14, %v3934_v46, 0.0  ;;  %v3937_v13 = vmul.f32 %v13896_v41, %v13896_v41 }
 0x31a   : > { %v3972_v6 = vsel %vm3575_vm14, %v3935_v12, 0.0  ;;  %v3938_v43 = vmul.f32 %v13899_v47, %v13899_v47  ;;  %v3974_v38 = vsel %vm3575_vm14, %v3936_v48, 0.0  ;;  %v3939_v62 = vmul.f32 %v13902_v54, %v13902_v54 }
 0x31b   : > { %v3965_v3 = vadd.f32 %v3964_v61, %v3963_v10  ;;  %v3976_v31 = vsel %vm3575_vm14, %v3937_v13, 0.0  ;;  %v3940_v26 = vmul.f32 %v13905_v14, %v13905_v14  ;;  %v3941_v15 = vmul.f32 %v13908_v9, %v13908_v9 }
 0x31c   : > { %v3978_v34 = vsel %vm3575_vm14, %v3938_v43, 0.0  ;;  %v3980_v1 = vsel %vm3575_vm14, %v3939_v62, 0.0  ;;  %v3942_v36 = vmul.f32 %v13911_v33, %v13911_v33  ;;  %v3943_v46 = vmul.f32 %v13914_v52, %v13914_v52 }
 0x31d   : > { %v3967_v30 = vadd.f32 %v3966_v51, %v3965_v3  ;;  %v3982_v61 = vsel %vm3575_vm14, %v3940_v26, 0.0  ;;  %v3984_v51 = vsel %vm3575_vm14, %v3941_v15, 0.0  ;;  %v3944_v12 = vmul.f32 %v13917_v60, %v13917_v60  ;;  %v4108_v15 = vld [vmem:[#allocation3] sm:$0x1] }
 0x31e   : > { %v3945_v48 = vmul.f32 %v13920_v21, %v13920_v21  ;;  %v3946_v13 = vmul.f32 %v13923_v22, %v13923_v22  ;;  %v3947_v43 = vmul.f32 %v13926_v59, %v13926_v59  ;;  %v3948_v62 = vmul.f32 %v13929_v25, %v13929_v25 }
 0x31f   : > { %v3969_v45 = vadd.f32 %v3968_v5, %v3967_v30  ;;  %v3986_v5 = vsel %vm3575_vm14, %v3942_v36, 0.0  ;;  %v3949_v26 = vmul.f32 %v13932_v4, %v13932_v4  ;;  %v4109_v36 = vsel %vm13626_vm6, 0, %v4108_v15 }
 0x320   : > { %4110 = vst [vmem:[#allocation3] sm:$0x1] %v4109_v36 }
 0x321   : > { %v3971_v11 = vadd.f32 %v3970_v28, %v3969_v45  ;;  %v3988_v28 = vsel %vm3575_vm14, %v3943_v46, 0.0  ;;  %v4000_v46 = vsel %vm3575_vm14, %v3949_v26, 0.0 }
 0x323   : > { %v3973_v17 = vadd.f32 %v3972_v6, %v3971_v11  ;;  %v3990_v6 = vsel %vm3575_vm14, %v3944_v12, 0.0  ;;  %v11616_v12 = vld [vmem:[%s16573_s2 + $0x18] sm:$0xff]  }
 0x325   : > { %v3975_v55 = vadd.f32 %v3974_v38, %v3973_v17  ;;  %v3992_v38 = vsel %vm3575_vm14, %v3945_v48, 0.0  ;;  %v11617_v48 = vld [vmem:[%s16573_s2 + $0x48] sm:$0xff]  }
 0x327   : > { %v3977_v42 = vadd.f32 %v3976_v31, %v3975_v55  ;;  %v3994_v31 = vsel %vm3575_vm14, %v3946_v13, 0.0  ;;  %v4748_v15 = vld [vmem:[#allocation3] sm:$0xf] }
 0x328   : > { %v4804_v36 = vshll.u32 %v4748_v15, 16 }
 0x329   : > { %v3979_v44 = vadd.f32 %v3978_v34, %v3977_v42  ;;  %v3996_v34 = vsel %vm3575_vm14, %v3947_v43, 0.0 }
 0x32b   : > { %v3981_v10 = vadd.f32 %v3980_v1, %v3979_v44  ;;  %v3950_v1 = vmul.f32 %v13934_v57, %v13934_v57 }
 0x32d   : > { %v3983_v3 = vadd.f32 %v3982_v61, %v3981_v10  ;;  %v3998_v10 = vsel %vm3575_vm14, %v3948_v62, 0.0  ;;  %v4002_v13 = vsel %vm3575_vm14, %v3950_v1, 0.0 }
 0x32f   : > { %v3985_v30 = vadd.f32 %v3984_v51, %v3983_v3  ;;  %v3951_v3 = vmul.f32 %v13937_v27, %v13937_v27  ;;  %v11614_v51 = vld [vmem:[%s16573_s2 + $0x10] sm:$0xff]  }
 0x330   : > { %10949 = vmatprep.subr.bf16.mxu0 %v11614_v51 }
 0x331   : > { %v3987_v45 = vadd.f32 %v3986_v5, %v3985_v30  ;;  %v11615_v30 = vld [vmem:[%s16573_s2 + $0x40] sm:$0xff]   ;;  %v3952_v5 = vmul.f32 %v13940_v40, %v13940_v40  ;;  %10950 = vmatpush3.bf16.msra.mxu0 %v11614_v51  ;;  %v4004_v62 = vsel %vm3575_vm14, %v3951_v3, 0.0  ;;  %v3955_v3 = vmul.f32 %v13946_v58, %v13946_v58 }
 0x332   : > { %11093 = vmatprep.subr.bf16.mxu1 %v11615_v30  ;;  %10951 = vmatprep.subr.bf16.mxu0 %v11616_v12 }
 0x333   : > { %v3989_v11 = vadd.f32 %v3988_v28, %v3987_v45  ;;  %v4163_v28 = vld [vmem:[#allocation3 + $0x8] sm:$0x1]  ;;  %11094 = vmatpush3.bf16.msra.mxu1 %v11615_v30 }
 0x334   : > { %11095 = vmatprep.subr.bf16.mxu1 %v11617_v48 }
 0x335   : > { %v3991_v17 = vadd.f32 %v3990_v6, %v3989_v11  ;;  %v4749_v11 = vld [vmem:[#allocation3 + $0x4] sm:$0xf]  ;;  %v4164_v6 = vsel %vm13637_vm2, 0, %v4163_v28  ;;  %10952 = vmatpush3.bf16.msra.mxu0 %v11616_v12  ;;  %v3956_v28 = vmul.f32 %v13948_v50, %v13948_v50 }
 0x336   : > { %v4814_v43 = vshrl.u32 %v4749_v11, 16  ;;  %4165 = vst [vmem:[#allocation3 + $0x8] sm:$0x1] %v4164_v6 }
 0x337   : > { %v3993_v55 = vadd.f32 %v3992_v38, %v3991_v17  ;;  %v4810_v17 = vshll.u32 %v4749_v11, 16  ;;  %11096 = vmatpush3.bf16.msra.mxu1 %v11617_v48 }
 0x339   : > { %v3995_v42 = vadd.f32 %v3994_v31, %v3993_v55  ;;  %v3953_v55 = vmul.f32 %v13942_v8, %v13942_v8  ;;  %v4812_v31 = vrot.slane %v4810_v17, 5  ;;  %v3957_v17 = vmul.f32 %v13950_v19, %v13950_v19 }
 0x33b   : > { %v3997_v44 = vadd.f32 %v3996_v34, %v3995_v42  ;;  %v4816_v42 = vrot.slane %v4814_v43, 4  ;;  %v3954_v34 = vmul.f32 %v13944_v35, %v13944_v35  ;;  %v4012_v43 = vsel %vm3575_vm14, %v3955_v3, 0.0 }
 0x33d   : > { %v3999_v61 = vadd.f32 %v3998_v10, %v3997_v44  ;;  %v4006_v44 = vsel %vm3575_vm14, %v3952_v5, 0.0  ;;  %v4801_v10 = vshrl.u32 %v4748_v15, 16  ;;  %v4010_v5 = vsel %vm3575_vm14, %v3954_v34, 0.0  ;;  %v4784_v11 = vld [vmem:[#allocation3 + $0x8] sm:$0x1] }
 0x33e   : > { %v4820_v6 = vshll.u32 %v4784_v11, 16 }
 0x33f   : > { %v4001_v45 = vadd.f32 %v4000_v46, %v3999_v61  ;;  %v4817_v61 = vor.u32 %v4816_v42, %v4812_v31  ;;  %v4008_v46 = vsel %vm3575_vm14, %v3953_v55, 0.0  ;;  %v4803_v30 = vrot.slane %v4801_v10, 4 }
 0x340   : > { %v3958_v42 = vmul.f32 %v13952_v53, %v13952_v53  ;;  %v3959_v10 = vmul.f32 %v13954_v7, %v13954_v7 }
 0x341   : > { %v4003_v38 = vadd.f32 %v4002_v13, %v4001_v45  ;;  %v4806_v45 = vrot.slane %v4804_v36, 5  ;;  %v4818_v48 = vrot.slane %v4817_v61, 4  ;;  %v4016_v36 = vsel %vm3575_vm14, %v3957_v17, 0.0 }
 0x343   : > { %v4005_v26 = vadd.f32 %v4004_v62, %v4003_v38  ;;  %v4807_v12 = vor.u32 %v4806_v45, %v4803_v30  ;;  %v4822_v62 = vrot.slane %v4820_v6, 5  ;;  %v4020_v30 = vsel %vm3575_vm14, %v3959_v10, 0.0 }
 0x345   : > { %v4007_v1 = vadd.f32 %v4006_v44, %v4005_v26  ;;  %v4808_v55 = vrot.slane %v4807_v12, 4  ;;  %v4014_v26 = vsel %vm3575_vm14, %v3956_v28, 0.0  ;;  %v4823_v15 = vsel %vm12056_vm15, %v4818_v48, %v4822_v62 }
 0x347   : > { %v4009_v51 = vadd.f32 %v4008_v46, %v4007_v1  ;;  %v4813_v34 = vsel %vm12056_vm15, %v4808_v55, %v4812_v31  ;;  %v11618_v1 = vld [vmem:[%s16573_s2 + $0x50] sm:$0xff]   ;;  %v3960_v46 = vmul.f32 %v13956_v23, %v13956_v23  ;;  %v4018_v31 = vsel %vm3575_vm14, %v3958_v42, 0.0 }
 0x348   : > { %v10230_v61 = vcombine.low %v4813_v34, %v4823_v15  ;;  %11129 = vmatprep.subr.bf16.mxu1 %v11618_v1 }
 0x349   : > { %v4011_v13 = vadd.f32 %v4010_v5, %v4009_v51  ;;  %v4022_v28 = vsel %vm3575_vm14, %v3960_v46, 0.0 }
 0x34a   : > { %10953 = vmatprep.mubr.msk.bf16.mxu0 %vm3575_vm14, %v10230_v61 }
 0x34b   : > { %v4013_v38 = vadd.f32 %v4012_v43, %v4011_v13 }
 0x34d   : > { %v4015_v44 = vadd.f32 %v4014_v26, %v4013_v38 }
 0x34f   : > { %v4017_v3 = vadd.f32 %v4016_v36, %v4015_v44 }
 0x351   : > { %v4019_v51 = vadd.f32 %v4018_v31, %v4017_v3 }
 0x353   : > { %v4021_v45 = vadd.f32 %v4020_v30, %v4019_v51 }
 0x355   : > { %v4023_v5 = vadd.f32 %v4022_v28, %v4021_v45 }
 0x357   : > { %v4024_v11 = vrot.slane %v4023_v5, 4 }
 0x359   : > { %v4025_v13 = vadd.f32 %v4024_v11, %v4023_v5 }
 0x35b   : > { %v4026_v12 = vrot.slane %v4025_v13, 2 }
 0x35d   : > { %v4027_v48 = vadd.f32 %v4026_v12, %v4025_v13 }
 0x35f   : > { %v4028_v6 = vrot.slane %v4027_v48, 1 }
 0x361   : > { %v4029_v17 = vadd.f32 %v4028_v6, %v4027_v48 }
 0x363   : > { %v4030_v43 = vmul.f32 0.00390625, %v4029_v17 }
 0x365   : > { %v4031_v38 = vadd.f32 1e-05, %v4030_v43 }
 0x367   : > { %11680 = vrsqrt.f32 %v4031_v38 }
 0x371   : > { %v11681_v55 = vpop.eup %11680 }
 0x372   : > { %v4061_v62 = vmul.f32 %v11681_v55, %v13950_v19  ;;  %v4062_v42 = vmul.f32 %v11681_v55, %v13952_v53  ;;  %v14081_v26 = vmul.f32 %v11681_v55, %v13872_v16  ;;  %v14084_v44 = vmul.f32 %v11681_v55, %v13875_v20 }
 0x373   : > { %v14087_v34 = vmul.f32 %v11681_v55, %v13878_v49  ;;  %v14090_v15 = vmul.f32 %v11681_v55, %v13881_v18  ;;  %v14093_v1 = vmul.f32 %v11681_v55, %v13884_v2  ;;  %v14096_v10 = vmul.f32 %v11681_v55, %v13887_v0 }
 0x374   : > { %v4093_v19 = vmax.f32 %v4061_v62, 0.0  ;;  %v4094_v53 = vmax.f32 %v4062_v42, 0.0  ;;  %v14099_v16 = vmul.f32 %v11681_v55, %v13890_v32  ;;  %v14102_v20 = vmul.f32 %v11681_v55, %v13893_v56 }
 0x375   : > { %v14105_v49 = vmul.f32 %v11681_v55, %v13896_v41  ;;  %v14108_v18 = vmul.f32 %v11681_v55, %v13899_v47  ;;  %v14111_v2 = vmul.f32 %v11681_v55, %v13902_v54  ;;  %v14114_v0 = vmul.f32 %v11681_v55, %v13905_v14 }
 0x376   : > { %v14116_v36 = vpack.c.bf16 %v4093_v19, %v4093_v19  ;;  %v10647_v61 = vpack.c.bf16 %v4094_v53, %v4094_v53  ;;  %v14119_v32 = vmul.f32 %v11681_v55, %v13908_v9  ;;  %v14122_v56 = vmul.f32 %v11681_v55, %v13911_v33 }
 0x377   : > { %v14125_v41 = vmul.f32 %v11681_v55, %v13914_v52  ;;  %v14128_v47 = vmul.f32 %v11681_v55, %v13917_v60  ;;  %v14131_v54 = vmul.f32 %v11681_v55, %v13920_v21  ;;  %v14134_v14 = vmul.f32 %v11681_v55, %v13923_v22 }
 0x378   : > { %v4552_v3 = vshrl.u32 %v14116_v36, 16  ;;  %v4560_v46 = vshrl.u32 %v10647_v61, 16  ;;  %v4563_v9 = vshll.u32 %v10647_v61, 16  ;;  %v14138_v31 = vmul.f32 %v11681_v55, %v13926_v59 }
 0x379   : > { %v14141_v33 = vmul.f32 %v11681_v55, %v13929_v25  ;;  %v14144_v52 = vmul.f32 %v11681_v55, %v13932_v4  ;;  %v14147_v60 = vmul.f32 %v11681_v55, %v13934_v57  ;;  %v14150_v21 = vmul.f32 %v11681_v55, %v13937_v27  ;;  %v4738_v25 = vld [vmem:[#allocation3 + $0xbc] sm:$0x1] }
 0x37a   : > { %v14152_v22 = vrot.slane %v4552_v3, 7  ;;  %v4562_v51 = vrot.slane %v4560_v46, 7  ;;  %v14155_v30 = vmul.f32 %v11681_v55, %v13940_v40  ;;  %v14158_v59 = vmul.f32 %v11681_v55, %v13942_v8 }
 0x37b   : > { %v14161_v45 = vmul.f32 %v11681_v55, %v13944_v35  ;;  %v14164_v4 = vmul.f32 %v11681_v55, %v13946_v58  ;;  %v14167_v57 = vmul.f32 %v11681_v55, %v13948_v50  ;;  %v14170_v27 = vmul.f32 %v11681_v55, %v13954_v7 }
 0x37c   : > { %v4558_v28 = vrot.slane %v14152_v22, 4  ;;  %v4565_v40 = vor.u32 %v4563_v9, %v4562_v51  ;;  %v4567_v5 = vrot.slane %v4562_v51, 4  ;;  %v14174_v8 = vmul.f32 %v11681_v55, %v13956_v23 }
 0x37d   : > { %v4555_v11 = vshll.u32 %v14116_v36, 16  ;;  %v4065_v35 = vmax.f32 %v14081_v26, 0.0  ;;  %v4066_v58 = vmax.f32 %v14084_v44, 0.0  ;;  %v4067_v13 = vmax.f32 %v14087_v34, 0.0 }
 0x37e   : > { %v4566_v50 = vsel %vm11981_vm12, %v4558_v28, %v4565_v40  ;;  %v4739_v7 = vsel %vm13626_vm6, %v4567_v5, %v4738_v25  ;;  %v4068_v12 = vmax.f32 %v14090_v15, 0.0  ;;  %v4069_v48 = vmax.f32 %v14093_v1, 0.0 }
 0x37f   : > { %4737 = vst.msk [vmem:[#allocation3 + $0xb8] sm:$0xf] %vm16645_vm4, %v4566_v50  ;;  %4740 = vst [vmem:[#allocation3 + $0xbc] sm:$0x1] %v4739_v7  ;;  %v4070_v23 = vmax.f32 %v14096_v10, 0.0  ;;  %v4071_v6 = vmax.f32 %v14099_v16, 0.0 }
 0x380   : > { %v4072_v17 = vmax.f32 %v14102_v20, 0.0  ;;  %v4073_v43 = vmax.f32 %v14105_v49, 0.0  ;;  %v4074_v38 = vmax.f32 %v14108_v18, 0.0  ;;  %v4075_v55 = vmax.f32 %v14111_v2, 0.0  ;;  %vm16654_vm4 = vmmov %vm16651_vm0 }
 0x381   : > { %v4076_v62 = vmax.f32 %v14114_v0, 0.0  ;;  %v4077_v42 = vmax.f32 %v14119_v32, 0.0  ;;  %v4078_v26 = vmax.f32 %v14122_v56, 0.0  ;;  %v4079_v44 = vmax.f32 %v14125_v41, 0.0 }
 0x382   : > { %v4080_v34 = vmax.f32 %v14128_v47, 0.0  ;;  %v4081_v15 = vmax.f32 %v14131_v54, 0.0  ;;  %v4082_v1 = vmax.f32 %v14134_v14, 0.0  ;;  %v4083_v10 = vmax.f32 %v14138_v31, 0.0 }
 0x383   : > { %v4084_v19 = vmax.f32 %v14141_v33, 0.0  ;;  %v4085_v53 = vmax.f32 %v14144_v52, 0.0  ;;  %v4086_v16 = vmax.f32 %v14147_v60, 0.0  ;;  %v4087_v20 = vmax.f32 %v14150_v21, 0.0 }
 0x384   : > { %v4088_v49 = vmax.f32 %v14155_v30, 0.0  ;;  %v4089_v18 = vmax.f32 %v14158_v59, 0.0  ;;  %v4090_v2 = vmax.f32 %v14161_v45, 0.0  ;;  %v4091_v0 = vmax.f32 %v14164_v4, 0.0 }
 0x385   : > { %v4092_v61 = vmax.f32 %v14167_v57, 0.0  ;;  %v4095_v32 = vmax.f32 %v14170_v27, 0.0  ;;  %v4096_v56 = vmax.f32 %v14174_v8, 0.0  ;;  %v10618_v41 = vpack.c.bf16 %v4065_v35, %v4065_v35 }
 0x386   : > { %v10619_v47 = vpack.c.bf16 %v4066_v58, %v4066_v58  ;;  %v10620_v54 = vpack.c.bf16 %v4067_v13, %v4067_v13  ;;  %v10621_v14 = vpack.c.bf16 %v4068_v12, %v4068_v12  ;;  %v10622_v3 = vpack.c.bf16 %v4069_v48, %v4069_v48 }
 0x387   : > { %v10623_v46 = vpack.c.bf16 %v4070_v23, %v4070_v23  ;;  %v14212_v9 = vpack.c.bf16 %v4071_v6, %v4071_v6  ;;  %v14214_v31 = vpack.c.bf16 %v4072_v17, %v4072_v17  ;;  %v14216_v33 = vpack.c.bf16 %v4073_v43, %v4073_v43 }
 0x388   : > { %v14218_v52 = vpack.c.bf16 %v4074_v38, %v4074_v38  ;;  %v14220_v60 = vpack.c.bf16 %v4075_v55, %v4075_v55  ;;  %v14222_v21 = vpack.c.bf16 %v4076_v62, %v4076_v62  ;;  %v14224_v51 = vpack.c.bf16 %v4077_v42, %v4077_v42 }
 0x389   : > { %v14226_v30 = vpack.c.bf16 %v4078_v26, %v4078_v26  ;;  %v14228_v59 = vpack.c.bf16 %v4079_v44, %v4079_v44  ;;  %v14230_v25 = vpack.c.bf16 %v4080_v34, %v4080_v34  ;;  %v14232_v45 = vpack.c.bf16 %v4081_v15, %v4081_v15 }
 0x38a   : > { %v14234_v4 = vpack.c.bf16 %v4082_v1, %v4082_v1  ;;  %v14236_v57 = vpack.c.bf16 %v4083_v10, %v4083_v10  ;;  %v14238_v27 = vpack.c.bf16 %v4084_v19, %v4084_v19  ;;  %v14240_v28 = vpack.c.bf16 %v4085_v53, %v4085_v53 }
 0x38b   : > { %v14242_v40 = vpack.c.bf16 %v4086_v16, %v4086_v16  ;;  %v14244_v5 = vpack.c.bf16 %v4087_v20, %v4087_v20  ;;  %v14246_v8 = vpack.c.bf16 %v4088_v49, %v4088_v49  ;;  %v14248_v35 = vpack.c.bf16 %v4089_v18, %v4089_v18 }
 0x38c   : > { %v14250_v58 = vpack.c.bf16 %v4090_v2, %v4090_v2  ;;  %v14252_v13 = vpack.c.bf16 %v4091_v0, %v4091_v0  ;;  %v14254_v50 = vpack.c.bf16 %v4092_v61, %v4092_v61  ;;  %v14256_v7 = vpack.c.bf16 %v4095_v32, %v4095_v32 }
 0x38d   : > { %v14258_v12 = vpack.c.bf16 %v4096_v56, %v4096_v56  ;;  %v4314_v48 = vshrl.u32 %v10618_v41, 16  ;;  %v4317_v23 = vshll.u32 %v10618_v41, 16  ;;  %v4322_v6 = vshrl.u32 %v10619_v47, 16 }
 0x38e   : > { %v4325_v17 = vshll.u32 %v10619_v47, 16  ;;  %v4331_v43 = vshrl.u32 %v10620_v54, 16  ;;  %v4334_v55 = vshll.u32 %v10620_v54, 16  ;;  %v4339_v62 = vshrl.u32 %v10621_v14, 16 }
 0x38f   : > { %v4316_v38 = vrot.slane %v4314_v48, 7  ;;  %v4342_v42 = vshll.u32 %v10621_v14, 16  ;;  %v14260_v26 = vrot.slane %v4322_v6, 7  ;;  %v4348_v34 = vshrl.u32 %v10622_v3, 16 }
 0x390   : > { %v4333_v44 = vrot.slane %v4331_v43, 7  ;;  %v4351_v15 = vshll.u32 %v10622_v3, 16  ;;  %v14264_v19 = vrot.slane %v4339_v62, 7  ;;  %v4356_v53 = vshrl.u32 %v10623_v46, 16 }
 0x391   : > { %v14262_v1 = vor.u32 %v4317_v23, %v4316_v38  ;;  %v4320_v10 = vrot.slane %v4316_v38, 4  ;;  %v4327_v16 = vor.u32 %v4325_v17, %v14260_v26  ;;  %v4350_v61 = vrot.slane %v4348_v34, 7  ;;  %v4678_v23 = vld [vmem:[#allocation3 + $0x54] sm:$0xf] }
 0x392   : > { %v14268_v49 = vor.u32 %v4334_v55, %v4333_v44  ;;  %v4337_v18 = vrot.slane %v4333_v44, 4  ;;  %v4344_v2 = vor.u32 %v4342_v42, %v14264_v19  ;;  %v14272_v32 = vrot.slane %v4356_v53, 7 }
 0x393   : > { %v4328_v56 = vsel %vm11981_vm12, %v4320_v10, %v4327_v16  ;;  %v4359_v41 = vshll.u32 %v10623_v46, 16  ;;  %v4365_v47 = vshrl.u32 %v14212_v9, 16  ;;  %v4368_v54 = vshll.u32 %v14212_v9, 16 }
 0x394   : > { %v4345_v14 = vsel %vm11981_vm12, %v4337_v18, %v4344_v2  ;;  %v14280_v3 = vor.u32 %v4351_v15, %v4350_v61  ;;  %v4354_v48 = vrot.slane %v4350_v61, 4  ;;  %4639 = vst.msk [vmem:[#allocation3 + $0x10] sm:$0xf] %vm16646_vm5, %v4328_v56  ;;  %v4373_v43 = vshrl.u32 %v14214_v31, 16  ;;  %vm16655_vm5 = vmmov %vm16651_vm0 }
 0x395   : > { %v4361_v6 = vor.u32 %v4359_v41, %v14272_v32  ;;  %v4367_v17 = vrot.slane %v4365_v47, 7  ;;  %v4376_v46 = vshll.u32 %v14214_v31, 16  ;;  %4646 = vst.msk [vmem:[#allocation3 + $0x1c] sm:$0xf] %vm16647_vm9, %v4345_v14  ;;  %v4382_v9 = vshrl.u32 %v14216_v33, 16  ;;  %vm16656_vm9 = vmmov %vm16651_vm0 }
 0x396   : > { %v4385_v38 = vshll.u32 %v14216_v33, 16  ;;  %v4390_v55 = vshrl.u32 %v14218_v52, 16  ;;  %v4393_v62 = vshll.u32 %v14218_v52, 16  ;;  %v14296_v15 = vrot.slane %v4373_v43, 7  ;;  %v4675_v47 = vld [vmem:[#allocation3 + $0x50] sm:$0x1] }
 0x397   : > { %v4362_v42 = vsel %vm11981_vm12, %v4354_v48, %v4361_v6  ;;  %v14294_v44 = vor.u32 %v4368_v54, %v4367_v17  ;;  %v4371_v34 = vrot.slane %v4367_v17, 4  ;;  %v4384_v10 = vrot.slane %v4382_v9, 7  ;;  %v4668_v52 = vld [vmem:[#allocation3 + $0x44] sm:$0x1] }
 0x398   : > { %v14298_v31 = vrot.slane %v4390_v55, 7  ;;  %v4399_v53 = vshrl.u32 %v14220_v60, 16  ;;  %v4402_v16 = vshll.u32 %v14220_v60, 16  ;;  %4653 = vst.msk [vmem:[#allocation3 + $0x28] sm:$0xf] %vm16648_vm13, %v4362_v42  ;;  %v4378_v33 = vor.u32 %v4376_v46, %v14296_v15 }
 0x399   : > { %v4407_v18 = vshrl.u32 %v14222_v21, 16  ;;  %v4410_v2 = vshll.u32 %v14222_v21, 16  ;;  %v14307_v61 = vor.u32 %v4385_v38, %v4384_v10  ;;  %v4388_v56 = vrot.slane %v4384_v10, 4 }
 0x39a   : > { %v4395_v41 = vor.u32 %v4393_v62, %v14298_v31  ;;  %v4379_v60 = vsel %vm11981_vm12, %v4371_v34, %v4378_v33  ;;  %v4401_v54 = vrot.slane %v4399_v53, 7  ;;  %v4416_v48 = vshrl.u32 %v14224_v51, 16 }
 0x39b   : > { %v14313_v14 = vrot.slane %v4407_v18, 7  ;;  %v4419_v21 = vshll.u32 %v14224_v51, 16  ;;  %v4424_v17 = vshrl.u32 %v14226_v30, 16  ;;  %v4427_v43 = vshll.u32 %v14226_v30, 16  ;;  %4660 = vst.msk [vmem:[#allocation3 + $0x34] sm:$0xf] %vm16649_vm3, %v4379_v60  ;;  %vm16658_vm3 = vmmov %vm16651_vm0 }
 0x39c   : > { %v4396_v6 = vsel %vm11981_vm12, %v4388_v56, %v4395_v41  ;;  %v14322_v46 = vor.u32 %v4402_v16, %v4401_v54  ;;  %v4405_v9 = vrot.slane %v4401_v54, 4  ;;  %v4418_v62 = vrot.slane %v4416_v48, 7 }
 0x39d   : > { %v4412_v38 = vor.u32 %v4410_v2, %v14313_v14  ;;  %4667 = vst.msk [vmem:[#allocation3 + $0x40] sm:$0xf] %vm16650_vm11, %v4396_v6  ;;  %v14327_v42 = vrot.slane %v4424_v17, 7  ;;  %v4433_v51 = vshrl.u32 %v14228_v59, 16  ;;  %v4436_v34 = vshll.u32 %v14228_v59, 16 }
 0x39e   : > { %v4441_v10 = vshrl.u32 %v14230_v25, 16  ;;  %v4444_v53 = vshll.u32 %v14230_v25, 16  ;;  %v4450_v16 = vshrl.u32 %v14232_v45, 16  ;;  %v14336_v33 = vor.u32 %v4419_v21, %v4418_v62 }
 0x39f   : > { %v4413_v30 = vsel %vm11981_vm12, %v4405_v9, %v4412_v38  ;;  %v4422_v18 = vrot.slane %v4418_v62, 4  ;;  %v4429_v2 = vor.u32 %v4427_v43, %v14327_v42  ;;  %v4435_v41 = vrot.slane %v4433_v51, 7 }
 0x3a0   : > { %4674 = vst.msk [vmem:[#allocation3 + $0x4c] sm:$0xf] %vm16651_vm0, %v4413_v30  ;;  %v14341_v59 = vrot.slane %v4441_v10, 7  ;;  %v4452_v60 = vrot.slane %v4450_v16, 7  ;;  %v4453_v54 = vshll.u32 %v14232_v45, 16  ;;  %v4458_v48 = vshrl.u32 %v14234_v4, 16 }
 0x3a1   : > { %v4430_v25 = vsel %vm11981_vm12, %v4422_v18, %v4429_v2  ;;  %v4461_v6 = vshll.u32 %v14234_v4, 16  ;;  %v4467_v21 = vshrl.u32 %v14236_v57, 16  ;;  %v14349_v17 = vor.u32 %v4436_v34, %v4435_v41 }
 0x3a2   : > { %v4439_v43 = vrot.slane %v4435_v41, 4  ;;  %v4446_v9 = vor.u32 %v4444_v53, %v14341_v59  ;;  %4681 = vst.msk [vmem:[#allocation3 + $0x58] sm:$0xf] %vm16652_vm7, %v4430_v25  ;;  %v14354_v62 = vor.u32 %v4453_v54, %v4452_v60  ;;  %v4456_v45 = vrot.slane %v4452_v60, 4  ;;  %vm16663_vm7 = vmmov %vm16651_vm0 }
 0x3a3   : > { %v14356_v51 = vrot.slane %v4458_v48, 7  ;;  %v4469_v30 = vrot.slane %v4467_v21, 7  ;;  %v4470_v10 = vshll.u32 %v14236_v57, 16  ;;  %v4475_v34 = vshrl.u32 %v14238_v27, 16 }
 0x3a4   : > { %v4447_v4 = vsel %vm11981_vm12, %v4439_v43, %v4446_v9  ;;  %v4478_v16 = vshll.u32 %v14238_v27, 16  ;;  %v4484_v41 = vshrl.u32 %v14240_v28, 16  ;;  %v4487_v25 = vshll.u32 %v14240_v28, 16 }
 0x3a5   : > { %v4463_v53 = vor.u32 %v4461_v6, %v14356_v51  ;;  %v4473_v2 = vrot.slane %v4469_v30, 4  ;;  %4688 = vst.msk [vmem:[#allocation3 + $0x64] sm:$0xf] %vm16653_vm8, %v4447_v4  ;;  %v14367_v60 = vor.u32 %v4470_v10, %v4469_v30  ;;  %v14369_v54 = vrot.slane %v4475_v34, 7  ;;  %vm16666_vm8 = vmmov %vm16651_vm0 }
 0x3a6   : > { %v4492_v57 = vshrl.u32 %v14242_v40, 16  ;;  %v4486_v48 = vrot.slane %v4484_v41, 7  ;;  %v4495_v6 = vshll.u32 %v14242_v40, 16  ;;  %v4501_v21 = vshrl.u32 %v14244_v5, 16 }
 0x3a7   : > { %v4464_v27 = vsel %vm11981_vm12, %v4456_v45, %v4463_v53  ;;  %v4480_v43 = vor.u32 %v4478_v16, %v14369_v54  ;;  %v4504_v4 = vshll.u32 %v14244_v5, 16  ;;  %v4509_v45 = vshrl.u32 %v14246_v8, 16  ;;  %v4640_v16 = vld [vmem:[#allocation3 + $0x14] sm:$0x1] }
 0x3a8   : > { %v14379_v30 = vrot.slane %v4492_v57, 7  ;;  %4695 = vst.msk [vmem:[#allocation3 + $0x70] sm:$0xf] %vm16654_vm4, %v4464_v27  ;;  %v14383_v28 = vor.u32 %v4487_v25, %v4486_v48  ;;  %v4490_v10 = vrot.slane %v4486_v48, 4  ;;  %v4503_v34 = vrot.slane %v4501_v21, 7 }
 0x3a9   : > { %v4481_v40 = vsel %vm11981_vm12, %v4473_v2, %v4480_v43  ;;  %v4512_v41 = vshll.u32 %v14246_v8, 16  ;;  %v14393_v9 = vrot.slane %v4509_v45, 7  ;;  %v4518_v25 = vshrl.u32 %v14248_v35, 16 }
 0x3aa   : > { %v4497_v53 = vor.u32 %v4495_v6, %v14379_v30  ;;  %v14391_v57 = vor.u32 %v4504_v4, %v4503_v34  ;;  %v4507_v5 = vrot.slane %v4503_v34, 4  ;;  %4702 = vst.msk [vmem:[#allocation3 + $0x7c] sm:$0xf] %vm16655_vm5, %v4481_v40  ;;  %v4521_v2 = vshll.u32 %v14248_v35, 16  ;;  %v4636_v34 = vld [vmem:[#allocation3 + $0xc] sm:$0xf] }
 0x3ab   : > { %v4526_v48 = vshrl.u32 %v14250_v58, 16  ;;  %v4529_v6 = vshll.u32 %v14250_v58, 16  ;;  %v4514_v8 = vor.u32 %v4512_v41, %v14393_v9  ;;  %v4520_v43 = vrot.slane %v4518_v25, 7  ;;  %v4647_v58 = vld [vmem:[#allocation3 + $0x20] sm:$0x1] }
 0x3ac   : > { %v4498_v27 = vsel %vm11981_vm12, %v4490_v10, %v4497_v53  ;;  %v4535_v4 = vshrl.u32 %v14252_v13, 16  ;;  %v4538_v10 = vshll.u32 %v14252_v13, 16  ;;  %v4543_v35 = vshrl.u32 %v14254_v50, 16  ;;  %v4643_v53 = vld [vmem:[#allocation3 + $0x18] sm:$0xf] }
 0x3ad   : > { %4709 = vst.msk [vmem:[#allocation3 + $0x88] sm:$0xf] %vm16656_vm9, %v4498_v27  ;;  %v14406_v45 = vrot.slane %v4526_v48, 7  ;;  %v4546_v40 = vshll.u32 %v14254_v50, 16  ;;  %v4515_v41 = vsel %vm11981_vm12, %v4507_v5, %v4514_v8  ;;  %v14413_v25 = vor.u32 %v4521_v2, %v4520_v43  ;;  %v4650_v13 = vld [vmem:[#allocation3 + $0x24] sm:$0xf] }
 0x3ae   : > { %v4524_v21 = vrot.slane %v4520_v43, 4  ;;  %v4537_v18 = vrot.slane %v4535_v4, 7  ;;  %vm16657_vm13 = vsmask.f32 7938  ;;  %v14423_v38 = vrot.slane %v4543_v35, 7 }
 0x3af   : > { %vm14417_vm11 = vmand %vm16658_vm3, %vm16657_vm13  ;;  %v4531_v48 = vor.u32 %v4529_v6, %v14406_v45  ;;  %v14428_v5 = vor.u32 %v4555_v11, %v14152_v22  ;;  %4716 = vst.msk [vmem:[#allocation3 + $0x94] sm:$0xf] %vm16651_vm0, %v4515_v41  ;;  %v4657_v2 = vld [vmem:[#allocation3 + $0x30] sm:$0xf]  ;;  %v4661_v8 = vld [vmem:[#allocation3 + $0x38] sm:$0x1] }
 0x3b0   : > { %v4654_v43 = vld [vmem:[#allocation3 + $0x2c] sm:$0x1]  ;;  %v14431_v4 = vor.u32 %v4538_v10, %v4537_v18  ;;  %v4541_v56 = vrot.slane %v4537_v18, 4  ;;  %v4569_v55 = vshrl.u32 %v14256_v7, 16  ;;  %v4572_v6 = vshll.u32 %v14256_v7, 16 }
 0x3b1   : > { %16661 = vst [vmem:[#allocation10_spill] sm:$0xff] %v14428_v5  ;;  %v4671_v50 = vld [vmem:[#allocation3 + $0x48] sm:$0xf]  ;;  %v4664_v35 = vld [vmem:[#allocation3 + $0x3c] sm:$0xf]  ;;  %v4532_v36 = vsel %vm11981_vm12, %v4524_v21, %v4531_v48  ;;  %v4548_v22 = vor.u32 %v4546_v40, %v14423_v38  ;;  %v4577_v41 = vshrl.u32 %v14258_v12, 16  ;;  %v4637_v7 = vsel %vm14417_vm11, %v14262_v1, %v4636_v34 }
 0x3b2   : > { %v4685_v10 = vld [vmem:[#allocation3 + $0x60] sm:$0xf]  ;;  %v4682_v18 = vld [vmem:[#allocation3 + $0x5c] sm:$0x1]  ;;  %v4571_v0 = vrot.slane %v4569_v55, 7  ;;  %v4580_v20 = vshll.u32 %v14258_v12, 16  ;;  %v4644_v12 = vsel %vm14417_vm11, %v14268_v49, %v4643_v53 }
 0x3b3   : > { %v16662_v37 = vrot.slane %v14260_v26, 4  ;;  %4723 = vst.msk [vmem:[#allocation3 + $0xa0] sm:$0xf] %vm16663_vm7, %v4532_v36  ;;  %v4689_v40 = vld [vmem:[#allocation3 + $0x68] sm:$0x1]  ;;  %v4549_v55 = vsel %vm11981_vm12, %v4541_v56, %v4548_v22  ;;  %v14451_v63 = vrot.slane %v4577_v41, 7  ;;  %v4651_v22 = vsel %vm14417_vm11, %v14280_v3, %v4650_v13 }
 0x3b4   : > { %v4699_v48 = vld [vmem:[#allocation3 + $0x78] sm:$0xf]  ;;  %v4692_v11 = vld [vmem:[#allocation3 + $0x6c] sm:$0xf]  ;;  %4638 = vst [vmem:[#allocation3 + $0xc] sm:$0xf] %v4637_v7  ;;  %v14460_v5 = vor.u32 %v4572_v6, %v4571_v0  ;;  %v4658_v3 = vsel %vm14417_vm11, %v14294_v44, %v4657_v2 }
 0x3b5   : > { %v4641_v21 = vsel %vm13626_vm6, %v16662_v37, %v4640_v16  ;;  %v16664_v26 = vrot.slane %v14264_v19, 4  ;;  %v4703_v1 = vld [vmem:[#allocation3 + $0x80] sm:$0x1]  ;;  %v4713_v16 = vld [vmem:[#allocation3 + $0x90] sm:$0xf]  ;;  %v4575_v56 = vrot.slane %v4571_v0, 4  ;;  %v4582_v6 = vor.u32 %v4580_v20, %v14451_v63 }
 0x3b6   : > { %4642 = vst [vmem:[#allocation3 + $0x14] sm:$0x1] %v4641_v21  ;;  %v4706_v34 = vld [vmem:[#allocation3 + $0x84] sm:$0xf]  ;;  %v4710_v36 = vld [vmem:[#allocation3 + $0x8c] sm:$0x1] }
 0x3b7   : > { %v4648_v37 = vsel %vm13626_vm6, %v16664_v26, %v4647_v58  ;;  %4645 = vst [vmem:[#allocation3 + $0x18] sm:$0xf] %v4644_v12  ;;  %v16665_v49 = vrot.slane %v14272_v32, 4  ;;  %4730 = vst.msk [vmem:[#allocation3 + $0xac] sm:$0xf] %vm16666_vm8, %v4549_v55  ;;  %v4584_v0 = vrot.slane %v14451_v63, 4  ;;  %v4665_v63 = vsel %vm14417_vm11, %v14307_v61, %v4664_v35 }
 0x3b8   : > { %4649 = vst [vmem:[#allocation3 + $0x20] sm:$0x1] %v4648_v37  ;;  %v4717_v53 = vld [vmem:[#allocation3 + $0x98] sm:$0x1]  ;;  %v4727_v58 = vld [vmem:[#allocation3 + $0xa8] sm:$0xf]  ;;  %v4583_v26 = vsel %vm11981_vm12, %v4575_v56, %v4582_v6  ;;  %vm16673_vm12 = vmmov %vm16651_vm0 }
 0x3b9   : > { %v4655_v19 = vsel %vm13626_vm6, %v16665_v49, %v4654_v43  ;;  %v4720_v41 = vld [vmem:[#allocation3 + $0x9c] sm:$0xf]  ;;  %v4724_v7 = vld [vmem:[#allocation3 + $0xa4] sm:$0x1]  ;;  %4652 = vst [vmem:[#allocation3 + $0x24] sm:$0xf] %v4651_v22 }
 0x3ba   : > { %4656 = vst [vmem:[#allocation3 + $0x2c] sm:$0x1] %v4655_v19  ;;  %v16667_v32 = vrot.slane %v14296_v15, 4  ;;  %v4731_v43 = vld [vmem:[#allocation3 + $0xb0] sm:$0x1]  ;;  %v16668_v20 = vrot.slane %v14298_v31, 4  ;;  %v4672_v15 = vsel %vm14417_vm11, %v14322_v46, %v4671_v50  ;;  %v4679_v31 = vsel %vm14417_vm11, %v14336_v33, %v4678_v23 }
 0x3bb   : > { %v4741_v21 = vld [vmem:[#allocation3 + $0xc0] sm:$0xf]  ;;  %v4734_v55 = vld [vmem:[#allocation3 + $0xb4] sm:$0xf]  ;;  %v4745_v12 = vld [vmem:[#allocation3 + $0xc8] sm:$0x1]  ;;  %v4693_v23 = vsel %vm14417_vm11, %v14354_v62, %v4692_v11  ;;  %v4700_v33 = vsel %vm14417_vm11, %v14367_v60, %v4699_v48  ;;  %v4707_v62 = vsel %vm14417_vm11, %v14383_v28, %v4706_v34  ;;  %v4714_v60 = vsel %vm14417_vm11, %v14391_v57, %v4713_v16 }
 0x3bc   : > { %v4662_v13 = vsel %vm13626_vm6, %v16667_v32, %v4661_v8  ;;  %4659 = vst [vmem:[#allocation3 + $0x30] sm:$0xf] %v4658_v3  ;;  %v4669_v44 = vsel %vm13626_vm6, %v16668_v20, %v4668_v52  ;;  %v16669_v2 = vrot.slane %v14313_v14, 4  ;;  %4666 = vst [vmem:[#allocation3 + $0x3c] sm:$0xf] %v4665_v63  ;;  %v16670_v52 = vrot.slane %v14327_v42, 4 }
 0x3bd   : > { %4663 = vst [vmem:[#allocation3 + $0x38] sm:$0x1] %v4662_v13  ;;  %4670 = vst [vmem:[#allocation3 + $0x44] sm:$0x1] %v4669_v44  ;;  %v16671_v39 = vrot.slane %v14341_v59, 4  ;;  %v16672_v46 = vrot.slane %v14356_v51, 4 }
 0x3be   : > { %v4676_v8 = vsel %vm13626_vm6, %v16669_v2, %v4675_v47  ;;  %4673 = vst [vmem:[#allocation3 + $0x48] sm:$0xf] %v4672_v15  ;;  %v4683_v61 = vsel %vm13626_vm6, %v16670_v52, %v4682_v18  ;;  %v4686_v47 = vsel %vm14417_vm11, %v14349_v17, %v4685_v10  ;;  %4680 = vst [vmem:[#allocation3 + $0x54] sm:$0xf] %v4679_v31  ;;  %v16674_v59 = vrot.slane %v14369_v54, 4 }
 0x3bf   : > { %4677 = vst [vmem:[#allocation3 + $0x50] sm:$0x1] %v4676_v8  ;;  %4684 = vst [vmem:[#allocation3 + $0x5c] sm:$0x1] %v4683_v61  ;;  %v4690_v14 = vsel %vm13626_vm6, %v16671_v39, %v4689_v40  ;;  %v4697_v42 = vsel %vm13626_vm6, %v16672_v46, %v4696_v29  ;;  %v16675_v29 = vrot.slane %v14379_v30, 4  ;;  %v16676_v54 = vrot.slane %v14393_v9, 4 }
 0x3c0   : > { %4687 = vst [vmem:[#allocation3 + $0x60] sm:$0xf] %v4686_v47  ;;  %4744 = vst.msk [vmem:[#allocation3 + $0xc4] sm:$0xf] %vm16673_vm12, %v4583_v26  ;;  %v4704_v17 = vsel %vm13626_vm6, %v16674_v59, %v4703_v1  ;;  %v4751_v50 = vld [vmem:[#allocation3 + $0x10] sm:$0xf]  ;;  %v4721_v30 = vsel %vm14417_vm11, %v14413_v25, %v4720_v41  ;;  %v4728_v10 = vsel %vm14417_vm11, %v14431_v4, %v4727_v58 }
 0x3c1   : > { %4691 = vst [vmem:[#allocation3 + $0x68] sm:$0x1] %v4690_v14  ;;  %4694 = vst [vmem:[#allocation3 + $0x6c] sm:$0xf] %v4693_v23  ;;  %v4711_v51 = vsel %vm13626_vm6, %v16675_v29, %v4710_v36  ;;  %v14534_v35 = vld [vmem:[#allocation3 + $0x10] sm:$0xf]  ;;  %v4718_v28 = vsel %vm13626_vm6, %v16676_v54, %v4717_v53  ;;  %v4742_v4 = vsel %vm14417_vm11, %v14460_v5, %v4741_v21 }
 0x3c2   : > { %4698 = vst [vmem:[#allocation3 + $0x74] sm:$0x1] %v4697_v42  ;;  %4701 = vst [vmem:[#allocation3 + $0x78] sm:$0xf] %v4700_v33  ;;  %v16677_v11 = vrot.slane %v14406_v45, 4  ;;  %v16678_v9 = vrot.slane %v14423_v38, 4  ;;  %v4746_v1 = vsel %vm13626_vm6, %v4584_v0, %v4745_v12 }
 0x3c3   : > { %4705 = vst [vmem:[#allocation3 + $0x80] sm:$0x1] %v4704_v17  ;;  %4708 = vst [vmem:[#allocation3 + $0x84] sm:$0xf] %v4707_v62  ;;  %v4750_v18 = vld [vmem:[#allocation3 + $0xc] sm:$0xf] }
 0x3c4   : > { %4712 = vst [vmem:[#allocation3 + $0x8c] sm:$0x1] %v4711_v51  ;;  %4715 = vst [vmem:[#allocation3 + $0x90] sm:$0xf] %v4714_v60  ;;  %v4725_v57 = vsel %vm13626_vm6, %v16677_v11, %v4724_v7  ;;  %v4785_v40 = vld [vmem:[#allocation3 + $0x14] sm:$0x1]  ;;  %v4732_v25 = vsel %vm13626_vm6, %v16678_v9, %v4731_v43 }
 0x3c5   : > { %v6595_v48 = vld [vmem:[#allocation3 + $0xc] sm:$0xf]  ;;  %4719 = vst [vmem:[#allocation3 + $0x98] sm:$0x1] %v4718_v28  ;;  %4722 = vst [vmem:[#allocation3 + $0x9c] sm:$0xf] %v4721_v30 }
 0x3c6   : > { %4726 = vst [vmem:[#allocation3 + $0xa4] sm:$0x1] %v4725_v57  ;;  %4729 = vst [vmem:[#allocation3 + $0xa8] sm:$0xf] %v4728_v10  ;;  %v16679_v45 = vld [vmem:[#allocation10_spill] sm:$0xff]  ;;  %v4825_v16 = vshrl.u32 %v4750_v18, 16 }
 0x3c7   : > { %v4735_v37 = vsel %vm14417_vm11, %v16679_v45, %v4734_v55  ;;  %4733 = vst [vmem:[#allocation3 + $0xb0] sm:$0x1] %v4732_v25  ;;  %4743 = vst [vmem:[#allocation3 + $0xc0] sm:$0xf] %v4742_v4  ;;  %v4828_v38 = vshll.u32 %v4750_v18, 16  ;;  %v4834_v34 = vshll.u32 %v4751_v50, 16 }
 0x3c8   : > { %4736 = vst [vmem:[#allocation3 + $0xb4] sm:$0xf] %v4735_v37  ;;  %4747 = vst [vmem:[#allocation3 + $0xc8] sm:$0x1] %v4746_v1  ;;  %v4838_v36 = vshrl.u32 %v4751_v50, 16  ;;  %v4844_v56 = vshll.u32 %v4785_v40, 16 }
 0x3c9   : > { %v6597_v22 = vld [vmem:[#allocation3 + $0x14] sm:$0x1]  ;;  %v6644_v49 = vshrl.u32 %v6595_v48, 16  ;;  %v6647_v19 = vshll.u32 %v6595_v48, 16  ;;  %v6653_v53 = vshll.u32 %v14534_v35, 16  ;;  %v4827_v58 = vrot.slane %v4825_v16, 4 }
 0x3ca   : > { %v4830_v27 = vrot.slane %v4828_v38, 5  ;;  %v4836_v5 = vrot.slane %v4834_v34, 5  ;;  %v4840_v41 = vrot.slane %v4838_v36, 4  ;;  %v4752_v7 = vld [vmem:[#allocation3 + $0x18] sm:$0xf]  ;;  %v6657_v43 = vshrl.u32 %v14534_v35, 16 }
 0x3cb   : > { %v6646_v6 = vrot.slane %v6644_v49, 4  ;;  %v6649_v0 = vrot.slane %v6647_v19, 5  ;;  %v6655_v3 = vrot.slane %v6653_v53, 5  ;;  %v6663_v21 = vshll.u32 %v6597_v22, 16  ;;  %v4753_v55 = vld [vmem:[#allocation3 + $0x1c] sm:$0xf] }
 0x3cc   : > { %v4831_v32 = vor.u32 %v4830_v27, %v4827_v58  ;;  %v4841_v13 = vor.u32 %v4840_v41, %v4836_v5  ;;  %v4846_v12 = vrot.slane %v4844_v56, 5  ;;  %v4849_v20 = vshrl.u32 %v4752_v7, 16  ;;  %v4786_v26 = vld [vmem:[#allocation3 + $0x20] sm:$0x1]  ;;  %v6598_v39 = vld [vmem:[#allocation3 + $0x18] sm:$0xf] }
 0x3cd   : > { %v6650_v63 = vor.u32 %v6649_v0, %v6646_v6  ;;  %v6659_v2 = vrot.slane %v6657_v43, 4  ;;  %v6665_v8 = vrot.slane %v6663_v21, 5  ;;  %v4852_v61 = vshll.u32 %v4752_v7, 16  ;;  %v14568_v59 = vld [vmem:[#allocation3 + $0x1c] sm:$0xf]  ;;  %v11620_v17 = vld [vmem:[%s16573_s2] sm:$0xff]  }
 0x3ce   : > { %v4832_v44 = vrot.slane %v4831_v32, 4  ;;  %v4842_v15 = vrot.slane %v4841_v13, 4  ;;  %v4851_v52 = vrot.slane %v4849_v20, 4  ;;  %v4858_v47 = vshll.u32 %v4753_v55, 16  ;;  %10985 = vmatprep.subr.bf16.mxu0 %v11620_v17  ;;  %v6600_v57 = vld [vmem:[#allocation3 + $0x20] sm:$0x1] }
 0x3cf   : > { %v6651_v31 = vrot.slane %v6650_v63, 4  ;;  %v6660_v42 = vor.u32 %v6659_v2, %v6655_v3  ;;  %v4862_v33 = vshrl.u32 %v4753_v55, 16  ;;  %v4854_v51 = vrot.slane %v4852_v61, 5  ;;  %v6601_v37 = vld [vmem:[#allocation3 + $0x24] sm:$0xf]  ;;  %v11621_v34 = vld [vmem:[%s16573_s2 + $0x8] sm:$0xff]  }
 0x3d0   : > { %v4837_v23 = vsel %vm12056_vm15, %v4832_v44, %v4836_v5  ;;  %v4847_v46 = vsel %vm12056_vm15, %v4842_v15, %v4846_v12  ;;  %v4860_v60 = vrot.slane %v4858_v47, 5  ;;  %v4868_v28 = vshll.u32 %v4786_v26, 16  ;;  %v6602_v27 = vld [vmem:[#allocation3 + $0x28] sm:$0xf]  ;;  %v6603_v5 = vld [vmem:[#allocation3 + $0x2c] sm:$0x1] }
 0x3d1   : > { %v10231_v62 = vcombine.low %v4837_v23, %v4847_v46  ;;  %v6656_v29 = vsel %vm12056_vm15, %v6651_v31, %v6655_v3  ;;  %v6661_v50 = vrot.slane %v6660_v42, 4  ;;  %v4864_v54 = vrot.slane %v4862_v33, 4  ;;  %v4754_v32 = vld [vmem:[#allocation3 + $0x24] sm:$0xf]  ;;  %v4755_v15 = vld [vmem:[#allocation3 + $0x28] sm:$0xf] }
 0x3d2   : > { %v6668_v30 = vshrl.u32 %v6598_v39, 16  ;;  %v4855_v11 = vor.u32 %v4854_v51, %v4851_v52  ;;  %v6671_v10 = vshll.u32 %v6598_v39, 16  ;;  %v6677_v18 = vshll.u32 %v14568_v59, 16  ;;  %v4787_v26 = vld [vmem:[#allocation3 + $0x2c] sm:$0x1] }
 0x3d3   : > { %10954 = vmatmul.mubr.msk.bf16.vlgmr.msra.gmra.mrb[32].mxu0 %vm3575_vm14, %v10231_v62  ;;  %v6681_v40 = vshrl.u32 %v14568_v59, 16  ;;  %v6666_v48 = vsel %vm12056_vm15, %v6661_v50, %v6665_v8  ;;  %v4865_v9 = vor.u32 %v4864_v54, %v4860_v60  ;;  %v4870_v25 = vrot.slane %v4868_v28, 5  ;;  %v4756_v46 = vld [vmem:[#allocation3 + $0x30] sm:$0xf] }
 0x3d4   : > { %v6670_v45 = vrot.slane %v6668_v30, 4  ;;  %10986 = vmatpush3.bf16.msra.mxu0 %v11620_v17  ;;  %v10394_v4 = vcombine.low %v6656_v29, %v6666_v48  ;;  %v4856_v1 = vrot.slane %v4855_v11, 4  ;;  %v6673_v16 = vrot.slane %v6671_v10, 5  ;;  %v11619_v29 = vld [vmem:[%s16573_s2 + $0x58] sm:$0xff]   ;;  %v4757_v11 = vld [vmem:[#allocation3 + $0x34] sm:$0xf] }
 0x3d5   : > { %v6679_v38 = vrot.slane %v6677_v18, 5  ;;  %v4866_v36 = vrot.slane %v4865_v9, 4  ;;  %v6683_v56 = vrot.slane %v6681_v40, 4  ;;  %v6687_v22 = vshll.u32 %v6600_v57, 16  ;;  %10987 = vmatprep.subr.bf16.mxu0 %v11621_v34  ;;  %v11712_v18 = vld [vmem:[%s16573_s2 + $0x50] sm:$0xff]  }
 0x3d6   : > { %v16586_v49 = vrot.slane %v14568_v59, 5  ;;  %11097 = vmatprep.mubr.msk.bf16.mxu1 %vm3575_vm14, %v10394_v4  ;;  %v4861_v53 = vsel %vm12056_vm15, %v4856_v1, %v4860_v60  ;;  %v6674_v58 = vor.u32 %v6673_v16, %v6670_v45  ;;  %v6692_v41 = vshrl.u32 %v6601_v37, 16  ;;  %v4788_v45 = vld [vmem:[#allocation3 + $0x38] sm:$0x1] }
 0x3d7   : > { %v4871_v7 = vsel %vm12056_vm15, %v4866_v36, %v4870_v25  ;;  %v6684_v6 = vor.u32 %v6683_v56, %v6679_v38  ;;  %v6689_v0 = vrot.slane %v6687_v22, 5  ;;  %v6695_v55 = vshll.u32 %v6601_v37, 16 }
 0x3d8   : > { %v14592_v3 = vrot.slane %v16586_v49, 4  ;;  %10988 = vmatpush3.bf16.msra.mxu0 %v11621_v34  ;;  %v10232_v13 = vcombine.low %v4861_v53, %v4871_v7  ;;  %v6675_v43 = vrot.slane %v6674_v58, 4  ;;  %v6694_v21 = vrot.slane %v6692_v41, 4  ;;  %v11624_v34 = vld [vmem:[%s16573_s2 + $0x60] sm:$0xff]   ;;  %v6605_v58 = vld [vmem:[#allocation3 + $0x34] sm:$0xf] }
 0x3d9   : > { %v6685_v12 = vrot.slane %v6684_v6, 4  ;;  %v6701_v63 = vshll.u32 %v6602_v27, 16  ;;  %v6705_v20 = vshrl.u32 %v6602_v27, 16  ;;  %v6711_v44 = vshll.u32 %v6603_v5, 16 }
 0x3da   : > { %10957 = vmatprep.mubr.msk.bf16.mxu0 %vm3575_vm14, %v10232_v13  ;;  %v6680_v2 = vsel %vm12056_vm15, %v6675_v43, %v6679_v38  ;;  %v6697_v8 = vrot.slane %v6695_v55, 5  ;;  %v4873_v31 = vshrl.u32 %v4754_v32, 16  ;;  %v4876_v52 = vshll.u32 %v4754_v32, 16  ;;  %v6604_v38 = vld [vmem:[#allocation3 + $0x30] sm:$0xf] }
 0x3db   : > { %v6690_v61 = vsel %vm12056_vm15, %v6685_v12, %v6689_v0  ;;  %v6703_v47 = vrot.slane %v6701_v63, 5  ;;  %v6707_v39 = vrot.slane %v6705_v20, 4  ;;  %v6713_v23 = vrot.slane %v6711_v44, 5  ;;  %v6606_v13 = vld [vmem:[#allocation3 + $0x38] sm:$0x1] }
 0x3dc   : > { %v10395_v42 = vcombine.low %v6680_v2, %v6690_v61  ;;  %v6698_v33 = vor.u32 %v6697_v8, %v6694_v21  ;;  %v4875_v17 = vrot.slane %v4873_v31, 4  ;;  %v4878_v62 = vrot.slane %v4876_v52, 5  ;;  %v6607_v20 = vld [vmem:[#allocation3 + $0x3c] sm:$0xf] }
 0x3dd   : > { %v6708_v51 = vor.u32 %v6707_v39, %v6703_v47  ;;  %v4882_v60 = vshll.u32 %v4755_v15, 16  ;;  %v4886_v50 = vshrl.u32 %v4755_v15, 16  ;;  %v4892_v54 = vshll.u32 %v4787_v26, 16  ;;  %v6608_v26 = vld [vmem:[#allocation3 + $0x40] sm:$0xf] }
 0x3de   : > { %11098 = vmatmul.mubr.msk.bf16.vlgmr.msra.gmra.mrb[0].mxu1 %vm3575_vm14, %v10395_v42  ;;  %v6699_v28 = vrot.slane %v6698_v33, 4  ;;  %v4879_v30 = vor.u32 %v4878_v62, %v4875_v17  ;;  %v4897_v57 = vshrl.u32 %v4756_v46, 16  ;;  %v4900_v10 = vshll.u32 %v4756_v46, 16  ;;  %v6609_v42 = vld [vmem:[#allocation3 + $0x44] sm:$0x1] }
 0x3df   : > { %11130 = vmatpush3.bf16.msra.mxu1 %v11712_v18  ;;  %v6709_v40 = vrot.slane %v6708_v51, 4  ;;  %v4884_v48 = vrot.slane %v4882_v60, 5  ;;  %v4888_v9 = vrot.slane %v4886_v50, 4  ;;  %v4894_v25 = vrot.slane %v4892_v54, 5  ;;  %v4758_v60 = vld [vmem:[#allocation3 + $0x3c] sm:$0xf] }
 0x3e0   : > { %v6704_v37 = vsel %vm12056_vm15, %v6699_v28, %v6703_v47  ;;  %v4880_v4 = vrot.slane %v4879_v30, 4  ;;  %v4899_v1 = vrot.slane %v4897_v57, 4  ;;  %v4902_v16 = vrot.slane %v4900_v10, 5  ;;  %11131 = vmatprep.subr.bf16.mxu1 %v11619_v29 }
 0x3e1   : > { %v6714_v36 = vsel %vm12056_vm15, %v6709_v40, %v6713_v23  ;;  %v4889_v56 = vor.u32 %v4888_v9, %v4884_v48  ;;  %v4906_v22 = vshll.u32 %v4757_v11, 16  ;;  %v4910_v53 = vshrl.u32 %v4757_v11, 16  ;;  %v4759_v11 = vld [vmem:[#allocation3 + $0x40] sm:$0xf] }
 0x3e2   : > { %v10396_v27 = vcombine.low %v6704_v37, %v6714_v36  ;;  %v4885_v5 = vsel %vm12056_vm15, %v4880_v4, %v4884_v48  ;;  %v4903_v41 = vor.u32 %v4902_v16, %v4899_v1  ;;  %v4916_v7 = vshll.u32 %v4788_v45, 16  ;;  %v4789_v1 = vld [vmem:[#allocation3 + $0x44] sm:$0x1] }
 0x3e3   : > { %v4890_v6 = vrot.slane %v4889_v56, 4  ;;  %v4908_v0 = vrot.slane %v4906_v22, 5  ;;  %v4912_v32 = vrot.slane %v4910_v53, 4  ;;  %v6716_v43 = vshrl.u32 %v6604_v38, 16  ;;  %11132 = vmatpush3.bf16.msra.mxu1 %v11619_v29 }
 0x3e4   : > { %11101 = vmatprep.mubr.msk.bf16.mxu1 %vm3575_vm14, %v10396_v27  ;;  %v4904_v21 = vrot.slane %v4903_v41, 4  ;;  %v4918_v55 = vrot.slane %v4916_v7, 5  ;;  %v6719_v12 = vshll.u32 %v6604_v38, 16  ;;  %v6725_v63 = vshll.u32 %v6605_v58, 16  ;;  %11165 = vmatprep.subr.bf16.mxu1 %v11624_v34  ;;  %v4760_v34 = vld [vmem:[#allocation3 + $0x48] sm:$0xf] }
 0x3e5   : > { %v4895_v44 = vsel %vm12056_vm15, %v4890_v6, %v4894_v25  ;;  %v4913_v15 = vor.u32 %v4912_v32, %v4908_v0  ;;  %v6718_v2 = vrot.slane %v6716_v43, 4  ;;  %v6729_v8 = vshrl.u32 %v6605_v58, 16  ;;  %v4761_v58 = vld [vmem:[#allocation3 + $0x4c] sm:$0xf] }
 0x3e6   : > { %v10233_v31 = vcombine.low %v4885_v5, %v4895_v44  ;;  %v4909_v52 = vsel %vm12056_vm15, %v4904_v21, %v4908_v0  ;;  %v6721_v61 = vrot.slane %v6719_v12, 5  ;;  %v6727_v47 = vrot.slane %v6725_v63, 5 }
 0x3e7   : > { %v4914_v39 = vrot.slane %v4913_v15, 4  ;;  %v6731_v23 = vrot.slane %v6729_v8, 4  ;;  %v6735_v46 = vshll.u32 %v6606_v13, 16  ;;  %v6740_v33 = vshrl.u32 %v6607_v20, 16 }
 0x3e8   : > { %10958 = vmatmul.mubr.msk.bf16.gmra.mrb[36].mxu0 %vm3575_vm14, %v10233_v31  ;;  %v6722_v17 = vor.u32 %v6721_v61, %v6718_v2  ;;  %v6743_v62 = vshll.u32 %v6607_v20, 16  ;;  %v6749_v29 = vshll.u32 %v6608_v26, 16  ;;  %v6753_v51 = vshrl.u32 %v6608_v26, 16  ;;  %v6610_v20 = vld [vmem:[#allocation3 + $0x48] sm:$0xf] }
 0x3e9   : > { %v4919_v50 = vsel %vm12056_vm15, %v4914_v39, %v4918_v55  ;;  %v6732_v54 = vor.u32 %v6731_v23, %v6727_v47  ;;  %v6737_v28 = vrot.slane %v6735_v46, 5  ;;  %v6742_v30 = vrot.slane %v6740_v33, 4  ;;  %v4790_v55 = vld [vmem:[#allocation3 + $0x50] sm:$0x1]  ;;  %v6611_v26 = vld [vmem:[#allocation3 + $0x4c] sm:$0xf] }
 0x3ea   : > { %v10234_v57 = vcombine.low %v4909_v52, %v4919_v50  ;;  %v6723_v10 = vrot.slane %v6722_v17, 4  ;;  %v6745_v18 = vrot.slane %v6743_v62, 5  ;;  %v6751_v40 = vrot.slane %v6749_v29, 5  ;;  %v6612_v62 = vld [vmem:[#allocation3 + $0x50] sm:$0x1] }
 0x3eb   : > { %v6733_v48 = vrot.slane %v6732_v54, 4  ;;  %v6755_v9 = vrot.slane %v6753_v51, 4  ;;  %v6759_v25 = vshll.u32 %v6609_v42, 16  ;;  %v4921_v45 = vshrl.u32 %v4758_v60, 16 }
 0x3ec   : > { %10961 = vmatprep.mubr.msk.bf16.mxu0 %vm3575_vm14, %v10234_v57  ;;  %v6728_v37 = vsel %vm12056_vm15, %v6723_v10, %v6727_v47  ;;  %v6746_v4 = vor.u32 %v6745_v18, %v6742_v30  ;;  %v4924_v16 = vshll.u32 %v4758_v60, 16  ;;  %v4930_v38 = vshll.u32 %v4759_v11, 16  ;;  %v6613_v60 = vld [vmem:[#allocation3 + $0x54] sm:$0xf] }
 0x3ed   : > { %v6738_v36 = vsel %vm12056_vm15, %v6733_v48, %v6737_v28  ;;  %v6756_v56 = vor.u32 %v6755_v9, %v6751_v40  ;;  %v6761_v22 = vrot.slane %v6759_v25, 5  ;;  %v4923_v53 = vrot.slane %v4921_v45, 4  ;;  %v14638_v25 = vld [vmem:[#allocation3 + $0x58] sm:$0xf] }
 0x3ee   : > { %v10397_v27 = vcombine.low %v6728_v37, %v6738_v36  ;;  %v6747_v5 = vrot.slane %v6746_v4, 4  ;;  %v4926_v41 = vrot.slane %v4924_v16, 5  ;;  %v4932_v7 = vrot.slane %v4930_v38, 5  ;;  %v6615_v38 = vld [vmem:[#allocation3 + $0x5c] sm:$0x1] }
 0x3ef   : > { %v6757_v6 = vrot.slane %v6756_v56, 4  ;;  %v4934_v0 = vshrl.u32 %v4759_v11, 16  ;;  %v4940_v32 = vshll.u32 %v4789_v1, 16  ;;  %v4945_v13 = vshrl.u32 %v4760_v34, 16 }
 0x3f0   : > { %11102 = vmatmul.mubr.msk.bf16.gmra.mrb[4].mxu1 %vm3575_vm14, %v10397_v27  ;;  %v6752_v43 = vsel %vm12056_vm15, %v6747_v5, %v6751_v40  ;;  %v4927_v21 = vor.u32 %v4926_v41, %v4923_v53  ;;  %v4948_v12 = vshll.u32 %v4760_v34, 16  ;;  %v4954_v63 = vshll.u32 %v4761_v58, 16  ;;  %v4762_v34 = vld [vmem:[#allocation3 + $0x54] sm:$0xf] }
 0x3f1   : > { %v6762_v44 = vsel %vm12056_vm15, %v6757_v6, %v6761_v22  ;;  %v4936_v15 = vrot.slane %v4934_v0, 4  ;;  %v4942_v2 = vrot.slane %v4940_v32, 5  ;;  %v4947_v8 = vrot.slane %v4945_v13, 4  ;;  %v4763_v32 = vld [vmem:[#allocation3 + $0x58] sm:$0xf] }
 0x3f2   : > { %v10398_v31 = vcombine.low %v6752_v43, %v6762_v44  ;;  %v4928_v52 = vrot.slane %v4927_v21, 4  ;;  %v4950_v61 = vrot.slane %v4948_v12, 5  ;;  %v4956_v47 = vrot.slane %v4954_v63, 5  ;;  %v4791_v63 = vld [vmem:[#allocation3 + $0x5c] sm:$0x1] }
 0x3f3   : > { %v4937_v39 = vor.u32 %v4936_v15, %v4932_v7  ;;  %v4958_v23 = vshrl.u32 %v4761_v58, 16  ;;  %v4964_v46 = vshll.u32 %v4790_v55, 16  ;;  %v6764_v42 = vshrl.u32 %v6610_v20, 16 }
 0x3f4   : > { %11105 = vmatprep.mubr.msk.bf16.mxu1 %vm3575_vm14, %v10398_v31  ;;  %v4933_v33 = vsel %vm12056_vm15, %v4928_v52, %v4932_v7  ;;  %v4951_v17 = vor.u32 %v4950_v61, %v4947_v8  ;;  %v6767_v29 = vshll.u32 %v6610_v20, 16  ;;  %v6773_v51 = vshll.u32 %v6611_v26, 16  ;;  %v4764_v20 = vld [vmem:[#allocation3 + $0x60] sm:$0xf] }
 0x3f5   : > { %v4938_v50 = vrot.slane %v4937_v39, 4  ;;  %v4960_v54 = vrot.slane %v4958_v23, 4  ;;  %v4966_v28 = vrot.slane %v4964_v46, 5  ;;  %v6766_v30 = vrot.slane %v6764_v42, 4 }
 0x3f6   : > { %v4952_v11 = vrot.slane %v4951_v17, 4  ;;  %v6769_v57 = vrot.slane %v6767_v29, 5  ;;  %v6775_v10 = vrot.slane %v6773_v51, 5  ;;  %v6777_v18 = vshrl.u32 %v6611_v26, 16 }
 0x3f7   : > { %v4943_v40 = vsel %vm12056_vm15, %v4938_v50, %v4942_v2  ;;  %v4961_v48 = vor.u32 %v4960_v54, %v4956_v47  ;;  %v6783_v9 = vshll.u32 %v6612_v62, 16  ;;  %v6788_v45 = vshrl.u32 %v6613_v60, 16 }
 0x3f8   : > { %v10235_v37 = vcombine.low %v4933_v33, %v4943_v40  ;;  %v4957_v4 = vsel %vm12056_vm15, %v4952_v11, %v4956_v47  ;;  %v6770_v1 = vor.u32 %v6769_v57, %v6766_v30  ;;  %v6779_v16 = vrot.slane %v6777_v18, 4  ;;  %v4765_v47 = vld [vmem:[#allocation3 + $0x64] sm:$0xf]  ;;  %v4792_v33 = vld [vmem:[#allocation3 + $0x68] sm:$0x1] }
 0x3f9   : > { %v4962_v36 = vrot.slane %v4961_v48, 4  ;;  %v6785_v56 = vrot.slane %v6783_v9, 5  ;;  %v6790_v22 = vrot.slane %v6788_v45, 4  ;;  %v6791_v53 = vshll.u32 %v6613_v60, 16  ;;  %v14655_v30 = vld [vmem:[#allocation3 + $0x64] sm:$0xf] }
 0x3fa   : > { %10962 = vmatmul.mubr.msk.bf16.gmra.mrb[40].mxu0 %vm3575_vm14, %v10235_v37  ;;  %v6771_v58 = vrot.slane %v6770_v1, 4  ;;  %v6780_v27 = vor.u32 %v6779_v16, %v6775_v10  ;;  %v6797_v5 = vshll.u32 %v14638_v25, 16  ;;  %v6801_v41 = vshrl.u32 %v14638_v25, 16  ;;  %v6616_v40 = vld [vmem:[#allocation3 + $0x60] sm:$0xf] }
 0x3fb   : > { %v4967_v7 = vsel %vm12056_vm15, %v4962_v36, %v4966_v28  ;;  %v6793_v6 = vrot.slane %v6791_v53, 5  ;;  %v6807_v0 = vshll.u32 %v6615_v38, 16  ;;  %v4969_v13 = vshrl.u32 %v4762_v34, 16 }
 0x3fc   : > { %v10236_v43 = vcombine.low %v4957_v4, %v4967_v7  ;;  %v6776_v21 = vsel %vm12056_vm15, %v6771_v58, %v6775_v10  ;;  %v6781_v55 = vrot.slane %v6780_v27, 4  ;;  %v6799_v12 = vrot.slane %v6797_v5, 5  ;;  %v6619_v58 = vld [vmem:[#allocation3 + $0x6c] sm:$0xf] }
 0x3fd   : > { %v6794_v44 = vor.u32 %v6793_v6, %v6790_v22  ;;  %v6803_v15 = vrot.slane %v6801_v41, 4  ;;  %v6809_v2 = vrot.slane %v6807_v0, 5  ;;  %v4971_v8 = vrot.slane %v4969_v13, 4 }
 0x3fe   : > { %10965 = vmatprep.mubr.msk.bf16.mxu0 %vm3575_vm14, %v10236_v43  ;;  %v6786_v26 = vsel %vm12056_vm15, %v6781_v55, %v6785_v56  ;;  %v4972_v31 = vshll.u32 %v4762_v34, 16  ;;  %v4978_v52 = vshll.u32 %v4763_v32, 16  ;;  %v4982_v61 = vshrl.u32 %v4763_v32, 16  ;;  %v6618_v34 = vld [vmem:[#allocation3 + $0x68] sm:$0x1] }
 0x3ff   : > { %v10399_v39 = vcombine.low %v6776_v21, %v6786_v26  ;;  %v6795_v23 = vrot.slane %v6794_v44, 4  ;;  %v6804_v46 = vor.u32 %v6803_v15, %v6799_v12  ;;  %v4988_v42 = vshll.u32 %v4791_v63, 16  ;;  %v14665_v43 = vld [vmem:[#allocation3 + $0x70] sm:$0xf] }
 0x400   : > { %v4974_v17 = vrot.slane %v4972_v31, 5  ;;  %v4980_v62 = vrot.slane %v4978_v52, 5  ;;  %v4984_v29 = vrot.slane %v4982_v61, 4  ;;  %v4993_v51 = vshrl.u32 %v4764_v20, 16 }
 0x401   : > { %11106 = vmatmul.mubr.msk.bf16.gmra.mrb[8].mxu1 %vm3575_vm14, %v10399_v39  ;;  %v6800_v60 = vsel %vm12056_vm15, %v6795_v23, %v6799_v12  ;;  %v6805_v50 = vrot.slane %v6804_v46, 4  ;;  %v4990_v54 = vrot.slane %v4988_v42, 5  ;;  %v4996_v28 = vshll.u32 %v4764_v20, 16  ;;  %v14668_v20 = vld [vmem:[#allocation3 + $0x74] sm:$0x1] }
 0x402   : > { %v4975_v11 = vor.u32 %v4974_v17, %v4971_v8  ;;  %v4985_v57 = vor.u32 %v4984_v29, %v4980_v62  ;;  %v4995_v10 = vrot.slane %v4993_v51, 4  ;;  %v5002_v18 = vshll.u32 %v4765_v47, 16 }
 0x403   : > { %v6810_v48 = vsel %vm12056_vm15, %v6805_v50, %v6809_v2  ;;  %v4998_v9 = vrot.slane %v4996_v28, 5  ;;  %v5006_v45 = vshrl.u32 %v4765_v47, 16  ;;  %v5012_v37 = vshll.u32 %v4792_v33, 16  ;;  %v14674_v47 = vld [vmem:[#allocation3 + $0x6c] sm:$0xf] }
 0x404   : > { %v10400_v4 = vcombine.low %v6800_v60, %v6810_v48  ;;  %v4976_v1 = vrot.slane %v4975_v11, 4  ;;  %v4986_v16 = vrot.slane %v4985_v57, 4  ;;  %v5004_v38 = vrot.slane %v5002_v18, 5  ;;  %v14679_v33 = vld [vmem:[#allocation3 + $0x70] sm:$0xf]  ;;  %v14686_v57 = vld [vmem:[%s16573_s2 + $0x20] sm:$0xff]  }
 0x405   : > { %v4999_v36 = vor.u32 %v4998_v9, %v4995_v10  ;;  %v5008_v56 = vrot.slane %v5006_v45, 4  ;;  %v5014_v22 = vrot.slane %v5012_v37, 5  ;;  %v6812_v53 = vshrl.u32 %v6616_v40, 16  ;;  %v4793_v28 = vld [vmem:[#allocation3 + $0x74] sm:$0x1]  ;;  %11021 = vmatprep.subr.bf16.mxu0 %v14686_v57 }
 0x406   : > { %11109 = vmatprep.mubr.msk.bf16.mxu1 %vm3575_vm14, %v10400_v4  ;;  %v4981_v27 = vsel %vm12056_vm15, %v4976_v1, %v4980_v62  ;;  %v4991_v5 = vsel %vm12056_vm15, %v4986_v16, %v4990_v54  ;;  %v6815_v41 = vshll.u32 %v6616_v40, 16  ;;  %v6821_v7 = vshll.u32 %v14655_v30, 16  ;;  %v14693_v9 = vld [vmem:[#allocation3 + $0x78] sm:$0xf]  ;;  %v14695_v45 = vld [vmem:[#allocation3 + $0x7c] sm:$0xf] }
 0x407   : > { %v10237_v6 = vcombine.low %v4981_v27, %v4991_v5  ;;  %v5000_v0 = vrot.slane %v4999_v36, 4  ;;  %v5009_v32 = vor.u32 %v5008_v56, %v5004_v38  ;;  %v6814_v13 = vrot.slane %v6812_v53, 4 }
 0x408   : > { %v6817_v21 = vrot.slane %v6815_v41, 5  ;;  %v6823_v55 = vrot.slane %v6821_v7, 5  ;;  %v6825_v12 = vshrl.u32 %v14655_v30, 16  ;;  %v6831_v63 = vshll.u32 %v6618_v34, 16  ;;  %v4794_v7 = vld [vmem:[#allocation3 + $0x80] sm:$0x1] }
 0x409   : > { %10966 = vmatmul.mubr.msk.bf16.gmra.mrb[44].mxu0 %vm3575_vm14, %v10237_v6  ;;  %v5005_v44 = vsel %vm12056_vm15, %v5000_v0, %v5004_v38  ;;  %v5010_v15 = vrot.slane %v5009_v32, 4  ;;  %v6836_v2 = vshrl.u32 %v6619_v58, 16  ;;  %v6839_v8 = vshll.u32 %v6619_v58, 16  ;;  %v14705_v32 = vld [vmem:[#allocation3 + $0x7c] sm:$0xf] }
 0x40a   : > { %v6818_v26 = vor.u32 %v6817_v21, %v6814_v13  ;;  %v6827_v31 = vrot.slane %v6825_v12, 4  ;;  %v6833_v52 = vrot.slane %v6831_v63, 5  ;;  %v6845_v61 = vshll.u32 %v14665_v43, 16  ;;  %v6622_v63 = vld [vmem:[#allocation3 + $0x78] sm:$0xf] }
 0x40b   : > { %v5015_v39 = vsel %vm12056_vm15, %v5010_v15, %v5014_v22  ;;  %v6838_v23 = vrot.slane %v6836_v2, 4  ;;  %v6841_v46 = vrot.slane %v6839_v8, 5  ;;  %v6849_v42 = vshrl.u32 %v14665_v43, 16 }
 0x40c   : > { %v10238_v17 = vcombine.low %v5005_v44, %v5015_v39  ;;  %v6819_v62 = vrot.slane %v6818_v26, 4  ;;  %v6828_v29 = vor.u32 %v6827_v31, %v6823_v55  ;;  %v6847_v51 = vrot.slane %v6845_v61, 5  ;;  %v14712_v39 = vld [vmem:[#allocation3 + $0x80] sm:$0x1] }
 0x40d   : > { %v6842_v60 = vor.u32 %v6841_v46, %v6838_v23  ;;  %v6851_v50 = vrot.slane %v6849_v42, 4  ;;  %v6855_v54 = vshll.u32 %v14668_v20, 16  ;;  %v5017_v11 = vshrl.u32 %v14674_v47, 16 }
 0x40e   : > { %10969 = vmatprep.mubr.msk.bf16.mxu0 %vm3575_vm14, %v10238_v17  ;;  %v6824_v10 = vsel %vm12056_vm15, %v6819_v62, %v6823_v55  ;;  %v6829_v18 = vrot.slane %v6828_v29, 4  ;;  %v5020_v40 = vshll.u32 %v14674_v47, 16  ;;  %v5026_v48 = vshll.u32 %v14679_v33, 16 }
 0x40f   : > { %v6843_v37 = vrot.slane %v6842_v60, 4  ;;  %v6852_v4 = vor.u32 %v6851_v50, %v6847_v51  ;;  %v6857_v1 = vrot.slane %v6855_v54, 5  ;;  %v5019_v16 = vrot.slane %v5017_v11, 4  ;;  %v6625_v50 = vld [vmem:[#allocation3 + $0x84] sm:$0xf] }
 0x410   : > { %v6834_v38 = vsel %vm12056_vm15, %v6829_v18, %v6833_v52  ;;  %v5022_v34 = vrot.slane %v5020_v40, 5  ;;  %v5028_v36 = vrot.slane %v5026_v48, 5  ;;  %v5030_v56 = vshrl.u32 %v14679_v33, 16  ;;  %v14721_v18 = vld [vmem:[#allocation3 + $0x88] sm:$0xf] }
 0x411   : > { %v10401_v22 = vcombine.low %v6824_v10, %v6834_v38  ;;  %v6848_v53 = vsel %vm12056_vm15, %v6843_v37, %v6847_v51  ;;  %v6853_v58 = vrot.slane %v6852_v4, 4  ;;  %v5036_v27 = vshll.u32 %v4793_v28, 16 }
 0x412   : > { %v5023_v5 = vor.u32 %v5022_v34, %v5019_v16  ;;  %v5032_v41 = vrot.slane %v5030_v56, 4  ;;  %v5041_v6 = vshrl.u32 %v14693_v9, 16  ;;  %v5044_v0 = vshll.u32 %v14693_v9, 16  ;;  %v14726_v56 = vld [vmem:[#allocation3 + $0x84] sm:$0xf] }
 0x413   : > { %11110 = vmatmul.mubr.msk.bf16.gmra.mrb[12].mxu1 %vm3575_vm14, %v10401_v22  ;;  %v6858_v13 = vsel %vm12056_vm15, %v6853_v58, %v6857_v1  ;;  %v5038_v21 = vrot.slane %v5036_v27, 5  ;;  %v5050_v55 = vshll.u32 %v14695_v45, 16  ;;  %v5054_v12 = vshrl.u32 %v14695_v45, 16  ;;  %v14723_v1 = vld [vmem:[#allocation3 + $0x8c] sm:$0x1] }
 0x414   : > { %v10402_v44 = vcombine.low %v6848_v53, %v6858_v13  ;;  %v5024_v15 = vrot.slane %v5023_v5, 4  ;;  %v5033_v2 = vor.u32 %v5032_v41, %v5028_v36  ;;  %v5043_v8 = vrot.slane %v5041_v6, 4 }
 0x415   : > { %v5046_v26 = vrot.slane %v5044_v0, 5  ;;  %v5052_v31 = vrot.slane %v5050_v55, 5  ;;  %v5056_v52 = vrot.slane %v5054_v12, 4  ;;  %v5060_v61 = vshll.u32 %v4794_v7, 16  ;;  %v14734_v0 = vld [vmem:[#allocation3 + $0x88] sm:$0xf] }
 0x416   : > { %11113 = vmatprep.mubr.msk.bf16.mxu1 %vm3575_vm14, %v10402_v44  ;;  %v5029_v23 = vsel %vm12056_vm15, %v5024_v15, %v5028_v36  ;;  %v5034_v46 = vrot.slane %v5033_v2, 4  ;;  %v6860_v42 = vshrl.u32 %v6622_v63, 16  ;;  %v6863_v17 = vshll.u32 %v6622_v63, 16  ;;  %v4795_v2 = vld [vmem:[#allocation3 + $0x8c] sm:$0x1] }
 0x417   : > { %v5047_v62 = vor.u32 %v5046_v26, %v5043_v8  ;;  %v5057_v29 = vor.u32 %v5056_v52, %v5052_v31  ;;  %v5062_v51 = vrot.slane %v5060_v61, 5  ;;  %v6869_v60 = vshll.u32 %v14705_v32, 16 }
 0x418   : > { %v5039_v54 = vsel %vm12056_vm15, %v5034_v46, %v5038_v21  ;;  %v6862_v28 = vrot.slane %v6860_v42, 4  ;;  %v6865_v11 = vrot.slane %v6863_v17, 5  ;;  %v6873_v10 = vshrl.u32 %v14705_v32, 16 }
 0x419   : > { %v10239_v40 = vcombine.low %v5029_v23, %v5039_v54  ;;  %v5048_v48 = vrot.slane %v5047_v62, 4  ;;  %v5058_v37 = vrot.slane %v5057_v29, 4  ;;  %v6871_v4 = vrot.slane %v6869_v60, 5  ;;  %v14744_v23 = vld [vmem:[#allocation3 + $0x90] sm:$0xf] }
 0x41a   : > { %v6866_v16 = vor.u32 %v6865_v11, %v6862_v28  ;;  %v6875_v38 = vrot.slane %v6873_v10, 4  ;;  %v6879_v34 = vshll.u32 %v14712_v39, 16  ;;  %v6884_v36 = vshrl.u32 %v6625_v50, 16  ;;  %v14749_v29 = vld [vmem:[#allocation3 + $0x94] sm:$0xf] }
 0x41b   : > { %10970 = vmatmul.mubr.msk.bf16.gmra.mrb[48].mxu0 %vm3575_vm14, %v10239_v40  ;;  %v5053_v22 = vsel %vm12056_vm15, %v5048_v48, %v5052_v31  ;;  %v5063_v53 = vsel %vm12056_vm15, %v5058_v37, %v5062_v51  ;;  %v6887_v58 = vshll.u32 %v6625_v50, 16  ;;  %v6893_v27 = vshll.u32 %v14721_v18, 16 }
 0x41c   : > { %v10240_v5 = vcombine.low %v5053_v22, %v5063_v53  ;;  %v6867_v41 = vrot.slane %v6866_v16, 4  ;;  %v6876_v7 = vor.u32 %v6875_v38, %v6871_v4  ;;  %v6881_v6 = vrot.slane %v6879_v34, 5  ;;  %v4796_v16 = vld [vmem:[#allocation3 + $0x98] sm:$0x1] }
 0x41d   : > { %v6886_v13 = vrot.slane %v6884_v36, 4  ;;  %v6889_v21 = vrot.slane %v6887_v58, 5  ;;  %v6895_v55 = vrot.slane %v6893_v27, 5  ;;  %v6897_v12 = vshrl.u32 %v14721_v18, 16  ;;  %v6628_v58 = vld [vmem:[#allocation3 + $0x90] sm:$0xf] }
 0x41e   : > { %10973 = vmatprep.mubr.msk.bf16.mxu0 %vm3575_vm14, %v10240_v5  ;;  %v6872_v63 = vsel %vm12056_vm15, %v6867_v41, %v6871_v4  ;;  %v6877_v44 = vrot.slane %v6876_v7, 4  ;;  %v6903_v15 = vshll.u32 %v14723_v1, 16  ;;  %v5065_v8 = vshrl.u32 %v14726_v56, 16 }
 0x41f   : > { %v6890_v26 = vor.u32 %v6889_v21, %v6886_v13  ;;  %v6899_v31 = vrot.slane %v6897_v12, 4  ;;  %v5068_v52 = vshll.u32 %v14726_v56, 16  ;;  %v5074_v61 = vshll.u32 %v14734_v0, 16 }
 0x420   : > { %v6882_v46 = vsel %vm12056_vm15, %v6877_v44, %v6881_v6  ;;  %v6905_v42 = vrot.slane %v6903_v15, 5  ;;  %v5067_v17 = vrot.slane %v5065_v8, 4  ;;  %v5078_v62 = vshrl.u32 %v14734_v0, 16  ;;  %v14760_v6 = vld [vmem:[#allocation3 + $0x94] sm:$0xf] }
 0x421   : > { %v10403_v51 = vcombine.low %v6872_v63, %v6882_v46  ;;  %v6891_v60 = vrot.slane %v6890_v26, 4  ;;  %v6900_v50 = vor.u32 %v6899_v31, %v6895_v55  ;;  %v5070_v54 = vrot.slane %v5068_v52, 5  ;;  %v14762_v63 = vld [vmem:[#allocation3 + $0x98] sm:$0x1]  ;;  %v6631_v46 = vld [vmem:[#allocation3 + $0x9c] sm:$0xf] }
 0x422   : > { %v5076_v28 = vrot.slane %v5074_v61, 5  ;;  %v5080_v11 = vrot.slane %v5078_v62, 4  ;;  %v5084_v10 = vshll.u32 %v4795_v2, 16  ;;  %v5089_v40 = vshrl.u32 %v14744_v23, 16 }
 0x423   : > { %11114 = vmatmul.mubr.msk.bf16.gmra.mrb[16].mxu1 %vm3575_vm14, %v10403_v51  ;;  %v6896_v48 = vsel %vm12056_vm15, %v6891_v60, %v6895_v55  ;;  %v6901_v37 = vrot.slane %v6900_v50, 4  ;;  %v5071_v4 = vor.u32 %v5070_v54, %v5067_v17  ;;  %v5092_v38 = vshll.u32 %v14744_v23, 16  ;;  %v14770_v60 = vld [vmem:[#allocation3 + $0xa0] sm:$0xf] }
 0x424   : > { %v5081_v34 = vor.u32 %v5080_v11, %v5076_v28  ;;  %v5086_v36 = vrot.slane %v5084_v10, 5  ;;  %v5091_v22 = vrot.slane %v5089_v40, 4  ;;  %v5098_v53 = vshll.u32 %v14749_v29, 16 }
 0x425   : > { %v6906_v27 = vsel %vm12056_vm15, %v6901_v37, %v6905_v42  ;;  %v5072_v5 = vrot.slane %v5071_v4, 4  ;;  %v5094_v41 = vrot.slane %v5092_v38, 5  ;;  %v5102_v7 = vshrl.u32 %v14749_v29, 16 }
 0x426   : > { %v10404_v13 = vcombine.low %v6896_v48, %v6906_v27  ;;  %v5082_v21 = vrot.slane %v5081_v34, 4  ;;  %v5100_v55 = vrot.slane %v5098_v53, 5  ;;  %v5108_v12 = vshll.u32 %v4796_v16, 16  ;;  %v14777_v48 = vld [vmem:[#allocation3 + $0xa4] sm:$0x1] }
 0x427   : > { %v5077_v44 = vsel %vm12056_vm15, %v5072_v5, %v5076_v28  ;;  %v5095_v15 = vor.u32 %v5094_v41, %v5091_v22  ;;  %v5104_v2 = vrot.slane %v5102_v7, 4  ;;  %v6908_v8 = vshrl.u32 %v6628_v58, 16  ;;  %v14779_v16 = vld [vmem:[#allocation3 + $0xa0] sm:$0xf]  ;;  %v14782_v53 = vld [vmem:[#allocation3 + $0x9c] sm:$0xf] }
 0x428   : > { %11117 = vmatprep.mubr.msk.bf16.mxu1 %vm3575_vm14, %v10404_v13  ;;  %v5087_v26 = vsel %vm12056_vm15, %v5082_v21, %v5086_v36  ;;  %v5110_v31 = vrot.slane %v5108_v12, 5  ;;  %v6911_v52 = vshll.u32 %v6628_v58, 16  ;;  %v6917_v61 = vshll.u32 %v14760_v6, 16 }
 0x429   : > { %v10241_v42 = vcombine.low %v5077_v44, %v5087_v26  ;;  %v5096_v17 = vrot.slane %v5095_v15, 4  ;;  %v5105_v62 = vor.u32 %v5104_v2, %v5100_v55  ;;  %v6910_v51 = vrot.slane %v6908_v8, 4  ;;  %v14788_v2 = vld [vmem:[#allocation3 + $0xa4] sm:$0x1] }
 0x42a   : > { %v6913_v50 = vrot.slane %v6911_v52, 5  ;;  %v6919_v54 = vrot.slane %v6917_v61, 5  ;;  %v6921_v28 = vshrl.u32 %v14760_v6, 16  ;;  %v6927_v11 = vshll.u32 %v14762_v63, 16  ;;  %16681 = vst [vmem:[#allocation10_spill] sm:$0xff] %v14788_v2 }
 0x42b   : > { %10974 = vmatmul.mubr.msk.bf16.gmra.mrb[52].mxu0 %vm3575_vm14, %v10241_v42  ;;  %v5101_v10 = vsel %vm12056_vm15, %v5096_v17, %v5100_v55  ;;  %v5106_v40 = vrot.slane %v5105_v62, 4  ;;  %v6932_v37 = vshrl.u32 %v6631_v46, 16  ;;  %v6935_v4 = vshll.u32 %v6631_v46, 16  ;;  %v14796_v46 = vld [vmem:[#allocation3 + $0xa8] sm:$0xf] }
 0x42c   : > { %v6914_v38 = vor.u32 %v6913_v50, %v6910_v51  ;;  %v6923_v34 = vrot.slane %v6921_v28, 4  ;;  %v6929_v36 = vrot.slane %v6927_v11, 5  ;;  %v6941_v22 = vshll.u32 %v14770_v60, 16  ;;  %v14798_v50 = vld [vmem:[#allocation3 + $0xac] sm:$0xf] }
 0x42d   : > { %v5111_v58 = vsel %vm12056_vm15, %v5106_v40, %v5110_v31  ;;  %v6934_v27 = vrot.slane %v6932_v37, 4  ;;  %v6937_v5 = vrot.slane %v6935_v4, 5  ;;  %v6945_v41 = vshrl.u32 %v14770_v60, 16  ;;  %v14803_v40 = vld [vmem:[#allocation3 + $0xb0] sm:$0x1] }
 0x42e   : > { %v10242_v7 = vcombine.low %v5101_v10, %v5111_v58  ;;  %v6915_v13 = vrot.slane %v6914_v38, 4  ;;  %v6924_v21 = vor.u32 %v6923_v34, %v6919_v54  ;;  %v6943_v55 = vrot.slane %v6941_v22, 5  ;;  %16682 = vst [vmem:[#allocation11_spill] sm:$0xff] %v14803_v40  ;;  %v6634_v22 = vld [vmem:[#allocation3 + $0xa8] sm:$0xf] }
 0x42f   : > { %v6938_v12 = vor.u32 %v6937_v5, %v6934_v27  ;;  %v6947_v44 = vrot.slane %v6945_v41, 4  ;;  %v6951_v15 = vshll.u32 %v14777_v48, 16  ;;  %v5113_v8 = vshrl.u32 %v14782_v53, 16 }
 0x430   : > { %10977 = vmatprep.mubr.msk.bf16.mxu0 %vm3575_vm14, %v10242_v7  ;;  %v6920_v26 = vsel %vm12056_vm15, %v6915_v13, %v6919_v54  ;;  %v6925_v31 = vrot.slane %v6924_v21, 4  ;;  %v5116_v52 = vshll.u32 %v14782_v53, 16  ;;  %v5122_v61 = vshll.u32 %v14779_v16, 16 }
 0x431   : > { %v6939_v42 = vrot.slane %v6938_v12, 4  ;;  %v6948_v17 = vor.u32 %v6947_v44, %v6943_v55  ;;  %v6953_v62 = vrot.slane %v6951_v15, 5  ;;  %v5115_v51 = vrot.slane %v5113_v8, 4  ;;  %v14815_v8 = vld [vmem:[#allocation3 + $0xac] sm:$0xf] }
 0x432   : > { %v6930_v28 = vsel %vm12056_vm15, %v6925_v31, %v6929_v36  ;;  %v5118_v11 = vrot.slane %v5116_v52, 5  ;;  %v5124_v10 = vrot.slane %v5122_v61, 5  ;;  %v5126_v54 = vshrl.u32 %v14779_v16, 16 }
 0x433   : > { %v10405_v37 = vcombine.low %v6920_v26, %v6930_v28  ;;  %v6944_v4 = vsel %vm12056_vm15, %v6939_v42, %v6943_v55  ;;  %v6949_v38 = vrot.slane %v6948_v17, 4  ;;  %v5132_v34 = vshll.u32 %v14788_v2, 16  ;;  %v14821_v28 = vld [vmem:[#allocation3 + $0xb8] sm:$0xf] }
 0x434   : > { %v5119_v58 = vor.u32 %v5118_v11, %v5115_v51  ;;  %v5128_v27 = vrot.slane %v5126_v54, 4  ;;  %v5137_v5 = vshrl.u32 %v14796_v46, 16  ;;  %v5140_v36 = vshll.u32 %v14796_v46, 16 }
 0x435   : > { %11118 = vmatmul.mubr.msk.bf16.gmra.mrb[20].mxu1 %vm3575_vm14, %v10405_v37  ;;  %v6954_v41 = vsel %vm12056_vm15, %v6949_v38, %v6953_v62  ;;  %v5134_v7 = vrot.slane %v5132_v34, 5  ;;  %v5146_v13 = vshll.u32 %v14798_v50, 16  ;;  %v5150_v21 = vshrl.u32 %v14798_v50, 16  ;;  %v6637_v34 = vld [vmem:[#allocation3 + $0xb4] sm:$0xf] }
 0x436   : > { %v10406_v55 = vcombine.low %v6944_v4, %v6954_v41  ;;  %v5120_v12 = vrot.slane %v5119_v58, 4  ;;  %v5129_v44 = vor.u32 %v5128_v27, %v5124_v10  ;;  %v5139_v15 = vrot.slane %v5137_v5, 4  ;;  %v14823_v4 = vld [vmem:[#allocation3 + $0xb0] sm:$0x1] }
 0x437   : > { %v5142_v26 = vrot.slane %v5140_v36, 5  ;;  %v5148_v31 = vrot.slane %v5146_v13, 5  ;;  %v5152_v52 = vrot.slane %v5150_v21, 4  ;;  %v5156_v61 = vshll.u32 %v14803_v40, 16  ;;  %v14829_v21 = vld [vmem:[#allocation3 + $0xbc] sm:$0x1] }
 0x438   : > { %11121 = vmatprep.mubr.msk.bf16.mxu1 %vm3575_vm14, %v10406_v55  ;;  %v5125_v42 = vsel %vm12056_vm15, %v5120_v12, %v5124_v10  ;;  %v5130_v17 = vrot.slane %v5129_v44, 4  ;;  %v6956_v62 = vshrl.u32 %v6634_v22, 16  ;;  %v6959_v51 = vshll.u32 %v6634_v22, 16 }
 0x439   : > { %v5143_v11 = vor.u32 %v5142_v26, %v5139_v15  ;;  %v5153_v54 = vor.u32 %v5152_v52, %v5148_v31  ;;  %v5158_v37 = vrot.slane %v5156_v61, 5  ;;  %v6965_v38 = vshll.u32 %v14815_v8, 16 }
 0x43a   : > { %v5135_v58 = vsel %vm12056_vm15, %v5130_v17, %v5134_v7  ;;  %v6958_v27 = vrot.slane %v6956_v62, 4  ;;  %v6961_v5 = vrot.slane %v6959_v51, 5  ;;  %v6969_v10 = vshrl.u32 %v14815_v8, 16 }
 0x43b   : > { %v10243_v36 = vcombine.low %v5125_v42, %v5135_v58  ;;  %v5144_v41 = vrot.slane %v5143_v11, 4  ;;  %v5154_v22 = vrot.slane %v5153_v54, 4  ;;  %v6967_v13 = vrot.slane %v6965_v38, 5  ;;  %v14838_v42 = vld [vmem:[#allocation3 + $0xb4] sm:$0xf] }
 0x43c   : > { %v6962_v55 = vor.u32 %v6961_v5, %v6958_v27  ;;  %v6971_v12 = vrot.slane %v6969_v10, 4  ;;  %v6975_v44 = vshll.u32 %v14823_v4, 16  ;;  %v6980_v15 = vshrl.u32 %v6637_v34, 16  ;;  %16683 = vst [vmem:[#allocation12_spill] sm:$0xff] %v14838_v42  ;;  %v14840_v54 = vld [vmem:[#allocation3 + $0xb8] sm:$0xf] }
 0x43d   : > { %10978 = vmatmul.mubr.msk.bf16.gmra.mrb[56].mxu0 %vm3575_vm14, %v10243_v36  ;;  %v5149_v7 = vsel %vm12056_vm15, %v5144_v41, %v5148_v31  ;;  %v5159_v26 = vsel %vm12056_vm15, %v5154_v22, %v5158_v37  ;;  %v6983_v52 = vshll.u32 %v6637_v34, 16  ;;  %v6989_v61 = vshll.u32 %v14821_v28, 16  ;;  %v14843_v31 = vld [vmem:[#allocation3 + $0xbc] sm:$0x1]  ;;  %v6640_v41 = vld [vmem:[#allocation3 + $0xc0] sm:$0xf] }
 0x43e   : > { %v10244_v17 = vcombine.low %v5149_v7, %v5159_v26  ;;  %v6963_v62 = vrot.slane %v6962_v55, 4  ;;  %v6972_v51 = vor.u32 %v6971_v12, %v6967_v13  ;;  %v6977_v11 = vrot.slane %v6975_v44, 5  ;;  %16684 = vst [vmem:[#allocation13_spill] sm:$0xff] %v14843_v31 }
 0x43f   : > { %v6982_v38 = vrot.slane %v6980_v15, 4  ;;  %v6985_v58 = vrot.slane %v6983_v52, 5  ;;  %v6991_v27 = vrot.slane %v6989_v61, 5  ;;  %v6993_v5 = vshrl.u32 %v14821_v28, 16  ;;  %v14852_v15 = vld [vmem:[#allocation3 + $0xc4] sm:$0xf] }
 0x440   : > { %10981 = vmatprep.mubr.msk.bf16.mxu0 %vm3575_vm14, %v10244_v17  ;;  %v6968_v37 = vsel %vm12056_vm15, %v6963_v62, %v6967_v13  ;;  %v6973_v34 = vrot.slane %v6972_v51, 4  ;;  %v6999_v10 = vshll.u32 %v14829_v21, 16  ;;  %v5161_v36 = vshrl.u32 %v14838_v42, 16 }
 0x441   : > { %v6986_v22 = vor.u32 %v6985_v58, %v6982_v38  ;;  %v6995_v55 = vrot.slane %v6993_v5, 4  ;;  %v5164_v12 = vshll.u32 %v14838_v42, 16  ;;  %v5170_v44 = vshll.u32 %v14840_v54, 16 }
 0x442   : > { %v6978_v7 = vsel %vm12056_vm15, %v6973_v34, %v6977_v11  ;;  %v7001_v26 = vrot.slane %v6999_v10, 5  ;;  %v5163_v52 = vrot.slane %v5161_v36, 4  ;;  %v5174_v13 = vshrl.u32 %v14840_v54, 16  ;;  %v14861_v34 = vld [vmem:[#allocation3 + $0xc8] sm:$0x1] }
 0x443   : > { %v10407_v61 = vcombine.low %v6968_v37, %v6978_v7  ;;  %v6987_v17 = vrot.slane %v6986_v22, 4  ;;  %v6996_v62 = vor.u32 %v6995_v55, %v6991_v27  ;;  %v5166_v51 = vrot.slane %v5164_v12, 5  ;;  %v7333_v12 = vld [vmem:[#allocation3 + $0xc] sm:$0xe] }
 0x444   : > { %v5172_v49 = vrot.slane %v5170_v44, 5  ;;  %v5176_v38 = vrot.slane %v5174_v13, 4  ;;  %v5180_v58 = vshll.u32 %v14843_v31, 16  ;;  %v7004_v5 = vshrl.u32 %v6640_v41, 16 }
 0x445   : > { %11122 = vmatmul.mubr.msk.bf16.gmra.mrb[24].mxu1 %vm3575_vm14, %v10407_v61  ;;  %v6992_v19 = vsel %vm12056_vm15, %v6987_v17, %v6991_v27  ;;  %v6997_v40 = vrot.slane %v6996_v62, 4  ;;  %v5167_v11 = vor.u32 %v5166_v51, %v5163_v52  ;;  %v7007_v10 = vshll.u32 %v6640_v41, 16  ;;  %v7334_v62 = vld [vmem:[#allocation3 + $0x18] sm:$0xe] }
 0x446   : > { %v5177_v36 = vor.u32 %v5176_v38, %v5172_v49  ;;  %v5182_v37 = vrot.slane %v5180_v58, 5  ;;  %v7006_v22 = vrot.slane %v7004_v5, 4  ;;  %v7013_v55 = vshll.u32 %v14852_v15, 16  ;;  %v11713_v5 = vld [vmem:[#allocation3 + $0x14] sm:$0x1] }
 0x447   : > { %v7002_v44 = vsel %vm12056_vm15, %v6997_v40, %v7001_v26  ;;  %v5168_v7 = vrot.slane %v5167_v11, 4  ;;  %v7009_v13 = vrot.slane %v7007_v10, 5  ;;  %v7017_v61 = vshrl.u32 %v14852_v15, 16  ;;  %v14875_v11 = vld [vmem:[#allocation3 + $0x4] sm:$0xf] }
 0x448   : > { %v10408_v31 = vcombine.low %v6992_v19, %v7002_v44  ;;  %v5178_v27 = vrot.slane %v5177_v36, 4  ;;  %v7015_v17 = vrot.slane %v7013_v55, 5  ;;  %v7023_v52 = vshll.u32 %v14861_v34, 16  ;;  %v11715_v10 = vld [vmem:[#allocation3] sm:$0xf] }
 0x449   : > { %v5173_v41 = vsel %vm12056_vm15, %v5168_v7, %v5172_v49  ;;  %v7010_v51 = vor.u32 %v7009_v13, %v7006_v22  ;;  %v7019_v38 = vrot.slane %v7017_v61, 4  ;;  %v10428_v58 = vrot.slane %v7333_v12, 9  ;;  %v11716_v55 = vld [vmem:[#allocation3 + $0x20] sm:$0x1] }
 0x44a   : > { %v7402_v2 = vrot.slane %v11713_v5, 5  ;;  %11125 = vmatprep.mubr.msk.bf16.mxu1 %vm3575_vm14, %v10408_v31  ;;  %v5183_v40 = vsel %vm12056_vm15, %v5178_v27, %v5182_v37  ;;  %v16685_v19 = vrot.slane %v14534_v35, 5  ;;  %v10264_v36 = vcombine.low %v11715_v10, %v14875_v11 }
 0x44b   : > { %v7409_v49 = vrot.slane %v11716_v55, 5  ;;  %v10245_v22 = vcombine.low %v5173_v41, %v5183_v40  ;;  %v7011_v44 = vrot.slane %v7010_v51, 4  ;;  %v7020_v12 = vor.u32 %v7019_v38, %v7015_v17  ;;  %v11720_v55 = vld [vmem:[#allocation3 + $0x18] sm:$0xf] }
 0x44c   : > { %v7401_v26 = vrot.slane %v16685_v19, 4  ;;  %v7025_v7 = vrot.slane %v7023_v52, 5  ;;  %v16686_v13 = vmov %v16685_v19  ;;  %v10429_v27 = vrot.slane %v7334_v62, 9 }
 0x44d   : > { %v7400_v61 = vsel %vm11969_vm10, %v10428_v58, %v16686_v13  ;;  %10982 = vmatmul.mubr.msk.bf16.gmra.mrb[60].mxu0 %vm3575_vm14, %v10245_v22  ;;  %v7016_v5 = vsel %vm12056_vm15, %v7011_v44, %v7015_v17  ;;  %v7021_v19 = vrot.slane %v7020_v12, 4  ;;  %v7410_v52 = vsel %vm11969_vm10, %v14592_v3, %v7409_v49  ;;  %v7335_v58 = vld [vmem:[#allocation3 + $0x24] sm:$0xe]  ;;  %v14899_v3 = vld [vmem:[#allocation3 + $0x10] sm:$0xf] }
 0x44e   : > { %v7403_v37 = vsel %vm11969_vm10, %v7401_v26, %v7402_v2  ;;  %10989 = vmatprep.mubr.msk.bf16.mxu0 %vm3575_vm14, %v10264_v36  ;;  %v16688_v35 = vrot.slane %v14568_v59, 5  ;;  %v11717_v2 = vld [vmem:[#allocation3 + $0x28] sm:$0xf]  ;;  %v11719_v26 = vld [vmem:[#allocation3 + $0xc] sm:$0xf]  ;;  %v11642_v36 = vld [vmem:[%s16573_s2 + $0x28] sm:$0xff]  }
 0x44f   : > { %v10448_v10 = vcombine.low %v7400_v61, %v7403_v37  ;;  %v7413_v62 = vrot.slane %v11717_v2, 5  ;;  %v7026_v51 = vsel %vm12056_vm15, %v7021_v19, %v7025_v7  ;;  %v10265_v59 = vcombine.low %v11719_v26, %v14899_v3  ;;  %v14905_v49 = vld [vmem:[#allocation3 + $0x1c] sm:$0xf]  ;;  %v11722_v12 = vld [vmem:[#allocation3 + $0x2c] sm:$0x1]  ;;  %v11633_v2 = vld [vmem:[%s16573_s2 + $0x68] sm:$0xff]  }
 0x450   : > { %v7407_v41 = vsel %vm11969_vm10, %v10429_v27, %v16688_v35  ;;  %v10409_v17 = vcombine.low %v7016_v5, %v7026_v51  ;;  %v10266_v22 = vcombine.low %v11720_v55, %v14905_v49  ;;  %v10430_v44 = vrot.slane %v7335_v58, 9  ;;  %v11723_v13 = vld [vmem:[#allocation3 + $0x34] sm:$0xf]  ;;  %v11724_v27 = vld [vmem:[#allocation3 + $0x40] sm:$0xf]  ;;  %v14921_v51 = vld [vmem:[%s16573_s2 + $0x30] sm:$0xff]  }
 0x451   : > { %v10449_v38 = vcombine.low %v7407_v41, %v7410_v52  ;;  %v7415_v40 = vrot.slane %v7413_v62, 4  ;;  %v7416_v7 = vrot.slane %v11722_v12, 5  ;;  %v7420_v61 = vrot.slane %v11723_v13, 5  ;;  %v7336_v19 = vld [vmem:[#allocation3 + $0x30] sm:$0xe]  ;;  %16689 = vst [vmem:[#allocation7_spill] sm:$0xff] %v14921_v51 }
 0x452   : > { %11126 = vmatmul.mubr.msk.bf16.gmra.mrb[28].mxu1 %vm3575_vm14, %v10409_v17  ;;  %v7427_v5 = vrot.slane %v11724_v27, 5  ;;  %v7337_v52 = vld [vmem:[#allocation3 + $0x3c] sm:$0xe]  ;;  %v11725_v35 = vld [vmem:[#allocation3 + $0x4c] sm:$0xf]  ;;  %v7441_v13 = vrot.slane %v14638_v25, 5 }
 0x453   : > { %11133 = vmatprep.mubr.msk.bf16.mxu1 %vm3575_vm14, %v10448_v10  ;;  %v7417_v37 = vsel %vm11969_vm10, %v7415_v40, %v7416_v7  ;;  %v7414_v10 = vsel %vm11969_vm10, %v10430_v44, %v7413_v62  ;;  %v7434_v41 = vrot.slane %v11725_v35, 5  ;;  %v7422_v58 = vrot.slane %v7420_v61, 4  ;;  %v14924_v40 = vld [vmem:[#allocation3 + $0x28] sm:$0xf]  ;;  %v7339_v55 = vld [vmem:[#allocation3 + $0x54] sm:$0xe] }
 0x454   : > { %v10450_v17 = vcombine.low %v7414_v10, %v7417_v37  ;;  %16690 = vst [vmem:[#allocation14_spill] sm:$0xff] %v14924_v40  ;;  %v7429_v26 = vrot.slane %v7427_v5, 4  ;;  %v10431_v44 = vrot.slane %v7336_v19, 9  ;;  %v11729_v12 = vld [vmem:[#allocation3 + $0x38] sm:$0x1] }
 0x455   : > { %10990 = vmatmul.mubr.msk.bf16.vlgmr.msra.gmra.mrb[32].mxu0 %vm3575_vm14, %v10265_v59  ;;  %v7338_v59 = vld [vmem:[#allocation3 + $0x48] sm:$0xe]  ;;  %v7423_v7 = vrot.slane %v11729_v12, 5  ;;  %v11730_v37 = vld [vmem:[#allocation3 + $0x30] sm:$0xf] }
 0x456   : > { %10993 = vmatprep.mubr.msk.bf16.mxu0 %vm3575_vm14, %v10266_v22  ;;  %11022 = vmatpush3.bf16.msra.mxu0 %v14686_v57  ;;  %v11726_v57 = vld [vmem:[#allocation3 + $0x24] sm:$0xf]  ;;  %v11728_v22 = vld [vmem:[%s16573_s2 + $0x60] sm:$0xff]   ;;  %v14932_v27 = vld [vmem:[#allocation3 + $0x34] sm:$0xf]  ;;  %v10433_v19 = vrot.slane %v7338_v59, 9  ;;  %v7421_v59 = vsel %vm11969_vm10, %v10431_v44, %v7420_v61 }
 0x457   : > { %11023 = vmatprep.subr.bf16.mxu0 %v11642_v36  ;;  %v10267_v62 = vcombine.low %v11726_v57, %v14924_v40  ;;  %16691 = vst [vmem:[#allocation15_spill] sm:$0xff] %v14932_v27  ;;  %v10268_v10 = vcombine.low %v11730_v37, %v14932_v27  ;;  %v11732_v35 = vld [vmem:[#allocation3 + $0x44] sm:$0x1]  ;;  %v7436_v57 = vrot.slane %v7434_v41, 4  ;;  %v7424_v25 = vsel %vm11969_vm10, %v7422_v58, %v7423_v7  ;;  %v11733_v37 = vld [vmem:[#allocation3 + $0x3c] sm:$0xf] }
 0x458   : > { %v11735_v27 = vld [vmem:[#allocation3 + $0x48] sm:$0xf]  ;;  %v11737_v40 = vld [vmem:[#allocation3 + $0x50] sm:$0x1]  ;;  %v7443_v7 = vrot.slane %v7441_v13, 4  ;;  %v10451_v42 = vcombine.low %v7421_v59, %v7424_v25  ;;  %v7435_v61 = vsel %vm11969_vm10, %v10433_v19, %v7434_v41  ;;  %v7448_v44 = vrot.slane %v14655_v30, 5 }
 0x459   : > { %v7437_v58 = vrot.slane %v11737_v40, 5  ;;  %v7486_v19 = vrot.slane %v14777_v48, 5 }
 0x45a   : > { %11134 = vmatmul.mubr.msk.bf16.vlgmr.msra.gmra.mrb[0].mxu1 %vm3575_vm14, %v10449_v38  ;;  %11024 = vmatpush3.bf16.msra.mxu0 %v11642_v36  ;;  %v10432_v38 = vrot.slane %v7337_v52, 9  ;;  %v7430_v36 = vrot.slane %v11732_v35, 5  ;;  %v10434_v52 = vrot.slane %v7339_v55, 9  ;;  %v14947_v35 = vld [vmem:[#allocation3 + $0x40] sm:$0xf] }
 0x45b   : > { %11166 = vmatpush3.bf16.msra.mxu1 %v11728_v22  ;;  %11137 = vmatprep.mubr.msk.bf16.mxu1 %vm3575_vm14, %v10450_v17  ;;  %v14938_v22 = vld [vmem:[%s16573_s2 + $0x70] sm:$0xff]   ;;  %v7344_v17 = vld [vmem:[#allocation3 + $0x90] sm:$0xe]  ;;  %16692 = vst [vmem:[#allocation16_spill] sm:$0xff] %v14947_v35  ;;  %v10269_v14 = vcombine.low %v11733_v37, %v14947_v35  ;;  %v7438_v37 = vsel %vm11969_vm10, %v7436_v57, %v7437_v58  ;;  %v7479_v57 = vrot.slane %v14762_v63, 5  ;;  %v7455_v58 = vrot.slane %v14665_v43, 5 }
 0x45c   : > { %11167 = vmatprep.subr.bf16.mxu1 %v11633_v2  ;;  %11057 = vmatprep.subr.bf16.mxu0 %v14921_v51  ;;  %v7431_v12 = vsel %vm11969_vm10, %v7429_v26, %v7430_v36  ;;  %v14950_v51 = vld [vmem:[#allocation3 + $0x4c] sm:$0xf]  ;;  %v7428_v55 = vsel %vm11969_vm10, %v10432_v38, %v7427_v5  ;;  %v11738_v26 = vld [vmem:[#allocation3 + $0x5c] sm:$0x1]  ;;  %v7345_v36 = vld [vmem:[#allocation3 + $0x9c] sm:$0xe]  ;;  %v7442_v5 = vsel %vm11969_vm10, %v10434_v52, %v7441_v13 }
 0x45d   : > { %10994 = vmatmul.mubr.msk.bf16.gmra.mrb[36].mxu0 %vm3575_vm14, %v10267_v62  ;;  %v10270_v62 = vcombine.low %v11735_v27, %v14950_v51  ;;  %v10439_v35 = vrot.slane %v7344_v17, 9  ;;  %v7476_v27 = vrot.slane %v14760_v6, 5  ;;  %v10452_v40 = vcombine.low %v7428_v55, %v7431_v12  ;;  %v7347_v17 = vld [vmem:[#allocation3 + $0xb4] sm:$0xe] }
 0x45e   : > { %10997 = vmatprep.mubr.msk.bf16.mxu0 %vm3575_vm14, %v10268_v10  ;;  %v7444_v10 = vrot.slane %v11738_v26, 5  ;;  %v10440_v25 = vrot.slane %v7345_v36, 9  ;;  %v7483_v6 = vrot.slane %v14770_v60, 5  ;;  %v10453_v12 = vcombine.low %v7435_v61, %v7438_v37  ;;  %v7340_v37 = vld [vmem:[#allocation3 + $0x60] sm:$0xe] }
 0x45f   : > { %11168 = vmatpush3.bf16.msra.mxu1 %v11633_v2  ;;  %v7346_v2 = vld [vmem:[#allocation3 + $0xa8] sm:$0xe]  ;;  %v7478_v38 = vrot.slane %v7476_v27, 4  ;;  %v14974_v13 = vsel %vm11969_vm10, %v10439_v35, %v7476_v27  ;;  %v7490_v60 = vrot.slane %v14815_v8, 5  ;;  %v10442_v55 = vrot.slane %v7347_v17, 9 }
 0x460   : > { %11201 = vmatprep.subr.bf16.mxu1 %v14938_v22  ;;  %v7445_v41 = vsel %vm11969_vm10, %v7443_v7, %v7444_v10  ;;  %v7485_v63 = vrot.slane %v7483_v6, 4  ;;  %v10441_v52 = vrot.slane %v7346_v2, 9  ;;  %v7497_v35 = vrot.slane %v14821_v28, 5  ;;  %v7348_v7 = vld [vmem:[#allocation3 + $0xc0] sm:$0xe] }
 0x461   : > { %v14990_v48 = vsel %vm11969_vm10, %v10440_v25, %v7483_v6  ;;  %v7493_v43 = vrot.slane %v14823_v4, 5  ;;  %v10454_v26 = vcombine.low %v7442_v5, %v7445_v41  ;;  %v7500_v28 = vrot.slane %v14829_v21, 5  ;;  %v7341_v5 = vld [vmem:[#allocation3 + $0x6c] sm:$0xe]  ;;  %v11739_v17 = vld [vmem:[#allocation3 + $0x54] sm:$0xf] }
 0x462   : > { %11138 = vmatmul.mubr.msk.bf16.gmra.mrb[4].mxu1 %vm3575_vm14, %v10451_v42  ;;  %v14979_v42 = vsel %vm11969_vm10, %v7478_v38, %v7479_v57  ;;  %v14994_v8 = vsel %vm11969_vm10, %v7485_v63, %v7486_v19  ;;  %v7499_v36 = vrot.slane %v7497_v35, 4  ;;  %v7504_v61 = vrot.slane %v14852_v15, 5  ;;  %v15026_v41 = vld [vmem:[#allocation3 + $0x58] sm:$0xf]  ;;  %v11741_v63 = vld [vmem:[#allocation3 + $0x60] sm:$0xf] }
 0x463   : > { %11141 = vmatprep.mubr.msk.bf16.mxu1 %vm3575_vm14, %v10452_v40  ;;  %v10459_v59 = vcombine.low %v14974_v13, %v14979_v42  ;;  %v10460_v10 = vcombine.low %v14990_v48, %v14994_v8  ;;  %v10443_v40 = vrot.slane %v7348_v7, 9  ;;  %v7450_v4 = vrot.slane %v7448_v44, 4  ;;  %v5761_v8 = vld [vmem:[#allocation3 + $0x18] sm:$0xe] }
 0x464   : > { %v15015_v21 = vsel %vm11969_vm10, %v10442_v55, %v7497_v35  ;;  %v15019_v38 = vsel %vm11969_vm10, %v7499_v36, %v7500_v28  ;;  %v7457_v57 = vrot.slane %v7455_v58, 4  ;;  %v7506_v25 = vrot.slane %v7504_v61, 4  ;;  %v11743_v55 = vld [vmem:[#allocation3 + $0x68] sm:$0x1] }
 0x465   : > { %10998 = vmatmul.mubr.msk.bf16.gmra.mrb[40].mxu0 %vm3575_vm14, %v10269_v14  ;;  %v7492_v14 = vrot.slane %v7490_v60, 4  ;;  %v10462_v15 = vcombine.low %v15015_v21, %v15019_v38  ;;  %v7507_v6 = vrot.slane %v14861_v34, 5  ;;  %v10271_v19 = vcombine.low %v11739_v17, %v15026_v41  ;;  %v11746_v21 = vld [vmem:[#allocation3 + $0x20] sm:$0x1] }
 0x466   : > { %11001 = vmatprep.mubr.msk.bf16.mxu0 %vm3575_vm14, %v10270_v62  ;;  %v15002_v62 = vsel %vm11969_vm10, %v10441_v52, %v7490_v60  ;;  %v15029_v52 = vld [vmem:[#allocation3 + $0x64] sm:$0xf]  ;;  %v7451_v35 = vrot.slane %v11743_v55, 5  ;;  %v10436_v7 = vrot.slane %v7341_v5, 9  ;;  %v15035_v34 = vsel %vm11969_vm10, %v10443_v40, %v7504_v61  ;;  %v5759_v55 = vld [vmem:[#allocation3] sm:$0xe] }
 0x467   : > { %v15006_v27 = vsel %vm11969_vm10, %v7492_v14, %v7493_v43  ;;  %v10272_v60 = vcombine.low %v11741_v63, %v15029_v52  ;;  %v7458_v14 = vrot.slane %v14668_v20, 5  ;;  %v15039_v43 = vsel %vm11969_vm10, %v7506_v25, %v7507_v6  ;;  %v7343_v6 = vld [vmem:[#allocation3 + $0x84] sm:$0xe] }
 0x468   : > { %v10461_v2 = vcombine.low %v15002_v62, %v15006_v27  ;;  %v7462_v36 = vrot.slane %v14705_v32, 5  ;;  %v10463_v28 = vcombine.low %v15035_v34, %v15039_v43  ;;  %v7342_v32 = vld [vmem:[#allocation3 + $0x78] sm:$0xe]  ;;  %v5823_v48 = vrot.slane %v14905_v49, 5  ;;  %v11662_v34 = vld [vmem:[%s16573_s2 + $0x38] sm:$0xff]  }
 0x469   : > { %v7459_v20 = vsel %vm11969_vm10, %v7457_v57, %v7458_v14  ;;  %v10437_v30 = vrot.slane %v7342_v32, 9  ;;  %v7465_v57 = vrot.slane %v14712_v39, 5  ;;  %v10275_v39 = vcombine.low %v14726_v56, %v14734_v0 }
 0x46a   : > { %11142 = vmatmul.mubr.msk.bf16.gmra.mrb[8].mxu1 %vm3575_vm14, %v10453_v12  ;;  %v10435_v12 = vrot.slane %v7340_v37, 9  ;;  %v7469_v37 = vrot.slane %v14721_v18, 5  ;;  %v7464_v25 = vrot.slane %v7462_v36, 4  ;;  %v10273_v18 = vcombine.low %v14674_v47, %v14679_v33 }
 0x46b   : > { %11145 = vmatprep.mubr.msk.bf16.mxu1 %vm3575_vm14, %v10454_v26  ;;  %v7452_v26 = vsel %vm11969_vm10, %v7450_v4, %v7451_v35  ;;  %v7456_v4 = vsel %vm11969_vm10, %v10436_v7, %v7455_v58  ;;  %v7472_v58 = vrot.slane %v14723_v1, 5  ;;  %v7463_v47 = vsel %vm11969_vm10, %v10437_v30, %v7462_v36  ;;  %v4159_v35 = vld [vmem:[#allocation3 + $0xcc] sm:$0x1] }
 0x46c   : > { %v7449_v40 = vsel %vm11969_vm10, %v10435_v12, %v7448_v44  ;;  %v10456_v5 = vcombine.low %v7456_v4, %v7459_v20  ;;  %v7471_v17 = vrot.slane %v7469_v37, 4  ;;  %v10274_v44 = vcombine.low %v14693_v9, %v14695_v45  ;;  %v16695_v20 = vld [vmem:[#allocation15_spill] sm:$0xff]  ;;  %v5763_v4 = vld [vmem:[#allocation3 + $0x30] sm:$0xe] }
 0x46d   : > { %11002 = vmatmul.mubr.msk.bf16.gmra.mrb[44].mxu0 %vm3575_vm14, %v10271_v19  ;;  %v10455_v61 = vcombine.low %v7449_v40, %v7452_v26  ;;  %v10438_v19 = vrot.slane %v7343_v6, 9  ;;  %v7466_v63 = vsel %vm11969_vm10, %v7464_v25, %v7465_v57  ;;  %v10276_v1 = vcombine.low %v14744_v23, %v14749_v29  ;;  %v11744_v29 = vld [vmem:[#allocation3 + $0x8] sm:$0x1]  ;;  %v16694_v26 = vld [vmem:[#allocation14_spill] sm:$0xff]  ;;  %v5764_v6 = vld [vmem:[#allocation3 + $0x3c] sm:$0xe] }
 0x46e   : > { %11005 = vmatprep.mubr.msk.bf16.mxu0 %vm3575_vm14, %v10272_v60  ;;  %v7473_v60 = vsel %vm11969_vm10, %v7471_v17, %v7472_v58  ;;  %v10457_v33 = vcombine.low %v7463_v47, %v7466_v63  ;;  %v5809_v12 = vrot.slane %v14875_v11, 5  ;;  %v10277_v56 = vcombine.low %v14782_v53, %v14779_v16  ;;  %v11641_v17 = vld [vmem:[#allocation3 + $0x18] sm:$0xff]   ;;  %v11747_v57 = vld [vmem:[#allocation3 + $0x2c] sm:$0x1] }
 0x46f   : > { %v7470_v9 = vsel %vm11969_vm10, %v10438_v19, %v7469_v37  ;;  %v10298_v0 = vrot.slane %v5759_v55, 9  ;;  %v5812_v7 = vrot.slane %v11744_v29, 5  ;;  %v10278_v11 = vcombine.low %v14796_v46, %v14798_v50  ;;  %v5760_v46 = vld [vmem:[#allocation3 + $0xc] sm:$0xe]  ;;  %v16696_v19 = vld [vmem:[#allocation16_spill] sm:$0xff] }
 0x470   : > { %v10458_v45 = vcombine.low %v7470_v9, %v7473_v60  ;;  %v5811_v23 = vrot.slane %v5809_v12, 4  ;;  %v4160_v13 = vsel %vm13626_vm6, 0, %v4159_v35  ;;  %v5825_v49 = vrot.slane %v5823_v48, 4  ;;  %v11748_v47 = vld [vmem:[#allocation3 + $0x38] sm:$0x1] }
 0x471   : > { %4161 = vst [vmem:[#allocation3 + $0xcc] sm:$0x1] %v4160_v13  ;;  %v5810_v42 = vsel %vm11969_vm10, %v10298_v0, %v5809_v12  ;;  %v5837_v37 = vrot.slane %v16695_v20, 5  ;;  %v10299_v62 = vrot.slane %v5760_v46, 9  ;;  %v10300_v27 = vrot.slane %v5761_v8, 9  ;;  %v16697_v46 = vld [vmem:[#allocation7_spill] sm:$0xff] }
 0x472   : > { %11146 = vmatmul.mubr.msk.bf16.gmra.mrb[12].mxu1 %vm3575_vm14, %v10455_v61  ;;  %v5813_v53 = vsel %vm11969_vm10, %v5811_v23, %v5812_v7  ;;  %v5826_v38 = vrot.slane %v11746_v21, 5  ;;  %v5844_v58 = vrot.slane %v16696_v19, 5  ;;  %v10302_v60 = vrot.slane %v5763_v4, 9  ;;  %v15152_v29 = vld [vmem:[#allocation3 + $0x7c] sm:$0xf]  ;;  %v11645_v21 = vld [vmem:[#allocation3 + $0x30] sm:$0xff]  }
 0x473   : > { %11149 = vmatprep.mubr.msk.bf16.mxu1 %vm3575_vm14, %v10456_v5  ;;  %v10318_v24 = vcombine.low %v5810_v42, %v5813_v53  ;;  %v5839_v25 = vrot.slane %v5837_v37, 4  ;;  %v5824_v30 = vsel %vm11969_vm10, %v10300_v27, %v5823_v48  ;;  %v5851_v9 = vrot.slane %v14950_v51, 5  ;;  %v11751_v42 = vld [vmem:[#allocation3 + $0x44] sm:$0x1]  ;;  %v5766_v48 = vld [vmem:[#allocation3 + $0x54] sm:$0xe] }
 0x474   : > { %v5827_v5 = vsel %vm11969_vm10, %v5825_v49, %v5826_v38  ;;  %v10303_v12 = vrot.slane %v5764_v6, 9  ;;  %v5858_v55 = vrot.slane %v15026_v41, 5  ;;  %v5865_v35 = vrot.slane %v15029_v52, 5  ;;  %v11644_v49 = vld [vmem:[#allocation3 + $0x24] sm:$0xff]   ;;  %v11752_v20 = vld [vmem:[#allocation3 + $0x50] sm:$0x1] }
 0x475   : > { %11006 = vmatmul.mubr.msk.bf16.gmra.mrb[48].mxu0 %vm3575_vm14, %v10273_v18  ;;  %v5846_v23 = vrot.slane %v5844_v58, 4  ;;  %v5879_v7 = vrot.slane %v15152_v29, 5  ;;  %v5838_v13 = vsel %vm11969_vm10, %v10302_v60, %v5837_v37  ;;  %v5847_v53 = vrot.slane %v11751_v42, 5  ;;  %v11754_v6 = vld [vmem:[#allocation3 + $0x68] sm:$0x1] }
 0x476   : > { %11009 = vmatprep.mubr.msk.bf16.mxu0 %vm3575_vm14, %v10274_v44  ;;  %v5833_v44 = vrot.slane %v11747_v57, 5  ;;  %v5854_v37 = vrot.slane %v11752_v20, 5  ;;  %v5867_v27 = vrot.slane %v5865_v35, 4  ;;  %v11756_v57 = vld [vmem:[#allocation3 + $0x88] sm:$0xf] }
 0x477   : > { %v15180_v38 = vsel %vm11969_vm10, %v5846_v23, %v5847_v53  ;;  %v5771_v19 = vld [vmem:[#allocation3 + $0x90] sm:$0xe]  ;;  %v15210_v51 = vld [vmem:[%s16573_s2 + $0x80] sm:$0xff]   ;;  %v11646_v53 = vld [vmem:[#allocation3 + $0x3c] sm:$0xff]  }
 0x478   : > { %v11647_v52 = vld [vmem:[#allocation3 + $0x48] sm:$0xff]   ;;  %v8186_v29 = vld [vmem:[#allocation3 + $0x18] sm:$0xf]  ;;  %v8189_v20 = vld [vmem:[#allocation3 + $0x24] sm:$0xf] }
 0x47a   : > { %11150 = vmatmul.mubr.msk.bf16.gmra.mrb[16].mxu1 %vm3575_vm14, %v10457_v33  ;;  %v5840_v33 = vrot.slane %v11748_v47, 5  ;;  %v11757_v47 = vld [vmem:[#allocation3 + $0x80] sm:$0x1] }
 0x47b   : > { %11153 = vmatprep.mubr.msk.bf16.mxu1 %vm3575_vm14, %v10458_v45 }
 0x47c   : > { %v15144_v43 = vsel %vm11969_vm10, %v5839_v25, %v5840_v33  ;;  %v5882_v33 = vrot.slane %v11757_v47, 5  ;;  %v11648_v47 = vld [vmem:[#allocation3 + $0x54] sm:$0xff]  }
 0x47d   : > { %11010 = vmatmul.mubr.msk.bf16.gmra.mrb[52].mxu0 %vm3575_vm14, %v10275_v39  ;;  %v10320_v39 = vcombine.low %v5824_v30, %v5827_v5  ;;  %v5770_v5 = vld [vmem:[#allocation3 + $0x84] sm:$0xe] }
 0x47e   : > { %11013 = vmatprep.mubr.msk.bf16.mxu0 %vm3575_vm14, %v10276_v1 }
 0x482   : > { %11154 = vmatmul.mubr.msk.bf16.gmra.mrb[20].mxu1 %vm3575_vm14, %v10459_v59  ;;  %v5816_v59 = vrot.slane %v14899_v3, 5  ;;  %v5830_v3 = vrot.slane %v16694_v26, 5 }
 0x483   : > { %11157 = vmatprep.mubr.msk.bf16.mxu1 %vm3575_vm14, %v10460_v10  ;;  %v16693_v10 = vld [vmem:[#allocation12_spill] sm:$0xff] }
 0x484   : > { %v10279_v14 = vcombine.low %v16693_v10, %v14840_v54  ;;  %v5818_v36 = vrot.slane %v5816_v59, 4  ;;  %v5832_v61 = vrot.slane %v5830_v3, 4  ;;  %v5817_v18 = vsel %vm11969_vm10, %v10299_v62, %v5816_v59 }
 0x485   : > { %11014 = vmatmul.mubr.msk.bf16.gmra.mrb[56].mxu0 %vm3575_vm14, %v10277_v56  ;;  %v15148_v56 = vld [vmem:[#allocation3 + $0x70] sm:$0xf]  ;;  %v5853_v59 = vrot.slane %v5851_v9, 4  ;;  %v10322_v10 = vcombine.low %v5838_v13, %v15144_v43  ;;  %v5860_v62 = vrot.slane %v5858_v55, 4  ;;  %v11758_v43 = vld [vmem:[#allocation3 + $0x94] sm:$0xf] }
 0x486   : > { %11017 = vmatprep.mubr.msk.bf16.mxu0 %vm3575_vm14, %v10278_v11  ;;  %v15137_v1 = vsel %vm11969_vm10, %v5832_v61, %v5833_v44  ;;  %v5872_v0 = vrot.slane %v15148_v56, 5  ;;  %v11753_v61 = vld [vmem:[#allocation3 + $0x5c] sm:$0x1]  ;;  %v5886_v44 = vrot.slane %v11756_v57, 5 }
 0x487   : > { %v5861_v4 = vrot.slane %v11753_v61, 5  ;;  %v15187_v25 = vsel %vm11969_vm10, %v5853_v59, %v5854_v37 }
 0x488   : > { %v5888_v42 = vrot.slane %v5886_v44, 4 }
 0x48a   : > { %11158 = vmatmul.mubr.msk.bf16.gmra.mrb[24].mxu1 %vm3575_vm14, %v10461_v2  ;;  %v11745_v2 = vld [vmem:[#allocation3 + $0x14] sm:$0x1] }
 0x48b   : > { %11161 = vmatprep.mubr.msk.bf16.mxu1 %vm3575_vm14, %v10462_v15  ;;  %v5819_v40 = vrot.slane %v11745_v2, 5  ;;  %v5762_v15 = vld [vmem:[#allocation3 + $0x24] sm:$0xe]  ;;  %v5874_v2 = vrot.slane %v5872_v0, 4 }
 0x48c   : > { %v10301_v63 = vrot.slane %v5762_v15, 9  ;;  %v10305_v15 = vrot.slane %v5766_v48, 9 }
 0x48d   : > { %11018 = vmatmul.mubr.msk.bf16.gmra.mrb[60].mxu0 %vm3575_vm14, %v10279_v14  ;;  %v5820_v32 = vsel %vm11969_vm10, %v5818_v36, %v5819_v40  ;;  %v15167_v14 = vsel %vm11969_vm10, %v10303_v12, %v5844_v58  ;;  %v5769_v36 = vld [vmem:[#allocation3 + $0x78] sm:$0xe]  ;;  %v11652_v40 = vld [vmem:[%s16573_s2 + $0x78] sm:$0xff]   ;;  %v10309_v12 = vrot.slane %v5770_v5, 9 }
 0x48e   : > { %11025 = vmatprep.mubr.msk.bf16.mxu0 %vm3575_vm14, %v10318_v24  ;;  %v10319_v45 = vcombine.low %v5817_v18, %v5820_v32  ;;  %v5831_v11 = vsel %vm11969_vm10, %v10301_v63, %v5830_v3  ;;  %v5767_v24 = vld [vmem:[#allocation3 + $0x60] sm:$0xe]  ;;  %v5768_v3 = vld [vmem:[#allocation3 + $0x6c] sm:$0xe]  ;;  %v5881_v32 = vrot.slane %v5879_v7, 4  ;;  %v10308_v60 = vrot.slane %v5769_v36, 9 }
 0x48f   : > { %v10321_v8 = vcombine.low %v5831_v11, %v15137_v1  ;;  %v11755_v18 = vld [vmem:[#allocation3 + $0x74] sm:$0x1]  ;;  %v10306_v58 = vrot.slane %v5767_v24, 9  ;;  %v10307_v63 = vrot.slane %v5768_v3, 9  ;;  %v10323_v23 = vcombine.low %v15167_v14, %v15180_v38  ;;  %v15247_v24 = vld [vmem:[#allocation3 + $0x9c] sm:$0xe] }
 0x490   : > { %v5875_v30 = vrot.slane %v11755_v18, 5  ;;  %v15225_v13 = vsel %vm11969_vm10, %v10305_v15, %v5858_v55  ;;  %v15245_v55 = vsel %vm11969_vm10, %v10308_v60, %v5879_v7  ;;  %v15258_v7 = vsel %vm11969_vm10, %v10309_v12, %v5886_v44  ;;  %v11760_v3 = vld [vmem:[#allocation3 + $0x98] sm:$0x1]  ;;  %v15287_v60 = vld [vmem:[#allocation3 + $0x34] sm:$0xf] }
 0x491   : > { %v15233_v48 = vsel %vm11969_vm10, %v10306_v58, %v5865_v35  ;;  %v15239_v41 = vsel %vm11969_vm10, %v10307_v63, %v5872_v0  ;;  %v5896_v36 = vrot.slane %v11760_v3, 5  ;;  %v8238_v38 = vshll.u32 %v8186_v29, 16 }
 0x492   : > { %11162 = vmatmul.mubr.msk.bf16.gmra.mrb[28].mxu1 %vm3575_vm14, %v10463_v28  ;;  %v5765_v28 = vld [vmem:[#allocation3 + $0x48] sm:$0xe]  ;;  %v5914_v63 = vrot.slane %v14840_v54, 5  ;;  %v8204_v54 = vld [vmem:[#allocation3 + $0x60] sm:$0xf] }
 0x493   : > { %11169 = vmatprep.mubr.msk.bf16.mxu1 %vm3575_vm14, %v11641_v17  ;;  %v10304_v26 = vrot.slane %v5765_v28, 9  ;;  %v5868_v17 = vrot.slane %v11754_v6, 5  ;;  %v5893_v28 = vrot.slane %v11758_v43, 5  ;;  %v8262_v6 = vshll.u32 %v8189_v20, 16  ;;  %v8188_v43 = vld [vmem:[#allocation3 + $0x20] sm:$0x1] }
 0x494   : > { %v5916_v3 = vrot.slane %v5914_v63, 4 }
 0x495   : > { %11026 = vmatmul.mubr.msk.bf16.vlgmr.msra.gmra.mrb[32].mxu0 %vm3575_vm14, %v10319_v45  ;;  %v5852_v45 = vsel %vm11969_vm10, %v10304_v26, %v5851_v9  ;;  %v15201_v1 = vsel %vm11969_vm10, %v5867_v27, %v5868_v17  ;;  %v15215_v9 = vsel %vm11969_vm10, %v5881_v32, %v5882_v33  ;;  %v5895_v26 = vrot.slane %v5893_v28, 4 }
 0x496   : > { %11029 = vmatprep.mubr.msk.bf16.mxu0 %vm3575_vm14, %v10320_v39  ;;  %11058 = vmatpush3.bf16.msra.mxu0 %v16697_v46  ;;  %v15197_v39 = vsel %vm11969_vm10, %v5860_v62, %v5861_v4  ;;  %v10324_v11 = vcombine.low %v5852_v45, %v15187_v25  ;;  %v10326_v35 = vcombine.low %v15233_v48, %v15201_v1  ;;  %v11759_v46 = vld [vmem:[#allocation3 + $0x8c] sm:$0x1]  ;;  %v10311_v62 = vrot.slane %v15247_v24, 9  ;;  %v16698_v4 = vld [vmem:[#allocation10_spill] sm:$0xff] }
 0x497   : > { %11059 = vmatprep.subr.bf16.mxu0 %v11662_v34  ;;  %v10325_v59 = vcombine.low %v15225_v13, %v15197_v39  ;;  %v10328_v0 = vcombine.low %v15245_v55, %v15215_v9  ;;  %v5900_v27 = vrot.slane %v14779_v16, 5  ;;  %v5903_v32 = vrot.slane %v16698_v4, 5  ;;  %v4214_v39 = vld [vmem:[#allocation3 + $0xd4] sm:$0x1] }
 0x498   : > { %v8259_v25 = vshrl.u32 %v8189_v20, 16  ;;  %v8240_v45 = vrot.slane %v8238_v38, 5  ;;  %v15317_v38 = vld [vmem:[#allocation3 + $0x2c] sm:$0x1] }
 0x499   : > { %v5902_v57 = vrot.slane %v5900_v27, 4  ;;  %v8278_v48 = vshll.u32 %v15317_v38, 16 }
 0x49a   : > { %11170 = vmatmul.mubr.msk.bf16.vlgmr.msra.gmra.mrb[0].mxu1 %vm3575_vm14, %v11644_v49  ;;  %11060 = vmatpush3.bf16.msra.mxu0 %v11662_v34  ;;  %v10310_v34 = vrot.slane %v5771_v19, 9  ;;  %v15264_v49 = vld [vmem:[#allocation3 + $0xa8] sm:$0xe]  ;;  %v16699_v19 = vld [vmem:[#allocation11_spill] sm:$0xff] }
 0x49b   : > { %11202 = vmatpush3.bf16.msra.mxu1 %v14938_v22  ;;  %11173 = vmatprep.mubr.msk.bf16.mxu1 %vm3575_vm14, %v11645_v21  ;;  %v15205_v22 = vsel %vm11969_vm10, %v5874_v2, %v5875_v30  ;;  %v5907_v2 = vrot.slane %v14798_v50, 5  ;;  %v8235_v21 = vshrl.u32 %v8186_v29, 16  ;;  %v10312_v5 = vrot.slane %v15264_v49, 9  ;;  %v8192_v30 = vld [vmem:[#allocation3 + $0x30] sm:$0xf] }
 0x49c   : > { %11203 = vmatprep.subr.bf16.mxu1 %v11652_v40  ;;  %v10327_v56 = vcombine.low %v15239_v41, %v15205_v22  ;;  %v15262_v14 = vsel %vm11969_vm10, %v10310_v34, %v5893_v28  ;;  %v15282_v50 = vsel %vm11969_vm10, %v5895_v26, %v5896_v36  ;;  %v5910_v58 = vrot.slane %v16699_v19, 5  ;;  %v15313_v49 = vld [vmem:[#allocation3 + $0xb4] sm:$0xe]  ;;  %v11650_v19 = vld [vmem:[#allocation3 + $0x6c] sm:$0xff]  }
 0x49d   : > { %11030 = vmatmul.mubr.msk.bf16.gmra.mrb[36].mxu0 %vm3575_vm14, %v10321_v8  ;;  %v5889_v8 = vrot.slane %v11759_v46, 5  ;;  %v5909_v44 = vrot.slane %v5907_v2, 4  ;;  %v8237_v33 = vrot.slane %v8235_v21, 4  ;;  %v8261_v28 = vrot.slane %v8259_v25, 4 }
 0x49e   : > { %11033 = vmatprep.mubr.msk.bf16.mxu0 %vm3575_vm14, %v10322_v10  ;;  %v8187_v10 = vld [vmem:[#allocation3 + $0x1c] sm:$0xf]  ;;  %v8292_v46 = vshll.u32 %v15287_v60, 16  ;;  %v10330_v29 = vcombine.low %v15262_v14, %v15282_v50  ;;  %v15304_v26 = vsel %vm11969_vm10, %v5902_v57, %v5903_v32  ;;  %v15325_v32 = vsel %vm11969_vm10, %v10312_v5, %v5907_v2  ;;  %v15343_v5 = vld [vmem:[#allocation3 + $0x40] sm:$0xf] }
 0x49f   : > { %11204 = vmatpush3.bf16.msra.mxu1 %v11652_v40  ;;  %v15269_v37 = vsel %vm11969_vm10, %v5888_v42, %v5889_v8  ;;  %v8190_v40 = vld [vmem:[#allocation3 + $0x28] sm:$0xf]  ;;  %v8244_v15 = vshll.u32 %v8187_v10, 16  ;;  %v8248_v61 = vshrl.u32 %v8187_v10, 16  ;;  %v8283_v42 = vshrl.u32 %v8192_v30, 16 }
 0x4a0   : > { %11237 = vmatprep.subr.bf16.mxu1 %v15210_v51  ;;  %v10329_v16 = vcombine.low %v15258_v7, %v15269_v37  ;;  %v8268_v17 = vshll.u32 %v8190_v40, 16  ;;  %v8272_v18 = vshrl.u32 %v8190_v40, 16  ;;  %v8296_v8 = vshrl.u32 %v15287_v60, 16  ;;  %v11656_v37 = vld [vmem:[#allocation3 + $0xa8] sm:$0xff]  }
 0x4a1   : > { %v15289_v12 = vrot.slane %v8244_v15, 5  ;;  %v8250_v34 = vrot.slane %v8248_v61, 4  ;;  %v15300_v10 = vsel %vm11969_vm10, %v10311_v62, %v5900_v27  ;;  %v15311_v36 = vsel %vm11969_vm10, %v5909_v44, %v5910_v58  ;;  %v16700_v27 = vld [vmem:[#allocation13_spill] sm:$0xff] }
 0x4a2   : > { %11174 = vmatmul.mubr.msk.bf16.gmra.mrb[4].mxu1 %vm3575_vm14, %v11646_v53  ;;  %v8286_v53 = vshll.u32 %v8192_v30, 16  ;;  %v15291_v24 = vrot.slane %v8268_v17, 5  ;;  %v8241_v20 = vor.u32 %v8240_v45, %v8237_v33  ;;  %v8254_v62 = vshll.u32 %v8188_v43, 16  ;;  %v8198_v30 = vld [vmem:[#allocation3 + $0x48] sm:$0xf]  ;;  %v11651_v43 = vld [vmem:[#allocation3 + $0x78] sm:$0xff]  }
 0x4a3   : > { %11177 = vmatprep.mubr.msk.bf16.mxu1 %vm3575_vm14, %v11647_v52  ;;  %v8274_v52 = vrot.slane %v8272_v18, 4  ;;  %v8251_v40 = vor.u32 %v8250_v34, %v15289_v12  ;;  %v5917_v21 = vrot.slane %v16700_v27, 5  ;;  %v8285_v61 = vrot.slane %v8283_v42, 4  ;;  %v8195_v18 = vld [vmem:[#allocation3 + $0x3c] sm:$0xf] }
 0x4a4   : > { %v8288_v4 = vrot.slane %v8286_v53, 5  ;;  %v8298_v17 = vrot.slane %v8296_v8, 4  ;;  %v8242_v57 = vrot.slane %v8241_v20, 4  ;;  %v8256_v1 = vrot.slane %v8254_v62, 5 }
 0x4a5   : > { %11034 = vmatmul.mubr.msk.bf16.gmra.mrb[40].mxu0 %vm3575_vm14, %v10323_v23  ;;  %v8264_v23 = vrot.slane %v8262_v6, 5  ;;  %v8275_v25 = vor.u32 %v8274_v52, %v15291_v24  ;;  %v15328_v6 = vrot.slane %v8292_v46, 5  ;;  %v15341_v2 = vsel %vm11969_vm10, %v5916_v3, %v5917_v21 }
 0x4a6   : > { %11037 = vmatprep.mubr.msk.bf16.mxu0 %vm3575_vm14, %v10324_v11  ;;  %v11649_v11 = vld [vmem:[#allocation3 + $0x60] sm:$0xff]   ;;  %v8252_v44 = vrot.slane %v8251_v40, 4  ;;  %v8289_v33 = vor.u32 %v8288_v4, %v8285_v61  ;;  %v8307_v45 = vshrl.u32 %v8195_v18, 16  ;;  %v8310_v34 = vshll.u32 %v8195_v18, 16  ;;  %v8201_v4 = vld [vmem:[#allocation3 + $0x54] sm:$0xf] }
 0x4a7   : > { %v8265_v15 = vor.u32 %v8264_v23, %v8261_v28  ;;  %v8276_v28 = vrot.slane %v8275_v25, 4  ;;  %v8299_v23 = vor.u32 %v8298_v17, %v15328_v6  ;;  %v8316_v42 = vshll.u32 %v15343_v5, 16 }
 0x4a8   : > { %v8320_v53 = vshrl.u32 %v15343_v5, 16  ;;  %v8334_v52 = vshll.u32 %v8198_v30, 16  ;;  %v8257_v20 = vsel %vm12056_vm15, %v8252_v44, %v8256_v1  ;;  %v8280_v40 = vrot.slane %v8278_v48, 5  ;;  %v15394_v1 = vld [vmem:[#allocation3 + $0x58] sm:$0xf] }
 0x4a9   : > { %v8266_v58 = vrot.slane %v8265_v15, 4  ;;  %v15366_v21 = vrot.slane %v8289_v33, 4  ;;  %v8309_v15 = vrot.slane %v8307_v45, 4  ;;  %v8312_v61 = vrot.slane %v8310_v34, 5  ;;  %v11654_v45 = vld [vmem:[#allocation3 + $0x90] sm:$0xff]  }
 0x4aa   : > { %11178 = vmatmul.mubr.msk.bf16.gmra.mrb[8].mxu1 %vm3575_vm14, %v11648_v47  ;;  %v15348_v47 = vld [vmem:[#allocation3 + $0x38] sm:$0x1]  ;;  %v15374_v25 = vrot.slane %v8299_v23, 4  ;;  %v15376_v17 = vrot.slane %v8316_v42, 5  ;;  %v8322_v18 = vrot.slane %v8320_v53, 4  ;;  %v8355_v9 = vshrl.u32 %v8201_v4, 16 }
 0x4ab   : > { %11181 = vmatprep.mubr.msk.bf16.mxu1 %vm3575_vm14, %v11649_v11  ;;  %v8331_v11 = vshrl.u32 %v8198_v30, 16  ;;  %v8302_v62 = vshll.u32 %v15348_v47, 16  ;;  %v8271_v27 = vsel %vm12056_vm15, %v8266_v58, %v15291_v24  ;;  %v15382_v24 = vld [vmem:[#allocation3 + $0x44] sm:$0x1]  ;;  %v8358_v55 = vshll.u32 %v8201_v4, 16 }
 0x4ac   : > { %v8313_v33 = vor.u32 %v8312_v61, %v8309_v15  ;;  %v8323_v34 = vor.u32 %v8322_v18, %v15376_v17  ;;  %v15414_v23 = vld [vmem:[#allocation3 + $0x64] sm:$0xf] }
 0x4ad   : > { %11038 = vmatmul.mubr.msk.bf16.gmra.mrb[44].mxu0 %vm3575_vm14, %v10325_v59  ;;  %v10313_v59 = vrot.slane %v15313_v49, 9  ;;  %v8247_v49 = vsel %vm12056_vm15, %v8242_v57, %v15289_v12  ;;  %v8281_v12 = vsel %vm12056_vm15, %v8276_v28, %v8280_v40  ;;  %v8333_v30 = vrot.slane %v8331_v11, 4  ;;  %v15412_v28 = vld [vmem:[#allocation3 + $0x50] sm:$0x1] }
 0x4ae   : > { %11041 = vmatprep.mubr.msk.bf16.mxu0 %vm3575_vm14, %v10326_v35  ;;  %v15346_v35 = vld [vmem:[#allocation3 + $0x4c] sm:$0xf]  ;;  %v8336_v57 = vrot.slane %v8334_v52, 5  ;;  %v15392_v44 = vrot.slane %v8302_v62, 5  ;;  %v15400_v58 = vcombine.low %v8271_v27, %v8281_v12  ;;  %v8364_v11 = vshll.u32 %v15394_v1, 16 }
 0x4af   : > { %v8340_v46 = vshll.u32 %v15346_v35, 16  ;;  %v8344_v8 = vshrl.u32 %v15346_v35, 16  ;;  %v8368_v52 = vshrl.u32 %v15394_v1, 16  ;;  %v8379_v40 = vshrl.u32 %v8204_v54, 16 }
 0x4b0   : > { %v8337_v42 = vor.u32 %v8336_v57, %v8333_v30  ;;  %v8382_v62 = vshll.u32 %v8204_v54, 16  ;;  %v8314_v27 = vrot.slane %v8313_v33, 4  ;;  %v8350_v15 = vshll.u32 %v15412_v28, 16 }
 0x4b1   : > { %v15384_v22 = vrot.slane %v8340_v46, 5  ;;  %v8346_v41 = vrot.slane %v8344_v8, 4  ;;  %v8207_v46 = vld [vmem:[#allocation3 + $0x6c] sm:$0xf]  ;;  %v15420_v8 = vld [vmem:[#allocation3 + $0x70] sm:$0xf] }
 0x4b2   : > { %11182 = vmatmul.mubr.msk.bf16.gmra.mrb[12].mxu1 %vm3575_vm14, %v11650_v19  ;;  %v15398_v19 = vcombine.low %v8247_v49, %v8257_v20  ;;  %v8357_v49 = vrot.slane %v8355_v9, 4  ;;  %v8360_v20 = vrot.slane %v8358_v55, 5  ;;  %v8388_v61 = vshll.u32 %v15414_v23, 16 }
 0x4b3   : > { %11185 = vmatprep.mubr.msk.bf16.mxu1 %vm3575_vm14, %v11651_v43  ;;  %v8326_v43 = vshll.u32 %v15382_v24, 16  ;;  %v8347_v53 = vor.u32 %v8346_v41, %v15384_v22  ;;  %v8392_v4 = vshrl.u32 %v15414_v23, 16  ;;  %v8403_v12 = vshrl.u32 %v8207_v46, 16  ;;  %v11655_v41 = vld [vmem:[#allocation3 + $0x9c] sm:$0xff]  }
 0x4b4   : > { %v8406_v18 = vshll.u32 %v8207_v46, 16  ;;  %v8412_v30 = vshll.u32 %v15420_v8, 16  ;;  %v8416_v57 = vshrl.u32 %v15420_v8, 16  ;;  %v8324_v9 = vrot.slane %v8323_v34, 4 }
 0x4b5   : > { %11042 = vmatmul.mubr.msk.bf16.gmra.mrb[48].mxu0 %vm3575_vm14, %v10327_v56  ;;  %v15390_v56 = vsel %vm11969_vm10, %v10313_v59, %v5914_v63  ;;  %v8338_v55 = vrot.slane %v8337_v42, 4  ;;  %v15438_v33 = vrot.slane %v8364_v11, 5  ;;  %v8370_v7 = vrot.slane %v8368_v52, 4 }
 0x4b6   : > { %11045 = vmatprep.mubr.msk.bf16.mxu0 %vm3575_vm14, %v10328_v0  ;;  %v11653_v0 = vld [vmem:[#allocation3 + $0x84] sm:$0xff]   ;;  %v8361_v54 = vor.u32 %v8360_v20, %v8357_v49  ;;  %v8381_v46 = vrot.slane %v8379_v40, 4  ;;  %v8384_v48 = vrot.slane %v8382_v62, 5  ;;  %v8328_v13 = vrot.slane %v8326_v43, 5 }
 0x4b7   : > { %v8352_v63 = vrot.slane %v8350_v15, 5  ;;  %v15442_v14 = vrot.slane %v8388_v61, 5  ;;  %v8394_v50 = vrot.slane %v8392_v4, 4  ;;  %v8405_v34 = vrot.slane %v8403_v12, 4  ;;  %v15466_v61 = vld [vmem:[#allocation3 + $0x74] sm:$0x1] }
 0x4b8   : > { %v8408_v42 = vrot.slane %v8406_v18, 5  ;;  %v15444_v59 = vrot.slane %v8412_v30, 5  ;;  %v8418_v11 = vrot.slane %v8416_v57, 4  ;;  %v8329_v43 = vsel %vm12056_vm15, %v8324_v9, %v8328_v13  ;;  %v11657_v9 = vld [vmem:[#allocation3 + $0xb4] sm:$0xff]  }
 0x4b9   : > { %v8371_v52 = vor.u32 %v8370_v7, %v15438_v33  ;;  %v8343_v20 = vsel %vm12056_vm15, %v8338_v55, %v15384_v22  ;;  %v15460_v62 = vrot.slane %v8361_v54, 4  ;;  %v8385_v15 = vor.u32 %v8384_v48, %v8381_v46  ;;  %v11665_v54 = vld [vmem:[#allocation3 + $0x24] sm:$0xff]  }
 0x4ba   : > { %11186 = vmatmul.mubr.msk.bf16.gmra.mrb[16].mxu1 %vm3575_vm14, %v11653_v0  ;;  %v15436_v0 = vld [vmem:[#allocation3 + $0x5c] sm:$0x1]  ;;  %v8395_v13 = vor.u32 %v8394_v50, %v15442_v14  ;;  %v4215_v18 = vsel %vm13637_vm2, 0, %v4214_v39  ;;  %v16703_v22 = vcombine.low %v15300_v10, %v15304_v26  ;;  %v16704_v48 = vsel %vm12056_vm15, %v15374_v25, %v15392_v44 }
 0x4bb   : > { %11189 = vmatprep.mubr.msk.bf16.mxu1 %vm3575_vm14, %v11654_v45  ;;  %v15440_v45 = vld [vmem:[#allocation3 + $0x68] sm:$0x1]  ;;  %v8374_v49 = vshll.u32 %v15436_v0, 16  ;;  %v8409_v57 = vor.u32 %v8408_v42, %v8405_v34  ;;  %v8419_v39 = vor.u32 %v8418_v11, %v15444_v59  ;;  %4216 = vst [vmem:[#allocation3 + $0xd4] sm:$0x1] %v4215_v18  ;;  %v16706_v10 = vcombine.low %v15325_v32, %v15311_v36  ;;  %v11660_v18 = vld [vmem:[#allocation3 + $0xc] sm:$0xff]  }
 0x4bc   : > { %v15493_v25 = vrot.slane %v8371_v52, 4  ;;  %v8422_v36 = vshll.u32 %v15466_v61, 16  ;;  %v15504_v32 = vld [vmem:[#allocation3 + $0x80] sm:$0x1]  ;;  %v15510_v46 = vrot.slane %v8395_v13, 4  ;;  %vm16761_vm2 = vcmask 293888  }
 0x4bd   : > { %11046 = vmatmul.mubr.msk.bf16.gmra.mrb[52].mxu0 %vm3575_vm14, %v10329_v16  ;;  %v8348_v16 = vrot.slane %v8347_v53, 4  ;;  %v8319_v53 = vsel %vm12056_vm15, %v8314_v27, %v15376_v17  ;;  %v15462_v17 = vld [vmem:[#allocation3 + $0x7c] sm:$0xf]  ;;  %v8398_v27 = vshll.u32 %v15440_v45, 16  ;;  %v15499_v7 = vrot.slane %v8374_v49, 5  ;;  %vm16765_vm6 = vmmov %vm16761_vm2 }
 0x4be   : > { %11049 = vmatprep.mubr.msk.bf16.mxu0 %vm3575_vm14, %v10330_v29  ;;  %v8210_v29 = vld [vmem:[#allocation3 + $0x78] sm:$0xf]  ;;  %v15491_v26 = vcombine.low %v8319_v53, %v8329_v43  ;;  %v8436_v44 = vshll.u32 %v15462_v17, 16  ;;  %v15516_v34 = vld [vmem:[#allocation3 + $0x88] sm:$0xf]  ;;  %v15518_v42 = vrot.slane %v8409_v57, 4  ;;  %vm16766_vm4 = vmmov %vm16761_vm2 }
 0x4bf   : > { %v8353_v40 = vsel %vm12056_vm15, %v8348_v16, %v8352_v63  ;;  %v8427_v4 = vshrl.u32 %v8210_v29, 16  ;;  %v16705_v63 = vsel %vm12056_vm15, %v15366_v21, %v15328_v6  ;;  %v8440_v6 = vshrl.u32 %v15462_v17, 16  ;;  %v8213_v21 = vld [vmem:[#allocation3 + $0x84] sm:$0xf]  ;;  %v8926_v52 = vld [vmem:[#allocation3 + $0x30] sm:$0xe]  ;;  %vm16767_vm5 = vmmov %vm16761_vm2 }
 0x4c0   : > { %v15484_v30 = vcombine.low %v16705_v63, %v16704_v48  ;;  %v15497_v55 = vcombine.low %v8343_v20, %v8353_v40  ;;  %v11658_v16 = vld [vmem:[#allocation3 + $0xc0] sm:$0xff]   ;;  %v15512_v50 = vrot.slane %v8398_v27, 5  ;;  %v15520_v11 = vrot.slane %v8419_v39, 4  ;;  %v8927_v39 = vld [vmem:[#allocation3 + $0x3c] sm:$0xe]  ;;  %vm16768_vm9 = vmmov %vm16761_vm2 }
 0x4c1   : > { %v8451_v43 = vshrl.u32 %v8213_v21, 16  ;;  %v15529_v20 = vrot.slane %v8436_v44, 5  ;;  %v15531_v40 = vrot.slane %v8440_v6, 4  ;;  %v15538_v27 = vrot.slane %v8422_v36, 5  ;;  %v8929_v13 = vld [vmem:[#allocation3 + $0x54] sm:$0xe]  ;;  %vm16769_vm13 = vmmov %vm16761_vm2 }
 0x4c2   : > { %11190 = vmatmul.mubr.msk.bf16.gmra.mrb[20].mxu1 %vm3575_vm14, %v11655_v41  ;;  %v8430_v41 = vshll.u32 %v8210_v29, 16  ;;  %v15514_v29 = vrot.slane %v8427_v4, 4  ;;  %v8460_v4 = vshll.u32 %v15516_v34, 16  ;;  %v8464_v12 = vshrl.u32 %v15516_v34, 16  ;;  %vm16770_vm3 = vmmov %vm16761_vm2 }
 0x4c3   : > { %11193 = vmatprep.mubr.msk.bf16.mxu1 %vm3575_vm14, %v11656_v37  ;;  %v15501_v37 = vrot.slane %v8385_v15, 4  ;;  %v8454_v15 = vshll.u32 %v8213_v21, 16  ;;  %v10560_v63 = vrot.slane %v8926_v52, 9  ;;  %v9004_v57 = vrot.slane %v15287_v60, 5  ;;  %v15564_v21 = vld [vmem:[#allocation3 + $0x90] sm:$0xf]  ;;  %vm16771_vm11 = vmmov %vm16761_vm2 }
 0x4c4   : > { %v15522_v53 = vrot.slane %v8430_v41, 5  ;;  %v16707_v41 = vcombine.low %v15390_v56, %v15341_v2  ;;  %v15562_v60 = vrot.slane %v8451_v43, 4  ;;  %v8928_v2 = vld [vmem:[#allocation3 + $0x48] sm:$0xe]  ;;  %v11661_v56 = vld [vmem:[#allocation3 + $0xcc] sm:$0xff]   ;;  %v15574_v48 = vrot.slane %v8460_v4, 5  ;;  %vm16772_vm0 = vmmov %vm16761_vm2 }
 0x4c5   : > { %11050 = vmatmul.mubr.msk.bf16.gmra.mrb[56].mxu0 %vm3575_vm14, %v16703_v22  ;;  %v15569_v36 = vrot.slane %v8454_v15, 5  ;;  %v9006_v52 = vrot.slane %v9004_v57, 4  ;;  %v15576_v43 = vrot.slane %v8464_v12, 4  ;;  %v10561_v6 = vrot.slane %v8927_v39, 9  ;;  %v8930_v39 = vld [vmem:[#allocation3 + $0x60] sm:$0xe]  ;;  %vm16773_vm7 = vmmov %vm16772_vm0 }
 0x4c6   : > { %11053 = vmatprep.mubr.msk.bf16.mxu0 %vm3575_vm14, %v16706_v10  ;;  %v9011_v10 = vrot.slane %v15343_v5, 5  ;;  %v9018_v44 = vrot.slane %v15346_v35, 5  ;;  %v11663_v35 = vld [vmem:[#allocation3 + $0x18] sm:$0xff]   ;;  %v9021_v12 = vrot.slane %v15412_v28, 5  ;;  %v10563_v5 = vrot.slane %v8929_v13, 9  ;;  %vm16774_vm8 = vmmov %vm16772_vm0 }
 0x4c7   : > { %v9025_v22 = vrot.slane %v15394_v1, 5  ;;  %v9032_v49 = vrot.slane %v15414_v23, 5  ;;  %v9035_v23 = vrot.slane %v15440_v45, 5  ;;  %v15639_v45 = vld [vmem:[#allocation3 + $0x98] sm:$0x1]  ;;  %v9049_v4 = vrot.slane %v15504_v32, 5  ;;  %vm16775_vm12 = vmmov %vm16772_vm0 }
 0x4c9   : > { %v9027_v13 = vrot.slane %v9025_v22, 4 }
 0x4ca   : > { %11194 = vmatmul.mubr.msk.bf16.gmra.mrb[24].mxu1 %vm3575_vm14, %v11657_v9  ;;  %v10562_v9 = vrot.slane %v8928_v2, 9  ;;  %v9014_v2 = vrot.slane %v15382_v24, 5 }
 0x4cb   : > { %11197 = vmatprep.mubr.msk.bf16.mxu1 %vm3575_vm14, %v11658_v16  ;;  %v15571_v16 = vld [vmem:[#allocation3 + $0x94] sm:$0xf] }
 0x4cc   : > { %v15610_v24 = vsel %vm11969_vm10, %v10562_v9, %v9018_v44  ;;  %v9034_v9 = vrot.slane %v9032_v49, 4 }
 0x4cd   : > { %11054 = vmatmul.mubr.msk.bf16.gmra.mrb[60].mxu0 %vm3575_vm14, %v16707_v41  ;;  %v9007_v41 = vrot.slane %v15348_v47, 5  ;;  %v8935_v47 = vld [vmem:[#allocation3 + $0x9c] sm:$0xe] }
 0x4ce   : > { %11061 = vmatprep.mubr.msk.bf16.mxu0 %vm3575_vm14, %v11660_v18  ;;  %v15581_v18 = vsel %vm11969_vm10, %v10560_v63, %v9004_v57  ;;  %v9013_v57 = vrot.slane %v9011_v10, 4 }
 0x4cf   : > { %v15585_v15 = vsel %vm11969_vm10, %v9006_v52, %v9007_v41  ;;  %v9020_v52 = vrot.slane %v9018_v44, 4  ;;  %v15600_v41 = vsel %vm11969_vm10, %v10561_v6, %v9011_v10  ;;  %v8932_v10 = vld [vmem:[#allocation3 + $0x78] sm:$0xe]  ;;  %v9028_v6 = vrot.slane %v15436_v0, 5  ;;  %v15679_v44 = vld [vmem:[#allocation3 + $0xac] sm:$0xf] }
 0x4d0   : > { %v15606_v63 = vsel %vm11969_vm10, %v9013_v57, %v9014_v2  ;;  %v15625_v57 = vld [vmem:[#allocation3 + $0x8c] sm:$0x1]  ;;  %v15629_v2 = vsel %vm11969_vm10, %v10563_v5, %v9025_v22  ;;  %v9039_v0 = vrot.slane %v15420_v8, 5  ;;  %v15649_v5 = vsel %vm11969_vm10, %v9034_v9, %v9035_v23 }
 0x4d1   : > { %v15618_v1 = vsel %vm11969_vm10, %v9020_v52, %v9021_v12  ;;  %16708 = vst [vmem:[#allocation12_spill] sm:$0xff] %v15629_v2  ;;  %v15633_v12 = vsel %vm11969_vm10, %v9027_v13, %v9028_v6  ;;  %v8933_v52 = vld [vmem:[#allocation3 + $0x84] sm:$0xe]  ;;  %16711 = vst [vmem:[#allocation16_spill] sm:$0xff] %v15649_v5  ;;  %v9046_v8 = vrot.slane %v15462_v17, 5  ;;  %v11666_v13 = vld [vmem:[#allocation3 + $0x30] sm:$0xff]  }
 0x4d2   : > { %11198 = vmatmul.mubr.msk.bf16.gmra.mrb[28].mxu1 %vm3575_vm14, %v11661_v56  ;;  %v8931_v56 = vld [vmem:[#allocation3 + $0x6c] sm:$0xe]  ;;  %16709 = vst [vmem:[#allocation14_spill] sm:$0xff] %v15633_v12  ;;  %v15652_v6 = vld [vmem:[#allocation3 + $0xa0] sm:$0xf]  ;;  %v9041_v28 = vrot.slane %v9039_v0, 4 }
 0x4d3   : > { %11205 = vmatprep.mubr.msk.bf16.mxu1 %vm3575_vm14, %v15398_v19  ;;  %v10564_v19 = vrot.slane %v8930_v39, 9  ;;  %v10565_v39 = vrot.slane %v8931_v56, 9  ;;  %v9042_v56 = vrot.slane %v15466_v61, 5  ;;  %v9048_v17 = vrot.slane %v9046_v8, 4  ;;  %v15668_v61 = vld [vmem:[#allocation3 + $0xa4] sm:$0x1] }
 0x4d4   : > { %v10567_v9 = vrot.slane %v8933_v52, 9  ;;  %v9053_v23 = vrot.slane %v15516_v34, 5  ;;  %v9060_v52 = vrot.slane %v15571_v16, 5  ;;  %v8936_v34 = vld [vmem:[#allocation3 + $0xa8] sm:$0xe]  ;;  %v10569_v12 = vrot.slane %v8935_v47, 9 }
 0x4d5   : > { %11062 = vmatmul.mubr.msk.bf16.vlgmr.msra.gmra.mrb[32].mxu0 %vm3575_vm14, %v11663_v35  ;;  %v11673_v35 = vld [vmem:[%s16573_s2 + $0x88] sm:$0xff]   ;;  %v15645_v22 = vsel %vm11969_vm10, %v10564_v19, %v9032_v49  ;;  %v11667_v49 = vld [vmem:[#allocation3 + $0x3c] sm:$0xff]   ;;  %v15662_v19 = vsel %vm11969_vm10, %v10565_v39, %v9039_v0 }
 0x4d6   : > { %11065 = vmatprep.mubr.msk.bf16.mxu0 %vm3575_vm14, %v11665_v54  ;;  %v10566_v54 = vrot.slane %v8932_v10, 9  ;;  %16710 = vst [vmem:[#allocation15_spill] sm:$0xff] %v15645_v22  ;;  %v8934_v10 = vld [vmem:[#allocation3 + $0x90] sm:$0xe]  ;;  %16712 = vst [vmem:[#allocation7_spill] sm:$0xff] %v15662_v19  ;;  %v9062_v5 = vrot.slane %v9060_v52, 4 }
 0x4d7   : > { %v10568_v0 = vrot.slane %v8934_v10, 9  ;;  %v9063_v22 = vrot.slane %v15639_v45, 5  ;;  %v8937_v10 = vld [vmem:[#allocation3 + $0xb4] sm:$0xe] }
 0x4d8   : > { %v15676_v39 = vsel %vm11969_vm10, %v10566_v54, %v9046_v8  ;;  %v9056_v54 = vrot.slane %v15625_v57, 5  ;;  %v15691_v8 = vld [vmem:[#allocation3 + $0xb8] sm:$0xf]  ;;  %v16738_v31 = vld [vmem:[#allocation12_spill] sm:$0xff] }
 0x4d9   : > { %16714 = vst [vmem:[#allocation11_spill] sm:$0xff] %v15676_v39  ;;  %v9070_v39 = vrot.slane %v15668_v61, 5 }
 0x4da   : > { %11206 = vmatmul.mubr.msk.bf16.vlgmr.msra.gmra.mrb[0].mxu1 %vm3575_vm14, %v15400_v58  ;;  %v15672_v58 = vsel %vm11969_vm10, %v9041_v28, %v9042_v56  ;;  %v15687_v28 = vsel %vm11969_vm10, %v9048_v17, %v9049_v4  ;;  %v9055_v56 = vrot.slane %v9053_v23, 4  ;;  %v15701_v4 = vsel %vm11969_vm10, %v10567_v9, %v9053_v23 }
 0x4db   : > { %11238 = vmatpush3.bf16.msra.mxu1 %v15210_v51  ;;  %11209 = vmatprep.mubr.msk.bf16.mxu1 %vm3575_vm14, %v15484_v30  ;;  %16713 = vst [vmem:[#allocation10_spill] sm:$0xff] %v15672_v58  ;;  %v15681_v51 = vld [vmem:[#allocation3 + $0xb0] sm:$0x1]  ;;  %16715 = vst [vmem:[#allocation13_spill] sm:$0xff] %v15687_v28  ;;  %v15697_v30 = vld [vmem:[#allocation3 + $0xbc] sm:$0x1]  ;;  %v15718_v9 = vsel %vm11969_vm10, %v9062_v5, %v9063_v22 }
 0x4dc   : > { %11239 = vmatprep.subr.bf16.mxu1 %v11673_v35  ;;  %16716 = vst [vmem:[#allocation8_spill] sm:$0xff] %v15701_v4  ;;  %v9067_v17 = vrot.slane %v15652_v6, 5  ;;  %v10570_v58 = vrot.slane %v8936_v34, 9  ;;  %v15708_v28 = vld [vmem:[#allocation3 + $0xc4] sm:$0xf]  ;;  %16719 = vst [vmem:[#allocation18_spill] sm:$0xff] %v15718_v9 }
 0x4dd   : > { %11066 = vmatmul.mubr.msk.bf16.gmra.mrb[36].mxu0 %vm3575_vm14, %v11666_v13  ;;  %v15705_v13 = vsel %vm11969_vm10, %v9055_v56, %v9056_v54  ;;  %v9074_v23 = vrot.slane %v15679_v44, 5  ;;  %v8938_v56 = vld [vmem:[#allocation3 + $0xc0] sm:$0xe]  ;;  %v15721_v54 = vld [vmem:[#allocation3 + $0xc8] sm:$0x1]  ;;  %v9077_v47 = vrot.slane %v15681_v51, 5 }
 0x4de   : > { %11069 = vmatprep.mubr.msk.bf16.mxu0 %vm3575_vm14, %v11667_v49  ;;  %16717 = vst [vmem:[#allocation9_spill] sm:$0xff] %v15705_v13  ;;  %v15714_v49 = vsel %vm11969_vm10, %v10568_v0, %v9060_v52  ;;  %v9069_v34 = vrot.slane %v9067_v17, 4  ;;  %v15729_v0 = vsel %vm11969_vm10, %v10569_v12, %v9067_v17  ;;  %v10571_v22 = vrot.slane %v8937_v10, 9  ;;  %v8939_v13 = vld [vmem:[#allocation3 + $0xcc] sm:$0xe] }
 0x4df   : > { %11240 = vmatpush3.bf16.msra.mxu1 %v11673_v35  ;;  %16718 = vst [vmem:[#allocation17_spill] sm:$0xff] %v15714_v49  ;;  %v9076_v52 = vrot.slane %v9074_v23, 4  ;;  %v9081_v5 = vrot.slane %v15691_v8, 5  ;;  %v15740_v9 = vsel %vm11969_vm10, %v10570_v58, %v9074_v23  ;;  %v10572_v49 = vrot.slane %v8938_v56, 9  ;;  %v11668_v10 = vld [vmem:[#allocation3 + $0x48] sm:$0xff]   ;;  %v11669_v23 = vld [vmem:[#allocation3 + $0x54] sm:$0xff]  }
 0x4e0   : > { %v15736_v35 = vsel %vm11969_vm10, %v9069_v34, %v9070_v39  ;;  %v9088_v12 = vrot.slane %v15708_v28, 5  ;;  %v15745_v17 = vld [vmem:[#allocation3 + $0xd0] sm:$0xf]  ;;  %v9084_v58 = vrot.slane %v15697_v30, 5  ;;  %v15754_v56 = vld [vmem:[#allocation3 + $0xd4] sm:$0x1] }
 0x4e1   : > { %16720 = vst [vmem:[#allocation19_spill] sm:$0xff] %v15736_v35  ;;  %v15751_v39 = vsel %vm11969_vm10, %v9076_v52, %v9077_v47  ;;  %v9083_v34 = vrot.slane %v9081_v5, 4  ;;  %v9091_v19 = vrot.slane %v15721_v54, 5  ;;  %v10573_v2 = vrot.slane %v8939_v13, 9 }
 0x4e2   : > { %11210 = vmatmul.mubr.msk.bf16.gmra.mrb[4].mxu1 %vm3575_vm14, %v15491_v26  ;;  %16721 = vst [vmem:[#allocation20_spill] sm:$0xff] %v15751_v39  ;;  %v15762_v26 = vsel %vm11969_vm10, %v10571_v22, %v9081_v5  ;;  %v9095_v52 = vrot.slane %v15745_v17, 5  ;;  %v9098_v35 = vrot.slane %v15754_v56, 5  ;;  %v16722_v4 = vshrl.u32 %v15564_v21, 16 }
 0x4e3   : > { %11213 = vmatprep.mubr.msk.bf16.mxu1 %vm3575_vm14, %v15497_v55  ;;  %v9090_v55 = vrot.slane %v9088_v12, 4  ;;  %v15766_v47 = vsel %vm11969_vm10, %v9083_v34, %v9084_v58  ;;  %v15777_v22 = vsel %vm11969_vm10, %v10572_v49, %v9088_v12  ;;  %v16724_v49 = vsel %vm12056_vm15, %v15493_v25, %v15499_v7 }
 0x4e4   : > { %v8477_v39 = vrot.slane %v16722_v4, 4  ;;  %v10591_v13 = vcombine.low %v15762_v26, %v15766_v47  ;;  %v15789_v4 = vsel %vm11969_vm10, %v10573_v2, %v9095_v52  ;;  %v16726_v12 = vsel %vm12056_vm15, %v15510_v46, %v15512_v50 }
 0x4e5   : > { %11070 = vmatmul.mubr.msk.bf16.gmra.mrb[40].mxu0 %vm3575_vm14, %v11668_v10  ;;  %v15781_v5 = vsel %vm11969_vm10, %v9090_v55, %v9091_v19  ;;  %v16723_v10 = vshll.u32 %v15564_v21, 16  ;;  %v16725_v19 = vsel %vm12056_vm15, %v15460_v62, %v15438_v33  ;;  %v16727_v2 = vsel %vm12056_vm15, %v15501_v37, %v15442_v14  ;;  %v8219_v33 = vld [vmem:[#allocation3 + $0x9c] sm:$0xf] }
 0x4e6   : > { %11073 = vmatprep.mubr.msk.bf16.mxu0 %vm3575_vm14, %v11669_v23  ;;  %v10592_v58 = vcombine.low %v15777_v22, %v15781_v5  ;;  %v9097_v23 = vrot.slane %v9095_v52, 4  ;;  %v10529_v21 = vcombine.low %v16725_v19, %v16724_v49  ;;  %v10530_v55 = vcombine.low %v16727_v2, %v16726_v12  ;;  %v8222_v19 = vld [vmem:[#allocation3 + $0xa8] sm:$0xf]  ;;  %v11671_v2 = vld [vmem:[#allocation3 + $0x6c] sm:$0xff]  }
 0x4e7   : > { %v8480_v34 = vrot.slane %v16723_v10, 5  ;;  %v16728_v52 = vshll.u32 %v15571_v16, 16  ;;  %v16729_v7 = vshrl.u32 %v15571_v16, 16  ;;  %v16730_v62 = vsel %vm12056_vm15, %v15520_v11, %v15538_v27 }
 0x4e8   : > { %v16731_v46 = vsel %vm12056_vm15, %v15518_v42, %v15444_v59  ;;  %v16732_v37 = vor.u32 %v15522_v53, %v15514_v29  ;;  %v16733_v49 = vshll.u32 %v15504_v32, 16  ;;  %v15834_v12 = vsel %vm11969_vm10, %v9097_v23, %v9098_v35  ;;  %v11670_v42 = vld [vmem:[#allocation3 + $0x60] sm:$0xff]   ;;  %v8225_v32 = vld [vmem:[#allocation3 + $0xb4] sm:$0xf] }
 0x4e9   : > { %v15813_v25 = vrot.slane %v16728_v52, 5  ;;  %v8490_v10 = vrot.slane %v16729_v7, 4  ;;  %v10531_v14 = vcombine.low %v16731_v46, %v16730_v62  ;;  %v16734_v11 = vor.u32 %v15531_v40, %v15529_v20 }
 0x4ea   : > { %v8434_v50 = vrot.slane %v16732_v37, 4  ;;  %v8448_v16 = vrot.slane %v16733_v49, 5  ;;  %11214 = vmatmul.mubr.msk.bf16.gmra.mrb[8].mxu1 %vm3575_vm14, %v10529_v21  ;;  %v8457_v59 = vor.u32 %v15569_v36, %v15562_v60  ;;  %v8467_v29 = vor.u32 %v15576_v43, %v15574_v48 }
 0x4eb   : > { %v8444_v27 = vrot.slane %v16734_v11, 4  ;;  %11217 = vmatprep.mubr.msk.bf16.mxu1 %vm3575_vm14, %v10530_v55  ;;  %v8481_v53 = vor.u32 %v8480_v34, %v8477_v39  ;;  %v8499_v35 = vshrl.u32 %v8219_v33, 16  ;;  %v8502_v23 = vshll.u32 %v8219_v33, 16 }
 0x4ec   : > { %v8508_v21 = vshll.u32 %v15652_v6, 16  ;;  %v8491_v40 = vor.u32 %v8490_v10, %v15813_v25  ;;  %v8512_v52 = vshrl.u32 %v15652_v6, 16  ;;  %v8523_v60 = vshrl.u32 %v8222_v19, 16 }
 0x4ed   : > { %v8526_v36 = vshll.u32 %v8222_v19, 16  ;;  %11074 = vmatmul.mubr.msk.bf16.gmra.mrb[44].mxu0 %vm3575_vm14, %v11670_v42  ;;  %v8439_v43 = vsel %vm12056_vm15, %v8434_v50, %v15529_v20  ;;  %v8470_v55 = vshll.u32 %v15625_v57, 16  ;;  %v8532_v39 = vshll.u32 %v15679_v44, 16 }
 0x4ee   : > { %v8536_v34 = vshrl.u32 %v15679_v44, 16  ;;  %11077 = vmatprep.mubr.msk.bf16.mxu0 %vm3575_vm14, %v11671_v2  ;;  %v8449_v7 = vsel %vm12056_vm15, %v8444_v27, %v8448_v16  ;;  %v8458_v6 = vrot.slane %v8457_v59, 4  ;;  %v8468_v10 = vrot.slane %v8467_v29, 4  ;;  %v11672_v27 = vld [vmem:[#allocation3 + $0x78] sm:$0xff]  }
 0x4ef   : > { %v8494_v33 = vshll.u32 %v15639_v45, 16  ;;  %v8482_v62 = vrot.slane %v8481_v53, 4  ;;  %v8501_v46 = vrot.slane %v8499_v35, 4  ;;  %v8504_v37 = vrot.slane %v8502_v23, 5  ;;  %v8228_v23 = vld [vmem:[#allocation3 + $0xc0] sm:$0xf] }
 0x4f0   : > { %v15861_v49 = vrot.slane %v8508_v21, 5  ;;  %v8492_v20 = vrot.slane %v8491_v40, 4  ;;  %v8514_v57 = vrot.slane %v8512_v52, 4  ;;  %v8525_v50 = vrot.slane %v8523_v60, 4 }
 0x4f1   : > { %v8528_v19 = vrot.slane %v8526_v36, 5  ;;  %v10532_v11 = vcombine.low %v8439_v43, %v8449_v7  ;;  %v8472_v44 = vrot.slane %v8470_v55, 5  ;;  %v15863_v42 = vrot.slane %v8532_v39, 5 }
 0x4f2   : > { %v8538_v2 = vrot.slane %v8536_v34, 4  ;;  %11218 = vmatmul.mubr.msk.bf16.gmra.mrb[12].mxu1 %vm3575_vm14, %v10531_v14  ;;  %v8463_v45 = vsel %vm12056_vm15, %v8458_v6, %v15574_v48  ;;  %v8496_v16 = vrot.slane %v8494_v33, 5  ;;  %v8487_v29 = vsel %vm12056_vm15, %v8482_v62, %v15813_v25  ;;  %v11674_v14 = vld [vmem:[#allocation3 + $0x84] sm:$0xff]  }
 0x4f3   : > { %11221 = vmatprep.mubr.msk.bf16.mxu1 %vm3575_vm14, %v10532_v11  ;;  %v8473_v59 = vsel %vm12056_vm15, %v8468_v10, %v8472_v44  ;;  %v8505_v53 = vor.u32 %v8504_v37, %v8501_v46  ;;  %v8518_v35 = vshll.u32 %v15668_v61, 16  ;;  %v8515_v48 = vor.u32 %v8514_v57, %v15861_v49 }
 0x4f4   : > { %v8497_v21 = vsel %vm12056_vm15, %v8492_v20, %v8496_v16  ;;  %v8529_v40 = vor.u32 %v8528_v19, %v8525_v50  ;;  %v8547_v52 = vshrl.u32 %v8225_v32, 16  ;;  %v8539_v60 = vor.u32 %v8538_v2, %v15863_v42  ;;  %v8231_v20 = vld [vmem:[#allocation3 + $0xcc] sm:$0xf] }
 0x4f5   : > { %11078 = vmatmul.mubr.msk.bf16.gmra.mrb[48].mxu0 %vm3575_vm14, %v11672_v27  ;;  %v8550_v36 = vshll.u32 %v8225_v32, 16  ;;  %v8556_v43 = vshll.u32 %v15691_v8, 16  ;;  %v8560_v25 = vshrl.u32 %v15691_v8, 16  ;;  %v8571_v61 = vshrl.u32 %v8228_v23, 16 }
 0x4f6   : > { %11081 = vmatprep.mubr.msk.bf16.mxu0 %vm3575_vm14, %v11674_v14  ;;  %v8574_v55 = vshll.u32 %v8228_v23, 16  ;;  %v8580_v39 = vshll.u32 %v15708_v28, 16  ;;  %v8584_v34 = vshrl.u32 %v15708_v28, 16  ;;  %v10533_v7 = vcombine.low %v8463_v45, %v8473_v59  ;;  %v11675_v45 = vld [vmem:[#allocation3 + $0x90] sm:$0xff]  }
 0x4f7   : > { %v10534_v6 = vcombine.low %v8487_v29, %v8497_v21  ;;  %v8506_v10 = vrot.slane %v8505_v53, 4  ;;  %v8520_v33 = vrot.slane %v8518_v35, 5  ;;  %v8516_v62 = vrot.slane %v8515_v48, 4  ;;  %v11676_v29 = vld [vmem:[#allocation3 + $0x9c] sm:$0xff]  }
 0x4f8   : > { %v8530_v46 = vrot.slane %v8529_v40, 4  ;;  %v8542_v32 = vshll.u32 %v15681_v51, 16  ;;  %v8549_v37 = vrot.slane %v8547_v52, 4  ;;  %v8540_v57 = vrot.slane %v8539_v60, 4 }
 0x4f9   : > { %v8552_v8 = vrot.slane %v8550_v36, 5  ;;  %v8558_v50 = vrot.slane %v8556_v43, 5  ;;  %v8562_v19 = vrot.slane %v8560_v25, 4  ;;  %v8573_v11 = vrot.slane %v8571_v61, 4 }
 0x4fa   : > { %11222 = vmatmul.mubr.msk.bf16.gmra.mrb[16].mxu1 %vm3575_vm14, %v10533_v7  ;;  %v8576_v44 = vrot.slane %v8574_v55, 5  ;;  %v8582_v2 = vrot.slane %v8580_v39, 5  ;;  %v8586_v28 = vrot.slane %v8584_v34, 4  ;;  %v8595_v16 = vshrl.u32 %v8231_v20, 16 }
 0x4fb   : > { %11225 = vmatprep.mubr.msk.bf16.mxu1 %vm3575_vm14, %v10534_v6  ;;  %v8598_v27 = vshll.u32 %v8231_v20, 16  ;;  %v8604_v59 = vshll.u32 %v15745_v17, 16  ;;  %v8608_v51 = vshrl.u32 %v15745_v17, 16  ;;  %v8511_v53 = vsel %vm12056_vm15, %v8506_v10, %v15861_v49  ;;  %v11677_v10 = vld [vmem:[#allocation3 + $0xa8] sm:$0xff]  }
 0x4fc   : > { %v8544_v35 = vrot.slane %v8542_v32, 5  ;;  %v8521_v23 = vsel %vm12056_vm15, %v8516_v62, %v8520_v33  ;;  %v8535_v14 = vsel %vm12056_vm15, %v8530_v46, %v15863_v42  ;;  %v8553_v21 = vor.u32 %v8552_v8, %v8549_v37  ;;  %v11678_v32 = vld [vmem:[#allocation3 + $0xb4] sm:$0xff]  }
 0x4fd   : > { %11082 = vmatmul.mubr.msk.bf16.gmra.mrb[52].mxu0 %vm3575_vm14, %v11675_v45  ;;  %v8563_v48 = vor.u32 %v8562_v19, %v8558_v50  ;;  %v8566_v40 = vshll.u32 %v15697_v30, 16  ;;  %v8577_v49 = vor.u32 %v8576_v44, %v8573_v11  ;;  %v8587_v52 = vor.u32 %v8586_v28, %v8582_v2  ;;  %v11761_v19 = vld [vmem:[#allocation3 + $0x1c] sm:$0xf] }
 0x4fe   : > { %11085 = vmatprep.mubr.msk.bf16.mxu0 %vm3575_vm14, %v11676_v29  ;;  %v8545_v17 = vsel %vm12056_vm15, %v8540_v57, %v8544_v35  ;;  %v8597_v60 = vrot.slane %v8595_v16, 4  ;;  %v8600_v36 = vrot.slane %v8598_v27, 5  ;;  %v8606_v43 = vrot.slane %v8604_v59, 5  ;;  %v8924_v27 = vld [vmem:[#allocation3 + $0x18] sm:$0xe]  ;;  %v11679_v59 = vld [vmem:[#allocation3 + $0xc0] sm:$0xff]  }
 0x4ff   : > { %v8610_v25 = vrot.slane %v8608_v51, 4  ;;  %v10535_v61 = vcombine.low %v8511_v53, %v8521_v23  ;;  %v8590_v55 = vshll.u32 %v15721_v54, 16  ;;  %v10536_v39 = vcombine.low %v8535_v14, %v8545_v17  ;;  %v11762_v53 = vld [vmem:[#allocation3 + $0x20] sm:$0x1]  ;;  %v11763_v23 = vld [vmem:[#allocation3 + $0x28] sm:$0xf] }
 0x500   : > { %v8554_v42 = vrot.slane %v8553_v21, 4  ;;  %v8564_v34 = vrot.slane %v8563_v48, 4  ;;  %v8578_v7 = vrot.slane %v8577_v49, 4  ;;  %v8588_v6 = vrot.slane %v8587_v52, 4 }
 0x501   : > { %v8568_v30 = vrot.slane %v8566_v40, 5  ;;  %v8601_v33 = vor.u32 %v8600_v36, %v8597_v60  ;;  %v8611_v62 = vor.u32 %v8610_v25, %v8606_v43  ;;  %v8614_v46 = vshll.u32 %v15754_v56, 16  ;;  %v8925_v40 = vld [vmem:[#allocation3 + $0x24] sm:$0xe] }
 0x502   : > { %11226 = vmatmul.mubr.msk.bf16.gmra.mrb[20].mxu1 %vm3575_vm14, %v10535_v61  ;;  %v8592_v37 = vrot.slane %v8590_v55, 5  ;;  %v8559_v54 = vsel %vm12056_vm15, %v8554_v42, %v8558_v50  ;;  %v8583_v57 = vsel %vm12056_vm15, %v8578_v7, %v8582_v2  ;;  %v8990_v56 = vrot.slane %v11761_v19, 5  ;;  %v16742_v7 = vld [vmem:[#allocation16_spill] sm:$0xff] }
 0x503   : > { %11229 = vmatprep.mubr.msk.bf16.mxu1 %vm3575_vm14, %v10536_v39  ;;  %v8569_v20 = vsel %vm12056_vm15, %v8564_v34, %v8568_v30  ;;  %v8602_v11 = vrot.slane %v8601_v33, 4  ;;  %v8612_v44 = vrot.slane %v8611_v62, 4  ;;  %v8616_v28 = vrot.slane %v8614_v46, 5  ;;  %v16739_v39 = vld [vmem:[#allocation14_spill] sm:$0xff]  ;;  %v16741_v34 = vld [vmem:[#allocation15_spill] sm:$0xff]  ;;  %v16751_v30 = vld [vmem:[#allocation9_spill] sm:$0xff] }
 0x504   : > { %v8593_v8 = vsel %vm12056_vm15, %v8588_v6, %v8592_v37  ;;  %v10537_v45 = vcombine.low %v8559_v54, %v8569_v20  ;;  %v8992_v50 = vrot.slane %v8990_v56, 4  ;;  %v10558_v29 = vrot.slane %v8924_v27, 9  ;;  %v16745_v6 = vld [vmem:[#allocation10_spill] sm:$0xff]  ;;  %v16753_v62 = vld [vmem:[#allocation17_spill] sm:$0xff]  ;;  %v16756_v37 = vld [vmem:[#allocation19_spill] sm:$0xff] }
 0x505   : > { %11086 = vmatmul.mubr.msk.bf16.gmra.mrb[56].mxu0 %vm3575_vm14, %v11677_v10  ;;  %v10538_v16 = vcombine.low %v8583_v57, %v8593_v8  ;;  %v8607_v2 = vsel %vm12056_vm15, %v8602_v11, %v8606_v43  ;;  %v8617_v51 = vsel %vm12056_vm15, %v8612_v44, %v8616_v28  ;;  %v8993_v35 = vrot.slane %v11762_v53, 5  ;;  %v16748_v10 = vld [vmem:[#allocation13_spill] sm:$0xff]  ;;  %v16754_v46 = vld [vmem:[#allocation18_spill] sm:$0xff]  ;;  %v16758_v20 = vld [vmem:[#allocation20_spill] sm:$0xff] }
 0x506   : > { %11089 = vmatprep.mubr.msk.bf16.mxu0 %vm3575_vm14, %v11678_v32  ;;  %v8997_v14 = vrot.slane %v11763_v23, 5  ;;  %v10539_v21 = vcombine.low %v8607_v2, %v8617_v51  ;;  %v8991_v17 = vsel %vm11969_vm10, %v10558_v29, %v8990_v56  ;;  %v10559_v3 = vrot.slane %v8925_v40, 9  ;;  %vm16763_vm15 = vmmov %vm16761_vm2 }
 0x507   : > { %v8994_v48 = vsel %vm11969_vm10, %v8992_v50, %v8993_v35  ;;  %v9000_v60 = vrot.slane %v15317_v38, 5  ;;  %v16735_v61 = vcombine.low %v15581_v18, %v15585_v15  ;;  %v16736_v55 = vcombine.low %v15600_v41, %v15606_v63  ;;  %v16744_v15 = vld [vmem:[#allocation7_spill] sm:$0xff] }
 0x508   : > { %v10578_v49 = vcombine.low %v8991_v17, %v8994_v48  ;;  %v8999_v52 = vrot.slane %v8997_v14, 4  ;;  %v8998_v43 = vsel %vm11969_vm10, %v10559_v3, %v8997_v14  ;;  %v16737_v38 = vcombine.low %v15610_v24, %v15618_v1  ;;  %v16747_v41 = vld [vmem:[#allocation11_spill] sm:$0xff]  ;;  %v16750_v1 = vld [vmem:[#allocation8_spill] sm:$0xff] }
 0x509   : > { %v16740_v42 = vcombine.low %v16738_v31, %v16739_v39  ;;  %v16743_v18 = vcombine.low %v16741_v34, %v16742_v7  ;;  %v16746_v63 = vcombine.low %v16744_v15, %v16745_v6  ;;  %v16749_v24 = vcombine.low %v16747_v41, %v16748_v10 }
 0x50a   : > { %11230 = vmatmul.mubr.msk.bf16.gmra.mrb[24].mxu1 %vm3575_vm14, %v10537_v45  ;;  %v9001_v36 = vsel %vm11969_vm10, %v8999_v52, %v9000_v60  ;;  %v16752_v33 = vcombine.low %v16750_v1, %v16751_v30  ;;  %v16755_v32 = vcombine.low %v16753_v62, %v16754_v46  ;;  %v16757_v54 = vcombine.low %v15729_v0, %v16756_v37  ;;  %vm16762_vm10 = vmmov %vm16761_vm2 }
 0x50b   : > { %11233 = vmatprep.mubr.msk.bf16.mxu1 %vm3575_vm14, %v10538_v16  ;;  %v10579_v25 = vcombine.low %v8998_v43, %v9001_v36  ;;  %v16759_v57 = vcombine.low %v15740_v9, %v16758_v20  ;;  %v16760_v0 = vcombine.low %v15789_v4, %v15834_v12 }
 0x50d   : > { %11090 = vmatmul.mubr.msk.bf16.gmra.mrb[60].mxu0 %vm3575_vm14, %v11679_v59 }
 0x512   : > { %11234 = vmatmul.mubr.msk.bf16.gmra.mrb[28].mxu1 %vm3575_vm14, %v10539_v21 }
 0x513   : > { %11241 = vmatprep.mubr.msk.bf16.mxu1 %vm3575_vm14, %v10578_v49 }
 0x51a   : > { %11242 = vmatmul.mubr.msk.bf16.vlgmr.msra.gmra.mrb[0].mxu1 %vm3575_vm14, %v10579_v25 }
 0x51b   : > { %11245 = vmatprep.mubr.msk.bf16.mxu1 %vm3575_vm14, %v16735_v61 }
 0x522   : > { %11246 = vmatmul.mubr.msk.bf16.gmra.mrb[4].mxu1 %vm3575_vm14, %v16736_v55 }
 0x523   : > { %11249 = vmatprep.mubr.msk.bf16.mxu1 %vm3575_vm14, %v16737_v38 }
 0x52a   : > { %11250 = vmatmul.mubr.msk.bf16.gmra.mrb[8].mxu1 %vm3575_vm14, %v16740_v42 }
 0x52b   : > { %11253 = vmatprep.mubr.msk.bf16.mxu1 %vm3575_vm14, %v16743_v18 }
 0x532   : > { %11254 = vmatmul.mubr.msk.bf16.gmra.mrb[12].mxu1 %vm3575_vm14, %v16746_v63 }
 0x533   : > { %11257 = vmatprep.mubr.msk.bf16.mxu1 %vm3575_vm14, %v16749_v24 }
 0x53a   : > { %11258 = vmatmul.mubr.msk.bf16.gmra.mrb[16].mxu1 %vm3575_vm14, %v16752_v33 }
 0x53b   : > { %11261 = vmatprep.mubr.msk.bf16.mxu1 %vm3575_vm14, %v16755_v32 }
 0x542   : > { %11262 = vmatmul.mubr.msk.bf16.gmra.mrb[20].mxu1 %vm3575_vm14, %v16757_v54 }
 0x543   : > { %11265 = vmatprep.mubr.msk.bf16.mxu1 %vm3575_vm14, %v16759_v57 }
 0x54a   : > { %11266 = vmatmul.mubr.msk.bf16.gmra.mrb[24].mxu1 %vm3575_vm14, %v10591_v13 }
 0x54b   : > { %11269 = vmatprep.mubr.msk.bf16.mxu1 %vm3575_vm14, %v10592_v58 }
 0x552   : > { %11270 = vmatmul.mubr.msk.bf16.gmra.mrb[28].mxu1 %vm3575_vm14, %v16760_v0 }
 0x5a8   : > { %v11063_v8 = vpop.f32.mrb[32].mxu0 }
 0x5a9   : > { %v6436_v19 = vpop.f32.mrb[33].mxu0 }
 0x5aa   : > { %v11064_v9 = vpop.f32.mrb[34].mxu0 }
 0x5ab   : > { %v6439_v56 = vpop.f32.mrb[35].mxu0 }
 0x5b0   : > { %v11067_v11 = vpop.f32.mrb[36].mxu0 }
 0x5b1   : > { %v6452_v44 = vpop.f32.mrb[37].mxu0 }
 0x5b2   : > { %v11068_v28 = vpop.f32.mrb[38].mxu0 }
 0x5b3   : > { %v6455_v26 = vpop.f32.mrb[39].mxu0 }
 0x5b8   : > { %v11071_v47 = vpop.f32.mrb[40].mxu0 }
 0x5b9   : > { %v6468_v13 = vpop.f32.mrb[41].mxu0 }
 0x5ba   : > { %v11072_v45 = vpop.f32.mrb[42].mxu0 }
 0x5bb   : > { %v6471_v16 = vpop.f32.mrb[43].mxu0 }
 0x5c0   : > { %v15993_v22 = vpop.f32.mrb[44].mxu0 }
 0x5c1   : > { %v15995_v5 = vpop.f32.mrb[45].mxu0 }
 0x5c2   : > { %v15997_v58 = vpop.f32.mrb[46].mxu0 }
 0x5c3   : > { %v15999_v4 = vpop.f32.mrb[47].mxu0 }
 0x5c8   : > { %v16001_v12 = vpop.f32.mrb[48].mxu0 }
 0x5c9   : > { %v16003_v27 = vpop.f32.mrb[49].mxu0 }
 0x5ca   : > { %v16005_v50 = vpop.f32.mrb[50].mxu0 }
 0x5cb   : > { %v16007_v59 = vpop.f32.mrb[51].mxu0 }
 0x5d0   : > { %v16009_v2 = vpop.f32.mrb[52].mxu0 }
 0x5d1   : > { %v16011_v51 = vpop.f32.mrb[53].mxu0 }
 0x5d2   : > { %v16013_v29 = vpop.f32.mrb[54].mxu0 }
 0x5d3   : > { %v16015_v53 = vpop.f32.mrb[55].mxu0 }
 0x5d8   : > { %v16017_v35 = vpop.f32.mrb[56].mxu0 }
 0x5d9   : > { %v16019_v23 = vpop.f32.mrb[57].mxu0 }
 0x5da   : > { %v16021_v14 = vpop.f32.mrb[58].mxu0 }
 0x5db   : > { %v16023_v21 = vpop.f32.mrb[59].mxu0 }
 0x5e0   : > { %v16025_v48 = vpop.f32.mrb[60].mxu0 }
 0x5e1   : > { %v16027_v17 = vpop.f32.mrb[61].mxu0 }
 0x5e2   : > { %v16029_v40 = vpop.f32.mrb[62].mxu0 }
 0x5e3   : > { %v16031_v49 = vpop.f32.mrb[63].mxu0 }
 0x5ed   : > { %v11243_v52 = vpop.f32.mrb[0].mxu1 }
 0x5ee   : > { %v16033_v3 = vadd.f32 %v11243_v52, %v11063_v8  ;;  %v9247_v60 = vpop.f32.mrb[1].mxu1 }
 0x5ef   : > { %v16035_v36 = vadd.f32 %v9247_v60, %v6436_v19  ;;  %v11244_v43 = vpop.f32.mrb[2].mxu1 }
 0x5f0   : > { %v16037_v25 = vadd.f32 %v11244_v43, %v11064_v9  ;;  %v9250_v61 = vpop.f32.mrb[3].mxu1  ;;  %v9409_v42 = vsel %vm3575_vm14, %v16033_v3, 0.0 }
 0x5f1   : > { %v16039_v55 = vadd.f32 %v9250_v61, %v6439_v56  ;;  %v9406_v38 = vsel %vm3575_vm14, %v16035_v36, 0.0 }
 0x5f2   : > { %v9411_v6 = vsel %vm3575_vm14, %v16037_v25, 0.0 }
 0x5f3   : > { %v9407_v31 = vsel %vm3575_vm14, %v16039_v55, 0.0 }
 0x5f4   : > { %v9408_v39 = vadd.f32 %v9407_v31, %v9406_v38 }
 0x5f5   : > { %v11247_v34 = vpop.f32.mrb[4].mxu1 }
 0x5f6   : > { %v9410_v7 = vadd.f32 %v9409_v42, %v9408_v39  ;;  %v16047_v18 = vadd.f32 %v11247_v34, %v11067_v11  ;;  %v9263_v15 = vpop.f32.mrb[5].mxu1 }
 0x5f7   : > { %v16051_v63 = vadd.f32 %v9263_v15, %v6452_v44  ;;  %v11248_v41 = vpop.f32.mrb[6].mxu1 }
 0x5f8   : > { %v9412_v10 = vadd.f32 %v9411_v6, %v9410_v7  ;;  %v16053_v24 = vadd.f32 %v11248_v41, %v11068_v28  ;;  %v9266_v1 = vpop.f32.mrb[7].mxu1  ;;  %v9417_v37 = vsel %vm3575_vm14, %v16047_v18, 0.0 }
 0x5f9   : > { %v9413_v30 = vsel %vm3575_vm14, %v16051_v63, 0.0  ;;  %v16057_v33 = vadd.f32 %v9266_v1, %v6455_v26 }
 0x5fa   : > { %v9414_v62 = vadd.f32 %v9413_v30, %v9412_v10  ;;  %v9419_v8 = vsel %vm3575_vm14, %v16053_v24, 0.0 }
 0x5fb   : > { %v9415_v46 = vsel %vm3575_vm14, %v16057_v33, 0.0 }
 0x5fc   : > { %v9416_v32 = vadd.f32 %v9415_v46, %v9414_v62 }
 0x5fd   : > { %v11251_v54 = vpop.f32.mrb[8].mxu1 }
 0x5fe   : > { %v9418_v20 = vadd.f32 %v9417_v37, %v9416_v32  ;;  %v16063_v57 = vadd.f32 %v11251_v54, %v11071_v47  ;;  %v9279_v0 = vpop.f32.mrb[9].mxu1 }
 0x5ff   : > { %v16067_v19 = vadd.f32 %v9279_v0, %v6468_v13  ;;  %v11252_v9 = vpop.f32.mrb[10].mxu1 }
 0x600   : > { %v9420_v56 = vadd.f32 %v9419_v8, %v9418_v20  ;;  %v16069_v11 = vadd.f32 %v11252_v9, %v11072_v45  ;;  %v9282_v44 = vpop.f32.mrb[11].mxu1  ;;  %v9425_v43 = vsel %vm3575_vm14, %v16063_v57, 0.0 }
 0x601   : > { %v9421_v28 = vsel %vm3575_vm14, %v16067_v19, 0.0  ;;  %v16073_v26 = vadd.f32 %v9282_v44, %v6471_v16 }
 0x602   : > { %v9422_v52 = vadd.f32 %v9421_v28, %v9420_v56  ;;  %v9427_v31 = vsel %vm3575_vm14, %v16069_v11, 0.0 }
 0x603   : > { %v9423_v47 = vsel %vm3575_vm14, %v16073_v26, 0.0 }
 0x604   : > { %v9424_v60 = vadd.f32 %v9423_v47, %v9422_v52 }
 0x605   : > { %v11255_v13 = vpop.f32.mrb[12].mxu1 }
 0x606   : > { %v9426_v61 = vadd.f32 %v9425_v43, %v9424_v60  ;;  %v16080_v38 = vadd.f32 %v11255_v13, %v15993_v22  ;;  %v9295_v45 = vpop.f32.mrb[13].mxu1 }
 0x607   : > { %v16085_v16 = vadd.f32 %v9295_v45, %v15995_v5  ;;  %v11256_v39 = vpop.f32.mrb[14].mxu1 }
 0x608   : > { %v9428_v42 = vadd.f32 %v9427_v31, %v9426_v61  ;;  %v16088_v34 = vadd.f32 %v11256_v39, %v15997_v58  ;;  %v9298_v7 = vpop.f32.mrb[15].mxu1  ;;  %v9433_v5 = vsel %vm3575_vm14, %v16080_v38, 0.0 }
 0x609   : > { %v9429_v15 = vsel %vm3575_vm14, %v16085_v16, 0.0  ;;  %v16093_v6 = vadd.f32 %v9298_v7, %v15999_v4 }
 0x60a   : > { %v9430_v22 = vadd.f32 %v9429_v15, %v9428_v42  ;;  %v9435_v46 = vsel %vm3575_vm14, %v16088_v34, 0.0 }
 0x60b   : > { %v9431_v41 = vsel %vm3575_vm14, %v16093_v6, 0.0 }
 0x60c   : > { %v9432_v10 = vadd.f32 %v9431_v41, %v9430_v22 }
 0x60d   : > { %v11259_v1 = vpop.f32.mrb[16].mxu1 }
 0x60e   : > { %v9434_v30 = vadd.f32 %v9433_v5, %v9432_v10  ;;  %v16100_v58 = vadd.f32 %v11259_v1, %v16001_v12  ;;  %v9311_v62 = vpop.f32.mrb[17].mxu1 }
 0x60f   : > { %v16105_v4 = vadd.f32 %v9311_v62, %v16003_v27  ;;  %v11260_v32 = vpop.f32.mrb[18].mxu1 }
 0x610   : > { %v9436_v37 = vadd.f32 %v9435_v46, %v9434_v30  ;;  %v16108_v54 = vadd.f32 %v11260_v32, %v16005_v50  ;;  %v9314_v20 = vpop.f32.mrb[19].mxu1  ;;  %v9441_v27 = vsel %vm3575_vm14, %v16100_v58, 0.0 }
 0x611   : > { %v9437_v0 = vsel %vm3575_vm14, %v16105_v4, 0.0  ;;  %v16113_v8 = vadd.f32 %v9314_v20, %v16007_v59 }
 0x612   : > { %v9438_v12 = vadd.f32 %v9437_v0, %v9436_v37  ;;  %v9443_v47 = vsel %vm3575_vm14, %v16108_v54, 0.0 }
 0x613   : > { %v9439_v9 = vsel %vm3575_vm14, %v16113_v8, 0.0 }
 0x614   : > { %v9440_v56 = vadd.f32 %v9439_v9, %v9438_v12 }
 0x615   : > { %v11263_v44 = vpop.f32.mrb[20].mxu1 }
 0x616   : > { %v9442_v28 = vadd.f32 %v9441_v27, %v9440_v56  ;;  %v16120_v50 = vadd.f32 %v11263_v44, %v16009_v2  ;;  %v9327_v52 = vpop.f32.mrb[21].mxu1 }
 0x617   : > { %v16125_v59 = vadd.f32 %v9327_v52, %v16011_v51  ;;  %v11264_v60 = vpop.f32.mrb[22].mxu1 }
 0x618   : > { %v9444_v43 = vadd.f32 %v9443_v47, %v9442_v28  ;;  %v16128_v13 = vadd.f32 %v11264_v60, %v16013_v29  ;;  %v9330_v61 = vpop.f32.mrb[23].mxu1  ;;  %v9449_v7 = vsel %vm3575_vm14, %v16120_v50, 0.0 }
 0x619   : > { %v9445_v45 = vsel %vm3575_vm14, %v16125_v59, 0.0  ;;  %v11296_v31 = vadd.f32 %v9330_v61, %v16015_v53 }
 0x61a   : > { %v9446_v2 = vadd.f32 %v9445_v45, %v9444_v43  ;;  %v9451_v29 = vsel %vm3575_vm14, %v16128_v13, 0.0 }
 0x61b   : > { %v9447_v39 = vsel %vm3575_vm14, %v11296_v31, 0.0 }
 0x61c   : > { %v9448_v42 = vadd.f32 %v9447_v39, %v9446_v2 }
 0x61d   : > { %v11267_v51 = vpop.f32.mrb[24].mxu1 }
 0x61e   : > { %v9450_v15 = vadd.f32 %v9449_v7, %v9448_v42  ;;  %v11297_v22 = vadd.f32 %v11267_v51, %v16017_v35  ;;  %v9343_v41 = vpop.f32.mrb[25].mxu1 }
 0x61f   : > { %v11298_v10 = vadd.f32 %v9343_v41, %v16019_v23  ;;  %v11268_v5 = vpop.f32.mrb[26].mxu1 }
 0x620   : > { %v9452_v1 = vadd.f32 %v9451_v29, %v9450_v15  ;;  %v11299_v53 = vadd.f32 %v11268_v5, %v16021_v14  ;;  %v9346_v30 = vpop.f32.mrb[27].mxu1  ;;  %v9457_v35 = vsel %vm3575_vm14, %v11297_v22, 0.0 }
 0x621   : > { %v9453_v62 = vsel %vm3575_vm14, %v11298_v10, 0.0  ;;  %v11300_v46 = vadd.f32 %v9346_v30, %v16023_v21 }
 0x622   : > { %v9454_v32 = vadd.f32 %v9453_v62, %v9452_v1  ;;  %v9459_v56 = vsel %vm3575_vm14, %v11299_v53, 0.0 }
 0x623   : > { %v9455_v37 = vsel %vm3575_vm14, %v11300_v46, 0.0 }
 0x624   : > { %v9456_v20 = vadd.f32 %v9455_v37, %v9454_v32 }
 0x625   : > { %v11271_v0 = vpop.f32.mrb[28].mxu1 }
 0x626   : > { %v9458_v12 = vadd.f32 %v9457_v35, %v9456_v20  ;;  %v11301_v9 = vadd.f32 %v11271_v0, %v16025_v48  ;;  %v9359_v23 = vpop.f32.mrb[29].mxu1 }
 0x627   : > { %v11302_v14 = vadd.f32 %v9359_v23, %v16027_v17  ;;  %v11272_v27 = vpop.f32.mrb[30].mxu1 }
 0x628   : > { %v9460_v44 = vadd.f32 %v9459_v56, %v9458_v12  ;;  %v11303_v28 = vadd.f32 %v11272_v27, %v16029_v40  ;;  %v9362_v21 = vpop.f32.mrb[31].mxu1  ;;  %v9465_v48 = vsel %vm3575_vm14, %v11301_v9, 0.0 }
 0x629   : > { %v9461_v52 = vsel %vm3575_vm14, %v11302_v14, 0.0  ;;  %v11304_v47 = vadd.f32 %v9362_v21, %v16031_v49 }
 0x62a   : > { %v9462_v60 = vadd.f32 %v9461_v52, %v9460_v44  ;;  %v9467_v2 = vsel %vm3575_vm14, %v11303_v28, 0.0 }
 0x62b   : > { %v9463_v43 = vsel %vm3575_vm14, %v11304_v47, 0.0 }
 0x62c   : > { %v9464_v61 = vadd.f32 %v9463_v43, %v9462_v60 }
 0x62e   : > { %v9466_v45 = vadd.f32 %v9465_v48, %v9464_v61 }
 0x630   : > { %v9468_v39 = vadd.f32 %v9467_v2, %v9466_v45 }
 0x632   : > { %v9469_v17 = vrot.slane %v9468_v39, 4 }
 0x634   : > { %v9470_v42 = vadd.f32 %v9469_v17, %v9468_v39 }
 0x636   : > { %v9471_v7 = vrot.slane %v9470_v42, 2 }
 0x638   : > { %v9472_v51 = vadd.f32 %v9471_v7, %v9470_v42 }
 0x63a   : > { %v9473_v40 = vrot.slane %v9472_v51, 1 }
 0x63c   : > { %v9474_v15 = vadd.f32 %v9473_v40, %v9472_v51 }
 0x63e   : > { %v9475_v41 = vmul.f32 0.00390625, %v9474_v15 }
 0x640   : > { %v16155_v29 = vsub.f32 %v16073_v26, %v9475_v41  ;;  %v16158_v49 = vsub.f32 %v16069_v11, %v9475_v41  ;;  %v16161_v5 = vsub.f32 %v16085_v16, %v9475_v41  ;;  %v16164_v1 = vsub.f32 %v16093_v6, %v9475_v41 }
 0x641   : > { %v16167_v30 = vsub.f32 %v16080_v38, %v9475_v41  ;;  %v16170_v62 = vsub.f32 %v16088_v34, %v9475_v41  ;;  %v16173_v32 = vsub.f32 %v16105_v4, %v9475_v41  ;;  %v16176_v26 = vsub.f32 %v16113_v8, %v9475_v41 }
 0x642   : > { %v16179_v11 = vsub.f32 %v16100_v58, %v9475_v41  ;;  %v16182_v16 = vsub.f32 %v16108_v54, %v9475_v41  ;;  %v16185_v6 = vsub.f32 %v16125_v59, %v9475_v41  ;;  %v16187_v38 = vsub.f32 %v11296_v31, %v9475_v41 }
 0x643   : > { %v16190_v34 = vsub.f32 %v16120_v50, %v9475_v41  ;;  %v16193_v4 = vsub.f32 %v16128_v13, %v9475_v41  ;;  %v16195_v37 = vsub.f32 %v11298_v10, %v9475_v41  ;;  %v16197_v8 = vsub.f32 %v11300_v46, %v9475_v41 }
 0x644   : > { %v16199_v58 = vsub.f32 %v11297_v22, %v9475_v41  ;;  %v16201_v20 = vsub.f32 %v11299_v53, %v9475_v41  ;;  %v16203_v54 = vsub.f32 %v11302_v14, %v9475_v41  ;;  %v16205_v59 = vsub.f32 %v11304_v47, %v9475_v41 }
 0x645   : > { %v16207_v31 = vsub.f32 %v11301_v9, %v9475_v41  ;;  %v16209_v35 = vsub.f32 %v11303_v28, %v9475_v41  ;;  %v16212_v50 = vsub.f32 %v16035_v36, %v9475_v41  ;;  %v16215_v13 = vsub.f32 %v16039_v55, %v9475_v41 }
 0x646   : > { %v16218_v10 = vsub.f32 %v16033_v3, %v9475_v41  ;;  %v16221_v22 = vsub.f32 %v16037_v25, %v9475_v41  ;;  %v16228_v0 = vsub.f32 %v16051_v63, %v9475_v41  ;;  %v16233_v55 = vsub.f32 %v16057_v33, %v9475_v41 }
 0x647   : > { %v9508_v53 = vmul.f32 %v16212_v50, %v16212_v50  ;;  %v9509_v46 = vmul.f32 %v16215_v13, %v16215_v13  ;;  %v16240_v23 = vsub.f32 %v16047_v18, %v9475_v41  ;;  %v16246_v33 = vsub.f32 %v16053_v24, %v9475_v41 }
 0x648   : > { %v9510_v36 = vmul.f32 %v16218_v10, %v16218_v10  ;;  %v9511_v3 = vmul.f32 %v16221_v22, %v16221_v22  ;;  %v9512_v63 = vmul.f32 %v16228_v0, %v16228_v0  ;;  %v9513_v27 = vmul.f32 %v16233_v55, %v16233_v55 }
 0x649   : > { %v9540_v25 = vsel %vm3575_vm14, %v9508_v53, 0.0  ;;  %v9541_v12 = vsel %vm3575_vm14, %v9509_v46, 0.0  ;;  %v16252_v21 = vsub.f32 %v16067_v19, %v9475_v41  ;;  %v9514_v18 = vmul.f32 %v16240_v23, %v16240_v23 }
 0x64a   : > { %v9542_v9 = vadd.f32 %v9541_v12, %v9540_v25  ;;  %v9543_v56 = vsel %vm3575_vm14, %v9510_v36, 0.0  ;;  %v9545_v44 = vsel %vm3575_vm14, %v9511_v3, 0.0  ;;  %v9547_v52 = vsel %vm3575_vm14, %v9512_v63, 0.0 }
 0x64b   : > { %v9515_v60 = vmul.f32 %v16246_v33, %v16246_v33  ;;  %v9549_v24 = vsel %vm3575_vm14, %v9513_v27, 0.0  ;;  %v16261_v61 = vsub.f32 %v16063_v57, %v9475_v41  ;;  %v9516_v48 = vmul.f32 %v16252_v21, %v16252_v21 }
 0x64c   : > { %v9544_v14 = vadd.f32 %v9543_v56, %v9542_v9  ;;  %v9551_v19 = vsel %vm3575_vm14, %v9514_v18, 0.0  ;;  %v9517_v2 = vmul.f32 %v16155_v29, %v16155_v29  ;;  %v9519_v57 = vmul.f32 %v16158_v49, %v16158_v49 }
 0x64d   : > { %v9553_v39 = vsel %vm3575_vm14, %v9515_v60, 0.0  ;;  %v9518_v42 = vmul.f32 %v16261_v61, %v16261_v61  ;;  %v9555_v7 = vsel %vm3575_vm14, %v9516_v48, 0.0  ;;  %v9520_v41 = vmul.f32 %v16161_v5, %v16161_v5 }
 0x64e   : > { %v9546_v28 = vadd.f32 %v9545_v44, %v9544_v14  ;;  %v9557_v40 = vsel %vm3575_vm14, %v9517_v2, 0.0  ;;  %v9521_v36 = vmul.f32 %v16164_v1, %v16164_v1  ;;  %v9561_v3 = vsel %vm3575_vm14, %v9519_v57, 0.0 }
 0x64f   : > { %v9559_v53 = vsel %vm3575_vm14, %v9518_v42, 0.0  ;;  %v9522_v12 = vmul.f32 %v16167_v30, %v16167_v30  ;;  %v9563_v9 = vsel %vm3575_vm14, %v9520_v41, 0.0  ;;  %v9523_v56 = vmul.f32 %v16170_v62, %v16170_v62 }
 0x650   : > { %v9548_v47 = vadd.f32 %v9547_v52, %v9546_v28  ;;  %v9565_v14 = vsel %vm3575_vm14, %v9521_v36, 0.0  ;;  %v9524_v44 = vmul.f32 %v16173_v32, %v16173_v32  ;;  %v9525_v52 = vmul.f32 %v16176_v26, %v16176_v26 }
 0x651   : > { %v9567_v28 = vsel %vm3575_vm14, %v9522_v12, 0.0 }
 0x652   : > { %v9550_v43 = vadd.f32 %v9549_v24, %v9548_v47  ;;  %v9569_v47 = vsel %vm3575_vm14, %v9523_v56, 0.0  ;;  %v9526_v24 = vmul.f32 %v16179_v11, %v16179_v11 }
 0x654   : > { %v9552_v45 = vadd.f32 %v9551_v19, %v9550_v43  ;;  %v9571_v43 = vsel %vm3575_vm14, %v9524_v44, 0.0  ;;  %v9527_v19 = vmul.f32 %v16182_v16, %v16182_v16 }
 0x656   : > { %v9554_v17 = vadd.f32 %v9553_v39, %v9552_v45  ;;  %v9573_v45 = vsel %vm3575_vm14, %v9525_v52, 0.0  ;;  %v9528_v39 = vmul.f32 %v16185_v6, %v16185_v6 }
 0x658   : > { %v9556_v51 = vadd.f32 %v9555_v7, %v9554_v17  ;;  %v9575_v17 = vsel %vm3575_vm14, %v9526_v24, 0.0  ;;  %v9529_v7 = vmul.f32 %v16187_v38, %v16187_v38 }
 0x65a   : > { %v9558_v15 = vadd.f32 %v9557_v40, %v9556_v51  ;;  %v9577_v51 = vsel %vm3575_vm14, %v9527_v19, 0.0  ;;  %v9530_v40 = vmul.f32 %v16190_v34, %v16190_v34 }
 0x65c   : > { %v9560_v46 = vadd.f32 %v9559_v53, %v9558_v15  ;;  %v9579_v15 = vsel %vm3575_vm14, %v9528_v39, 0.0  ;;  %v9531_v53 = vmul.f32 %v16193_v4, %v16193_v4 }
 0x65e   : > { %v9562_v25 = vadd.f32 %v9561_v3, %v9560_v46  ;;  %v9581_v46 = vsel %vm3575_vm14, %v9529_v7, 0.0  ;;  %v9532_v3 = vmul.f32 %v16195_v37, %v16195_v37 }
 0x660   : > { %v9564_v63 = vadd.f32 %v9563_v9, %v9562_v25  ;;  %v9583_v25 = vsel %vm3575_vm14, %v9530_v40, 0.0  ;;  %v9533_v9 = vmul.f32 %v16197_v8, %v16197_v8 }
 0x662   : > { %v9566_v27 = vadd.f32 %v9565_v14, %v9564_v63  ;;  %v9585_v63 = vsel %vm3575_vm14, %v9531_v53, 0.0  ;;  %v9534_v14 = vmul.f32 %v16199_v58, %v16199_v58 }
 0x664   : > { %v9568_v18 = vadd.f32 %v9567_v28, %v9566_v27  ;;  %v9587_v27 = vsel %vm3575_vm14, %v9532_v3, 0.0  ;;  %v9535_v28 = vmul.f32 %v16201_v20, %v16201_v20 }
 0x666   : > { %v9570_v60 = vadd.f32 %v9569_v47, %v9568_v18  ;;  %v9589_v18 = vsel %vm3575_vm14, %v9533_v9, 0.0  ;;  %v9536_v47 = vmul.f32 %v16203_v54, %v16203_v54 }
 0x668   : > { %v9572_v48 = vadd.f32 %v9571_v43, %v9570_v60  ;;  %v9591_v60 = vsel %vm3575_vm14, %v9534_v14, 0.0  ;;  %v9537_v43 = vmul.f32 %v16205_v59, %v16205_v59 }
 0x66a   : > { %v9574_v2 = vadd.f32 %v9573_v45, %v9572_v48  ;;  %v9593_v48 = vsel %vm3575_vm14, %v9535_v28, 0.0  ;;  %v9538_v45 = vmul.f32 %v16207_v31, %v16207_v31 }
 0x66c   : > { %v9576_v42 = vadd.f32 %v9575_v17, %v9574_v2  ;;  %v9595_v2 = vsel %vm3575_vm14, %v9536_v47, 0.0  ;;  %v9539_v17 = vmul.f32 %v16209_v35, %v16209_v35 }
 0x66e   : > { %v9578_v57 = vadd.f32 %v9577_v51, %v9576_v42  ;;  %v9597_v42 = vsel %vm3575_vm14, %v9537_v43, 0.0  ;;  %v9599_v51 = vsel %vm3575_vm14, %v9538_v45, 0.0  ;;  %v9601_v40 = vsel %vm3575_vm14, %v9539_v17, 0.0  ;;  %v10716_v43 = vld [vmem:[%s11950_s28 + $0x10] sm:$0xff]   ;;  %vm16764_vm14 = vmmov %vm16761_vm2 }
 0x66f   : > { %v10661_v17 = vunpack.c.l.bf16 %v10716_v43 }
 0x670   : > { %v9580_v41 = vadd.f32 %v9579_v15, %v9578_v57 }
 0x672   : > { %v9582_v36 = vadd.f32 %v9581_v46, %v9580_v41 }
 0x674   : > { %v9584_v12 = vadd.f32 %v9583_v25, %v9582_v36 }
 0x676   : > { %v9586_v56 = vadd.f32 %v9585_v63, %v9584_v12 }
 0x678   : > { %v9588_v44 = vadd.f32 %v9587_v27, %v9586_v56 }
 0x67a   : > { %v9590_v52 = vadd.f32 %v9589_v18, %v9588_v44 }
 0x67c   : > { %v9592_v24 = vadd.f32 %v9591_v60, %v9590_v52 }
 0x67e   : > { %v9594_v19 = vadd.f32 %v9593_v48, %v9592_v24 }
 0x680   : > { %v9596_v39 = vadd.f32 %v9595_v2, %v9594_v19  ;;  %v10662_v2 = vunpack.c.h.bf16 %v10716_v43 }
 0x682   : > { %v9598_v7 = vadd.f32 %v9597_v42, %v9596_v39  ;;  %v10717_v42 = vld [vmem:[%s11950_s28 + $0x18] sm:$0xff]  }
 0x684   : > { %v9600_v57 = vadd.f32 %v9599_v51, %v9598_v7 }
 0x686   : > { %v9602_v15 = vadd.f32 %v9601_v40, %v9600_v57  ;;  %v10666_v40 = vunpack.c.h.bf16 %v10717_v42 }
 0x688   : > { %v9603_v41 = vrot.slane %v9602_v15, 4 }
 0x68a   : > { %v9604_v53 = vadd.f32 %v9603_v41, %v9602_v15  ;;  %v10665_v41 = vunpack.c.l.bf16 %v10717_v42 }
 0x68c   : > { %v9605_v46 = vrot.slane %v9604_v53, 2 }
 0x68e   : > { %v9606_v36 = vadd.f32 %v9605_v46, %v9604_v53  ;;  %v10718_v53 = vld [vmem:[%s11950_s28 + $0x20] sm:$0xff]  }
 0x690   : > { %v9607_v3 = vrot.slane %v9606_v36, 1 }
 0x692   : > { %v9608_v25 = vadd.f32 %v9607_v3, %v9606_v36 }
 0x694   : > { %v9609_v12 = vmul.f32 0.00390625, %v9608_v25  ;;  %v10670_v25 = vunpack.c.h.bf16 %v10718_v53 }
 0x696   : > { %v9610_v9 = vadd.f32 1e-05, %v9609_v12 }
 0x698   : > { %11682 = vrsqrt.f32 %v9610_v9  ;;  %v10669_v9 = vunpack.c.l.bf16 %v10718_v53 }
 0x6a2   : > { %v11683_v63 = vpop.eup %11682 }
 0x6a3   : > { %v9612_v56 = vmul.f32 %v11683_v63, %v16212_v50  ;;  %v9613_v14 = vmul.f32 %v11683_v63, %v16215_v13  ;;  %v9615_v27 = vmul.f32 %v11683_v63, %v16221_v22  ;;  %v9614_v44 = vmul.f32 %v11683_v63, %v16218_v10 }
 0x6a4   : > { %v9617_v28 = vmul.f32 %v11683_v63, %v16233_v55  ;;  %v9616_v18 = vmul.f32 %v11683_v63, %v16228_v0  ;;  %v9619_v50 = vmul.f32 %v11683_v63, %v16246_v33  ;;  %v9618_v13 = vmul.f32 %v11683_v63, %v16240_v23 }
 0x6a5   : > { %9742 = vrot.lane.b32.xlu1 %v9613_v14, %s11832_s5  ;;  %9740 = vrot.lane.b32.xlu0 %v9612_v56, %s11832_s5  ;;  %v9621_v10 = vmul.f32 %v11683_v63, %v16155_v29  ;;  %v9620_v22 = vmul.f32 %v11683_v63, %v16252_v21  ;;  %v9623_v0 = vmul.f32 %v11683_v63, %v16158_v49 }
 0x6a6   : > { %v9622_v55 = vmul.f32 %v11683_v63, %v16261_v61  ;;  %v9625_v23 = vmul.f32 %v11683_v63, %v16164_v1  ;;  %v9624_v33 = vmul.f32 %v11683_v63, %v16161_v5  ;;  %v9627_v29 = vmul.f32 %v11683_v63, %v16170_v62 }
 0x6a7   : > { %v9626_v21 = vmul.f32 %v11683_v63, %v16167_v30  ;;  %v9629_v49 = vmul.f32 %v11683_v63, %v16176_v26  ;;  %v9628_v61 = vmul.f32 %v11683_v63, %v16173_v32  ;;  %v9631_v5 = vmul.f32 %v11683_v63, %v16182_v16 }
 0x6a8   : > { %v9630_v1 = vmul.f32 %v11683_v63, %v16179_v11  ;;  %v9633_v30 = vmul.f32 %v11683_v63, %v16187_v38  ;;  %v9632_v62 = vmul.f32 %v11683_v63, %v16185_v6  ;;  %v9635_v32 = vmul.f32 %v11683_v63, %v16193_v4 }
 0x6a9   : > { %9746 = vrot.lane.b32.xlu1 %v9615_v27, %s11832_s5  ;;  %9744 = vrot.lane.b32.xlu0 %v9614_v44, %s11832_s5  ;;  %v9634_v26 = vmul.f32 %v11683_v63, %v16190_v34  ;;  %v9637_v11 = vmul.f32 %v11683_v63, %v16197_v8  ;;  %v9636_v16 = vmul.f32 %v11683_v63, %v16195_v37 }
 0x6aa   : > { %v9639_v6 = vmul.f32 %v11683_v63, %v16201_v20  ;;  %v9638_v38 = vmul.f32 %v11683_v63, %v16199_v58  ;;  %v9641_v34 = vmul.f32 %v11683_v63, %v16205_v59  ;;  %v9640_v4 = vmul.f32 %v11683_v63, %v16203_v54  ;;  %v10652_v58 = vld [vmem:[%s11950_s28] sm:$0xff]   ;;  %v10715_v54 = vld [vmem:[%s11950_s28 + $0x8] sm:$0xff]  }
 0x6ab   : > { %v9643_v37 = vmul.f32 %v11683_v63, %v16209_v35  ;;  %v9642_v8 = vmul.f32 %v11683_v63, %v16207_v31  ;;  %v10654_v20 = vunpack.c.h.bf16 %v10652_v58  ;;  %v10653_v59 = vunpack.c.l.bf16 %v10652_v58  ;;  %v10719_v63 = vld [vmem:[%s11950_s28 + $0x28] sm:$0xff]  }
 0x6ac   : > { %v10658_v35 = vunpack.c.h.bf16 %v10715_v54  ;;  %v10657_v24 = vunpack.c.l.bf16 %v10715_v54  ;;  %v10674_v44 = vunpack.c.h.bf16 %v10719_v63 }
 0x6ad   : > { %9750 = vrot.lane.b32.xlu1 %v9617_v28, %s11832_s5  ;;  %9748 = vrot.lane.b32.xlu0 %v9616_v18, %s11832_s5  ;;  %v10673_v18 = vunpack.c.l.bf16 %v10719_v63 }
 0x6b1   : > { %9754 = vrot.lane.b32.xlu1 %v9619_v50, %s11832_s5  ;;  %9752 = vrot.lane.b32.xlu0 %v9618_v13, %s11832_s5  ;;  %v10720_v50 = vld [vmem:[%s11950_s28 + $0x30] sm:$0xff]  }
 0x6b5   : > { %9758 = vrot.lane.b32.xlu1 %v9621_v10, %s11832_s5  ;;  %9756 = vrot.lane.b32.xlu0 %v9620_v22, %s11832_s5 }
 0x6b9   : > { %9762 = vrot.lane.b32.xlu1 %v9623_v0, %s11832_s5  ;;  %9760 = vrot.lane.b32.xlu0 %v9622_v55, %s11832_s5  ;;  %v10678_v0 = vunpack.c.h.bf16 %v10720_v50 }
 0x6bd   : > { %9766 = vrot.lane.b32.xlu1 %v9625_v23, %s11832_s5  ;;  %9764 = vrot.lane.b32.xlu0 %v9624_v33, %s11832_s5  ;;  %v10677_v23 = vunpack.c.l.bf16 %v10720_v50  ;;  %v10721_v33 = vld [vmem:[%s11950_s28 + $0x38] sm:$0xff]  }
 0x6c1   : > { %9770 = vrot.lane.b32.xlu1 %v9627_v29, %s11832_s5  ;;  %9768 = vrot.lane.b32.xlu0 %v9626_v21, %s11832_s5 }
 0x6c5   : > { %9774 = vrot.lane.b32.xlu1 %v9629_v49, %s11832_s5  ;;  %9772 = vrot.lane.b32.xlu0 %v9628_v61, %s11832_s5  ;;  %v10682_v61 = vunpack.c.h.bf16 %v10721_v33 }
 0x6c9   : > { %9778 = vrot.lane.b32.xlu1 %v9631_v5, %s11832_s5  ;;  %9776 = vrot.lane.b32.xlu0 %v9630_v1, %s11832_s5  ;;  %v10681_v1 = vunpack.c.l.bf16 %v10721_v33 }
 0x6cd   : > { %9782 = vrot.lane.b32.xlu1 %v9633_v30, %s11832_s5  ;;  %9780 = vrot.lane.b32.xlu0 %v9632_v62, %s11832_s5  ;;  %v10722_v30 = vld [vmem:[%s11950_s28 + $0x40] sm:$0xff]  }
 0x6d1   : > { %9786 = vrot.lane.b32.xlu1 %v9635_v32, %s11832_s5  ;;  %9784 = vrot.lane.b32.xlu0 %v9634_v26, %s11832_s5 }
 0x6d5   : > { %9790 = vrot.lane.b32.xlu1 %v9637_v11, %s11832_s5  ;;  %9788 = vrot.lane.b32.xlu0 %v9636_v16, %s11832_s5  ;;  %v10686_v11 = vunpack.c.h.bf16 %v10722_v30 }
 0x6d9   : > { %9794 = vrot.lane.b32.xlu1 %v9639_v6, %s11832_s5  ;;  %9792 = vrot.lane.b32.xlu0 %v9638_v38, %s11832_s5  ;;  %v10685_v6 = vunpack.c.l.bf16 %v10722_v30  ;;  %v10723_v38 = vld [vmem:[%s11950_s28 + $0x48] sm:$0xff]  }
 0x6dd   : > { %9798 = vrot.lane.b32.xlu1 %v9641_v34, %s11832_s5  ;;  %9796 = vrot.lane.b32.xlu0 %v9640_v4, %s11832_s5 }
 0x6e1   : > { %9802 = vrot.lane.b32.xlu1 %v9643_v37, %s11832_s5  ;;  %9800 = vrot.lane.b32.xlu0 %v9642_v8, %s11832_s5  ;;  %v10690_v8 = vunpack.c.h.bf16 %v10723_v38  ;;  %s10650_s5 = sshll.u32 %s11880_s16, 12  ;;  %s16529_s16 = scalar_lea.sflag [#allocation5], %s161_s11 }
 0x6e2   : > { %s16517_s25 = scalar_lea.hbm %s16574_s3, %s10650_s5 }
 0x717   : > { %v9743_v52 = vpop.permute.xlu1 %9742  ;;  %v9741_v60 = vpop.permute.xlu0 %9740 }
 0x718   : > { %v9837_v47 = vsel %vm3328_vm1, %v10654_v20, %v9743_v52  ;;  %v9836_v31 = vsel %vm3328_vm1, %v10653_v59, %v9741_v60  ;;  %v10689_v20 = vunpack.c.l.bf16 %v10723_v38  ;;  %v10724_v59 = vld [vmem:[%s11950_s28 + $0x50] sm:$0xff]  }
 0x719   : > { %9869 = vst.msk [vmem:[%s16407_s19 + $0x8] sm:$0xff] %vm16761_vm2, %v9837_v47  ;;  %vm16776_vm2 = vmmov %vm16772_vm0  ;;  %v10694_v60 = vunpack.c.h.bf16 %v10724_v59 }
 0x71a   : > { %9868 = vst.msk [vmem:[%s16407_s19] sm:$0xff] %vm16762_vm10, %v9836_v31  ;;  %vm16777_vm10 = vmmov %vm16772_vm0  ;;  %v10693_v31 = vunpack.c.l.bf16 %v10724_v59 }
 0x71b   : > { %v9747_v48 = vpop.permute.xlu1 %9746  ;;  %v9745_v45 = vpop.permute.xlu0 %9744 }
 0x71c   : > { %v9839_v19 = vsel %vm3328_vm1, %v10658_v35, %v9747_v48  ;;  %v9838_v39 = vsel %vm3328_vm1, %v10657_v24, %v9745_v45  ;;  %v10725_v24 = vld [vmem:[%s11950_s28 + $0x58] sm:$0xff]  }
 0x71d   : > { %9871 = vst.msk [vmem:[%s16407_s19 + $0x18] sm:$0xff] %vm16763_vm15, %v9839_v19  ;;  %vm16778_vm15 = vmmov %vm16772_vm0  ;;  %v10698_v45 = vunpack.c.h.bf16 %v10725_v24 }
 0x71e   : > { %9870 = vst.msk [vmem:[%s16407_s19 + $0x10] sm:$0xff] %vm16764_vm14, %v9838_v39  ;;  %vm16779_vm14 = vmmov %vm16772_vm0  ;;  %v10697_v39 = vunpack.c.l.bf16 %v10725_v24 }
 0x71f   : > { %v9751_v7 = vpop.permute.xlu1 %9750  ;;  %v9749_v57 = vpop.permute.xlu0 %9748 }
 0x720   : > { %v9841_v51 = vsel %vm3328_vm1, %v10662_v2, %v9751_v7  ;;  %v9840_v15 = vsel %vm3328_vm1, %v10661_v17, %v9749_v57  ;;  %v10726_v17 = vld [vmem:[%s11950_s28 + $0x60] sm:$0xff]  }
 0x721   : > { %9873 = vst.msk [vmem:[%s16407_s19 + $0x28] sm:$0xff] %vm16765_vm6, %v9841_v51  ;;  %vm16780_vm6 = vmmov %vm16772_vm0  ;;  %v10702_v57 = vunpack.c.h.bf16 %v10726_v17 }
 0x722   : > { %9872 = vst.msk [vmem:[%s16407_s19 + $0x20] sm:$0xff] %vm16766_vm4, %v9840_v15  ;;  %vm16781_vm4 = vmmov %vm16772_vm0  ;;  %v10701_v15 = vunpack.c.l.bf16 %v10726_v17 }
 0x723   : > { %v9755_v46 = vpop.permute.xlu1 %9754  ;;  %v9753_v3 = vpop.permute.xlu0 %9752 }
 0x724   : > { %v9843_v36 = vsel %vm3328_vm1, %v10666_v40, %v9755_v46  ;;  %v9842_v12 = vsel %vm3328_vm1, %v10665_v41, %v9753_v3  ;;  %v10727_v41 = vld [vmem:[%s11950_s28 + $0x68] sm:$0xff]  }
 0x725   : > { %9875 = vst.msk [vmem:[%s16407_s19 + $0x38] sm:$0xff] %vm16767_vm5, %v9843_v36  ;;  %vm16782_vm5 = vmmov %vm16772_vm0  ;;  %v10706_v3 = vunpack.c.h.bf16 %v10727_v41 }
 0x726   : > { %9874 = vst.msk [vmem:[%s16407_s19 + $0x30] sm:$0xff] %vm16768_vm9, %v9842_v12  ;;  %vm16783_vm9 = vmmov %vm16772_vm0  ;;  %v10705_v12 = vunpack.c.l.bf16 %v10727_v41 }
 0x727   : > { %v9759_v56 = vpop.permute.xlu1 %9758  ;;  %v9757_v27 = vpop.permute.xlu0 %9756 }
 0x728   : > { %v9845_v14 = vsel %vm3328_vm1, %v10670_v25, %v9759_v56  ;;  %v9844_v28 = vsel %vm3328_vm1, %v10669_v9, %v9757_v27  ;;  %v10728_v9 = vld [vmem:[%s11950_s28 + $0x70] sm:$0xff]  }
 0x729   : > { %9877 = vst.msk [vmem:[%s16407_s19 + $0x48] sm:$0xff] %vm16769_vm13, %v9845_v14  ;;  %vm16784_vm13 = vmmov %vm16772_vm0  ;;  %v10710_v27 = vunpack.c.h.bf16 %v10728_v9 }
 0x72a   : > { %9876 = vst.msk [vmem:[%s16407_s19 + $0x40] sm:$0xff] %vm16770_vm3, %v9844_v28  ;;  %vm16785_vm3 = vmmov %vm16772_vm0  ;;  %v10709_v28 = vunpack.c.l.bf16 %v10728_v9 }
 0x72b   : > { %v9763_v13 = vpop.permute.xlu1 %9762  ;;  %v9761_v22 = vpop.permute.xlu0 %9760 }
 0x72c   : > { %v9847_v10 = vsel %vm3328_vm1, %v10674_v44, %v9763_v13  ;;  %v9846_v55 = vsel %vm3328_vm1, %v10673_v18, %v9761_v22  ;;  %v10729_v18 = vld [vmem:[%s11950_s28 + $0x78] sm:$0xff]  }
 0x72d   : > { %9879 = vst.msk [vmem:[%s16407_s19 + $0x58] sm:$0xff] %vm16771_vm11, %v9847_v10  ;;  %vm16786_vm11 = vmmov %vm16772_vm0  ;;  %v10714_v22 = vunpack.c.h.bf16 %v10729_v18 }
 0x72e   : > { %9878 = vst.msk [vmem:[%s16407_s19 + $0x50] sm:$0xff] %vm16772_vm0, %v9846_v55  ;;  %v10713_v55 = vunpack.c.l.bf16 %v10729_v18 }
 0x72f   : > { %v9767_v29 = vpop.permute.xlu1 %9766  ;;  %v9765_v49 = vpop.permute.xlu0 %9764 }
 0x730   : > { %v9849_v21 = vsel %vm3328_vm1, %v10678_v0, %v9767_v29  ;;  %v9848_v5 = vsel %vm3328_vm1, %v10677_v23, %v9765_v49 }
 0x731   : > { %9881 = vst.msk [vmem:[%s16407_s19 + $0x68] sm:$0xff] %vm16773_vm7, %v9849_v21  ;;  %vm16787_vm7 = vmmov %vm16772_vm0 }
 0x732   : > { %9880 = vst.msk [vmem:[%s16407_s19 + $0x60] sm:$0xff] %vm16774_vm8, %v9848_v5  ;;  %vm16788_vm8 = vmmov %vm16772_vm0 }
 0x733   : > { %v9771_v62 = vpop.permute.xlu1 %9770  ;;  %v9769_v26 = vpop.permute.xlu0 %9768 }
 0x734   : > { %v9851_v32 = vsel %vm3328_vm1, %v10682_v61, %v9771_v62  ;;  %v9850_v16 = vsel %vm3328_vm1, %v10681_v1, %v9769_v26 }
 0x735   : > { %9883 = vst.msk [vmem:[%s16407_s19 + $0x78] sm:$0xff] %vm16775_vm12, %v9851_v32  ;;  %vm16789_vm12 = vmmov %vm16772_vm0 }
 0x736   : > { %9882 = vst.msk [vmem:[%s16407_s19 + $0x70] sm:$0xff] %vm16776_vm2, %v9850_v16  ;;  %vm16790_vm2 = vmmov %vm16772_vm0 }
 0x737   : > { %v9775_v34 = vpop.permute.xlu1 %9774  ;;  %v9773_v37 = vpop.permute.xlu0 %9772 }
 0x738   : > { %v9853_v4 = vsel %vm3328_vm1, %v10686_v11, %v9775_v34  ;;  %v9852_v58 = vsel %vm3328_vm1, %v10685_v6, %v9773_v37 }
 0x739   : > { %9885 = vst.msk [vmem:[%s16407_s19 + $0x88] sm:$0xff] %vm16777_vm10, %v9853_v4  ;;  %vm16791_vm10 = vmmov %vm16772_vm0 }
 0x73a   : > { %9884 = vst.msk [vmem:[%s16407_s19 + $0x80] sm:$0xff] %vm16778_vm15, %v9852_v58 }
 0x73b   : > { %v9779_v54 = vpop.permute.xlu1 %9778  ;;  %v9777_v47 = vpop.permute.xlu0 %9776 }
 0x73c   : > { %v9855_v52 = vsel %vm3328_vm1, %v10690_v8, %v9779_v54  ;;  %v9854_v35 = vsel %vm3328_vm1, %v10689_v20, %v9777_v47 }
 0x73d   : > { %9887 = vst.msk [vmem:[%s16407_s19 + $0x98] sm:$0xff] %vm16779_vm14, %v9855_v52 }
 0x73e   : > { %9886 = vst.msk [vmem:[%s16407_s19 + $0x90] sm:$0xff] %vm16780_vm6, %v9854_v35 }
 0x73f   : > { %v9783_v43 = vpop.permute.xlu1 %9782  ;;  %v9781_v19 = vpop.permute.xlu0 %9780 }
 0x740   : > { %v9857_v48 = vsel %vm3328_vm1, %v10694_v60, %v9783_v43  ;;  %v9856_v2 = vsel %vm3328_vm1, %v10693_v31, %v9781_v19 }
 0x741   : > { %9889 = vst.msk [vmem:[%s16407_s19 + $0xa8] sm:$0xff] %vm16781_vm4, %v9857_v48 }
 0x742   : > { %9888 = vst.msk [vmem:[%s16407_s19 + $0xa0] sm:$0xff] %vm16782_vm5, %v9856_v2 }
 0x743   : > { %v9787_v42 = vpop.permute.xlu1 %9786  ;;  %v9785_v51 = vpop.permute.xlu0 %9784 }
 0x744   : > { %v9859_v7 = vsel %vm3328_vm1, %v10698_v45, %v9787_v42  ;;  %v9858_v40 = vsel %vm3328_vm1, %v10697_v39, %v9785_v51 }
 0x745   : > { %9891 = vst.msk [vmem:[%s16407_s19 + $0xb8] sm:$0xff] %vm16783_vm9, %v9859_v7 }
 0x746   : > { %9890 = vst.msk [vmem:[%s16407_s19 + $0xb0] sm:$0xff] %vm16784_vm13, %v9858_v40 }
 0x747   : > { %v9791_v53 = vpop.permute.xlu1 %9790  ;;  %v9789_v36 = vpop.permute.xlu0 %9788 }
 0x748   : > { %v9861_v46 = vsel %vm3328_vm1, %v10702_v57, %v9791_v53  ;;  %v9860_v25 = vsel %vm3328_vm1, %v10701_v15, %v9789_v36 }
 0x749   : > { %9893 = vst.msk [vmem:[%s16407_s19 + $0xc8] sm:$0xff] %vm16785_vm3, %v9861_v46 }
 0x74a   : > { %9892 = vst.msk [vmem:[%s16407_s19 + $0xc0] sm:$0xff] %vm16786_vm11, %v9860_v25 }
 0x74b   : > { %v9795_v63 = vpop.permute.xlu1 %9794  ;;  %v9793_v14 = vpop.permute.xlu0 %9792 }
 0x74c   : > { %v9863_v56 = vsel %vm3328_vm1, %v10706_v3, %v9795_v63  ;;  %v9862_v44 = vsel %vm3328_vm1, %v10705_v12, %v9793_v14 }
 0x74d   : > { %9895 = vst.msk [vmem:[%s16407_s19 + $0xd8] sm:$0xff] %vm16772_vm0, %v9863_v56 }
 0x74e   : > { %9894 = vst.msk [vmem:[%s16407_s19 + $0xd0] sm:$0xff] %vm16787_vm7, %v9862_v44 }
 0x74f   : > { %v9799_v50 = vpop.permute.xlu1 %9798  ;;  %v9797_v10 = vpop.permute.xlu0 %9796 }
 0x750   : > { %v9865_v13 = vsel %vm3328_vm1, %v10710_v27, %v9799_v50  ;;  %v9864_v0 = vsel %vm3328_vm1, %v10709_v28, %v9797_v10 }
 0x751   : > { %9897 = vst.msk [vmem:[%s16407_s19 + $0xe8] sm:$0xff] %vm16788_vm8, %v9865_v13 }
 0x752   : > { %9896 = vst.msk [vmem:[%s16407_s19 + $0xe0] sm:$0xff] %vm16789_vm12, %v9864_v0 }
 0x753   : > { %v9803_v23 = vpop.permute.xlu1 %9802  ;;  %v9801_v29 = vpop.permute.xlu0 %9800 }
 0x754   : > { %v9867_v33 = vsel %vm3328_vm1, %v10714_v22, %v9803_v23  ;;  %v9866_v21 = vsel %vm3328_vm1, %v10713_v55, %v9801_v29 }
 0x755   : > { %9899 = vst.msk [vmem:[%s16407_s19 + $0xf8] sm:$0xff] %vm16790_vm2, %v9867_v33 }
 0x756   : > { %9898 = vst.msk [vmem:[%s16407_s19 + $0xf0] sm:$0xff] %vm16791_vm10, %v9866_v21 }
 0x757   : > { %11777 = shalt.err (!%p11774_p3)
}
 0x758   : > { %s11778_s6 = scalar_lea.hbm %s16517_s25, 4096  ;;  %s11782_s9 = scalar_lea.hbm %s16574_s3, 8192 }
 0x759   : > { %p11779_p4 = scmp.ne.s32.totalorder %s16517_s25, %s11778_s6  ;;  %p11783_p9 = scmp.lt.u32.totalorder %s16517_s25, %s16574_s3 }
 0x75a   : > { %p11784_p10 = scmp.lt.u32.totalorder %s11782_s9, %s11778_s6  ;;  %p11786_p12 = scmp.lt.u32.totalorder %s11778_s6, %s16517_s25 }
 0x75b   : > { %p11780_p7 = pnand %p11779_p4, %p11897_p5 }
 0x75c   : > { %p11785_p11 = por %p11784_p10, %p11783_p9 }
 0x75d   : > { %p11781_p8 = pneg %p11780_p7 }
 0x75e   : > { %p11787_p13 = por %p11786_p12, %p11785_p11 }
 0x760   : > { %p11788_p0 = pnand %p11787_p13, %p11781_p8 }
 0x762   : > { %11791 = shalt.err (!%p11788_p0)
}
 0x763   : > { %s11838_s17 = smov 128  }
 0x764   : > { %11530 = dma.vmem_to_hbm [thread:$0]  (%p11897_p5), %s16520_s20, 4096, %s16517_s25, %s16529_s16, %s11838_s17, %s11838_s17, %s11829_s29  }
 0x765 PF: > { %p11536_p1 = scmp.ge.s32.totalorder %s11826_s15, 2  ;;  %s9929_s19 = sand.u32 1, %s11814_s12  }
 0x766   : > { %s9930_s5 = scalar_lea.sflag [#allocation5], %s9929_s19 }
 0x767   : > { %p11533_p2 = pnand %p11536_p1, %p11901_p6 }
 0x769   : > { %11809 = dma.done.wait (!%p11533_p2), %s9930_s5, 4096  }
 0x76a   : > { %11811 = vsyncadd (!%p11533_p2), %s9930_s5, 4294963200  ;;  %p13_p3 = scmp.ge.s32.totalorder %s11884_s18, 4   ;;  %s16792_s12 = smov %s11818_s13 }
 0x76b   : > { %s16793_s13 = smov %s11822_s14  ;;  %s16794_s14 = smov %s11895_s21 }
 0x76c   : > { %s16795_s15 = smov %s11884_s18  ;;  %15 = sbr.rel (!%p13_p3) target bundleno = 3 (0x3), region = 81 }
 0x773   :  { %9935 = vsyncpa [#allocation5], 1 }
 0x774   :  { %9937 = vsyncpa [#allocation5 + $0x1], 1 }

</bundles_post_ra>
